<compile_context>
chip_gen: v7x
topology: tpu7x:2x2x1
jax: 0.10.0
libtpu: 0.0.40
codegen_flags: <defaults>
</compile_context>

<pallas_src>
import math

import numpy as np
import jax
import jax.numpy as jnp
from jax import lax
from jax.experimental import pallas as pl
from jax.experimental.pallas import tpu as pltpu

H, W = 20, 10          # Tetris board: 20 rows x 10 cols
C1, C2 = 32, 64        # conv channel counts
HID = 128              # fc1 width
FEAT = C2 * H * W      # 12800
MAX_TB = 128           # max boards per grid step


# ----------------------------------------------------------------------------
# Fused kernel: conv1 + ReLU + conv2 + ReLU + fc1 + ReLU + fc2
# ----------------------------------------------------------------------------
def _value_net_kernel(x_ref, a1_ref, b1w_ref, a2_ref, b2w_ref,
                      w1_ref, b1_ref, w2_ref, b2_ref, o_ref):
    """One batch tile (TB boards), activations in (h-major, board-minor) rows.

    x_ref  : (H, TB, W)        f32   boards, height-major
    a1_ref : (3*W, W*C1)       bf16  conv1 banded weights, all 3 kh taps stacked
    b1w_ref: (1, W*C1)         f32   conv1 bias tiled over w
    a2_ref : (3, W*C1, W*C2)   bf16  conv2 banded weights (per kh)
    b2w_ref: (1, W*C2)         f32   conv2 bias tiled over w
    w1_ref : (H, W*C2, HID)    bf16  fc1 weight permuted to (h, w, c) row order
    b1_ref : (1, HID)          f32
    w2_ref : (1, HID)          f32   fc2 weight row
    b2_ref : (1, 1)            f32
    o_ref  : (TB, 1)           f32
    """
    hh, tb, ww = x_ref.shape
    wc1 = a2_ref.shape[1]          # 320
    hid = w1_ref.shape[2]          # 128
    rows = hh * tb                 # H * TB

    # ---- conv1: aligned row shifts + one K=3*W matmul ----------------------
    x = x_ref[...].reshape(rows, ww).astype(jnp.bfloat16)        # (rows, 10)
    zx = jnp.zeros((tb, ww), jnp.bfloat16)
    x_up = jnp.concatenate([zx, x[:rows - tb]], axis=0)          # row h <- h-1
    x_dn = jnp.concatenate([x[tb:], zx], axis=0)                 # row h <- h+1
    xcat = jnp.concatenate([x_up, x, x_dn], axis=1)              # (rows, 30)
    acc1 = jnp.dot(xcat, a1_ref[...], preferred_element_type=jnp.float32)
    h1 = jnp.maximum(acc1 + b1w_ref[...], 0.0).astype(jnp.bfloat16)   # (rows, 320)

    # ---- conv2: aligned row shifts + 3 accumulating K=320 matmuls ----------
    zc = jnp.zeros((tb, wc1), jnp.bfloat16)
    h1_up = jnp.concatenate([zc, h1[:rows - tb]], axis=0)
    h1_dn = jnp.concatenate([h1[tb:], zc], axis=0)
    acc2 = jnp.dot(h1_up, a2_ref[0], preferred_element_type=jnp.float32)
    acc2 = acc2 + jnp.dot(h1, a2_ref[1], preferred_element_type=jnp.float32)
    acc2 = acc2 + jnp.dot(h1_dn, a2_ref[2], preferred_element_type=jnp.float32)
    h2 = jnp.maximum(acc2 + b2w_ref[...], 0.0).astype(jnp.bfloat16)   # (rows, 640)

    # ---- fc1: per-height accumulating matmuls, weight resident in VMEM ----
    acc = jnp.zeros((tb, hid), jnp.float32)
    for h in range(hh):                                  # static unroll (20)
        acc = acc + jnp.dot(h2[h * tb:(h + 1) * tb, :], w1_ref[h],
                            preferred_element_type=jnp.float32)
    hfc = jnp.maximum(acc + b1_ref[...], 0.0)            # (TB, 128) f32

    # ---- fc2: N=1 -> VPU multiply + XLU lane-reduce (no MXU) ---------------
    o_ref[...] = (jnp.sum(hfc * w2_ref[...], axis=-1, keepdims=True)
                  + b2_ref[...])


# ----------------------------------------------------------------------------
# pallas_call wrapper
# ----------------------------------------------------------------------------
def _fused_forward(x_hbw, kp, tb):
    """x_hbw: (H, Bp, W) f32 -> (Bp, 1) f32."""
    hh, bp, ww = x_hbw.shape
    a1, b1w, a2, b2w = kp["a1"], kp["b1w"], kp["a2"], kp["b2w"]
    w1r, b1, w2, b2 = kp["fc1_wr"], kp["fc1_b"], kp["fc2_w"], kp["fc2_b"]

    flops = bp * (2 * H * (3 * W) * (W * C1)
                  + 3 * 2 * H * (W * C1) * (W * C2)
                  + 2 * FEAT * HID + 2 * HID)
    weight_bytes = ((a1.size + a2.size + w1r.size) * 2
                    + (b1w.size + b2w.size + b1.size + w2.size + b2.size) * 4)
    bytes_accessed = bp * H * W * 4 + weight_bytes + bp * 4

    return pl.pallas_call(
        _value_net_kernel,
        out_shape=jax.ShapeDtypeStruct((bp, 1), jnp.float32),
        grid=(bp // tb,),
        in_specs=[
            pl.BlockSpec((hh, tb, ww), lambda i: (0, i, 0)),
            pl.BlockSpec(a1.shape, lambda i: (0, 0)),
            pl.BlockSpec(b1w.shape, lambda i: (0, 0)),
            pl.BlockSpec(a2.shape, lambda i: (0, 0, 0)),
            pl.BlockSpec(b2w.shape, lambda i: (0, 0)),
            pl.BlockSpec(w1r.shape, lambda i: (0, 0, 0)),
            pl.BlockSpec(b1.shape, lambda i: (0, 0)),
            pl.BlockSpec(w2.shape, lambda i: (0, 0)),
            pl.BlockSpec(b2.shape, lambda i: (0, 0)),
        ],
        out_specs=pl.BlockSpec((tb, 1), lambda i: (i, 0)),
        compiler_params=pltpu.CompilerParams(
            dimension_semantics=("parallel",),
            vmem_limit_bytes=48 * 1024 * 1024),
        cost_estimate=pl.CostEstimate(flops=flops, transcendentals=0,
                                      bytes_accessed=bytes_accessed),
    )(x_hbw, a1, b1w, a2, b2w, w1r, b1, w2, b2)


def _round_up(n, m):
    return ((n + m - 1) // m) * m


def _choose_tb(b):
    """Batch tile: multiple of 16, <=128, and >=2 grid steps when batch allows
    (keeps both v7x TensorCores busy via the 'parallel' grid axis)."""
    if b <= 16:
        return 16
    return min(MAX_TB, _round_up((b + 1) // 2, 16))


@jax.jit
def value_network_forward(x_nchw, kp):
    """Forward pass. x_nchw: (B, 1, 20, 10) f32 -> (B, 1) f32."""
    b = x_nchw.shape[0]
    tb = _choose_tb(b)
    bp = _round_up(b, tb)
    x = x_nchw.reshape(b, H, W).astype(jnp.float32)
    if bp != b:
        x = jnp.concatenate([x, jnp.zeros((bp - b, H, W), x.dtype)], axis=0)
    # Layout plumbing in the wrapper: height-major so in-kernel H-shifts are
    # aligned whole-tile row shifts (no board-boundary masks needed).
    x_hbw = jnp.transpose(x, (1, 0, 2))                    # (H, Bp, W)
    out = _fused_forward(x_hbw, kp, tb)
    return out[:b]


# ----------------------------------------------------------------------------
# Parameter construction
# ----------------------------------------------------------------------------
def _build_toeplitz(w_oihw):
    """OIHW conv weight (Cout, Cin, 3, 3) -> banded A: (3, W*Cin, W*Cout) with
    A[kh, wp*Cin+ci, w*Cout+co] = w[co, ci, kh, wp-w+1] inside the 3-band, 0 else.
    """
    sel = np.zeros((3, W, W), np.float32)
    for dw in range(3):
        for w_ in range(W):
            wp = w_ + dw - 1
            if 0 <= wp < W:
                sel[dw, wp, w_] = 1.0
    sel = jnp.asarray(sel)
    cout, cin = w_oihw.shape[0], w_oihw.shape[1]
    t = jnp.einsum("dpw,oihd->hpiwo", sel, w_oihw)   # (3, W, cin, W, cout)
    return t.reshape(3, W * cin, W * cout)


def init_params(key):
    """PyTorch-layout parameters with the module's init scheme."""
    k1, k2, k3, k4 = jax.random.split(key, 4)

    def kaiming_conv(k, cout, cin):
        fan_out = cout * 3 * 3
        std = math.sqrt(2.0 / fan_out)
        return jax.random.normal(k, (cout, cin, 3, 3), jnp.float32) * std

    def xavier_linear(k, out_f, in_f):
        limit = math.sqrt(6.0 / (in_f + out_f))
        return jax.random.uniform(k, (out_f, in_f), jnp.float32, -limit, limit)

    return {
        "conv1_w_oihw": kaiming_conv(k1, C1, 1),
        "conv1_b": jnp.zeros((C1,), jnp.float32),
        "conv2_w_oihw": kaiming_conv(k2, C2, C1),
        "conv2_b": jnp.zeros((C2,), jnp.float32),
        "fc1_w": xavier_linear(k3, HID, FEAT),
        "fc1_b": jnp.zeros((HID,), jnp.float32),
        "fc2_w": xavier_linear(k4, 1, HID),
        "fc2_b": jnp.zeros((1,), jnp.float32),
    }


def prepare_kernel_params(p):
    """One-time repack into kernel-friendly layouts."""
    # conv1: stack the 3 kh taps into one (30, 320) band -> single K=30 matmul.
    a1 = _build_toeplitz(p["conv1_w_oihw"]).reshape(3 * W, W * C1).astype(jnp.bfloat16)
    a2 = _build_toeplitz(p["conv2_w_oihw"]).astype(jnp.bfloat16)       # (3, 320, 640)
    b1w = jnp.tile(p["conv1_b"], (W,)).reshape(1, W * C1).astype(jnp.float32)
    b2w = jnp.tile(p["conv2_b"], (W,)).reshape(1, W * C2).astype(jnp.float32)
    # fc1 rows: PyTorch flatten is (c, h, w); the kernel contracts per-h over
    # lanes (w, c) -> permute to (H, W*C2, HID).
    w1r = (p["fc1_w"].T.reshape(C2, H, W, HID)
           .transpose(1, 2, 0, 3).reshape(H, W * C2, HID)).astype(jnp.bfloat16)
    return {
        "a1": a1, "b1w": b1w, "a2": a2, "b2w": b2w,
        "fc1_wr": w1r, "fc1_b": p["fc1_b"].reshape(1, HID),
        "fc2_w": p["fc2_w"].reshape(1, HID), "fc2_b": p["fc2_b"].reshape(1, 1),
    }


def reference_forward(x_nchw, params):
    """Pure-JAX replica of the PyTorch forward (f32) for correctness check."""
    dn = ("NCHW", "OIHW", "NCHW")
    x = lax.conv_general_dilated(x_nchw, params["conv1_w_oihw"], (1, 1), "SAME",
                                 dimension_numbers=dn)
    x = jnp.maximum(x + params["conv1_b"][None, :, None, None], 0.0)
    x = lax.conv_general_dilated(x, params["conv2_w_oihw"], (1, 1), "SAME",
                                 dimension_numbers=dn)
    x = jnp.maximum(x + params["conv2_b"][None, :, None, None], 0.0)
    x = x.reshape(x.shape[0], -1)
    x = jnp.maximum(x @ params["fc1_w"].T + params["fc1_b"], 0.0)
    return x @ params["fc2_w"].T + params["fc2_b"]


if __name__ == "__main__":
    key = jax.random.PRNGKey(0)
    pkey, xkey1, xkey2 = jax.random.split(key, 3)
    params = init_params(pkey)
    kparams = prepare_kernel_params(params)

    # B=2: single padded tile.  B=48: batch padding + multi-step grid (>= 2).
    for bsz, xk in ((2, xkey1), (48, xkey2)):
        x = jax.random.uniform(xk, (bsz, 1, H, W), jnp.float32)   # NCHW boards
        out = jax.block_until_ready(value_network_forward(x, kparams))
        ref = reference_forward(x, params)
        assert out.shape == (bsz, 1), out.shape
        max_err = float(jnp.max(jnp.abs(out - ref)))
        scale = float(jnp.max(jnp.abs(ref))) + 1.0
        # bf16 weights/activations on the conv/fc1 path -> loose tolerance vs f32 ref.
        assert max_err <= 2e-2 * scale, \
            f"B={bsz}: mismatch max_err={max_err}, ref_scale={scale}"

    print("KERNEL_OK")
</pallas_src>

<mosaic_0001>
module attributes {stable_mosaic.version = 11 : i64} {
  func.func @_value_net_kernel(%arg0: i32, %arg1: memref<20x16x10xf32, #tpu.memory_space<vmem>>, %arg2: memref<30x320xbf16, #tpu.memory_space<vmem>>, %arg3: memref<1x320xf32, #tpu.memory_space<vmem>>, %arg4: memref<3x320x640xbf16, #tpu.memory_space<vmem>>, %arg5: memref<1x640xf32, #tpu.memory_space<vmem>>, %arg6: memref<20x640x128xbf16, #tpu.memory_space<vmem>>, %arg7: memref<1x128xf32, #tpu.memory_space<vmem>>, %arg8: memref<1x128xf32, #tpu.memory_space<vmem>>, %arg9: memref<1x1xf32, #tpu.memory_space<vmem>>, %arg10: memref<16x1xf32, #tpu.memory_space<vmem>>) attributes {dimension_semantics = [#tpu.dimension_semantics<parallel>], iteration_bounds = array<i64: 1>, scalar_prefetch = 0 : i64, scratch_operands = 0 : i64, tpu.core_type = #tpu.core_type<tc>, window_params = [{transform_indices = @transform_0, window_bounds = array<i64: 20, 16, 10>}, {pipeline_mode = #tpu.pipeline_mode<synchronous>, transform_indices = @transform_1, window_bounds = array<i64: 30, 320>}, {pipeline_mode = #tpu.pipeline_mode<synchronous>, transform_indices = @transform_2, window_bounds = array<i64: 1, 320>}, {pipeline_mode = #tpu.pipeline_mode<synchronous>, transform_indices = @transform_3, window_bounds = array<i64: 3, 320, 640>}, {pipeline_mode = #tpu.pipeline_mode<synchronous>, transform_indices = @transform_4, window_bounds = array<i64: 1, 640>}, {pipeline_mode = #tpu.pipeline_mode<synchronous>, transform_indices = @transform_5, window_bounds = array<i64: 20, 640, 128>}, {pipeline_mode = #tpu.pipeline_mode<synchronous>, transform_indices = @transform_6, window_bounds = array<i64: 1, 128>}, {pipeline_mode = #tpu.pipeline_mode<synchronous>, transform_indices = @transform_7, window_bounds = array<i64: 1, 128>}, {pipeline_mode = #tpu.pipeline_mode<synchronous>, transform_indices = @transform_8, window_bounds = array<i64: 1, 1>}, {transform_indices = @transform_9, window_bounds = array<i64: 16, 1>}]} {
    %c0 = arith.constant 0 : index
    %c0_0 = arith.constant 0 : index
    %c0_1 = arith.constant 0 : index
    %0 = vector.load %arg1[%c0, %c0_0, %c0_1] : memref<20x16x10xf32, #tpu.memory_space<vmem>>, vector<20x16x10xf32>
    %1 = vector.shape_cast %0 : vector<20x16x10xf32> to vector<320x10xf32>
    %2 = arith.truncf %1 : vector<320x10xf32> to vector<320x10xbf16>
    %cst = arith.constant 0.000000e+00 : bf16
    %3 = vector.broadcast %cst : bf16 to vector<16x10xbf16>
    %4 = vector.extract_strided_slice %2 {offsets = [0, 0], sizes = [304, 10], strides = [1, 1]} : vector<320x10xbf16> to vector<304x10xbf16>
    %5 = tpu.concatenate %3, %4 in 0 : vector<16x10xbf16>, vector<304x10xbf16> -> vector<320x10xbf16>
    %6 = vector.extract_strided_slice %2 {offsets = [16, 0], sizes = [304, 10], strides = [1, 1]} : vector<320x10xbf16> to vector<304x10xbf16>
    %7 = tpu.concatenate %6, %3 in 0 : vector<304x10xbf16>, vector<16x10xbf16> -> vector<320x10xbf16>
    %8 = tpu.concatenate %5, %2, %7 in 1 : vector<320x10xbf16>, vector<320x10xbf16>, vector<320x10xbf16> -> vector<320x30xbf16>
    %c0_2 = arith.constant 0 : index
    %c0_3 = arith.constant 0 : index
    %9 = vector.load %arg2[%c0_2, %c0_3] : memref<30x320xbf16, #tpu.memory_space<vmem>>, vector<30x320xbf16>
    %cst_4 = arith.constant dense<0.000000e+00> : vector<320x320xf32>
    %10 = tpu.matmul %8, %9, %cst_4 {dimension_numbers = #tpu.dot_dimension_numbers<[1], [0], [0], [1], [0, 0, 1, 1], [], []>} : vector<320x30xbf16>, vector<30x320xbf16>, vector<320x320xf32> -> vector<320x320xf32>
    %c0_5 = arith.constant 0 : index
    %c0_6 = arith.constant 0 : index
    %11 = vector.load %arg3[%c0_5, %c0_6] : memref<1x320xf32, #tpu.memory_space<vmem>>, vector<1x320xf32>
    %12 = vector.broadcast %11 : vector<1x320xf32> to vector<320x320xf32>
    %13 = arith.addf %10, %12 : vector<320x320xf32>
    %cst_7 = arith.constant 0.000000e+00 : f32
    %14 = vector.broadcast %cst_7 : f32 to vector<320x320xf32>
    %15 = arith.maximumf %13, %14 : vector<320x320xf32>
    %16 = arith.truncf %15 : vector<320x320xf32> to vector<320x320xbf16>
    %cst_8 = arith.constant 0.000000e+00 : bf16
    %17 = vector.broadcast %cst_8 : bf16 to vector<16x320xbf16>
    %18 = vector.extract_strided_slice %16 {offsets = [0, 0], sizes = [304, 320], strides = [1, 1]} : vector<320x320xbf16> to vector<304x320xbf16>
    %19 = tpu.concatenate %17, %18 in 0 : vector<16x320xbf16>, vector<304x320xbf16> -> vector<320x320xbf16>
    %20 = vector.extract_strided_slice %16 {offsets = [16, 0], sizes = [304, 320], strides = [1, 1]} : vector<320x320xbf16> to vector<304x320xbf16>
    %21 = tpu.concatenate %20, %17 in 0 : vector<304x320xbf16>, vector<16x320xbf16> -> vector<320x320xbf16>
    %c0_9 = arith.constant 0 : index
    %c0_10 = arith.constant 0 : index
    %c0_11 = arith.constant 0 : index
    %22 = vector.load %arg4[%c0_9, %c0_10, %c0_11] : memref<3x320x640xbf16, #tpu.memory_space<vmem>>, vector<1x320x640xbf16>
    %23 = vector.shape_cast %22 : vector<1x320x640xbf16> to vector<320x640xbf16>
    %cst_12 = arith.constant dense<0.000000e+00> : vector<320x640xf32>
    %24 = tpu.matmul %19, %23, %cst_12 {dimension_numbers = #tpu.dot_dimension_numbers<[1], [0], [0], [1], [0, 0, 1, 1], [], []>} : vector<320x320xbf16>, vector<320x640xbf16>, vector<320x640xf32> -> vector<320x640xf32>
    %c1 = arith.constant 1 : index
    %c0_13 = arith.constant 0 : index
    %c0_14 = arith.constant 0 : index
    %25 = vector.load %arg4[%c1, %c0_13, %c0_14] : memref<3x320x640xbf16, #tpu.memory_space<vmem>>, vector<1x320x640xbf16>
    %26 = vector.shape_cast %25 : vector<1x320x640xbf16> to vector<320x640xbf16>
    %cst_15 = arith.constant dense<0.000000e+00> : vector<320x640xf32>
    %27 = tpu.matmul %16, %26, %cst_15 {dimension_numbers = #tpu.dot_dimension_numbers<[1], [0], [0], [1], [0, 0, 1, 1], [], []>} : vector<320x320xbf16>, vector<320x640xbf16>, vector<320x640xf32> -> vector<320x640xf32>
    %28 = arith.addf %24, %27 : vector<320x640xf32>
    %c2 = arith.constant 2 : index
    %c0_16 = arith.constant 0 : index
    %c0_17 = arith.constant 0 : index
    %29 = vector.load %arg4[%c2, %c0_16, %c0_17] : memref<3x320x640xbf16, #tpu.memory_space<vmem>>, vector<1x320x640xbf16>
    %30 = vector.shape_cast %29 : vector<1x320x640xbf16> to vector<320x640xbf16>
    %cst_18 = arith.constant dense<0.000000e+00> : vector<320x640xf32>
    %31 = tpu.matmul %21, %30, %cst_18 {dimension_numbers = #tpu.dot_dimension_numbers<[1], [0], [0], [1], [0, 0, 1, 1], [], []>} : vector<320x320xbf16>, vector<320x640xbf16>, vector<320x640xf32> -> vector<320x640xf32>
    %32 = arith.addf %28, %31 : vector<320x640xf32>
    %c0_19 = arith.constant 0 : index
    %c0_20 = arith.constant 0 : index
    %33 = vector.load %arg5[%c0_19, %c0_20] : memref<1x640xf32, #tpu.memory_space<vmem>>, vector<1x640xf32>
    %34 = vector.broadcast %33 : vector<1x640xf32> to vector<320x640xf32>
    %35 = arith.addf %32, %34 : vector<320x640xf32>
    %cst_21 = arith.constant 0.000000e+00 : f32
    %36 = vector.broadcast %cst_21 : f32 to vector<320x640xf32>
    %37 = arith.maximumf %35, %36 : vector<320x640xf32>
    %38 = arith.truncf %37 : vector<320x640xf32> to vector<320x640xbf16>
    %cst_22 = arith.constant 0.000000e+00 : f32
    %39 = vector.broadcast %cst_22 : f32 to vector<16x128xf32>
    %40 = vector.extract_strided_slice %38 {offsets = [0, 0], sizes = [16, 640], strides = [1, 1]} : vector<320x640xbf16> to vector<16x640xbf16>
    %c0_23 = arith.constant 0 : index
    %c0_24 = arith.constant 0 : index
    %c0_25 = arith.constant 0 : index
    %41 = vector.load %arg6[%c0_23, %c0_24, %c0_25] : memref<20x640x128xbf16, #tpu.memory_space<vmem>>, vector<1x640x128xbf16>
    %42 = vector.shape_cast %41 : vector<1x640x128xbf16> to vector<640x128xbf16>
    %cst_26 = arith.constant dense<0.000000e+00> : vector<16x128xf32>
    %43 = tpu.matmul %40, %42, %cst_26 {dimension_numbers = #tpu.dot_dimension_numbers<[1], [0], [0], [1], [0, 0, 1, 1], [], []>} : vector<16x640xbf16>, vector<640x128xbf16>, vector<16x128xf32> -> vector<16x128xf32>
    %44 = arith.addf %39, %43 : vector<16x128xf32>
    %45 = vector.extract_strided_slice %38 {offsets = [16, 0], sizes = [16, 640], strides = [1, 1]} : vector<320x640xbf16> to vector<16x640xbf16>
    %c1_27 = arith.constant 1 : index
    %c0_28 = arith.constant 0 : index
    %c0_29 = arith.constant 0 : index
    %46 = vector.load %arg6[%c1_27, %c0_28, %c0_29] : memref<20x640x128xbf16, #tpu.memory_space<vmem>>, vector<1x640x128xbf16>
    %47 = vector.shape_cast %46 : vector<1x640x128xbf16> to vector<640x128xbf16>
    %cst_30 = arith.constant dense<0.000000e+00> : vector<16x128xf32>
    %48 = tpu.matmul %45, %47, %cst_30 {dimension_numbers = #tpu.dot_dimension_numbers<[1], [0], [0], [1], [0, 0, 1, 1], [], []>} : vector<16x640xbf16>, vector<640x128xbf16>, vector<16x128xf32> -> vector<16x128xf32>
    %49 = arith.addf %44, %48 : vector<16x128xf32>
    %50 = vector.extract_strided_slice %38 {offsets = [32, 0], sizes = [16, 640], strides = [1, 1]} : vector<320x640xbf16> to vector<16x640xbf16>
    %c2_31 = arith.constant 2 : index
    %c0_32 = arith.constant 0 : index
    %c0_33 = arith.constant 0 : index
    %51 = vector.load %arg6[%c2_31, %c0_32, %c0_33] : memref<20x640x128xbf16, #tpu.memory_space<vmem>>, vector<1x640x128xbf16>
    %52 = vector.shape_cast %51 : vector<1x640x128xbf16> to vector<640x128xbf16>
    %cst_34 = arith.constant dense<0.000000e+00> : vector<16x128xf32>
    %53 = tpu.matmul %50, %52, %cst_34 {dimension_numbers = #tpu.dot_dimension_numbers<[1], [0], [0], [1], [0, 0, 1, 1], [], []>} : vector<16x640xbf16>, vector<640x128xbf16>, vector<16x128xf32> -> vector<16x128xf32>
    %54 = arith.addf %49, %53 : vector<16x128xf32>
    %55 = vector.extract_strided_slice %38 {offsets = [48, 0], sizes = [16, 640], strides = [1, 1]} : vector<320x640xbf16> to vector<16x640xbf16>
    %c3 = arith.constant 3 : index
    %c0_35 = arith.constant 0 : index
    %c0_36 = arith.constant 0 : index
    %56 = vector.load %arg6[%c3, %c0_35, %c0_36] : memref<20x640x128xbf16, #tpu.memory_space<vmem>>, vector<1x640x128xbf16>
    %57 = vector.shape_cast %56 : vector<1x640x128xbf16> to vector<640x128xbf16>
    %cst_37 = arith.constant dense<0.000000e+00> : vector<16x128xf32>
    %58 = tpu.matmul %55, %57, %cst_37 {dimension_numbers = #tpu.dot_dimension_numbers<[1], [0], [0], [1], [0, 0, 1, 1], [], []>} : vector<16x640xbf16>, vector<640x128xbf16>, vector<16x128xf32> -> vector<16x128xf32>
    %59 = arith.addf %54, %58 : vector<16x128xf32>
    %60 = vector.extract_strided_slice %38 {offsets = [64, 0], sizes = [16, 640], strides = [1, 1]} : vector<320x640xbf16> to vector<16x640xbf16>
    %c4 = arith.constant 4 : index
    %c0_38 = arith.constant 0 : index
    %c0_39 = arith.constant 0 : index
    %61 = vector.load %arg6[%c4, %c0_38, %c0_39] : memref<20x640x128xbf16, #tpu.memory_space<vmem>>, vector<1x640x128xbf16>
    %62 = vector.shape_cast %61 : vector<1x640x128xbf16> to vector<640x128xbf16>
    %cst_40 = arith.constant dense<0.000000e+00> : vector<16x128xf32>
    %63 = tpu.matmul %60, %62, %cst_40 {dimension_numbers = #tpu.dot_dimension_numbers<[1], [0], [0], [1], [0, 0, 1, 1], [], []>} : vector<16x640xbf16>, vector<640x128xbf16>, vector<16x128xf32> -> vector<16x128xf32>
    %64 = arith.addf %59, %63 : vector<16x128xf32>
    %65 = vector.extract_strided_slice %38 {offsets = [80, 0], sizes = [16, 640], strides = [1, 1]} : vector<320x640xbf16> to vector<16x640xbf16>
    %c5 = arith.constant 5 : index
    %c0_41 = arith.constant 0 : index
    %c0_42 = arith.constant 0 : index
    %66 = vector.load %arg6[%c5, %c0_41, %c0_42] : memref<20x640x128xbf16, #tpu.memory_space<vmem>>, vector<1x640x128xbf16>
    %67 = vector.shape_cast %66 : vector<1x640x128xbf16> to vector<640x128xbf16>
    %cst_43 = arith.constant dense<0.000000e+00> : vector<16x128xf32>
    %68 = tpu.matmul %65, %67, %cst_43 {dimension_numbers = #tpu.dot_dimension_numbers<[1], [0], [0], [1], [0, 0, 1, 1], [], []>} : vector<16x640xbf16>, vector<640x128xbf16>, vector<16x128xf32> -> vector<16x128xf32>
    %69 = arith.addf %64, %68 : vector<16x128xf32>
    %70 = vector.extract_strided_slice %38 {offsets = [96, 0], sizes = [16, 640], strides = [1, 1]} : vector<320x640xbf16> to vector<16x640xbf16>
    %c6 = arith.constant 6 : index
    %c0_44 = arith.constant 0 : index
    %c0_45 = arith.constant 0 : index
    %71 = vector.load %arg6[%c6, %c0_44, %c0_45] : memref<20x640x128xbf16, #tpu.memory_space<vmem>>, vector<1x640x128xbf16>
    %72 = vector.shape_cast %71 : vector<1x640x128xbf16> to vector<640x128xbf16>
    %cst_46 = arith.constant dense<0.000000e+00> : vector<16x128xf32>
    %73 = tpu.matmul %70, %72, %cst_46 {dimension_numbers = #tpu.dot_dimension_numbers<[1], [0], [0], [1], [0, 0, 1, 1], [], []>} : vector<16x640xbf16>, vector<640x128xbf16>, vector<16x128xf32> -> vector<16x128xf32>
    %74 = arith.addf %69, %73 : vector<16x128xf32>
    %75 = vector.extract_strided_slice %38 {offsets = [112, 0], sizes = [16, 640], strides = [1, 1]} : vector<320x640xbf16> to vector<16x640xbf16>
    %c7 = arith.constant 7 : index
    %c0_47 = arith.constant 0 : index
    %c0_48 = arith.constant 0 : index
    %76 = vector.load %arg6[%c7, %c0_47, %c0_48] : memref<20x640x128xbf16, #tpu.memory_space<vmem>>, vector<1x640x128xbf16>
    %77 = vector.shape_cast %76 : vector<1x640x128xbf16> to vector<640x128xbf16>
    %cst_49 = arith.constant dense<0.000000e+00> : vector<16x128xf32>
    %78 = tpu.matmul %75, %77, %cst_49 {dimension_numbers = #tpu.dot_dimension_numbers<[1], [0], [0], [1], [0, 0, 1, 1], [], []>} : vector<16x640xbf16>, vector<640x128xbf16>, vector<16x128xf32> -> vector<16x128xf32>
    %79 = arith.addf %74, %78 : vector<16x128xf32>
    %80 = vector.extract_strided_slice %38 {offsets = [128, 0], sizes = [16, 640], strides = [1, 1]} : vector<320x640xbf16> to vector<16x640xbf16>
    %c8 = arith.constant 8 : index
    %c0_50 = arith.constant 0 : index
    %c0_51 = arith.constant 0 : index
    %81 = vector.load %arg6[%c8, %c0_50, %c0_51] : memref<20x640x128xbf16, #tpu.memory_space<vmem>>, vector<1x640x128xbf16>
    %82 = vector.shape_cast %81 : vector<1x640x128xbf16> to vector<640x128xbf16>
    %cst_52 = arith.constant dense<0.000000e+00> : vector<16x128xf32>
    %83 = tpu.matmul %80, %82, %cst_52 {dimension_numbers = #tpu.dot_dimension_numbers<[1], [0], [0], [1], [0, 0, 1, 1], [], []>} : vector<16x640xbf16>, vector<640x128xbf16>, vector<16x128xf32> -> vector<16x128xf32>
    %84 = arith.addf %79, %83 : vector<16x128xf32>
    %85 = vector.extract_strided_slice %38 {offsets = [144, 0], sizes = [16, 640], strides = [1, 1]} : vector<320x640xbf16> to vector<16x640xbf16>
    %c9 = arith.constant 9 : index
    %c0_53 = arith.constant 0 : index
    %c0_54 = arith.constant 0 : index
    %86 = vector.load %arg6[%c9, %c0_53, %c0_54] : memref<20x640x128xbf16, #tpu.memory_space<vmem>>, vector<1x640x128xbf16>
    %87 = vector.shape_cast %86 : vector<1x640x128xbf16> to vector<640x128xbf16>
    %cst_55 = arith.constant dense<0.000000e+00> : vector<16x128xf32>
    %88 = tpu.matmul %85, %87, %cst_55 {dimension_numbers = #tpu.dot_dimension_numbers<[1], [0], [0], [1], [0, 0, 1, 1], [], []>} : vector<16x640xbf16>, vector<640x128xbf16>, vector<16x128xf32> -> vector<16x128xf32>
    %89 = arith.addf %84, %88 : vector<16x128xf32>
    %90 = vector.extract_strided_slice %38 {offsets = [160, 0], sizes = [16, 640], strides = [1, 1]} : vector<320x640xbf16> to vector<16x640xbf16>
    %c10 = arith.constant 10 : index
    %c0_56 = arith.constant 0 : index
    %c0_57 = arith.constant 0 : index
    %91 = vector.load %arg6[%c10, %c0_56, %c0_57] : memref<20x640x128xbf16, #tpu.memory_space<vmem>>, vector<1x640x128xbf16>
    %92 = vector.shape_cast %91 : vector<1x640x128xbf16> to vector<640x128xbf16>
    %cst_58 = arith.constant dense<0.000000e+00> : vector<16x128xf32>
    %93 = tpu.matmul %90, %92, %cst_58 {dimension_numbers = #tpu.dot_dimension_numbers<[1], [0], [0], [1], [0, 0, 1, 1], [], []>} : vector<16x640xbf16>, vector<640x128xbf16>, vector<16x128xf32> -> vector<16x128xf32>
    %94 = arith.addf %89, %93 : vector<16x128xf32>
    %95 = vector.extract_strided_slice %38 {offsets = [176, 0], sizes = [16, 640], strides = [1, 1]} : vector<320x640xbf16> to vector<16x640xbf16>
    %c11 = arith.constant 11 : index
    %c0_59 = arith.constant 0 : index
    %c0_60 = arith.constant 0 : index
    %96 = vector.load %arg6[%c11, %c0_59, %c0_60] : memref<20x640x128xbf16, #tpu.memory_space<vmem>>, vector<1x640x128xbf16>
    %97 = vector.shape_cast %96 : vector<1x640x128xbf16> to vector<640x128xbf16>
    %cst_61 = arith.constant dense<0.000000e+00> : vector<16x128xf32>
    %98 = tpu.matmul %95, %97, %cst_61 {dimension_numbers = #tpu.dot_dimension_numbers<[1], [0], [0], [1], [0, 0, 1, 1], [], []>} : vector<16x640xbf16>, vector<640x128xbf16>, vector<16x128xf32> -> vector<16x128xf32>
    %99 = arith.addf %94, %98 : vector<16x128xf32>
    %100 = vector.extract_strided_slice %38 {offsets = [192, 0], sizes = [16, 640], strides = [1, 1]} : vector<320x640xbf16> to vector<16x640xbf16>
    %c12 = arith.constant 12 : index
    %c0_62 = arith.constant 0 : index
    %c0_63 = arith.constant 0 : index
    %101 = vector.load %arg6[%c12, %c0_62, %c0_63] : memref<20x640x128xbf16, #tpu.memory_space<vmem>>, vector<1x640x128xbf16>
    %102 = vector.shape_cast %101 : vector<1x640x128xbf16> to vector<640x128xbf16>
    %cst_64 = arith.constant dense<0.000000e+00> : vector<16x128xf32>
    %103 = tpu.matmul %100, %102, %cst_64 {dimension_numbers = #tpu.dot_dimension_numbers<[1], [0], [0], [1], [0, 0, 1, 1], [], []>} : vector<16x640xbf16>, vector<640x128xbf16>, vector<16x128xf32> -> vector<16x128xf32>
    %104 = arith.addf %99, %103 : vector<16x128xf32>
    %105 = vector.extract_strided_slice %38 {offsets = [208, 0], sizes = [16, 640], strides = [1, 1]} : vector<320x640xbf16> to vector<16x640xbf16>
    %c13 = arith.constant 13 : index
    %c0_65 = arith.constant 0 : index
    %c0_66 = arith.constant 0 : index
    %106 = vector.load %arg6[%c13, %c0_65, %c0_66] : memref<20x640x128xbf16, #tpu.memory_space<vmem>>, vector<1x640x128xbf16>
    %107 = vector.shape_cast %106 : vector<1x640x128xbf16> to vector<640x128xbf16>
    %cst_67 = arith.constant dense<0.000000e+00> : vector<16x128xf32>
    %108 = tpu.matmul %105, %107, %cst_67 {dimension_numbers = #tpu.dot_dimension_numbers<[1], [0], [0], [1], [0, 0, 1, 1], [], []>} : vector<16x640xbf16>, vector<640x128xbf16>, vector<16x128xf32> -> vector<16x128xf32>
    %109 = arith.addf %104, %108 : vector<16x128xf32>
    %110 = vector.extract_strided_slice %38 {offsets = [224, 0], sizes = [16, 640], strides = [1, 1]} : vector<320x640xbf16> to vector<16x640xbf16>
    %c14 = arith.constant 14 : index
    %c0_68 = arith.constant 0 : index
    %c0_69 = arith.constant 0 : index
    %111 = vector.load %arg6[%c14, %c0_68, %c0_69] : memref<20x640x128xbf16, #tpu.memory_space<vmem>>, vector<1x640x128xbf16>
    %112 = vector.shape_cast %111 : vector<1x640x128xbf16> to vector<640x128xbf16>
    %cst_70 = arith.constant dense<0.000000e+00> : vector<16x128xf32>
    %113 = tpu.matmul %110, %112, %cst_70 {dimension_numbers = #tpu.dot_dimension_numbers<[1], [0], [0], [1], [0, 0, 1, 1], [], []>} : vector<16x640xbf16>, vector<640x128xbf16>, vector<16x128xf32> -> vector<16x128xf32>
    %114 = arith.addf %109, %113 : vector<16x128xf32>
    %115 = vector.extract_strided_slice %38 {offsets = [240, 0], sizes = [16, 640], strides = [1, 1]} : vector<320x640xbf16> to vector<16x640xbf16>
    %c15 = arith.constant 15 : index
    %c0_71 = arith.constant 0 : index
    %c0_72 = arith.constant 0 : index
    %116 = vector.load %arg6[%c15, %c0_71, %c0_72] : memref<20x640x128xbf16, #tpu.memory_space<vmem>>, vector<1x640x128xbf16>
    %117 = vector.shape_cast %116 : vector<1x640x128xbf16> to vector<640x128xbf16>
    %cst_73 = arith.constant dense<0.000000e+00> : vector<16x128xf32>
    %118 = tpu.matmul %115, %117, %cst_73 {dimension_numbers = #tpu.dot_dimension_numbers<[1], [0], [0], [1], [0, 0, 1, 1], [], []>} : vector<16x640xbf16>, vector<640x128xbf16>, vector<16x128xf32> -> vector<16x128xf32>
    %119 = arith.addf %114, %118 : vector<16x128xf32>
    %120 = vector.extract_strided_slice %38 {offsets = [256, 0], sizes = [16, 640], strides = [1, 1]} : vector<320x640xbf16> to vector<16x640xbf16>
    %c16 = arith.constant 16 : index
    %c0_74 = arith.constant 0 : index
    %c0_75 = arith.constant 0 : index
    %121 = vector.load %arg6[%c16, %c0_74, %c0_75] : memref<20x640x128xbf16, #tpu.memory_space<vmem>>, vector<1x640x128xbf16>
    %122 = vector.shape_cast %121 : vector<1x640x128xbf16> to vector<640x128xbf16>
    %cst_76 = arith.constant dense<0.000000e+00> : vector<16x128xf32>
    %123 = tpu.matmul %120, %122, %cst_76 {dimension_numbers = #tpu.dot_dimension_numbers<[1], [0], [0], [1], [0, 0, 1, 1], [], []>} : vector<16x640xbf16>, vector<640x128xbf16>, vector<16x128xf32> -> vector<16x128xf32>
    %124 = arith.addf %119, %123 : vector<16x128xf32>
    %125 = vector.extract_strided_slice %38 {offsets = [272, 0], sizes = [16, 640], strides = [1, 1]} : vector<320x640xbf16> to vector<16x640xbf16>
    %c17 = arith.constant 17 : index
    %c0_77 = arith.constant 0 : index
    %c0_78 = arith.constant 0 : index
    %126 = vector.load %arg6[%c17, %c0_77, %c0_78] : memref<20x640x128xbf16, #tpu.memory_space<vmem>>, vector<1x640x128xbf16>
    %127 = vector.shape_cast %126 : vector<1x640x128xbf16> to vector<640x128xbf16>
    %cst_79 = arith.constant dense<0.000000e+00> : vector<16x128xf32>
    %128 = tpu.matmul %125, %127, %cst_79 {dimension_numbers = #tpu.dot_dimension_numbers<[1], [0], [0], [1], [0, 0, 1, 1], [], []>} : vector<16x640xbf16>, vector<640x128xbf16>, vector<16x128xf32> -> vector<16x128xf32>
    %129 = arith.addf %124, %128 : vector<16x128xf32>
    %130 = vector.extract_strided_slice %38 {offsets = [288, 0], sizes = [16, 640], strides = [1, 1]} : vector<320x640xbf16> to vector<16x640xbf16>
    %c18 = arith.constant 18 : index
    %c0_80 = arith.constant 0 : index
    %c0_81 = arith.constant 0 : index
    %131 = vector.load %arg6[%c18, %c0_80, %c0_81] : memref<20x640x128xbf16, #tpu.memory_space<vmem>>, vector<1x640x128xbf16>
    %132 = vector.shape_cast %131 : vector<1x640x128xbf16> to vector<640x128xbf16>
    %cst_82 = arith.constant dense<0.000000e+00> : vector<16x128xf32>
    %133 = tpu.matmul %130, %132, %cst_82 {dimension_numbers = #tpu.dot_dimension_numbers<[1], [0], [0], [1], [0, 0, 1, 1], [], []>} : vector<16x640xbf16>, vector<640x128xbf16>, vector<16x128xf32> -> vector<16x128xf32>
    %134 = arith.addf %129, %133 : vector<16x128xf32>
    %135 = vector.extract_strided_slice %38 {offsets = [304, 0], sizes = [16, 640], strides = [1, 1]} : vector<320x640xbf16> to vector<16x640xbf16>
    %c19 = arith.constant 19 : index
    %c0_83 = arith.constant 0 : index
    %c0_84 = arith.constant 0 : index
    %136 = vector.load %arg6[%c19, %c0_83, %c0_84] : memref<20x640x128xbf16, #tpu.memory_space<vmem>>, vector<1x640x128xbf16>
    %137 = vector.shape_cast %136 : vector<1x640x128xbf16> to vector<640x128xbf16>
    %cst_85 = arith.constant dense<0.000000e+00> : vector<16x128xf32>
    %138 = tpu.matmul %135, %137, %cst_85 {dimension_numbers = #tpu.dot_dimension_numbers<[1], [0], [0], [1], [0, 0, 1, 1], [], []>} : vector<16x640xbf16>, vector<640x128xbf16>, vector<16x128xf32> -> vector<16x128xf32>
    %139 = arith.addf %134, %138 : vector<16x128xf32>
    %c0_86 = arith.constant 0 : index
    %c0_87 = arith.constant 0 : index
    %140 = vector.load %arg7[%c0_86, %c0_87] : memref<1x128xf32, #tpu.memory_space<vmem>>, vector<1x128xf32>
    %141 = vector.broadcast %140 : vector<1x128xf32> to vector<16x128xf32>
    %142 = arith.addf %139, %141 : vector<16x128xf32>
    %cst_88 = arith.constant 0.000000e+00 : f32
    %143 = vector.broadcast %cst_88 : f32 to vector<16x128xf32>
    %144 = arith.maximumf %142, %143 : vector<16x128xf32>
    %c0_89 = arith.constant 0 : index
    %c0_90 = arith.constant 0 : index
    %145 = vector.load %arg8[%c0_89, %c0_90] : memref<1x128xf32, #tpu.memory_space<vmem>>, vector<1x128xf32>
    %146 = vector.broadcast %145 : vector<1x128xf32> to vector<16x128xf32>
    %147 = arith.mulf %144, %146 : vector<16x128xf32>
    %cst_91 = arith.constant dense<0.000000e+00> : vector<16xf32>
    %148 = vector.multi_reduction <add>, %147, %cst_91 [1] : vector<16x128xf32> to vector<16xf32>
    %149 = vector.shape_cast %148 : vector<16xf32> to vector<16x1xf32>
    %c0_92 = arith.constant 0 : index
    %c0_93 = arith.constant 0 : index
    %150 = vector.load %arg9[%c0_92, %c0_93] : memref<1x1xf32, #tpu.memory_space<vmem>>, vector<1x1xf32>
    %151 = vector.broadcast %150 : vector<1x1xf32> to vector<16x1xf32>
    %152 = arith.addf %149, %151 : vector<16x1xf32>
    %c0_94 = arith.constant 0 : index
    %c0_95 = arith.constant 0 : index
    %153 = vector.load %arg10[%c0_94, %c0_95] : memref<16x1xf32, #tpu.memory_space<vmem>>, vector<16x1xf32>
    tpu.vector_store %arg10[%c0_94, %c0_95], %152 {strides = array<i32>} : memref<16x1xf32, #tpu.memory_space<vmem>>, vector<16x1xf32>,
    return
  }
  func.func @transform_0(%arg0: i32) -> (i32, i32, i32) {
    %c0_i32 = arith.constant 0 : i32
    %c0_i32_0 = arith.constant 0 : i32
    %c0_i32_1 = arith.constant 0 : i32
    return %c0_i32, %arg0, %c0_i32_0 : i32, i32, i32
  }
  func.func @transform_1(%arg0: i32) -> (i32, i32) {
    %c0_i32 = arith.constant 0 : i32
    %c0_i32_0 = arith.constant 0 : i32
    %c0_i32_1 = arith.constant 0 : i32
    return %c0_i32, %c0_i32_0 : i32, i32
  }
  func.func @transform_2(%arg0: i32) -> (i32, i32) {
    %c0_i32 = arith.constant 0 : i32
    %c0_i32_0 = arith.constant 0 : i32
    %c0_i32_1 = arith.constant 0 : i32
    return %c0_i32, %c0_i32_0 : i32, i32
  }
  func.func @transform_3(%arg0: i32) -> (i32, i32, i32) {
    %c0_i32 = arith.constant 0 : i32
    %c0_i32_0 = arith.constant 0 : i32
    %c0_i32_1 = arith.constant 0 : i32
    %c0_i32_2 = arith.constant 0 : i32
    return %c0_i32, %c0_i32_0, %c0_i32_1 : i32, i32, i32
  }
  func.func @transform_4(%arg0: i32) -> (i32, i32) {
    %c0_i32 = arith.constant 0 : i32
    %c0_i32_0 = arith.constant 0 : i32
    %c0_i32_1 = arith.constant 0 : i32
    return %c0_i32, %c0_i32_0 : i32, i32
  }
  func.func @transform_5(%arg0: i32) -> (i32, i32, i32) {
    %c0_i32 = arith.constant 0 : i32
    %c0_i32_0 = arith.constant 0 : i32
    %c0_i32_1 = arith.constant 0 : i32
    %c0_i32_2 = arith.constant 0 : i32
    return %c0_i32, %c0_i32_0, %c0_i32_1 : i32, i32, i32
  }
  func.func @transform_6(%arg0: i32) -> (i32, i32) {
    %c0_i32 = arith.constant 0 : i32
    %c0_i32_0 = arith.constant 0 : i32
    %c0_i32_1 = arith.constant 0 : i32
    return %c0_i32, %c0_i32_0 : i32, i32
  }
  func.func @transform_7(%arg0: i32) -> (i32, i32) {
    %c0_i32 = arith.constant 0 : i32
    %c0_i32_0 = arith.constant 0 : i32
    %c0_i32_1 = arith.constant 0 : i32
    return %c0_i32, %c0_i32_0 : i32, i32
  }
  func.func @transform_8(%arg0: i32) -> (i32, i32) {
    %c0_i32 = arith.constant 0 : i32
    %c0_i32_0 = arith.constant 0 : i32
    %c0_i32_1 = arith.constant 0 : i32
    return %c0_i32, %c0_i32_0 : i32, i32
  }
  func.func @transform_9(%arg0: i32) -> (i32, i32) {
    %c0_i32 = arith.constant 0 : i32
    %c0_i32_0 = arith.constant 0 : i32
    return %arg0, %c0_i32 : i32, i32
  }
}

</mosaic_0001>

<bundles_post_ra>
// kernel: value_network_forward.1
= control target key start
LH: loop header
LB: loop body
LE: loop exit
PB: predicated region body
PF: predicated region fallthrough
CT: control target
= control target key end

     0   :  { %s25195_s0 = inlined_call_operand.vmem [shape: f32[20,16,10], index: 0, kind: input, shape index: {}]   ;;  %s25196_s1 = inlined_call_operand.hbm [shape: bf16[30,320], index: 1, kind: input, shape index: {}]   ;;  %s25197_s2 = inlined_call_operand.hbm [shape: f32[1,320], index: 2, kind: input, shape index: {}]   ;;  %s25198_s3 = inlined_call_operand.hbm [shape: bf16[3,320,640], index: 3, kind: input, shape index: {}]   ;;  %s25199_s4 = inlined_call_operand.hbm [shape: f32[1,640], index: 4, kind: input, shape index: {}]   ;;  %s25200_s5 = inlined_call_operand.hbm [shape: bf16[20,640,128], index: 5, kind: input, shape index: {}]   ;;  %s25201_s6 = inlined_call_operand.hbm [shape: f32[1,128], index: 6, kind: input, shape index: {}]   ;;  %s25202_s7 = inlined_call_operand.hbm [shape: f32[1,128], index: 7, kind: input, shape index: {}]   ;;  %s25203_s8 = inlined_call_operand.<no memory space> [shape: f32[1,1], index: 8, kind: input, shape index: {}]   ;;  %s25204_s9 = inlined_call_operand.vmem [shape: f32[16,1], index: 9, kind: output, shape index: {}]  }
   0x1   :  { %v14_v0 = vstv %s25203_s8 }
   0x2   :  { %15 = vst [vmem:[#allocation2] sm:$0x1] %v14_v0 }
   0x3   :  { %16 = vsyncpa [#allocation4], 0 }
   0x4   :  { %17 = vsyncpa [#allocation6], 0 }
   0x5   :  { %18 = vsyncpa [#allocation9], 0 }
   0x6   :  { %19 = vsyncpa [#allocation12], 0  ;;  %s21997_s11 = smov [#allocation5]   ;;  %s21998_s13 = smov [#allocation8]  }
   0x7   :  { %s40_s12 = sshll.u32 %s21997_s11, 4  ;;  %s62_s14 = sshll.u32 %s21998_s13, 4  ;;  %s41_s12 = int_to_ptr.vmem [resolvable:$true] %s40_s12  ;;  %s63_s14 = int_to_ptr.vmem [resolvable:$true] %s62_s14 }
   0x8   :  { %s21835_s17 = scalar_lea.hbm %s25197_s2, 48 }
   0x9   :  { %p21836_p0 = scmp.ne.s32.totalorder %s25197_s2, %s21835_s17  ;;  %p21839_p1 = scmp.lt.u32.totalorder %s21835_s17, %s25197_s2 }
   0xb   :  { %p21841_p2 = pnand %p21839_p1, %p21836_p0 }
   0xd   :  { %21844 = shalt.err (!%p21841_p2)
}
   0xe   :  { %s21845_s21 = scalar_lea.vmem %s41_s12, 48  ;;  %s21849_s22 = scalar_lea.vmem %s41_s12, 64 }
   0xf   :  { %p21846_p3 = scmp.ne.s32.totalorder %s41_s12, %s21845_s21  ;;  %p21850_p4 = scmp.lt.s32.totalorder %s41_s12, %s41_s12 }
  0x10   :  { %p21851_p5 = scmp.lt.s32.totalorder %s21849_s22, %s21845_s21 }
  0x12   :  { %p21852_p6 = por %p21851_p5, %p21850_p4 }
  0x14   :  { %p21853_p7 = pnand %p21852_p6, %p21846_p3 }
  0x16   :  { %21856 = shalt.err (!%p21853_p7)
}
  0x17   :  { %43 = dma.hbm_to_vmem [thread:$0]  %s25197_s2, 48, %s41_s12, [#allocation6]  }
  0x18   :  { %s21857_s27 = scalar_lea.hbm %s25199_s4, 80 }
  0x19   :  { %p21858_p8 = scmp.ne.s32.totalorder %s25199_s4, %s21857_s27  ;;  %p21861_p9 = scmp.lt.u32.totalorder %s21857_s27, %s25199_s4 }
  0x1b   :  { %p21863_p10 = pnand %p21861_p9, %p21858_p8 }
  0x1d   :  { %21866 = shalt.err (!%p21863_p10)
}
  0x1e   :  { %s21867_s11 = scalar_lea.vmem %s63_s14, 80  ;;  %s21871_s13 = scalar_lea.vmem %s63_s14, 96 }
  0x1f   :  { %p21868_p11 = scmp.ne.s32.totalorder %s63_s14, %s21867_s11  ;;  %p21872_p12 = scmp.lt.s32.totalorder %s63_s14, %s63_s14 }
  0x20   :  { %p21873_p13 = scmp.lt.s32.totalorder %s21871_s13, %s21867_s11 }
  0x22   :  { %p21874_p0 = por %p21873_p13, %p21872_p12 }
  0x24   :  { %p21875_p1 = pnand %p21874_p0, %p21868_p11 }
  0x26   :  { %21878 = shalt.err (!%p21875_p1)
}
  0x27   :  { %65 = dma.hbm_to_vmem [thread:$0]  %s25199_s4, 80, %s63_s14, [#allocation9]  }
  0x28   :  { %s21999_s15 = smov [#allocation11]   ;;  %s22000_s17 = smov [#allocation3]  }
  0x29   :  { %s84_s16 = sshll.u32 %s21999_s15, 4  ;;  %s27_s18 = sshll.u32 %s22000_s17, 4  ;;  %s85_s16 = int_to_ptr.vmem [resolvable:$true] %s84_s16  ;;  %s22091_s18 = int_to_ptr.vmem [resolvable:$true] %s27_s18 }
  0x2a   :  { %s21879_s20 = scalar_lea.hbm %s25201_s6, 16 }
  0x2b   :  { %p21880_p2 = scmp.ne.s32.totalorder %s25201_s6, %s21879_s20  ;;  %p21883_p3 = scmp.lt.u32.totalorder %s21879_s20, %s25201_s6 }
  0x2d   :  { %p21885_p4 = pnand %p21883_p3, %p21880_p2 }
  0x2f   :  { %21888 = shalt.err (!%p21885_p4)
}
  0x30   :  { %s21889_s4 = scalar_lea.vmem %s85_s16, 16  ;;  %s21893_s14 = scalar_lea.vmem %s85_s16, 32 }
  0x31   :  { %p21890_p5 = scmp.ne.s32.totalorder %s85_s16, %s21889_s4  ;;  %p21894_p6 = scmp.lt.s32.totalorder %s85_s16, %s85_s16 }
  0x32   :  { %p21895_p7 = scmp.lt.s32.totalorder %s21893_s14, %s21889_s4 }
  0x34   :  { %p21896_p8 = por %p21895_p7, %p21894_p6 }
  0x36   :  { %p21897_p9 = pnand %p21896_p8, %p21890_p5 }
  0x38   :  { %21900 = shalt.err (!%p21897_p9)
}
  0x39   :  { %87 = dma.hbm_to_vmem [thread:$0]  %s25201_s6, 16, %s85_s16, [#allocation12]  }
  0x3a   :  { %s21901_s29 = scalar_lea.hbm %s25196_s1, 768 }
  0x3b   :  { %p21902_p10 = scmp.ne.s32.totalorder %s25196_s1, %s21901_s29  ;;  %p21905_p11 = scmp.lt.u32.totalorder %s21901_s29, %s25196_s1 }
  0x3d   :  { %p21907_p12 = pnand %p21905_p11, %p21902_p10 }
  0x3f   :  { %21910 = shalt.err (!%p21907_p12)
}
  0x40   :  { %s21911_s2 = scalar_lea.vmem %s22091_s18, 768  ;;  %p21916_p0 = scmp.lt.s32.totalorder %s22091_s18, %s22091_s18 }
  0x41   :  { %p21912_p13 = scmp.ne.s32.totalorder %s22091_s18, %s21911_s2  ;;  %p21917_p1 = scmp.lt.s32.totalorder %s21911_s2, %s21911_s2 }
  0x43   :  { %p21918_p2 = por %p21917_p1, %p21916_p0 }
  0x45   :  { %p21919_p3 = pnand %p21918_p2, %p21912_p13 }
  0x47   :  { %21922 = shalt.err (!%p21919_p3)
}
  0x48   :  { %s22001_s6 = smov 192   ;;  %s22002_s12 = smov 12  }
  0x49   :  { %33 = dma.hbm_to_vmem [thread:$0]  %s25196_s1, 768, %s22091_s18, [#allocation4], %s22001_s6, %s22001_s6, %s22002_s12  }
  0x4a   :  { %s22003_s17 = smov [#allocation7]   ;;  %s21923_s21 = scalar_lea.hbm %s25198_s3, 38400 }
  0x4b   :  { %s49_s19 = sshll.u32 %s22003_s17, 4  ;;  %p21924_p4 = scmp.ne.s32.totalorder %s25198_s3, %s21923_s21  ;;  %s50_s19 = int_to_ptr.vmem [resolvable:$true] %s49_s19 }
  0x4c   :  { %p21927_p5 = scmp.lt.u32.totalorder %s21923_s21, %s25198_s3 }
  0x4e   :  { %p21929_p6 = pnand %p21927_p5, %p21924_p4 }
  0x50   :  { %21932 = shalt.err (!%p21929_p6)
}
  0x51   :  { %s21933_s14 = scalar_lea.vmem %s50_s19, 38400  ;;  %p21938_p8 = scmp.lt.s32.totalorder %s50_s19, %s50_s19 }
  0x52   :  { %p21934_p7 = scmp.ne.s32.totalorder %s50_s19, %s21933_s14  ;;  %p21939_p9 = scmp.lt.s32.totalorder %s21933_s14, %s21933_s14 }
  0x54   :  { %p21940_p10 = por %p21939_p9, %p21938_p8 }
  0x56   :  { %p21941_p11 = pnand %p21940_p10, %p21934_p7 }
  0x58   :  { %21944 = shalt.err (!%p21941_p11)
}
  0x59   :  { %s22004_s1 = smov 320   ;;  %s22005_s18 = smov 20  }
  0x5a   :  { %55 = dma.hbm_to_vmem [thread:$0]  %s25198_s3, 38400, %s50_s19, [#allocation6], %s22004_s1, %s22004_s1, %s22005_s18  }
  0x5b   :  { %s22006_s27 = smov [#allocation10]   ;;  %s21945_s10 = scalar_lea.hbm %s25200_s5, 102400 }
  0x5c   :  { %s71_s28 = sshll.u32 %s22006_s27, 4  ;;  %p21946_p12 = scmp.ne.s32.totalorder %s25200_s5, %s21945_s10  ;;  %s72_s28 = int_to_ptr.vmem [resolvable:$true] %s71_s28 }
  0x5d   :  { %p21949_p13 = scmp.lt.u32.totalorder %s21945_s10, %s25200_s5 }
  0x5f   :  { %p21951_p0 = pnand %p21949_p13, %p21946_p12 }
  0x61   :  { %21954 = shalt.err (!%p21951_p0)
}
  0x62   :  { %s21955_s12 = scalar_lea.vmem %s72_s28, 102400  ;;  %p21960_p2 = scmp.lt.s32.totalorder %s72_s28, %s72_s28 }
  0x63   :  { %p21956_p1 = scmp.ne.s32.totalorder %s72_s28, %s21955_s12  ;;  %p21961_p3 = scmp.lt.s32.totalorder %s21955_s12, %s21955_s12 }
  0x65   :  { %p21962_p4 = por %p21961_p3, %p21960_p2 }
  0x67   :  { %p21963_p5 = pnand %p21962_p4, %p21956_p1 }
  0x69   :  { %21966 = shalt.err (!%p21963_p5)
}
  0x6a   :  { %s22007_s3 = smov 64   ;;  %s22008_s15 = smov 4  }
  0x6b   :  { %77 = dma.hbm_to_vmem [thread:$0]  %s25200_s5, 102400, %s72_s28, [#allocation9], %s22007_s3, %s22007_s3, %s22008_s15  }
  0x6c   :  { %s22009_s19 = smov [#allocation13]   ;;  %s21967_s22 = scalar_lea.hbm %s25202_s7, 16 }
  0x6d   :  { %s94_s8 = sshll.u32 %s22009_s19, 4  ;;  %p21968_p6 = scmp.ne.s32.totalorder %s25202_s7, %s21967_s22  ;;  %s95_s8 = int_to_ptr.vmem [resolvable:$true] %s94_s8 }
  0x6e   :  { %p21971_p7 = scmp.lt.u32.totalorder %s21967_s22, %s25202_s7 }
  0x70   :  { %p21973_p8 = pnand %p21971_p7, %p21968_p6 }
  0x72   :  { %21976 = shalt.err (!%p21973_p8)
}
  0x73   :  { %s21977_s1 = scalar_lea.vmem %s95_s8, 16  ;;  %s21981_s5 = scalar_lea.vmem %s95_s8, 32 }
  0x74   :  { %p21978_p9 = scmp.ne.s32.totalorder %s95_s8, %s21977_s1  ;;  %p21982_p10 = scmp.lt.s32.totalorder %s95_s8, %s95_s8 }
  0x75   :  { %p21983_p11 = scmp.lt.s32.totalorder %s21981_s5, %s21977_s1 }
  0x77   :  { %p21984_p12 = por %p21983_p11, %p21982_p10 }
  0x79   :  { %p21985_p13 = pnand %p21984_p12, %p21978_p9 }
  0x7b   :  { %21988 = shalt.err (!%p21985_p13)
}
  0x7c   :  { %97 = dma.hbm_to_vmem [thread:$0]  %s25202_s7, 16, %s95_s8, [#allocation12]  }
  0x7d   :  { %21989 = dma.done.wait [#allocation4], 768  }
  0x7e   :  { %21990 = vsyncadd [#allocation4], 4294966528 }
  0x7f   :  { %21991 = dma.done.wait [#allocation6], 38448  }
  0x80   :  { %21992 = vsyncadd [#allocation6], 4294928848 }
  0x81   :  { %21993 = dma.done.wait [#allocation9], 102480  }
  0x82   :  { %21994 = vsyncadd [#allocation9], 4294864816 }
  0x83   :  { %21995 = dma.done.wait [#allocation12], 32  }
  0x84   :  { %21996 = vsyncadd [#allocation12], 4294967264  ;;  %v25208_v1 = vmov 0   ;;  %v122_v2 = vld [vmem:[%s25195_s0] sm:$0xff]  ;;  %v123_v3 = vld [vmem:[%s25195_s0 + $0x8] sm:$0xff]  ;;  %s22011_s15 = smov 10  }
  0x85   :  { %522 = vmatprep.mubr.bf16.mxu0 %v25208_v1  ;;  %v124_v4 = vld [vmem:[%s25195_s0 + $0x10] sm:$0xff]  ;;  %v22169_v5 = vpack.c.bf16 %v123_v3, %v122_v2  ;;  %v125_v6 = vld [vmem:[%s25195_s0 + $0x18] sm:$0xff]  ;;  %v126_v7 = vld [vmem:[%s25195_s0 + $0x20] sm:$0xff]  ;;  %vm480_vm0 = vcmask 1046528   ;;  %vm283_vm1 = vcmask 80896   ;;  %vm344_vm2 = vcmask 162816  }
  0x86   :  { %v127_v8 = vld [vmem:[%s25195_s0 + $0x28] sm:$0xff]  ;;  %v22180_v9 = vpack.c.bf16 %v125_v6, %v124_v4  ;;  %v128_v11 = vld [vmem:[%s25195_s0 + $0x30] sm:$0xff]  ;;  %v129_v12 = vld [vmem:[%s25195_s0 + $0x38] sm:$0xff]  ;;  %vm439_vm3 = vcmask 244736   ;;  %vm1857_vm4 = vcmask 523264   ;;  %vm22013_vm5 = vmmov 0  }
  0x87   :  { %202 = vrot.lane.b32.xlu0 %v22169_v5, %s22011_s15  ;;  %v22186_v10 = vpack.c.bf16 %v127_v8, %v126_v7  ;;  %v22198_v13 = vpack.c.bf16 %v129_v12, %v128_v11  ;;  %v130_v14 = vld [vmem:[%s25195_s0 + $0x40] sm:$0xff]  ;;  %v131_v15 = vld [vmem:[%s25195_s0 + $0x48] sm:$0xff]  ;;  %v132_v20 = vld [vmem:[%s25195_s0 + $0x50] sm:$0xff]  ;;  %vm16710_vm6 = vcmask 7168  }
  0x88   :  { %204 = vrot.lane.b32.xlu1 %v22180_v9, %s22011_s15  ;;  %v20605_v16 = vld [vmem:[#allocation3 + $0x4] ss:$12 sps:$4 sm:$0xff]   ;;  %v20607_v17 = vld [vmem:[#allocation3] ss:$12 sps:$4 sm:$0xff]   ;;  %v22210_v18 = vpack.c.bf16 %v131_v15, %v130_v14  ;;  %v20608_v19 = vld [vmem:[#allocation3 + $0x8] ss:$12 sps:$4 sm:$0xff]  }
  0x89   :  { %490 = vmatprep.subr.bf16.mxu0 %v20605_v16  ;;  %v133_v21 = vld [vmem:[%s25195_s0 + $0x58] sm:$0xff]  ;;  %19199 = vmatprep.subr.bf16.mxu1 %v20608_v19  ;;  %v20612_v24 = vld [vmem:[#allocation3 + $0x20] ss:$12 sps:$4 sm:$0x7f]   ;;  %v136_v30 = vld [vmem:[%s25195_s0 + $0x70] sm:$0xff] }
  0x8a   :  { %491 = vmatpush1.bf16.msra.mxu0 %v20607_v17  ;;  %v20609_v22 = vld [vmem:[#allocation3 + $0x1c] ss:$12 sps:$4 sm:$0x7f]   ;;  %v20611_v23 = vld [vmem:[#allocation3 + $0x18] ss:$12 sps:$4 sm:$0x7f]   ;;  %19200 = vmatpush3.bf16.msra.mxu1 %v20608_v19  ;;  %v22222_v25 = vpack.c.bf16 %v133_v21, %v132_v20 }
  0x8b   :  { %243 = vrot.lane.b32.xlu0 %v22180_v9, %s22005_s18  ;;  %v134_v26 = vld [vmem:[%s25195_s0 + $0x60] sm:$0xff]  ;;  %16727 = vmatprep.subr.msk.bf16.mxu0 %vm480_vm0, %v20609_v22  ;;  %v482_v27 = vsel %vm480_vm0, %v20611_v23, 0  ;;  %v135_v28 = vld [vmem:[%s25195_s0 + $0x68] sm:$0xff]  ;;  %v488_v29 = vsel %vm480_vm0, %v20612_v24, 0  ;;  %v137_v31 = vld [vmem:[%s25195_s0 + $0x78] sm:$0xff] }
  0x8c   :  { %245 = vrot.lane.b32.xlu1 %v22186_v10, %s22005_s18  ;;  %20587 = vmatprep.subr.msk.bf16.mxu1 %vm480_vm0, %v20612_v24  ;;  %v22240_v32 = vpack.c.bf16 %v135_v28, %v134_v26  ;;  %v138_v33 = vld [vmem:[%s25195_s0 + $0x80] sm:$0xff]  ;;  %v139_v34 = vld [vmem:[%s25195_s0 + $0x88] sm:$0xff]  ;;  %v22252_v35 = vpack.c.bf16 %v137_v31, %v136_v30  ;;  %v140_v36 = vld [vmem:[%s25195_s0 + $0x90] sm:$0xff] }
  0x8d   :  { %v141_v37 = vld [vmem:[%s25195_s0 + $0x98] sm:$0xff]  ;;  %v22264_v38 = vpack.c.bf16 %v139_v34, %v138_v33  ;;  %v142_v39 = vld [vmem:[%s25195_s0 + $0xa0] sm:$0xff]  ;;  %v143_v40 = vld [vmem:[%s25195_s0 + $0xa8] sm:$0xff] }
  0x8e   :  { %493 = vmatpush1.bf16.msra.mxu0 %v482_v27  ;;  %19202 = vmatpush3.bf16.msra.mxu1 %v488_v29  ;;  %v22276_v41 = vpack.c.bf16 %v141_v37, %v140_v36  ;;  %v144_v42 = vld [vmem:[%s25195_s0 + $0xb0] sm:$0xff]  ;;  %v145_v43 = vld [vmem:[%s25195_s0 + $0xb8] sm:$0xff]  ;;  %v22288_v44 = vpack.c.bf16 %v143_v40, %v142_v39  ;;  %v146_v45 = vld [vmem:[%s25195_s0 + $0xc0] sm:$0xff] }
  0x8f   :  { %206 = vrot.lane.b32.xlu0 %v22186_v10, %s22011_s15  ;;  %v147_v46 = vld [vmem:[%s25195_s0 + $0xc8] sm:$0xff]  ;;  %v22300_v47 = vpack.c.bf16 %v145_v43, %v144_v42  ;;  %v148_v48 = vld [vmem:[%s25195_s0 + $0xd0] sm:$0xff]  ;;  %v149_v49 = vld [vmem:[%s25195_s0 + $0xd8] sm:$0xff] }
  0x90   :  { %247 = vrot.lane.b32.xlu1 %v22198_v13, %s22005_s18  ;;  %v22312_v50 = vpack.c.bf16 %v147_v46, %v146_v45  ;;  %v150_v51 = vld [vmem:[%s25195_s0 + $0xe0] sm:$0xff]  ;;  %v151_v52 = vld [vmem:[%s25195_s0 + $0xe8] sm:$0xff]  ;;  %v22324_v53 = vpack.c.bf16 %v149_v49, %v148_v48  ;;  %v152_v54 = vld [vmem:[%s25195_s0 + $0xf0] sm:$0xff] }
  0x91   :  { %v153_v55 = vld [vmem:[%s25195_s0 + $0xf8] sm:$0xff]  ;;  %v22336_v56 = vpack.c.bf16 %v151_v52, %v150_v51  ;;  %v154_v57 = vld [vmem:[%s25195_s0 + $0x100] sm:$0xff]  ;;  %v155_v58 = vld [vmem:[%s25195_s0 + $0x108] sm:$0xff] }
  0x92   :  { %v22348_v59 = vpack.c.bf16 %v153_v55, %v152_v54  ;;  %v156_v60 = vld [vmem:[%s25195_s0 + $0x110] sm:$0xff]  ;;  %v157_v61 = vld [vmem:[%s25195_s0 + $0x118] sm:$0xff]  ;;  %v22360_v63 = vpack.c.bf16 %v155_v58, %v154_v57  ;;  %v158_v0 = vld [vmem:[%s25195_s0 + $0x120] sm:$0xff] }
  0x93   :  { %208 = vrot.lane.b32.xlu0 %v22198_v13, %s22011_s15  ;;  %v20615_v62 = vld [vmem:[#allocation7 + $0x32c] ss:$20 sps:$4 sm:$0xff]   ;;  %v159_v2 = vld [vmem:[%s25195_s0 + $0x128] sm:$0xff]  ;;  %v22372_v3 = vpack.c.bf16 %v157_v61, %v156_v60  ;;  %v20613_v14 = vld [vmem:[#allocation7 + $0x328] ss:$20 sps:$4 sm:$0xff]  }
  0x94   :  { %249 = vrot.lane.b32.xlu1 %v22210_v18, %s22005_s18  ;;  %2384 = vmatprep.subr.bf16.mxu0 %v20615_v62  ;;  %v22378_v4 = vpack.c.bf16 %v159_v2, %v158_v0  ;;  %v160_v6 = vld [vmem:[%s25195_s0 + $0x130] sm:$0xff]  ;;  %v161_v7 = vld [vmem:[%s25195_s0 + $0x138] sm:$0xff] }
  0x95   :  { %v181_v8 = vpack.c.bf16 %v161_v7, %v160_v6  ;;  %v20618_v16 = vld [vmem:[#allocation7 + $0x354] ss:$20 sps:$4 sm:$0xff]   ;;  %v20616_v23 = vld [vmem:[#allocation7 + $0x350] ss:$20 sps:$4 sm:$0xff]   ;;  %v20619_v29 = vld [vmem:[#allocation7 + $0x378] ss:$20 sps:$4 sm:$0xff]  }
  0x96   :  { %v20624_v30 = vld [vmem:[#allocation7 + $0x3a4] ss:$20 sps:$4 sm:$0xff]   ;;  %v20637_v37 = vld [vmem:[#allocation7 + $0x320] ss:$20 sps:$4 sm:$0xff]   ;;  %v20625_v46 = vld [vmem:[#allocation7 + $0x3c8] ss:$20 sps:$4 sm:$0xff]  }
  0x97   :  { %210 = vrot.lane.b32.xlu0 %v22210_v18, %s22011_s15  ;;  %v20627_v39 = vld [vmem:[#allocation7 + $0x3cc] ss:$20 sps:$4 sm:$0xff]   ;;  %v20639_v40 = vld [vmem:[#allocation7 + $0x324] ss:$20 sps:$4 sm:$0xff]   ;;  %v20630_v48 = vld [vmem:[#allocation7 + $0x3f4] ss:$20 sps:$4 sm:$0xff]  }
  0x98   :  { %251 = vrot.lane.b32.xlu1 %v22222_v25, %s22005_s18  ;;  %1918 = vmatprep.subr.bf16.mxu1 %v20639_v40  ;;  %v20628_v54 = vld [vmem:[#allocation7 + $0x3f0] ss:$20 sps:$4 sm:$0xff]   ;;  %v20640_v55 = vld [vmem:[#allocation7 + $0x348] ss:$20 sps:$4 sm:$0xff]   ;;  %v20642_v57 = vld [vmem:[#allocation7 + $0x34c] ss:$20 sps:$4 sm:$0xff]  }
  0x99   :  { %v20633_v58 = vld [vmem:[#allocation7 + $0x41c] ss:$20 sps:$4 sm:$0xff]   ;;  %v20648_v61 = vld [vmem:[#allocation7 + $0x374] ss:$20 sps:$4 sm:$0xff]   ;;  %v20631_v6 = vld [vmem:[#allocation7 + $0x418] ss:$20 sps:$4 sm:$0xff]  }
  0x9a   :  { %v20646_v60 = vld [vmem:[#allocation7 + $0x370] ss:$20 sps:$4 sm:$0xff]  }
  0x9b   :  { %212 = vrot.lane.b32.xlu0 %v22222_v25, %s22011_s15  ;;  %v20636_v7 = vld [vmem:[#allocation7 + $0x444] ss:$20 sps:$4 sm:$0xff]  }
  0x9c   :  { %253 = vrot.lane.b32.xlu1 %v22240_v32, %s22005_s18 }
  0x9f   :  { %214 = vrot.lane.b32.xlu0 %v22240_v32, %s22011_s15 }
  0xa0   :  { %255 = vrot.lane.b32.xlu1 %v22252_v35, %s22005_s18 }
  0xa3   :  { %216 = vrot.lane.b32.xlu0 %v22252_v35, %s22011_s15 }
  0xa4   :  { %257 = vrot.lane.b32.xlu1 %v22264_v38, %s22005_s18 }
  0xa7   :  { %218 = vrot.lane.b32.xlu0 %v22264_v38, %s22011_s15 }
  0xa8   :  { %259 = vrot.lane.b32.xlu1 %v22276_v41, %s22005_s18 }
  0xab   :  { %220 = vrot.lane.b32.xlu0 %v22276_v41, %s22011_s15 }
  0xac   :  { %261 = vrot.lane.b32.xlu1 %v22288_v44, %s22005_s18 }
  0xaf   :  { %222 = vrot.lane.b32.xlu0 %v22288_v44, %s22011_s15 }
  0xb0   :  { %263 = vrot.lane.b32.xlu1 %v22300_v47, %s22005_s18 }
  0xb3   :  { %224 = vrot.lane.b32.xlu0 %v22300_v47, %s22011_s15 }
  0xb4   :  { %265 = vrot.lane.b32.xlu1 %v22312_v50, %s22005_s18 }
  0xb7   :  { %226 = vrot.lane.b32.xlu0 %v22312_v50, %s22011_s15 }
  0xb8   :  { %267 = vrot.lane.b32.xlu1 %v22324_v53, %s22005_s18 }
  0xbb   :  { %228 = vrot.lane.b32.xlu0 %v22324_v53, %s22011_s15 }
  0xbc   :  { %269 = vrot.lane.b32.xlu1 %v22336_v56, %s22005_s18 }
  0xbf   :  { %230 = vrot.lane.b32.xlu0 %v22336_v56, %s22011_s15 }
  0xc0   :  { %271 = vrot.lane.b32.xlu1 %v22348_v59, %s22005_s18 }
  0xc3   :  { %232 = vrot.lane.b32.xlu0 %v22348_v59, %s22011_s15 }
  0xc4   :  { %273 = vrot.lane.b32.xlu1 %v22360_v63, %s22005_s18 }
  0xc7   :  { %234 = vrot.lane.b32.xlu0 %v22360_v63, %s22011_s15 }
  0xc8   :  { %275 = vrot.lane.b32.xlu1 %v22372_v3, %s22005_s18 }
  0xcb   :  { %236 = vrot.lane.b32.xlu0 %v22372_v3, %s22011_s15 }
  0xcc   :  { %277 = vrot.lane.b32.xlu1 %v22378_v4, %s22005_s18 }
  0xcf   :  { %238 = vrot.lane.b32.xlu0 %v22378_v4, %s22011_s15 }
  0xd0   :  { %279 = vrot.lane.b32.xlu1 %v181_v8, %s22005_s18 }
  0xd3   :  { %240 = vrot.lane.b32.xlu0 %v181_v8, %s22011_s15 }
  0xd4   :  { %281 = vrot.lane.b32.xlu1 %v25208_v1, %s22005_s18 }
  0xf9   :  { %v203_v11 = vpop.permute.xlu0 %202 }
  0xfa   :  { %v205_v12 = vpop.permute.xlu1 %204  ;;  %v286_v17 = vsel %vm283_vm1, 0, %v203_v11 }
  0xfb   :  { %v289_v15 = vsel %vm283_vm1, %v22169_v5, %v205_v12  ;;  %v20621_v5 = vld [vmem:[#allocation7 + $0x37c] ss:$20 sps:$4 sm:$0xff]  }
  0xfd   :  { %v244_v19 = vpop.permute.xlu0 %243 }
  0xfe   :  { %v346_v20 = vsel %vm344_vm2, %v286_v17, %v244_v19  ;;  %v246_v21 = vpop.permute.xlu1 %245  ;;  %v20634_v19 = vld [vmem:[#allocation7 + $0x440] ss:$20 sps:$4 sm:$0xff]  }
  0xff   :  { %v348_v22 = vsel %vm344_vm2, %v289_v15, %v246_v21  ;;  %16728 = vmatmul.mubr.msk.bf16.vlgmr.msra.gmra.mrb[0].mxu0 %vm439_vm3, %v346_v20  ;;  %19203 = vmatprep.mubr.msk.bf16.mxu1 %vm439_vm3, %v346_v20  ;;  %v20651_v15 = vld [vmem:[#allocation7 + $0x39c] ss:$20 sps:$4 sm:$0xff]   ;;  %v20645_v21 = vld [vmem:[#allocation7 + $0x46c] ss:$20 sps:$4 sm:$0xff]  }
 0x100   :  { %19204 = vmatmul.mubr.msk.bf16.vlgmr.msra.gmra.mrb[0].mxu1 %vm439_vm3, %v348_v22  ;;  %532 = vmatprep.mubr.bf16.mxu0 %v25208_v1 }
 0x101   :  { %v207_v24 = vpop.permute.xlu0 %206  ;;  %2385 = vmatpush1.bf16.msra.mxu0 %v20613_v14  ;;  %1919 = vmatpush1.bf16.msra.mxu1 %v20637_v37  ;;  %v20649_v14 = vld [vmem:[#allocation7 + $0x398] ss:$20 sps:$4 sm:$0xff]   ;;  %v20664_v37 = vld [vmem:[#allocation7 + $0x410] ss:$20 sps:$4 sm:$0xff]  }
 0x102   :  { %v292_v26 = vsel %vm283_vm1, %v22180_v9, %v207_v24  ;;  %v248_v27 = vpop.permute.xlu1 %247  ;;  %2386 = vmatprep.subr.bf16.mxu0 %v20618_v16  ;;  %v20622_v9 = vld [vmem:[#allocation7 + $0x3a0] ss:$20 sps:$4 sm:$0xff]   ;;  %1920 = vmatprep.subr.bf16.mxu1 %v20642_v57  ;;  %v20657_v16 = vld [vmem:[#allocation7 + $0x3c4] ss:$20 sps:$4 sm:$0xff]  }
 0x103   :  { %v350_v28 = vsel %vm344_vm2, %v292_v26, %v248_v27  ;;  %v20643_v26 = vld [vmem:[#allocation7 + $0x468] ss:$20 sps:$4 sm:$0xff]  }
 0x104   :  { %19207 = vmatprep.mubr.msk.bf16.mxu1 %vm439_vm3, %v350_v28 }
 0x105   :  { %v209_v31 = vpop.permute.xlu0 %208  ;;  %2387 = vmatpush1.bf16.msra.mxu0 %v20616_v23  ;;  %1921 = vmatpush1.bf16.msra.mxu1 %v20640_v55 }
 0x106   :  { %v295_v33 = vsel %vm283_vm1, %v22186_v10, %v209_v31  ;;  %v250_v34 = vpop.permute.xlu1 %249  ;;  %2388 = vmatprep.subr.bf16.mxu0 %v20621_v5  ;;  %1922 = vmatprep.subr.bf16.mxu1 %v20648_v61  ;;  %v20660_v5 = vld [vmem:[#allocation7 + $0x3ec] ss:$20 sps:$4 sm:$0xff]   ;;  %v20666_v31 = vld [vmem:[#allocation7 + $0x414] ss:$20 sps:$4 sm:$0xff]  }
 0x107   :  { %16729 = vmatmul.mubr.msk.bf16.gmra.mrb[4].mxu0 %vm439_vm3, %v348_v22  ;;  %v352_v36 = vsel %vm344_vm2, %v295_v33, %v250_v34  ;;  %v20655_v22 = vld [vmem:[#allocation7 + $0x3c0] ss:$20 sps:$4 sm:$0xff]   ;;  %v20676_v61 = vld [vmem:[#allocation7 + $0x488] ss:$20 sps:$4 sm:$0xff]  }
 0x108   :  { %542 = vmatprep.mubr.bf16.mxu0 %v25208_v1  ;;  %19208 = vmatmul.mubr.msk.bf16.gmra.mrb[4].mxu1 %vm439_vm3, %v352_v36 }
 0x109   :  { %v211_v42 = vpop.permute.xlu0 %210  ;;  %2389 = vmatpush1.bf16.msra.mxu0 %v20619_v29  ;;  %1923 = vmatpush1.bf16.msra.mxu1 %v20646_v60  ;;  %v20658_v29 = vld [vmem:[#allocation7 + $0x3e8] ss:$20 sps:$4 sm:$0xff]  }
 0x10a   :  { %v298_v43 = vsel %vm283_vm1, %v22198_v13, %v211_v42  ;;  %v252_v10 = vpop.permute.xlu1 %251  ;;  %2390 = vmatprep.subr.bf16.mxu0 %v20624_v30  ;;  %1924 = vmatprep.subr.bf16.mxu1 %v20651_v15  ;;  %v20661_v42 = vld [vmem:[#allocation7 + $0x4b8] ss:$20 sps:$4 sm:$0xff]   ;;  %v20679_v60 = vld [vmem:[#allocation7 + $0x508] ss:$20 sps:$4 sm:$0xff]  }
 0x10b   :  { %v22418_v45 = vsel %vm344_vm2, %v298_v43, %v252_v10  ;;  %v20667_v43 = vld [vmem:[#allocation7 + $0x438] ss:$20 sps:$4 sm:$0xff]  }
 0x10c   :  { %19211 = vmatprep.mubr.msk.bf16.mxu1 %vm439_vm3, %v22418_v45  ;;  %v20672_v10 = vld [vmem:[#allocation7 + $0x4e4] ss:$20 sps:$4 sm:$0xff]  }
 0x10d   :  { %v213_v49 = vpop.permute.xlu0 %212  ;;  %2391 = vmatpush1.bf16.msra.mxu0 %v20622_v9  ;;  %1925 = vmatpush1.bf16.msra.mxu1 %v20649_v14  ;;  %v20663_v9 = vld [vmem:[#allocation7 + $0x4bc] ss:$20 sps:$4 sm:$0xff]  }
 0x10e   :  { %v301_v51 = vsel %vm283_vm1, %v22210_v18, %v213_v49  ;;  %v254_v52 = vpop.permute.xlu1 %253  ;;  %2392 = vmatprep.subr.bf16.mxu0 %v20627_v39  ;;  %1926 = vmatprep.subr.bf16.mxu1 %v20657_v16  ;;  %v20669_v39 = vld [vmem:[#allocation7 + $0x43c] ss:$20 sps:$4 sm:$0xff]  }
 0x10f   :  { %16730 = vmatmul.mubr.msk.bf16.gmra.mrb[8].mxu0 %vm439_vm3, %v350_v28  ;;  %v22426_v13 = vsel %vm344_vm2, %v301_v51, %v254_v52  ;;  %v20654_v28 = vld [vmem:[#allocation7 + $0x494] ss:$20 sps:$4 sm:$0xff]  }
 0x110   :  { %552 = vmatprep.mubr.bf16.mxu0 %v25208_v1  ;;  %19212 = vmatmul.mubr.msk.bf16.gmra.mrb[8].mxu1 %vm439_vm3, %v22426_v13  ;;  %v20670_v51 = vld [vmem:[#allocation7 + $0x4e0] ss:$20 sps:$4 sm:$0xff]  }
 0x111   :  { %v215_v62 = vpop.permute.xlu0 %214  ;;  %2393 = vmatpush1.bf16.msra.mxu0 %v20625_v46  ;;  %1927 = vmatpush1.bf16.msra.mxu1 %v20655_v22  ;;  %v20675_v46 = vld [vmem:[#allocation7 + $0x464] ss:$20 sps:$4 sm:$0xff]   ;;  %v20673_v52 = vld [vmem:[#allocation7 + $0x460] ss:$20 sps:$4 sm:$0xff]  }
 0x112   :  { %v304_v18 = vsel %vm283_vm1, %v22222_v25, %v215_v62  ;;  %v256_v0 = vpop.permute.xlu1 %255  ;;  %2394 = vmatprep.subr.bf16.mxu0 %v20630_v48  ;;  %1928 = vmatprep.subr.bf16.mxu1 %v20660_v5  ;;  %v20690_v62 = vld [vmem:[#allocation7 + $0x534] ss:$20 sps:$4 sm:$0xff]  }
 0x113   :  { %v22434_v2 = vsel %vm344_vm2, %v304_v18, %v256_v0  ;;  %v20684_v0 = vld [vmem:[#allocation7 + $0x4b4] ss:$20 sps:$4 sm:$0xff]  }
 0x114   :  { %19215 = vmatprep.mubr.msk.bf16.mxu1 %vm439_vm3, %v22434_v2  ;;  %v20691_v5 = vld [vmem:[#allocation7 + $0x500] ss:$20 sps:$4 sm:$0xff]  }
 0x115   :  { %v217_v8 = vpop.permute.xlu0 %216  ;;  %2395 = vmatpush1.bf16.msra.mxu0 %v20628_v54  ;;  %1929 = vmatpush1.bf16.msra.mxu1 %v20658_v29  ;;  %v20681_v54 = vld [vmem:[#allocation7 + $0x50c] ss:$20 sps:$4 sm:$0xff]  }
 0x116   :  { %v307_v11 = vsel %vm283_vm1, %v22240_v32, %v217_v8  ;;  %v258_v12 = vpop.permute.xlu1 %257  ;;  %2396 = vmatprep.subr.bf16.mxu0 %v20633_v58  ;;  %1930 = vmatprep.subr.bf16.mxu1 %v20666_v31  ;;  %v20688_v8 = vld [vmem:[#allocation7 + $0x530] ss:$20 sps:$4 sm:$0xff]  }
 0x117   :  { %16731 = vmatmul.mubr.msk.bf16.gmra.mrb[12].mxu0 %vm439_vm3, %v352_v36  ;;  %v22442_v25 = vsel %vm344_vm2, %v307_v11, %v258_v12  ;;  %v20682_v11 = vld [vmem:[#allocation7 + $0x4b0] ss:$20 sps:$4 sm:$0xff]  }
 0x118   :  { %562 = vmatprep.mubr.bf16.mxu0 %v25208_v1  ;;  %19216 = vmatmul.mubr.msk.bf16.gmra.mrb[12].mxu1 %vm439_vm3, %v22442_v25  ;;  %v20699_v12 = vld [vmem:[#allocation7 + $0x55c] ss:$20 sps:$4 sm:$0xff]  }
 0x119   :  { %v219_v17 = vpop.permute.xlu0 %218  ;;  %2397 = vmatpush1.bf16.msra.mxu0 %v20631_v6  ;;  %1931 = vmatpush1.bf16.msra.mxu1 %v20664_v37 }
 0x11a   :  { %v310_v32 = vsel %vm283_vm1, %v22252_v35, %v219_v17  ;;  %v260_v20 = vpop.permute.xlu1 %259  ;;  %2398 = vmatprep.subr.bf16.mxu0 %v20636_v7  ;;  %1932 = vmatprep.subr.bf16.mxu1 %v20669_v39  ;;  %v20697_v17 = vld [vmem:[#allocation7 + $0x558] ss:$20 sps:$4 sm:$0xff]   ;;  %v20700_v39 = vld [vmem:[#allocation7 + $0x550] ss:$20 sps:$4 sm:$0xff]  }
 0x11b   :  { %v22450_v23 = vsel %vm344_vm2, %v310_v32, %v260_v20  ;;  %v20693_v20 = vld [vmem:[#allocation7 + $0x504] ss:$20 sps:$4 sm:$0xff]  }
 0x11c   :  { %19219 = vmatprep.mubr.msk.bf16.mxu1 %vm439_vm3, %v22450_v23 }
 0x11d   :  { %v221_v24 = vpop.permute.xlu0 %220  ;;  %2399 = vmatpush1.bf16.msra.mxu0 %v20634_v19  ;;  %1933 = vmatpush1.bf16.msra.mxu1 %v20667_v43  ;;  %v20685_v19 = vld [vmem:[#allocation7 + $0x4d8] ss:$20 sps:$4 sm:$0xff]   ;;  %v20706_v43 = vld [vmem:[#allocation7 + $0x580] ss:$20 sps:$4 sm:$0xff]  }
 0x11e   :  { %v313_v27 = vsel %vm283_vm1, %v22264_v38, %v221_v24  ;;  %v262_v35 = vpop.permute.xlu1 %261  ;;  %2400 = vmatprep.subr.bf16.mxu0 %v20645_v21  ;;  %v20652_v38 = vld [vmem:[#allocation7 + $0x490] ss:$20 sps:$4 sm:$0xff]   ;;  %1934 = vmatprep.subr.bf16.mxu1 %v20675_v46 }
 0x11f   :  { %16732 = vmatmul.mubr.msk.bf16.gmra.mrb[16].mxu0 %vm439_vm3, %v22418_v45  ;;  %v22459_v30 = vsel %vm344_vm2, %v313_v27, %v262_v35  ;;  %v20694_v35 = vld [vmem:[#allocation7 + $0x528] ss:$20 sps:$4 sm:$0xff]  }
 0x120   :  { %572 = vmatprep.mubr.bf16.mxu0 %v25208_v1  ;;  %19220 = vmatmul.mubr.msk.bf16.gmra.mrb[16].mxu1 %vm439_vm3, %v22459_v30 }
 0x121   :  { %v223_v33 = vpop.permute.xlu0 %222  ;;  %2401 = vmatpush1.bf16.msra.mxu0 %v20643_v26  ;;  %1935 = vmatpush1.bf16.msra.mxu1 %v20673_v52  ;;  %v20696_v26 = vld [vmem:[#allocation7 + $0x52c] ss:$20 sps:$4 sm:$0xff]  }
 0x122   :  { %v316_v34 = vsel %vm283_vm1, %v22276_v41, %v223_v33  ;;  %v264_v36 = vpop.permute.xlu1 %263  ;;  %2402 = vmatprep.subr.bf16.mxu0 %v20654_v28 }
 0x123   :  { %v22467_v40 = vsel %vm344_vm2, %v316_v34, %v264_v36 }
 0x124   :  { %19223 = vmatprep.mubr.msk.bf16.mxu1 %vm439_vm3, %v22467_v40 }
 0x125   :  { %v225_v45 = vpop.permute.xlu0 %224  ;;  %2403 = vmatpush1.bf16.msra.mxu0 %v20652_v38 }
 0x126   :  { %v319_v41 = vsel %vm283_vm1, %v22288_v44, %v225_v45  ;;  %v266_v48 = vpop.permute.xlu1 %265  ;;  %2404 = vmatprep.subr.bf16.mxu0 %v20663_v9  ;;  %v20678_v44 = vld [vmem:[#allocation7 + $0x48c] ss:$20 sps:$4 sm:$0xff]   ;;  %v395_v45 = vlaneseq }
 0x127   :  { %16733 = vmatmul.mubr.msk.bf16.gmra.mrb[20].mxu0 %vm439_vm3, %v22426_v13  ;;  %v22476_v49 = vsel %vm344_vm2, %v319_v41, %v266_v48  ;;  %1936 = vmatprep.subr.bf16.mxu1 %v20678_v44 }
 0x128   :  { %582 = vmatprep.mubr.bf16.mxu0 %v25208_v1  ;;  %19224 = vmatmul.mubr.msk.bf16.gmra.mrb[20].mxu1 %vm439_vm3, %v22476_v49  ;;  %v22562_v46 = vshrl.u32 %v395_v45, 7 }
 0x129   :  { %v227_v55 = vpop.permute.xlu0 %226  ;;  %2405 = vmatpush1.bf16.msra.mxu0 %v20661_v42  ;;  %1937 = vmatpush1.bf16.msra.mxu1 %v20676_v61  ;;  %v20703_v42 = vld [vmem:[#allocation7 + $0x578] ss:$20 sps:$4 sm:$0xff]  }
 0x12a   :  { %v322_v57 = vsel %vm283_vm1, %v22300_v47, %v227_v55  ;;  %v268_v58 = vpop.permute.xlu1 %267  ;;  %2406 = vmatprep.subr.bf16.mxu0 %v20672_v10  ;;  %1938 = vmatprep.subr.bf16.mxu1 %v20684_v0  ;;  %v20714_v10 = vld [vmem:[#allocation7 + $0x5ac] ss:$20 sps:$4 sm:$0xff]   ;;  %25327 = vst [vmem:[#allocation18_spill] sm:$0xff] %v22562_v46  ;;  %v25207_v41 = vsub.s32 0, %v22562_v46  ;;  %v25205_v48 = vsub.s32 1, %v22562_v46 }
 0x12b   :  { %v22484_v13 = vsel %vm344_vm2, %v322_v57, %v268_v58 }
 0x12c   :  { %19227 = vmatprep.mubr.msk.bf16.mxu1 %vm439_vm3, %v22484_v13 }
 0x12d   :  { %v229_v18 = vpop.permute.xlu0 %228  ;;  %2407 = vmatpush1.bf16.msra.mxu0 %v20670_v51  ;;  %1939 = vmatpush1.bf16.msra.mxu1 %v20682_v11  ;;  %v393_v51 = vld [vmem:[#allocation5] sm:$0x7] }
 0x12e   :  { %v325_v6 = vsel %vm283_vm1, %v22312_v50, %v229_v18  ;;  %v270_v47 = vpop.permute.xlu1 %269  ;;  %2408 = vmatprep.subr.bf16.mxu0 %v20681_v54  ;;  %v20687_v50 = vld [vmem:[#allocation7 + $0x4dc] ss:$20 sps:$4 sm:$0xff]   ;;  %v22569_v52 = vrot.slane %v393_v51, %v25207_v41  ;;  %v22573_v54 = vrot.slane %v393_v51, %v25205_v48 }
 0x12f   :  { %16734 = vmatmul.mubr.msk.bf16.gmra.mrb[24].mxu0 %vm439_vm3, %v22434_v2  ;;  %v22493_v7 = vsel %vm344_vm2, %v325_v6, %v270_v47  ;;  %1940 = vmatprep.subr.bf16.mxu1 %v20687_v50 }
 0x130   :  { %592 = vmatprep.mubr.bf16.mxu0 %v25208_v1  ;;  %19228 = vmatmul.mubr.msk.bf16.gmra.mrb[24].mxu1 %vm439_vm3, %v22493_v7 }
 0x131   :  { %v231_v14 = vpop.permute.xlu0 %230  ;;  %2409 = vmatpush1.bf16.msra.mxu0 %v20679_v60  ;;  %1941 = vmatpush1.bf16.msra.mxu1 %v20685_v19 }
 0x132   :  { %v328_v15 = vsel %vm283_vm1, %v22324_v53, %v231_v14  ;;  %v272_v16 = vpop.permute.xlu1 %271  ;;  %2410 = vmatprep.subr.bf16.mxu0 %v20690_v62  ;;  %1942 = vmatprep.subr.bf16.mxu1 %v20693_v20  ;;  %v20709_v20 = vld [vmem:[#allocation7 + $0x5a0] ss:$20 sps:$4 sm:$0xff]  }
 0x133   :  { %v22501_v2 = vsel %vm344_vm2, %v328_v15, %v272_v16 }
 0x134   :  { %19231 = vmatprep.mubr.msk.bf16.mxu1 %vm439_vm3, %v22501_v2 }
 0x135   :  { %v233_v32 = vpop.permute.xlu0 %232  ;;  %2411 = vmatpush1.bf16.msra.mxu0 %v20688_v8  ;;  %1943 = vmatpush1.bf16.msra.mxu1 %v20691_v5  ;;  %v20717_v5 = vld [vmem:[#allocation7 + $0x5cc] ss:$20 sps:$4 sm:$0xff]  }
 0x136   :  { %v331_v21 = vsel %vm283_vm1, %v22336_v56, %v233_v32  ;;  %v274_v22 = vpop.permute.xlu1 %273  ;;  %2412 = vmatprep.subr.bf16.mxu0 %v20699_v12  ;;  %1944 = vmatprep.subr.bf16.mxu1 %v20696_v26 }
 0x137   :  { %16735 = vmatmul.mubr.msk.bf16.gmra.mrb[28].mxu0 %vm439_vm3, %v22442_v25  ;;  %v22510_v53 = vsel %vm344_vm2, %v331_v21, %v274_v22  ;;  %v20712_v21 = vld [vmem:[#allocation7 + $0x5a8] ss:$20 sps:$4 sm:$0xff]  }
 0x138   :  { %602 = vmatprep.mubr.bf16.mxu0 %v25208_v1  ;;  %19232 = vmatmul.mubr.msk.bf16.gmra.mrb[28].mxu1 %vm439_vm3, %v22510_v53 }
 0x139   :  { %v235_v24 = vpop.permute.xlu0 %234  ;;  %2413 = vmatpush1.bf16.msra.mxu0 %v20697_v17  ;;  %1945 = vmatpush1.bf16.msra.mxu1 %v20694_v35 }
 0x13a   :  { %v334_v56 = vsel %vm283_vm1, %v22348_v59, %v235_v24  ;;  %v276_v27 = vpop.permute.xlu1 %275  ;;  %v20720_v24 = vld [vmem:[#allocation7 + $0x5d4] ss:$20 sps:$4 sm:$0xff]  }
 0x13b   :  { %v378_v25 = vsel %vm344_vm2, %v334_v56, %v276_v27 }
 0x13c   :  { %19235 = vmatprep.mubr.msk.bf16.mxu1 %vm439_vm3, %v378_v25 }
 0x13d   :  { %v237_v28 = vpop.permute.xlu0 %236 }
 0x13e   :  { %v337_v29 = vsel %vm283_vm1, %v22360_v63, %v237_v28  ;;  %v278_v31 = vpop.permute.xlu1 %277 }
 0x13f   :  { %16736 = vmatmul.mubr.msk.bf16.gmra.mrb[32].mxu0 %vm439_vm3, %v22450_v23  ;;  %v380_v33 = vsel %vm344_vm2, %v337_v29, %v278_v31 }
 0x140   :  { %612 = vmatprep.mubr.bf16.mxu0 %v25208_v1  ;;  %19236 = vmatmul.mubr.msk.bf16.gmra.mrb[32].mxu1 %vm439_vm3, %v380_v33 }
 0x141   :  { %v239_v59 = vpop.permute.xlu0 %238 }
 0x142   :  { %v340_v38 = vsel %vm283_vm1, %v22372_v3, %v239_v59  ;;  %v280_v34 = vpop.permute.xlu1 %279  ;;  %v20702_v3 = vld [vmem:[#allocation7 + $0x554] ss:$20 sps:$4 sm:$0xff]  }
 0x143   :  { %v382_v63 = vsel %vm344_vm2, %v340_v38, %v280_v34  ;;  %1946 = vmatprep.subr.bf16.mxu1 %v20702_v3  ;;  %v20715_v34 = vld [vmem:[#allocation7 + $0x5c8] ss:$20 sps:$4 sm:$0xff]  }
 0x144   :  { %19239 = vmatprep.mubr.msk.bf16.mxu1 %vm439_vm3, %v382_v63  ;;  %1947 = vmatpush1.bf16.msra.mxu1 %v20700_v39  ;;  %v20723_v39 = vld [vmem:[#allocation7 + $0x5f4] ss:$20 sps:$4 sm:$0xff]  }
 0x145   :  { %v241_v36 = vpop.permute.xlu0 %240 }
 0x146   :  { %v343_v23 = vsel %vm283_vm1, %v22378_v4, %v241_v36  ;;  %v282_v9 = vpop.permute.xlu1 %281  ;;  %v20705_v4 = vld [vmem:[#allocation7 + $0x57c] ss:$20 sps:$4 sm:$0xff]  }
 0x147   :  { %16737 = vmatmul.mubr.msk.bf16.gmra.mrb[36].mxu0 %vm439_vm3, %v22459_v30  ;;  %v384_v37 = vsel %vm344_vm2, %v343_v23, %v282_v9  ;;  %v20708_v30 = vld [vmem:[#allocation7 + $0x584] ss:$20 sps:$4 sm:$0xff]   ;;  %1948 = vmatprep.subr.bf16.mxu1 %v20705_v4  ;;  %v20726_v4 = vld [vmem:[#allocation7 + $0x5fc] ss:$20 sps:$4 sm:$0xff]  }
 0x148   :  { %622 = vmatprep.mubr.bf16.mxu0 %v25208_v1  ;;  %19240 = vmatmul.mubr.msk.bf16.gmra.mrb[36].mxu1 %vm439_vm3, %v384_v37 }
 0x149   :  { %2414 = vmatprep.subr.bf16.mxu0 %v20708_v30  ;;  %1949 = vmatpush1.bf16.msra.mxu1 %v20703_v42 }
 0x14a   :  { %2415 = vmatpush1.bf16.msra.mxu0 %v20706_v43 }
 0x14b   :  { %2617 = vmatprep.subr.bf16.mxu0 %v20714_v10 }
 0x14f   :  { %16738 = vmatmul.mubr.msk.bf16.gmra.mrb[40].mxu0 %vm439_vm3, %v22467_v40  ;;  %v20711_v40 = vld [vmem:[#allocation7 + $0x5a4] ss:$20 sps:$4 sm:$0xff]  }
 0x150   :  { %632 = vmatprep.mubr.bf16.mxu0 %v25208_v1  ;;  %2151 = vmatprep.subr.bf16.mxu1 %v20711_v40 }
 0x157   :  { %16739 = vmatmul.mubr.msk.bf16.gmra.mrb[44].mxu0 %vm439_vm3, %v22476_v49  ;;  %v25206_v49 = vsub.s32 2, %v22562_v46 }
 0x158   :  { %642 = vmatprep.mubr.bf16.mxu0 %v25208_v1 }
 0x159   :  { %v22577_v55 = vrot.slane %v393_v51, %v25206_v49 }
 0x15f   :  { %16740 = vmatmul.mubr.msk.bf16.gmra.mrb[48].mxu0 %vm439_vm3, %v22484_v13 }
 0x160   :  { %652 = vmatprep.mubr.bf16.mxu0 %v25208_v1 }
 0x167   :  { %16741 = vmatmul.mubr.msk.bf16.gmra.mrb[52].mxu0 %vm439_vm3, %v22493_v7 }
 0x168   :  { %662 = vmatprep.mubr.bf16.mxu0 %v25208_v1 }
 0x16f   :  { %16742 = vmatmul.mubr.msk.bf16.gmra.mrb[56].mxu0 %vm439_vm3, %v22501_v2 }
 0x170   :  { %672 = vmatprep.mubr.bf16.mxu0 %v25208_v1 }
 0x177   :  { %16743 = vmatmul.mubr.msk.bf16.gmra.mrb[60].mxu0 %vm439_vm3, %v22510_v53 }
 0x178   :  { %682 = vmatprep.mubr.bf16.mxu0 %v25208_v1 }
 0x17f   :  { %16744 = vmatmul.mubr.msk.bf16.gmra.mrb[64].mxu0 %vm439_vm3, %v378_v25 }
 0x180   :  { %692 = vmatprep.mubr.bf16.mxu0 %v25208_v1 }
 0x187   :  { %16745 = vmatmul.mubr.msk.bf16.gmra.mrb[68].mxu0 %vm439_vm3, %v380_v33 }
 0x188   :  { %702 = vmatprep.mubr.bf16.mxu0 %v25208_v1 }
 0x18f   :  { %16746 = vmatmul.mubr.msk.bf16.gmra.mrb[72].mxu0 %vm439_vm3, %v382_v63  ;;  %v20718_v63 = vld [vmem:[#allocation7 + $0x5d0] ss:$20 sps:$4 sm:$0xff]  }
 0x190   :  { %712 = vmatprep.mubr.bf16.mxu0 %v25208_v1 }
 0x197   :  { %16747 = vmatmul.mubr.msk.bf16.gmra.mrb[76].mxu0 %vm439_vm3, %v384_v37 }
 0x1d2   :  { %v524_v44 = vpop.f32.mrb[0].mxu0 }
 0x1d3   :  { %v525_v57 = vadd.f32 %v524_v44, %v22569_v52  ;;  %v526_v58 = vpop.f32.mrb[1].mxu0  ;;  %v19205_v13 = vpop.f32.mrb[0].mxu1 }
 0x1d4   :  { %v527_v60 = vadd.f32 %v526_v58, %v22573_v54  ;;  %v528_v61 = vpop.f32.mrb[2].mxu0  ;;  %v766_v62 = vadd.f32 %v19205_v13, %v22577_v55  ;;  %v757_v18 = vpop.f32.mrb[1].mxu1  ;;  %v20721_v13 = vld [vmem:[#allocation7 + $0x5f0] ss:$20 sps:$4 sm:$0xff]  }
 0x1d5   :  { %v916_v0 = vmax.f32 %v525_v57, 0.0  ;;  %v529_v6 = vadd.f32 %v528_v61, %v22569_v52  ;;  %v530_v47 = vpop.f32.mrb[3].mxu0  ;;  %v758_v7 = vadd.f32 %v757_v18, %v22577_v55  ;;  %v19206_v8 = vpop.f32.mrb[2].mxu1  ;;  %v20729_v18 = vld [vmem:[#allocation7 + $0x61c] ss:$20 sps:$4 sm:$0xff]  }
 0x1d6   :  { %v917_v11 = vmax.f32 %v527_v60, 0.0  ;;  %v924_v12 = vmax.f32 %v766_v62, 0.0  ;;  %v531_v14 = vadd.f32 %v530_v47, %v22573_v54  ;;  %v769_v50 = vadd.f32 %v19206_v8, %v22577_v55  ;;  %v760_v15 = vpop.f32.mrb[3].mxu1  ;;  %v20724_v60 = vld [vmem:[#allocation7 + $0x5f8] ss:$20 sps:$4 sm:$0xff]  }
 0x1d7   :  { %v919_v16 = vmax.f32 %v529_v6, 0.0  ;;  %v918_v2 = vmax.f32 %v758_v7, 0.0  ;;  %v761_v17 = vadd.f32 %v760_v15, %v22577_v55 }
 0x1d8   :  { %v920_v19 = vmax.f32 %v531_v14, 0.0  ;;  %v927_v32 = vmax.f32 %v769_v50, 0.0 }
 0x1d9   :  { %v22587_v22 = vpack.c.bf16 %v919_v16, %v916_v0  ;;  %v921_v53 = vmax.f32 %v761_v17, 0.0  ;;  %v20732_v0 = vld [vmem:[#allocation7 + $0x624] ss:$20 sps:$4 sm:$0xff]  }
 0x1da   :  { %v22589_v26 = vpack.c.bf16 %v920_v19, %v917_v11  ;;  %v22591_v56 = vpack.c.bf16 %v927_v32, %v924_v12  ;;  %v534_v27 = vpop.f32.mrb[4].mxu0  ;;  %v20727_v17 = vld [vmem:[#allocation7 + $0x618] ss:$20 sps:$4 sm:$0xff]   ;;  %v20730_v19 = vld [vmem:[#allocation7 + $0x620] ss:$20 sps:$4 sm:$0xff]  }
 0x1db   :  { %v22593_v25 = vpack.c.bf16 %v921_v53, %v918_v2  ;;  %v535_v35 = vadd.f32 %v534_v27, %v22569_v52  ;;  %v536_v28 = vpop.f32.mrb[5].mxu0  ;;  %v19209_v29 = vpop.f32.mrb[4].mxu1 }
 0x1dc   :  { %v537_v31 = vadd.f32 %v536_v28, %v22573_v54  ;;  %v538_v33 = vpop.f32.mrb[6].mxu0  ;;  %1950 = vmatprep.mubr.bf16.mxu1 %v22589_v26  ;;  %2416 = vmatprep.mubr.bf16.mxu0 %v22589_v26  ;;  %v782_v59 = vadd.f32 %v19209_v29, %v22577_v55  ;;  %v773_v38 = vpop.f32.mrb[5].mxu1 }
 0x1dd   :  { %v922_v36 = vmax.f32 %v535_v35, 0.0  ;;  %v539_v23 = vadd.f32 %v538_v33, %v22569_v52  ;;  %v540_v9 = vpop.f32.mrb[7].mxu0  ;;  %1951 = vmatmul.mubr.bf16.vlgmr.msra.gmra.mrb[40].mxu1 %v22587_v22  ;;  %2417 = vmatmul.mubr.bf16.vlgmr.msra.gmra.mrb[80].mxu0 %v22587_v22  ;;  %v774_v37 = vadd.f32 %v773_v38, %v22577_v55  ;;  %v19210_v3 = vpop.f32.mrb[6].mxu1 }
 0x1de   :  { %v923_v30 = vmax.f32 %v537_v31, 0.0  ;;  %v541_v42 = vadd.f32 %v540_v9, %v22573_v54  ;;  %2152 = vmatpush1.bf16.msra.mxu1 %v20709_v20  ;;  %2618 = vmatpush1.bf16.msra.mxu0 %v20712_v21  ;;  %v936_v43 = vmax.f32 %v782_v59, 0.0  ;;  %v785_v40 = vadd.f32 %v19210_v3, %v22577_v55  ;;  %v776_v10 = vpop.f32.mrb[7].mxu1 }
 0x1df   :  { %v925_v45 = vmax.f32 %v539_v23, 0.0  ;;  %v930_v51 = vmax.f32 %v774_v37, 0.0  ;;  %v777_v44 = vadd.f32 %v776_v10, %v22577_v55  ;;  %2153 = vmatprep.subr.bf16.mxu1 %v20717_v5  ;;  %2619 = vmatprep.subr.bf16.mxu0 %v20720_v24 }
 0x1e0   :  { %v926_v57 = vmax.f32 %v541_v42, 0.0  ;;  %v939_v58 = vmax.f32 %v785_v40, 0.0 }
 0x1e1   :  { %v22607_v61 = vpack.c.bf16 %v925_v45, %v922_v36  ;;  %v933_v62 = vmax.f32 %v777_v44, 0.0 }
 0x1e2   :  { %v22609_v6 = vpack.c.bf16 %v926_v57, %v923_v30  ;;  %v544_v47 = vpop.f32.mrb[8].mxu0  ;;  %v22611_v7 = vpack.c.bf16 %v939_v58, %v936_v43  ;;  %2154 = vmatpush1.bf16.msra.mxu1 %v20715_v34  ;;  %2620 = vmatpush1.bf16.msra.mxu0 %v20718_v63 }
 0x1e3   :  { %25328 = vst [vmem:[#allocation19_spill] sm:$0xff] %v22607_v61  ;;  %v545_v8 = vadd.f32 %v544_v47, %v22569_v52  ;;  %v546_v11 = vpop.f32.mrb[9].mxu0  ;;  %v22614_v12 = vpack.c.bf16 %v933_v62, %v930_v51  ;;  %v19213_v14 = vpop.f32.mrb[8].mxu1  ;;  %2155 = vmatprep.subr.bf16.mxu1 %v20723_v39  ;;  %2621 = vmatprep.subr.bf16.mxu0 %v20726_v4 }
 0x1e4   :  { %25329 = vst [vmem:[#allocation20_spill] sm:$0xff] %v22609_v6  ;;  %25330 = vst [vmem:[#allocation21_spill] sm:$0xff] %v22611_v7  ;;  %v547_v50 = vadd.f32 %v546_v11, %v22573_v54  ;;  %v548_v15 = vpop.f32.mrb[10].mxu0  ;;  %1960 = vmatprep.mubr.bf16.mxu1 %v22609_v6  ;;  %2426 = vmatprep.mubr.bf16.mxu0 %v22609_v6  ;;  %v798_v16 = vadd.f32 %v19213_v14, %v22577_v55  ;;  %v789_v2 = vpop.f32.mrb[9].mxu1 }
 0x1e5   :  { %25331 = vst [vmem:[#allocation22_spill] sm:$0xff] %v22614_v12  ;;  %v928_v32 = vmax.f32 %v545_v8, 0.0  ;;  %v549_v20 = vadd.f32 %v548_v15, %v22569_v52  ;;  %v550_v21 = vpop.f32.mrb[11].mxu0  ;;  %1961 = vmatmul.mubr.bf16.gmra.mrb[44].mxu1 %v22607_v61  ;;  %2427 = vmatmul.mubr.bf16.gmra.mrb[84].mxu0 %v22607_v61  ;;  %v790_v53 = vadd.f32 %v789_v2, %v22577_v55  ;;  %v19214_v5 = vpop.f32.mrb[10].mxu1 }
 0x1e6   :  { %v929_v24 = vmax.f32 %v547_v50, 0.0  ;;  %v551_v27 = vadd.f32 %v550_v21, %v22573_v54  ;;  %v948_v35 = vmax.f32 %v798_v16, 0.0  ;;  %v801_v28 = vadd.f32 %v19214_v5, %v22577_v55  ;;  %v792_v29 = vpop.f32.mrb[11].mxu1  ;;  %2156 = vmatpush1.bf16.msra.mxu1 %v20721_v13  ;;  %2622 = vmatpush1.bf16.msra.mxu0 %v20724_v60 }
 0x1e7   :  { %v931_v31 = vmax.f32 %v549_v20, 0.0  ;;  %v942_v33 = vmax.f32 %v790_v53, 0.0  ;;  %v793_v59 = vadd.f32 %v792_v29, %v22577_v55  ;;  %2157 = vmatprep.subr.bf16.mxu1 %v20729_v18  ;;  %2623 = vmatprep.subr.bf16.mxu0 %v20732_v0 }
 0x1e8   :  { %v932_v38 = vmax.f32 %v551_v27, 0.0  ;;  %v951_v34 = vmax.f32 %v801_v28, 0.0 }
 0x1e9   :  { %v22627_v63 = vpack.c.bf16 %v931_v31, %v928_v32  ;;  %v945_v36 = vmax.f32 %v793_v59, 0.0 }
 0x1ea   :  { %v22629_v23 = vpack.c.bf16 %v932_v38, %v929_v24  ;;  %v554_v9 = vpop.f32.mrb[12].mxu0  ;;  %v22631_v37 = vpack.c.bf16 %v951_v34, %v948_v35  ;;  %2158 = vmatpush1.bf16.msra.mxu1 %v20727_v17  ;;  %2624 = vmatpush1.bf16.msra.mxu0 %v20730_v19 }
 0x1eb   :  { %v555_v3 = vadd.f32 %v554_v9, %v22569_v52  ;;  %v556_v39 = vpop.f32.mrb[13].mxu0  ;;  %v22634_v4 = vpack.c.bf16 %v945_v36, %v942_v33  ;;  %v19217_v30 = vpop.f32.mrb[12].mxu1  ;;  %2850 = vmatprep.subr.bf16.mxu1 %v25208_v1 }
 0x1ec   :  { %25332 = vst [vmem:[#allocation23_spill] sm:$0xff] %v22631_v37  ;;  %v557_v42 = vadd.f32 %v556_v39, %v22573_v54  ;;  %v558_v43 = vpop.f32.mrb[14].mxu0  ;;  %1970 = vmatprep.mubr.bf16.mxu1 %v22629_v23  ;;  %2436 = vmatprep.mubr.bf16.mxu0 %v22629_v23  ;;  %v814_v40 = vadd.f32 %v19217_v30, %v22577_v55  ;;  %v805_v10 = vpop.f32.mrb[13].mxu1 }
 0x1ed   :  { %25333 = vst [vmem:[#allocation24_spill] sm:$0xff] %v22634_v4  ;;  %v934_v45 = vmax.f32 %v555_v3, 0.0  ;;  %v559_v51 = vadd.f32 %v558_v43, %v22569_v52  ;;  %v560_v44 = vpop.f32.mrb[15].mxu0  ;;  %1971 = vmatmul.mubr.bf16.gmra.mrb[48].mxu1 %v22627_v63  ;;  %2437 = vmatmul.mubr.bf16.gmra.mrb[88].mxu0 %v22627_v63  ;;  %v806_v57 = vadd.f32 %v805_v10, %v22577_v55  ;;  %v19218_v58 = vpop.f32.mrb[14].mxu1 }
 0x1ee   :  { %v935_v13 = vmax.f32 %v557_v42, 0.0  ;;  %v561_v60 = vadd.f32 %v560_v44, %v22573_v54  ;;  %v960_v62 = vmax.f32 %v814_v40, 0.0  ;;  %v817_v18 = vadd.f32 %v19218_v58, %v22577_v55  ;;  %v808_v0 = vpop.f32.mrb[15].mxu1 }
 0x1ef   :  { %v937_v47 = vmax.f32 %v559_v51, 0.0  ;;  %v954_v8 = vmax.f32 %v806_v57, 0.0  ;;  %v809_v11 = vadd.f32 %v808_v0, %v22577_v55 }
 0x1f0   :  { %v938_v14 = vmax.f32 %v561_v60, 0.0  ;;  %v963_v50 = vmax.f32 %v817_v18, 0.0 }
 0x1f1   :  { %v22648_v15 = vpack.c.bf16 %v937_v47, %v934_v45  ;;  %v957_v16 = vmax.f32 %v809_v11, 0.0 }
 0x1f2   :  { %v22650_v2 = vpack.c.bf16 %v938_v14, %v935_v13  ;;  %v564_v17 = vpop.f32.mrb[16].mxu0  ;;  %v22652_v19 = vpack.c.bf16 %v963_v50, %v960_v62 }
 0x1f3   :  { %25334 = vst [vmem:[#allocation25_spill] sm:$0xff] %v22648_v15  ;;  %v565_v32 = vadd.f32 %v564_v17, %v22569_v52  ;;  %v566_v20 = vpop.f32.mrb[17].mxu0  ;;  %v22655_v21 = vpack.c.bf16 %v957_v16, %v954_v8  ;;  %v19221_v53 = vpop.f32.mrb[16].mxu1 }
 0x1f4   :  { %25335 = vst [vmem:[#allocation26_spill] sm:$0xff] %v22650_v2  ;;  %25336 = vst [vmem:[#allocation27_spill] sm:$0xff] %v22652_v19  ;;  %v567_v5 = vadd.f32 %v566_v20, %v22573_v54  ;;  %v568_v24 = vpop.f32.mrb[18].mxu0  ;;  %1980 = vmatprep.mubr.bf16.mxu1 %v22650_v2  ;;  %2446 = vmatprep.mubr.bf16.mxu0 %v22650_v2  ;;  %v830_v27 = vadd.f32 %v19221_v53, %v22577_v55  ;;  %v821_v35 = vpop.f32.mrb[17].mxu1 }
 0x1f5   :  { %25337 = vst [vmem:[#allocation28_spill] sm:$0xff] %v22655_v21  ;;  %v569_v28 = vadd.f32 %v568_v24, %v22569_v52  ;;  %v570_v29 = vpop.f32.mrb[19].mxu0  ;;  %1981 = vmatmul.mubr.bf16.gmra.mrb[52].mxu1 %v22648_v15  ;;  %2447 = vmatmul.mubr.bf16.gmra.mrb[92].mxu0 %v22648_v15  ;;  %v822_v31 = vadd.f32 %v821_v35, %v22577_v55  ;;  %v19222_v33 = vpop.f32.mrb[18].mxu1  ;;  %v940_v59 = vmax.f32 %v565_v32, 0.0 }
 0x1f6   :  { %v571_v38 = vadd.f32 %v570_v29, %v22573_v54  ;;  %v972_v34 = vmax.f32 %v830_v27, 0.0  ;;  %v833_v36 = vadd.f32 %v19222_v33, %v22577_v55  ;;  %v824_v9 = vpop.f32.mrb[19].mxu1  ;;  %v941_v3 = vmax.f32 %v567_v5, 0.0  ;;  %v20734_v29 = vld [vmem:[#allocation7 + $0x5b0] ss:$20 sps:$4 sm:$0xff]  }
 0x1f7   :  { %v943_v39 = vmax.f32 %v569_v28, 0.0  ;;  %v966_v30 = vmax.f32 %v822_v31, 0.0  ;;  %v825_v42 = vadd.f32 %v824_v9, %v22577_v55  ;;  %19243 = vmatprep.subr.bf16.mxu0 %v20734_v29 }
 0x1f8   :  { %v944_v43 = vmax.f32 %v571_v38, 0.0  ;;  %v975_v40 = vmax.f32 %v833_v36, 0.0 }
 0x1f9   :  { %v22668_v10 = vpack.c.bf16 %v943_v39, %v940_v59  ;;  %v969_v45 = vmax.f32 %v825_v42, 0.0 }
 0x1fa   :  { %v22670_v51 = vpack.c.bf16 %v944_v43, %v941_v3  ;;  %v574_v44 = vpop.f32.mrb[20].mxu0  ;;  %v22672_v57 = vpack.c.bf16 %v975_v40, %v972_v34 }
 0x1fb   :  { %25338 = vst [vmem:[#allocation29_spill] sm:$0xff] %v22668_v10  ;;  %v575_v58 = vadd.f32 %v574_v44, %v22569_v52  ;;  %v576_v13 = vpop.f32.mrb[21].mxu0  ;;  %v22675_v60 = vpack.c.bf16 %v969_v45, %v966_v30  ;;  %v19225_v62 = vpop.f32.mrb[20].mxu1 }
 0x1fc   :  { %25339 = vst [vmem:[#allocation30_spill] sm:$0xff] %v22670_v51  ;;  %25340 = vst [vmem:[#allocation31_spill] sm:$0xff] %v22672_v57  ;;  %v577_v18 = vadd.f32 %v576_v13, %v22573_v54  ;;  %v578_v0 = vpop.f32.mrb[22].mxu0  ;;  %1990 = vmatprep.mubr.bf16.mxu1 %v22670_v51  ;;  %2456 = vmatprep.mubr.bf16.mxu0 %v22670_v51  ;;  %v846_v47 = vadd.f32 %v19225_v62, %v22577_v55  ;;  %v837_v8 = vpop.f32.mrb[21].mxu1 }
 0x1fd   :  { %v946_v11 = vmax.f32 %v575_v58, 0.0  ;;  %v579_v14 = vadd.f32 %v578_v0, %v22569_v52  ;;  %v580_v50 = vpop.f32.mrb[23].mxu0  ;;  %1991 = vmatmul.mubr.bf16.gmra.mrb[56].mxu1 %v22668_v10  ;;  %2457 = vmatmul.mubr.bf16.gmra.mrb[96].mxu0 %v22668_v10  ;;  %v838_v16 = vadd.f32 %v837_v8, %v22577_v55  ;;  %v19226_v17 = vpop.f32.mrb[22].mxu1 }
 0x1fe   :  { %v947_v32 = vmax.f32 %v577_v18, 0.0  ;;  %v581_v20 = vadd.f32 %v580_v50, %v22573_v54  ;;  %v984_v53 = vmax.f32 %v846_v47, 0.0  ;;  %v849_v5 = vadd.f32 %v19226_v17, %v22577_v55  ;;  %v840_v24 = vpop.f32.mrb[23].mxu1 }
 0x1ff   :  { %v949_v27 = vmax.f32 %v579_v14, 0.0  ;;  %v978_v35 = vmax.f32 %v838_v16, 0.0  ;;  %v841_v28 = vadd.f32 %v840_v24, %v22577_v55 }
 0x200   :  { %v950_v31 = vmax.f32 %v581_v20, 0.0  ;;  %v987_v33 = vmax.f32 %v849_v5, 0.0 }
 0x201   :  { %v22688_v59 = vpack.c.bf16 %v949_v27, %v946_v11  ;;  %v981_v38 = vmax.f32 %v841_v28, 0.0 }
 0x202   :  { %v22690_v34 = vpack.c.bf16 %v950_v31, %v947_v32  ;;  %v584_v36 = vpop.f32.mrb[24].mxu0  ;;  %v22692_v9 = vpack.c.bf16 %v987_v33, %v984_v53 }
 0x203   :  { %25341 = vst [vmem:[#allocation32_spill] sm:$0xff] %v22688_v59  ;;  %v585_v3 = vadd.f32 %v584_v36, %v22569_v52  ;;  %v586_v39 = vpop.f32.mrb[25].mxu0  ;;  %v22695_v30 = vpack.c.bf16 %v981_v38, %v978_v35  ;;  %v19229_v42 = vpop.f32.mrb[24].mxu1 }
 0x204   :  { %25342 = vst [vmem:[#allocation33_spill] sm:$0xff] %v22690_v34  ;;  %v587_v43 = vadd.f32 %v586_v39, %v22573_v54  ;;  %v588_v40 = vpop.f32.mrb[26].mxu0  ;;  %2000 = vmatprep.mubr.bf16.mxu1 %v22690_v34  ;;  %2466 = vmatprep.mubr.bf16.mxu0 %v22690_v34  ;;  %v862_v45 = vadd.f32 %v19229_v42, %v22577_v55  ;;  %v853_v44 = vpop.f32.mrb[25].mxu1 }
 0x205   :  { %v952_v58 = vmax.f32 %v585_v3, 0.0  ;;  %v589_v13 = vadd.f32 %v588_v40, %v22569_v52  ;;  %v590_v62 = vpop.f32.mrb[27].mxu0  ;;  %2001 = vmatmul.mubr.bf16.gmra.mrb[60].mxu1 %v22688_v59  ;;  %2467 = vmatmul.mubr.bf16.gmra.mrb[100].mxu0 %v22688_v59  ;;  %v854_v18 = vadd.f32 %v853_v44, %v22577_v55  ;;  %v19230_v0 = vpop.f32.mrb[26].mxu1 }
 0x206   :  { %v953_v47 = vmax.f32 %v587_v43, 0.0  ;;  %v591_v8 = vadd.f32 %v590_v62, %v22573_v54  ;;  %v996_v11 = vmax.f32 %v862_v45, 0.0  ;;  %v865_v14 = vadd.f32 %v19230_v0, %v22577_v55  ;;  %v856_v50 = vpop.f32.mrb[27].mxu1 }
 0x207   :  { %v955_v16 = vmax.f32 %v589_v13, 0.0  ;;  %v990_v17 = vmax.f32 %v854_v18, 0.0  ;;  %v857_v32 = vadd.f32 %v856_v50, %v22577_v55 }
 0x208   :  { %v956_v20 = vmax.f32 %v591_v8, 0.0  ;;  %v999_v53 = vmax.f32 %v865_v14, 0.0 }
 0x209   :  { %v22708_v5 = vpack.c.bf16 %v955_v16, %v952_v58  ;;  %v993_v24 = vmax.f32 %v857_v32, 0.0 }
 0x20a   :  { %v22710_v27 = vpack.c.bf16 %v956_v20, %v953_v47  ;;  %v594_v35 = vpop.f32.mrb[28].mxu0  ;;  %v22712_v28 = vpack.c.bf16 %v999_v53, %v996_v11 }
 0x20b   :  { %25343 = vst [vmem:[#allocation34_spill] sm:$0xff] %v22708_v5  ;;  %v595_v29 = vadd.f32 %v594_v35, %v22569_v52  ;;  %v596_v31 = vpop.f32.mrb[29].mxu0  ;;  %v22715_v33 = vpack.c.bf16 %v993_v24, %v990_v17  ;;  %v19233_v38 = vpop.f32.mrb[28].mxu1 }
 0x20c   :  { %25344 = vst [vmem:[#allocation35_spill] sm:$0xff] %v22710_v27  ;;  %v597_v36 = vadd.f32 %v596_v31, %v22573_v54  ;;  %v598_v3 = vpop.f32.mrb[30].mxu0  ;;  %2010 = vmatprep.mubr.bf16.mxu1 %v22710_v27  ;;  %2476 = vmatprep.mubr.bf16.mxu0 %v22710_v27  ;;  %v878_v39 = vadd.f32 %v19233_v38, %v22577_v55  ;;  %v869_v42 = vpop.f32.mrb[29].mxu1 }
 0x20d   :  { %25345 = vst [vmem:[#allocation36_spill] sm:$0xff] %v22715_v33  ;;  %v958_v43 = vmax.f32 %v595_v29, 0.0  ;;  %v599_v40 = vadd.f32 %v598_v3, %v22569_v52  ;;  %v600_v45 = vpop.f32.mrb[31].mxu0  ;;  %2011 = vmatmul.mubr.bf16.gmra.mrb[64].mxu1 %v22708_v5  ;;  %2477 = vmatmul.mubr.bf16.gmra.mrb[104].mxu0 %v22708_v5  ;;  %v870_v44 = vadd.f32 %v869_v42, %v22577_v55  ;;  %v19234_v58 = vpop.f32.mrb[30].mxu1 }
 0x20e   :  { %v959_v13 = vmax.f32 %v597_v36, 0.0  ;;  %v601_v62 = vadd.f32 %v600_v45, %v22573_v54  ;;  %v1008_v18 = vmax.f32 %v878_v39, 0.0  ;;  %v881_v0 = vadd.f32 %v19234_v58, %v22577_v55  ;;  %v872_v47 = vpop.f32.mrb[31].mxu1 }
 0x20f   :  { %v961_v8 = vmax.f32 %v599_v40, 0.0  ;;  %v1002_v11 = vmax.f32 %v870_v44, 0.0  ;;  %v873_v14 = vadd.f32 %v872_v47, %v22577_v55 }
 0x210   :  { %v962_v50 = vmax.f32 %v601_v62, 0.0  ;;  %v1011_v16 = vmax.f32 %v881_v0, 0.0 }
 0x211   :  { %v22728_v17 = vpack.c.bf16 %v961_v8, %v958_v43  ;;  %v1005_v32 = vmax.f32 %v873_v14, 0.0 }
 0x212   :  { %v22730_v20 = vpack.c.bf16 %v962_v50, %v959_v13  ;;  %v604_v53 = vpop.f32.mrb[32].mxu0  ;;  %v22732_v24 = vpack.c.bf16 %v1011_v16, %v1008_v18 }
 0x213   :  { %v605_v35 = vadd.f32 %v604_v53, %v22569_v52  ;;  %v606_v29 = vpop.f32.mrb[33].mxu0  ;;  %v22735_v31 = vpack.c.bf16 %v1005_v32, %v1002_v11  ;;  %v19237_v38 = vpop.f32.mrb[32].mxu1 }
 0x214   :  { %25346 = vst [vmem:[#allocation37_spill] sm:$0xff] %v22730_v20  ;;  %v607_v36 = vadd.f32 %v606_v29, %v22573_v54  ;;  %v608_v3 = vpop.f32.mrb[34].mxu0  ;;  %2020 = vmatprep.mubr.bf16.mxu1 %v22730_v20  ;;  %2486 = vmatprep.mubr.bf16.mxu0 %v22730_v20  ;;  %v894_v39 = vadd.f32 %v19237_v38, %v22577_v55  ;;  %v885_v42 = vpop.f32.mrb[33].mxu1 }
 0x215   :  { %v964_v43 = vmax.f32 %v605_v35, 0.0  ;;  %v609_v40 = vadd.f32 %v608_v3, %v22569_v52  ;;  %v610_v45 = vpop.f32.mrb[35].mxu0  ;;  %2021 = vmatmul.mubr.bf16.gmra.mrb[68].mxu1 %v22728_v17  ;;  %2487 = vmatmul.mubr.bf16.gmra.mrb[108].mxu0 %v22728_v17  ;;  %v886_v44 = vadd.f32 %v885_v42, %v22577_v55  ;;  %v19238_v58 = vpop.f32.mrb[34].mxu1 }
 0x216   :  { %v965_v13 = vmax.f32 %v607_v36, 0.0  ;;  %v611_v62 = vadd.f32 %v610_v45, %v22573_v54  ;;  %v1020_v18 = vmax.f32 %v894_v39, 0.0  ;;  %v897_v0 = vadd.f32 %v19238_v58, %v22577_v55  ;;  %v888_v47 = vpop.f32.mrb[35].mxu1 }
 0x217   :  { %v967_v8 = vmax.f32 %v609_v40, 0.0  ;;  %v1014_v11 = vmax.f32 %v886_v44, 0.0  ;;  %v889_v14 = vadd.f32 %v888_v47, %v22577_v55 }
 0x218   :  { %v968_v50 = vmax.f32 %v611_v62, 0.0  ;;  %v1023_v16 = vmax.f32 %v897_v0, 0.0 }
 0x219   :  { %v22748_v32 = vpack.c.bf16 %v967_v8, %v964_v43  ;;  %v1017_v53 = vmax.f32 %v889_v14, 0.0 }
 0x21a   :  { %v22750_v35 = vpack.c.bf16 %v968_v50, %v965_v13  ;;  %v614_v29 = vpop.f32.mrb[36].mxu0  ;;  %v22752_v38 = vpack.c.bf16 %v1023_v16, %v1020_v18 }
 0x21b   :  { %25347 = vst [vmem:[#allocation38_spill] sm:$0xff] %v22748_v32  ;;  %v615_v36 = vadd.f32 %v614_v29, %v22569_v52  ;;  %v616_v3 = vpop.f32.mrb[37].mxu0  ;;  %v22755_v39 = vpack.c.bf16 %v1017_v53, %v1014_v11  ;;  %v19241_v42 = vpop.f32.mrb[36].mxu1 }
 0x21c   :  { %25348 = vst [vmem:[#allocation39_spill] sm:$0xff] %v22750_v35  ;;  %25349 = vst [vmem:[#allocation40_spill] sm:$0xff] %v22752_v38  ;;  %v617_v40 = vadd.f32 %v616_v3, %v22573_v54  ;;  %v618_v45 = vpop.f32.mrb[38].mxu0  ;;  %2030 = vmatprep.mubr.bf16.mxu1 %v22750_v35  ;;  %2496 = vmatprep.mubr.bf16.mxu0 %v22750_v35  ;;  %v910_v43 = vadd.f32 %v19241_v42, %v22577_v55  ;;  %v901_v44 = vpop.f32.mrb[37].mxu1 }
 0x21d   :  { %25350 = vst [vmem:[#allocation41_spill] sm:$0xff] %v22755_v39  ;;  %v970_v58 = vmax.f32 %v615_v36, 0.0  ;;  %v619_v13 = vadd.f32 %v618_v45, %v22569_v52  ;;  %v620_v62 = vpop.f32.mrb[39].mxu0  ;;  %2031 = vmatmul.mubr.bf16.gmra.mrb[72].mxu1 %v22748_v32  ;;  %2497 = vmatmul.mubr.bf16.gmra.mrb[112].mxu0 %v22748_v32  ;;  %v902_v18 = vadd.f32 %v901_v44, %v22577_v55  ;;  %v19242_v0 = vpop.f32.mrb[38].mxu1 }
 0x21e   :  { %v971_v47 = vmax.f32 %v617_v40, 0.0  ;;  %v621_v8 = vadd.f32 %v620_v62, %v22573_v54  ;;  %v1032_v11 = vmax.f32 %v910_v43, 0.0  ;;  %v913_v14 = vadd.f32 %v19242_v0, %v22577_v55  ;;  %v904_v50 = vpop.f32.mrb[39].mxu1 }
 0x21f   :  { %v973_v16 = vmax.f32 %v619_v13, 0.0  ;;  %v1026_v53 = vmax.f32 %v902_v18, 0.0  ;;  %v905_v29 = vadd.f32 %v904_v50, %v22577_v55 }
 0x220   :  { %v974_v36 = vmax.f32 %v621_v8, 0.0  ;;  %v1035_v3 = vmax.f32 %v913_v14, 0.0 }
 0x221   :  { %v22768_v42 = vpack.c.bf16 %v973_v16, %v970_v58  ;;  %v1029_v45 = vmax.f32 %v905_v29, 0.0 }
 0x222   :  { %v22770_v48 = vpack.c.bf16 %v974_v36, %v971_v47  ;;  %v624_v44 = vpop.f32.mrb[40].mxu0  ;;  %v22772_v49 = vpack.c.bf16 %v1035_v3, %v1032_v11 }
 0x223   :  { %25351 = vst [vmem:[#allocation42_spill] sm:$0xff] %v22768_v42  ;;  %v625_v40 = vadd.f32 %v624_v44, %v22569_v52  ;;  %v626_v43 = vpop.f32.mrb[41].mxu0  ;;  %v22775_v62 = vpack.c.bf16 %v1029_v45, %v1026_v53 }
 0x224   :  { %25352 = vst [vmem:[#allocation43_spill] sm:$0xff] %v22770_v48  ;;  %25353 = vst [vmem:[#allocation44_spill] sm:$0xff] %v22772_v49  ;;  %v627_v13 = vadd.f32 %v626_v43, %v22573_v54  ;;  %v628_v18 = vpop.f32.mrb[42].mxu0  ;;  %2040 = vmatprep.mubr.bf16.mxu1 %v22770_v48  ;;  %2506 = vmatprep.mubr.bf16.mxu0 %v22770_v48 }
 0x225   :  { %25354 = vst [vmem:[#allocation45_spill] sm:$0xff] %v22775_v62  ;;  %v629_v55 = vadd.f32 %v628_v18, %v22569_v52  ;;  %v630_v58 = vpop.f32.mrb[43].mxu0  ;;  %2041 = vmatmul.mubr.bf16.gmra.mrb[76].mxu1 %v22768_v42  ;;  %2507 = vmatmul.mubr.bf16.gmra.mrb[116].mxu0 %v22768_v42  ;;  %v976_v47 = vmax.f32 %v625_v40, 0.0 }
 0x226   :  { %v631_v0 = vadd.f32 %v630_v58, %v22573_v54  ;;  %v977_v11 = vmax.f32 %v627_v13, 0.0 }
 0x227   :  { %v979_v8 = vmax.f32 %v629_v55, 0.0 }
 0x228   :  { %v980_v14 = vmax.f32 %v631_v0, 0.0 }
 0x229   :  { %v22784_v50 = vpack.c.bf16 %v979_v8, %v976_v47 }
 0x22a   :  { %v22786_v16 = vpack.c.bf16 %v980_v14, %v977_v11  ;;  %v634_v53 = vpop.f32.mrb[44].mxu0 }
 0x22b   :  { %25355 = vst [vmem:[#allocation46_spill] sm:$0xff] %v22784_v50  ;;  %v635_v29 = vadd.f32 %v634_v53, %v22569_v52  ;;  %v636_v36 = vpop.f32.mrb[45].mxu0 }
 0x22c   :  { %25356 = vst [vmem:[#allocation47_spill] sm:$0xff] %v22786_v16  ;;  %v637_v3 = vadd.f32 %v636_v36, %v22573_v54  ;;  %v638_v45 = vpop.f32.mrb[46].mxu0  ;;  %2050 = vmatprep.mubr.bf16.mxu1 %v22786_v16  ;;  %2516 = vmatprep.mubr.bf16.mxu0 %v22786_v16 }
 0x22d   :  { %v639_v44 = vadd.f32 %v638_v45, %v22569_v52  ;;  %v640_v40 = vpop.f32.mrb[47].mxu0  ;;  %2051 = vmatmul.mubr.bf16.gmra.mrb[80].mxu1 %v22784_v50  ;;  %2517 = vmatmul.mubr.bf16.gmra.mrb[120].mxu0 %v22784_v50  ;;  %v982_v13 = vmax.f32 %v635_v29, 0.0 }
 0x22e   :  { %v641_v43 = vadd.f32 %v640_v40, %v22573_v54  ;;  %v983_v55 = vmax.f32 %v637_v3, 0.0 }
 0x22f   :  { %v985_v18 = vmax.f32 %v639_v44, 0.0 }
 0x230   :  { %v986_v58 = vmax.f32 %v641_v43, 0.0 }
 0x231   :  { %v22796_v0 = vpack.c.bf16 %v985_v18, %v982_v13 }
 0x232   :  { %v22798_v47 = vpack.c.bf16 %v986_v58, %v983_v55  ;;  %v644_v8 = vpop.f32.mrb[48].mxu0 }
 0x233   :  { %25357 = vst [vmem:[#allocation48_spill] sm:$0xff] %v22796_v0  ;;  %v645_v11 = vadd.f32 %v644_v8, %v22569_v52  ;;  %v646_v14 = vpop.f32.mrb[49].mxu0 }
 0x234   :  { %25358 = vst [vmem:[#allocation49_spill] sm:$0xff] %v22798_v47  ;;  %v647_v53 = vadd.f32 %v646_v14, %v22573_v54  ;;  %v648_v36 = vpop.f32.mrb[50].mxu0  ;;  %2060 = vmatprep.mubr.bf16.mxu1 %v22798_v47  ;;  %2526 = vmatprep.mubr.bf16.mxu0 %v22798_v47 }
 0x235   :  { %v649_v29 = vadd.f32 %v648_v36, %v22569_v52  ;;  %v650_v45 = vpop.f32.mrb[51].mxu0  ;;  %2061 = vmatmul.mubr.bf16.gmra.mrb[84].mxu1 %v22796_v0  ;;  %2527 = vmatmul.mubr.bf16.gmra.mrb[124].mxu0 %v22796_v0  ;;  %v988_v44 = vmax.f32 %v645_v11, 0.0 }
 0x236   :  { %v651_v3 = vadd.f32 %v650_v45, %v22573_v54  ;;  %v989_v43 = vmax.f32 %v647_v53, 0.0 }
 0x237   :  { %v991_v40 = vmax.f32 %v649_v29, 0.0 }
 0x238   :  { %v992_v13 = vmax.f32 %v651_v3, 0.0 }
 0x239   :  { %v22808_v18 = vpack.c.bf16 %v991_v40, %v988_v44 }
 0x23a   :  { %v22810_v55 = vpack.c.bf16 %v992_v13, %v989_v43  ;;  %v654_v58 = vpop.f32.mrb[52].mxu0 }
 0x23b   :  { %25359 = vst [vmem:[#allocation50_spill] sm:$0xff] %v22808_v18  ;;  %v655_v8 = vadd.f32 %v654_v58, %v22569_v52  ;;  %v656_v14 = vpop.f32.mrb[53].mxu0 }
 0x23c   :  { %25360 = vst [vmem:[#allocation51_spill] sm:$0xff] %v22810_v55  ;;  %v657_v36 = vadd.f32 %v656_v14, %v22573_v54  ;;  %v658_v41 = vpop.f32.mrb[54].mxu0  ;;  %2070 = vmatprep.mubr.bf16.mxu1 %v22810_v55  ;;  %2536 = vmatprep.mubr.bf16.mxu0 %v22810_v55 }
 0x23d   :  { %v659_v11 = vadd.f32 %v658_v41, %v22569_v52  ;;  %v660_v29 = vpop.f32.mrb[55].mxu0  ;;  %2071 = vmatmul.mubr.bf16.gmra.mrb[88].mxu1 %v22808_v18  ;;  %2537 = vmatmul.mubr.bf16.gmra.mrb[128].mxu0 %v22808_v18  ;;  %v994_v45 = vmax.f32 %v655_v8, 0.0 }
 0x23e   :  { %v661_v53 = vadd.f32 %v660_v29, %v22573_v54  ;;  %v995_v44 = vmax.f32 %v657_v36, 0.0 }
 0x23f   :  { %v997_v3 = vmax.f32 %v659_v11, 0.0 }
 0x240   :  { %v998_v40 = vmax.f32 %v661_v53, 0.0 }
 0x241   :  { %v22820_v43 = vpack.c.bf16 %v997_v3, %v994_v45 }
 0x242   :  { %v22822_v13 = vpack.c.bf16 %v998_v40, %v995_v44  ;;  %v664_v58 = vpop.f32.mrb[56].mxu0 }
 0x243   :  { %25361 = vst [vmem:[#allocation52_spill] sm:$0xff] %v22820_v43  ;;  %v665_v14 = vadd.f32 %v664_v58, %v22569_v52  ;;  %v666_v1 = vpop.f32.mrb[57].mxu0 }
 0x244   :  { %25362 = vst [vmem:[#allocation53_spill] sm:$0xff] %v22822_v13  ;;  %v667_v41 = vadd.f32 %v666_v1, %v22573_v54  ;;  %v668_v46 = vpop.f32.mrb[58].mxu0  ;;  %2080 = vmatprep.mubr.bf16.mxu1 %v22822_v13  ;;  %2546 = vmatprep.mubr.bf16.mxu0 %v22822_v13 }
 0x245   :  { %v669_v8 = vadd.f32 %v668_v46, %v22569_v52  ;;  %v670_v11 = vpop.f32.mrb[59].mxu0  ;;  %2081 = vmatmul.mubr.bf16.gmra.mrb[92].mxu1 %v22820_v43  ;;  %2547 = vmatmul.mubr.bf16.gmra.mrb[132].mxu0 %v22820_v43  ;;  %v1000_v29 = vmax.f32 %v665_v14, 0.0 }
 0x246   :  { %v671_v36 = vadd.f32 %v670_v11, %v22573_v54  ;;  %v1001_v45 = vmax.f32 %v667_v41, 0.0 }
 0x247   :  { %v1003_v53 = vmax.f32 %v669_v8, 0.0 }
 0x248   :  { %v1004_v3 = vmax.f32 %v671_v36, 0.0 }
 0x249   :  { %v22832_v44 = vpack.c.bf16 %v1003_v53, %v1000_v29 }
 0x24a   :  { %v22834_v1 = vpack.c.bf16 %v1004_v3, %v1001_v45  ;;  %v674_v40 = vpop.f32.mrb[60].mxu0 }
 0x24b   :  { %25363 = vst [vmem:[#allocation54_spill] sm:$0xff] %v22832_v44  ;;  %v675_v58 = vadd.f32 %v674_v40, %v22569_v52  ;;  %v676_v13 = vpop.f32.mrb[61].mxu0 }
 0x24c   :  { %25364 = vst [vmem:[#allocation55_spill] sm:$0xff] %v22834_v1  ;;  %v677_v46 = vadd.f32 %v676_v13, %v22573_v54  ;;  %v678_v18 = vpop.f32.mrb[62].mxu0  ;;  %2090 = vmatprep.mubr.bf16.mxu1 %v22834_v1  ;;  %2556 = vmatprep.mubr.bf16.mxu0 %v22834_v1 }
 0x24d   :  { %v679_v14 = vadd.f32 %v678_v18, %v22569_v52  ;;  %v680_v8 = vpop.f32.mrb[63].mxu0  ;;  %2091 = vmatmul.mubr.bf16.gmra.mrb[96].mxu1 %v22832_v44  ;;  %2557 = vmatmul.mubr.bf16.gmra.mrb[136].mxu0 %v22832_v44  ;;  %v1006_v11 = vmax.f32 %v675_v58, 0.0 }
 0x24e   :  { %v681_v41 = vadd.f32 %v680_v8, %v22573_v54  ;;  %v1007_v29 = vmax.f32 %v677_v46, 0.0 }
 0x24f   :  { %v1009_v36 = vmax.f32 %v679_v14, 0.0 }
 0x250   :  { %v1010_v53 = vmax.f32 %v681_v41, 0.0 }
 0x251   :  { %v22844_v45 = vpack.c.bf16 %v1009_v36, %v1006_v11 }
 0x252   :  { %v22846_v13 = vpack.c.bf16 %v1010_v53, %v1007_v29  ;;  %v684_v3 = vpop.f32.mrb[64].mxu0 }
 0x253   :  { %25365 = vst [vmem:[#allocation56_spill] sm:$0xff] %v22844_v45  ;;  %v685_v40 = vadd.f32 %v684_v3, %v22569_v52  ;;  %v686_v1 = vpop.f32.mrb[65].mxu0 }
 0x254   :  { %25366 = vst [vmem:[#allocation57_spill] sm:$0xff] %v22846_v13  ;;  %v687_v18 = vadd.f32 %v686_v1, %v22573_v54  ;;  %v688_v43 = vpop.f32.mrb[66].mxu0  ;;  %2100 = vmatprep.mubr.bf16.mxu1 %v22846_v13  ;;  %2566 = vmatprep.mubr.bf16.mxu0 %v22846_v13 }
 0x255   :  { %v689_v58 = vadd.f32 %v688_v43, %v22569_v52  ;;  %v690_v14 = vpop.f32.mrb[67].mxu0  ;;  %2101 = vmatmul.mubr.bf16.gmra.mrb[100].mxu1 %v22844_v45  ;;  %2567 = vmatmul.mubr.bf16.gmra.mrb[140].mxu0 %v22844_v45  ;;  %v1012_v8 = vmax.f32 %v685_v40, 0.0 }
 0x256   :  { %v691_v46 = vadd.f32 %v690_v14, %v22573_v54  ;;  %v1013_v11 = vmax.f32 %v687_v18, 0.0 }
 0x257   :  { %v1015_v41 = vmax.f32 %v689_v58, 0.0 }
 0x258   :  { %v1016_v36 = vmax.f32 %v691_v46, 0.0 }
 0x259   :  { %v22856_v29 = vpack.c.bf16 %v1015_v41, %v1012_v8 }
 0x25a   :  { %v22858_v1 = vpack.c.bf16 %v1016_v36, %v1013_v11  ;;  %v694_v53 = vpop.f32.mrb[68].mxu0 }
 0x25b   :  { %25367 = vst [vmem:[#allocation58_spill] sm:$0xff] %v22856_v29  ;;  %v695_v3 = vadd.f32 %v694_v53, %v22569_v52  ;;  %v696_v13 = vpop.f32.mrb[69].mxu0 }
 0x25c   :  { %25368 = vst [vmem:[#allocation59_spill] sm:$0xff] %v22858_v1  ;;  %v697_v43 = vadd.f32 %v696_v13, %v22573_v54  ;;  %v698_v44 = vpop.f32.mrb[70].mxu0  ;;  %2110 = vmatprep.mubr.bf16.mxu1 %v22858_v1  ;;  %2576 = vmatprep.mubr.bf16.mxu0 %v22858_v1 }
 0x25d   :  { %v699_v40 = vadd.f32 %v698_v44, %v22569_v52  ;;  %v700_v58 = vpop.f32.mrb[71].mxu0  ;;  %2111 = vmatmul.mubr.bf16.gmra.mrb[104].mxu1 %v22856_v29  ;;  %2577 = vmatmul.mubr.bf16.gmra.mrb[144].mxu0 %v22856_v29  ;;  %v1018_v14 = vmax.f32 %v695_v3, 0.0 }
 0x25e   :  { %v701_v18 = vadd.f32 %v700_v58, %v22573_v54  ;;  %v1019_v8 = vmax.f32 %v697_v43, 0.0 }
 0x25f   :  { %v1021_v46 = vmax.f32 %v699_v40, 0.0 }
 0x260   :  { %v1022_v41 = vmax.f32 %v701_v18, 0.0 }
 0x261   :  { %v22868_v11 = vpack.c.bf16 %v1021_v46, %v1018_v14 }
 0x262   :  { %v22870_v13 = vpack.c.bf16 %v1022_v41, %v1019_v8  ;;  %v704_v36 = vpop.f32.mrb[72].mxu0 }
 0x263   :  { %25369 = vst [vmem:[#allocation60_spill] sm:$0xff] %v22868_v11  ;;  %v705_v53 = vadd.f32 %v704_v36, %v22569_v52  ;;  %v706_v1 = vpop.f32.mrb[73].mxu0 }
 0x264   :  { %25370 = vst [vmem:[#allocation61_spill] sm:$0xff] %v22870_v13  ;;  %v707_v44 = vadd.f32 %v706_v1, %v22573_v54  ;;  %v708_v45 = vpop.f32.mrb[74].mxu0  ;;  %2120 = vmatprep.mubr.bf16.mxu1 %v22870_v13  ;;  %2586 = vmatprep.mubr.bf16.mxu0 %v22870_v13 }
 0x265   :  { %v709_v3 = vadd.f32 %v708_v45, %v22569_v52  ;;  %v710_v40 = vpop.f32.mrb[75].mxu0  ;;  %2121 = vmatmul.mubr.bf16.gmra.mrb[108].mxu1 %v22868_v11  ;;  %2587 = vmatmul.mubr.bf16.gmra.mrb[148].mxu0 %v22868_v11  ;;  %v1024_v58 = vmax.f32 %v705_v53, 0.0 }
 0x266   :  { %v711_v43 = vadd.f32 %v710_v40, %v22573_v54  ;;  %v1025_v14 = vmax.f32 %v707_v44, 0.0 }
 0x267   :  { %v1027_v18 = vmax.f32 %v709_v3, 0.0 }
 0x268   :  { %v1028_v46 = vmax.f32 %v711_v43, 0.0 }
 0x269   :  { %v22880_v8 = vpack.c.bf16 %v1027_v18, %v1024_v58 }
 0x26a   :  { %v22882_v1 = vpack.c.bf16 %v1028_v46, %v1025_v14  ;;  %v714_v41 = vpop.f32.mrb[76].mxu0  ;;  %v20735_v46 = vld [vmem:[#allocation7 + $0x358] ss:$20 sps:$4 sm:$0xff]  }
 0x26b   :  { %v715_v36 = vadd.f32 %v714_v41, %v22569_v52  ;;  %v716_v13 = vpop.f32.mrb[77].mxu0  ;;  %v20744_v41 = vld [vmem:[#allocation7 + $0x600] ss:$20 sps:$4 sm:$0xff]  }
 0x26c   :  { %25371 = vst [vmem:[#allocation62_spill] sm:$0xff] %v22882_v1  ;;  %v717_v45 = vadd.f32 %v716_v13, %v22573_v54  ;;  %v718_v29 = vpop.f32.mrb[78].mxu0  ;;  %2130 = vmatprep.mubr.bf16.mxu1 %v22882_v1  ;;  %2596 = vmatprep.mubr.bf16.mxu0 %v22882_v1 }
 0x26d   :  { %v719_v53 = vadd.f32 %v718_v29, %v22569_v52  ;;  %v720_v3 = vpop.f32.mrb[79].mxu0  ;;  %2131 = vmatmul.mubr.bf16.gmra.mrb[112].mxu1 %v22880_v8  ;;  %2597 = vmatmul.mubr.bf16.gmra.mrb[152].mxu0 %v22880_v8  ;;  %v1030_v40 = vmax.f32 %v715_v36, 0.0  ;;  %v25374_v52 = vmov 0   ;;  %v20739_v29 = vld [vmem:[#allocation7 + $0x5d8] ss:$20 sps:$4 sm:$0xff]  }
 0x26e   :  { %v721_v44 = vadd.f32 %v720_v3, %v22573_v54  ;;  %v1031_v58 = vmax.f32 %v717_v45, 0.0  ;;  %v20733_v54 = vld [vmem:[#allocation7 + $0x330] ss:$20 sps:$4 sm:$0xff]   ;;  %v20736_v45 = vld [vmem:[#allocation7 + $0x380] ss:$20 sps:$4 sm:$0xff]  }
 0x26f   :  { %v1033_v43 = vmax.f32 %v719_v53, 0.0  ;;  %v21833_v36 = vld [vmem:[#allocation7 + $0x5b0] ss:$20 sps:$4 sm:$0xff]   ;;  %v20749_v53 = vld [vmem:[#allocation7 + $0x628] ss:$20 sps:$4 sm:$0xff]  }
 0x270   :  { %v1034_v18 = vmax.f32 %v721_v44, 0.0  ;;  %v20737_v3 = vld [vmem:[#allocation7 + $0x3a8] ss:$20 sps:$4 sm:$0xff]   ;;  %v20738_v44 = vld [vmem:[#allocation7 + $0x3d0] ss:$20 sps:$4 sm:$0xff]  }
 0x271   :  { %v22892_v14 = vpack.c.bf16 %v1033_v43, %v1030_v40  ;;  %v20740_v40 = vld [vmem:[#allocation7 + $0x3f8] ss:$20 sps:$4 sm:$0xff]   ;;  %v20741_v43 = vld [vmem:[#allocation7 + $0x420] ss:$20 sps:$4 sm:$0xff]  }
 0x272   :  { %v22894_v13 = vpack.c.bf16 %v1034_v18, %v1031_v58  ;;  %v20742_v58 = vld [vmem:[#allocation7 + $0x448] ss:$20 sps:$4 sm:$0xff]   ;;  %v20743_v18 = vld [vmem:[#allocation7 + $0x470] ss:$20 sps:$4 sm:$0xff]  }
 0x273   :  { %25372 = vst [vmem:[#allocation63_spill] sm:$0xff] %v22892_v14 }
 0x274   :  { %25373 = vst [vmem:[#allocation64_spill] sm:$0xff] %v22894_v13  ;;  %2140 = vmatprep.mubr.bf16.mxu1 %v22894_v13  ;;  %2606 = vmatprep.mubr.bf16.mxu0 %v22894_v13 }
 0x275   :  { %2141 = vmatmul.mubr.bf16.gmra.mrb[116].mxu1 %v22892_v14  ;;  %2607 = vmatmul.mubr.bf16.gmra.mrb[156].mxu0 %v22892_v14 }
 0x276   :  { %2183 = vmatprep.mubr.bf16.mxu1 %v25374_v52  ;;  %2649 = vmatprep.mubr.bf16.mxu0 %v25374_v52 }
 0x27d   :  { %16868 = vmatmul.mubr.msk.bf16.vlgmr.msra.gmra.mrb[40].mxu1 %vm1857_vm4, %v22593_v25  ;;  %16888 = vmatmul.mubr.msk.bf16.vlgmr.msra.gmra.mrb[80].mxu0 %vm1857_vm4, %v22593_v25 }
 0x27e   :  { %2851 = vmatpush1.bf16.msra.mxu1 %v20733_v54  ;;  %2193 = vmatprep.mubr.bf16.mxu1 %v25374_v52  ;;  %v20745_v54 = vld [vmem:[#allocation7 + $0x498] ss:$20 sps:$4 sm:$0xff]  }
 0x27f   :  { %2659 = vmatprep.mubr.bf16.mxu0 %v25374_v52  ;;  %19244 = vmatpush3.bf16.msra.mxu0 %v21833_v36  ;;  %v20748_v36 = vld [vmem:[#allocation7 + $0x510] ss:$20 sps:$4 sm:$0xff]  }
 0x280   :  { %2852 = vmatprep.subr.bf16.mxu1 %v25374_v52  ;;  %19245 = vmatprep.subr.bf16.mxu0 %v20739_v29 }
 0x282   :  { %2853 = vmatpush1.bf16.msra.mxu1 %v20735_v46  ;;  %v20746_v46 = vld [vmem:[#allocation7 + $0x4c0] ss:$20 sps:$4 sm:$0xff]  }
 0x283   :  { %2854 = vmatprep.subr.bf16.mxu1 %v25374_v52  ;;  %19246 = vmatpush3.bf16.msra.mxu0 %v20739_v29  ;;  %v20758_v29 = vld [vmem:[#allocation7 + $0xc] ss:$20 sps:$4 sm:$0xff]  }
 0x284   :  { %19247 = vmatprep.subr.bf16.mxu0 %v20744_v41 }
 0x285   :  { %16869 = vmatmul.mubr.msk.bf16.gmra.mrb[44].mxu1 %vm1857_vm4, %v22591_v56  ;;  %16889 = vmatmul.mubr.msk.bf16.gmra.mrb[84].mxu0 %vm1857_vm4, %v22591_v56 }
 0x286   :  { %2203 = vmatprep.mubr.bf16.mxu1 %v25374_v52  ;;  %2669 = vmatprep.mubr.bf16.mxu0 %v25374_v52 }
 0x287   :  { %2855 = vmatpush1.bf16.msra.mxu1 %v20736_v45  ;;  %19248 = vmatpush3.bf16.msra.mxu0 %v20744_v41  ;;  %v20747_v41 = vld [vmem:[#allocation7 + $0x4e8] ss:$20 sps:$4 sm:$0xff]   ;;  %v20750_v45 = vld [vmem:[#allocation7 + $0x538] ss:$20 sps:$4 sm:$0xff]  }
 0x288   :  { %2856 = vmatprep.subr.bf16.mxu1 %v25374_v52  ;;  %19249 = vmatprep.subr.bf16.mxu0 %v20749_v53 }
 0x28b   :  { %2857 = vmatpush1.bf16.msra.mxu1 %v20737_v3  ;;  %19250 = vmatpush3.bf16.msra.mxu0 %v20749_v53  ;;  %v20751_v53 = vld [vmem:[#allocation7 + $0x560] ss:$20 sps:$4 sm:$0xff]   ;;  %v20752_v3 = vld [vmem:[#allocation7 + $0x588] ss:$20 sps:$4 sm:$0xff]  }
 0x28c   :  { %2858 = vmatprep.subr.bf16.mxu1 %v25374_v52  ;;  %4224 = vmatprep.subr.bf16.mxu0 %v20758_v29  ;;  %v20762_v29 = vld [vmem:[#allocation7 + $0x30] ss:$20 sps:$4 sm:$0xff]  }
 0x28d   :  { %16870 = vmatmul.mubr.msk.bf16.gmra.mrb[48].mxu1 %vm1857_vm4, %v22614_v12  ;;  %16890 = vmatmul.mubr.msk.bf16.gmra.mrb[88].mxu0 %vm1857_vm4, %v22614_v12 }
 0x28e   :  { %2213 = vmatprep.mubr.bf16.mxu1 %v25374_v52  ;;  %2679 = vmatprep.mubr.bf16.mxu0 %v25374_v52 }
 0x28f   :  { %2859 = vmatpush1.bf16.msra.mxu1 %v20738_v44  ;;  %v20755_v44 = vld [vmem:[#allocation7 + $0x4] ss:$20 sps:$4 sm:$0xff]  }
 0x290   :  { %2860 = vmatprep.subr.bf16.mxu1 %v25374_v52 }
 0x293   :  { %2861 = vmatpush1.bf16.msra.mxu1 %v20740_v40  ;;  %v20753_v40 = vld [vmem:[#allocation7] ss:$20 sps:$4 sm:$0xff]  }
 0x294   :  { %2862 = vmatprep.subr.bf16.mxu1 %v25374_v52 }
 0x295   :  { %16871 = vmatmul.mubr.msk.bf16.gmra.mrb[52].mxu1 %vm1857_vm4, %v22611_v7  ;;  %16891 = vmatmul.mubr.msk.bf16.gmra.mrb[92].mxu0 %vm1857_vm4, %v22611_v7 }
 0x296   :  { %2223 = vmatprep.mubr.bf16.mxu1 %v25374_v52  ;;  %2689 = vmatprep.mubr.bf16.mxu0 %v25374_v52 }
 0x297   :  { %2863 = vmatpush1.bf16.msra.mxu1 %v20741_v43  ;;  %v20756_v43 = vld [vmem:[#allocation7 + $0x8] ss:$20 sps:$4 sm:$0xff]  }
 0x298   :  { %2864 = vmatprep.subr.bf16.mxu1 %v25374_v52 }
 0x29b   :  { %2865 = vmatpush1.bf16.msra.mxu1 %v20742_v58  ;;  %v20761_v58 = vld [vmem:[#allocation7 + $0x2c] ss:$20 sps:$4 sm:$0xff]  }
 0x29c   :  { %2866 = vmatprep.subr.bf16.mxu1 %v25374_v52 }
 0x29d   :  { %16872 = vmatmul.mubr.msk.bf16.gmra.mrb[56].mxu1 %vm1857_vm4, %v22634_v4  ;;  %16892 = vmatmul.mubr.msk.bf16.gmra.mrb[96].mxu0 %vm1857_vm4, %v22634_v4 }
 0x29e   :  { %2233 = vmatprep.mubr.bf16.mxu1 %v25374_v52  ;;  %2699 = vmatprep.mubr.bf16.mxu0 %v25374_v52 }
 0x29f   :  { %2867 = vmatpush1.bf16.msra.mxu1 %v20743_v18  ;;  %v20764_v18 = vld [vmem:[#allocation7 + $0x34] ss:$20 sps:$4 sm:$0xff]  }
 0x2a0   :  { %2868 = vmatprep.subr.bf16.mxu1 %v25374_v52 }
 0x2a3   :  { %2869 = vmatpush1.bf16.msra.mxu1 %v20745_v54  ;;  %v20759_v54 = vld [vmem:[#allocation7 + $0x28] ss:$20 sps:$4 sm:$0xff]  }
 0x2a4   :  { %2870 = vmatprep.subr.bf16.mxu1 %v25374_v52 }
 0x2a5   :  { %16873 = vmatmul.mubr.msk.bf16.gmra.mrb[60].mxu1 %vm1857_vm4, %v22631_v37  ;;  %16893 = vmatmul.mubr.msk.bf16.gmra.mrb[100].mxu0 %vm1857_vm4, %v22631_v37 }
 0x2a6   :  { %2243 = vmatprep.mubr.bf16.mxu1 %v25374_v52  ;;  %2709 = vmatprep.mubr.bf16.mxu0 %v25374_v52 }
 0x2a7   :  { %2871 = vmatpush1.bf16.msra.mxu1 %v20746_v46  ;;  %v20767_v46 = vld [vmem:[#allocation7 + $0x5c] ss:$20 sps:$4 sm:$0xff]  }
 0x2a8   :  { %2872 = vmatprep.subr.bf16.mxu1 %v25374_v52 }
 0x2ab   :  { %2873 = vmatpush1.bf16.msra.mxu1 %v20747_v41  ;;  %v20770_v41 = vld [vmem:[#allocation7 + $0x54] ss:$20 sps:$4 sm:$0xff]  }
 0x2ac   :  { %2874 = vmatprep.subr.bf16.mxu1 %v25374_v52 }
 0x2ad   :  { %16874 = vmatmul.mubr.msk.bf16.gmra.mrb[64].mxu1 %vm1857_vm4, %v22655_v21  ;;  %16894 = vmatmul.mubr.msk.bf16.gmra.mrb[104].mxu0 %vm1857_vm4, %v22655_v21 }
 0x2ae   :  { %2253 = vmatprep.mubr.bf16.mxu1 %v25374_v52  ;;  %2719 = vmatprep.mubr.bf16.mxu0 %v25374_v52 }
 0x2af   :  { %2875 = vmatpush1.bf16.msra.mxu1 %v20748_v36  ;;  %v20765_v36 = vld [vmem:[#allocation7 + $0x58] ss:$20 sps:$4 sm:$0xff]  }
 0x2b0   :  { %2876 = vmatprep.subr.bf16.mxu1 %v25374_v52 }
 0x2b3   :  { %2877 = vmatpush1.bf16.msra.mxu1 %v20750_v45  ;;  %v20768_v45 = vld [vmem:[#allocation7 + $0x50] ss:$20 sps:$4 sm:$0xff]  }
 0x2b4   :  { %2878 = vmatprep.subr.bf16.mxu1 %v25374_v52 }
 0x2b5   :  { %16875 = vmatmul.mubr.msk.bf16.gmra.mrb[68].mxu1 %vm1857_vm4, %v22652_v19  ;;  %16895 = vmatmul.mubr.msk.bf16.gmra.mrb[108].mxu0 %vm1857_vm4, %v22652_v19 }
 0x2b6   :  { %2263 = vmatprep.mubr.bf16.mxu1 %v25374_v52  ;;  %2729 = vmatprep.mubr.bf16.mxu0 %v25374_v52 }
 0x2b7   :  { %2879 = vmatpush1.bf16.msra.mxu1 %v20751_v53  ;;  %v20773_v53 = vld [vmem:[#allocation7 + $0x84] ss:$20 sps:$4 sm:$0xff]  }
 0x2b8   :  { %2880 = vmatprep.subr.bf16.mxu1 %v25374_v52 }
 0x2bb   :  { %2881 = vmatpush1.bf16.msra.mxu1 %v20752_v3  ;;  %v20779_v3 = vld [vmem:[#allocation7 + $0x7c] ss:$20 sps:$4 sm:$0xff]  }
 0x2bc   :  { %3758 = vmatprep.subr.bf16.mxu1 %v20755_v44  ;;  %v20771_v44 = vld [vmem:[#allocation7 + $0x80] ss:$20 sps:$4 sm:$0xff]  }
 0x2bd   :  { %16876 = vmatmul.mubr.msk.bf16.gmra.mrb[72].mxu1 %vm1857_vm4, %v22675_v60  ;;  %16896 = vmatmul.mubr.msk.bf16.gmra.mrb[112].mxu0 %vm1857_vm4, %v22675_v60 }
 0x2be   :  { %2273 = vmatprep.mubr.bf16.mxu1 %v25374_v52  ;;  %2739 = vmatprep.mubr.bf16.mxu0 %v25374_v52 }
 0x2c5   :  { %16877 = vmatmul.mubr.msk.bf16.gmra.mrb[76].mxu1 %vm1857_vm4, %v22672_v57  ;;  %16897 = vmatmul.mubr.msk.bf16.gmra.mrb[116].mxu0 %vm1857_vm4, %v22672_v57 }
 0x2c6   :  { %2283 = vmatprep.mubr.bf16.mxu1 %v25374_v52  ;;  %2749 = vmatprep.mubr.bf16.mxu0 %v25374_v52 }
 0x2cd   :  { %16878 = vmatmul.mubr.msk.bf16.gmra.mrb[80].mxu1 %vm1857_vm4, %v22695_v30  ;;  %16898 = vmatmul.mubr.msk.bf16.gmra.mrb[120].mxu0 %vm1857_vm4, %v22695_v30 }
 0x2ce   :  { %2293 = vmatprep.mubr.bf16.mxu1 %v25374_v52  ;;  %2759 = vmatprep.mubr.bf16.mxu0 %v25374_v52 }
 0x2d5   :  { %16879 = vmatmul.mubr.msk.bf16.gmra.mrb[84].mxu1 %vm1857_vm4, %v22692_v9  ;;  %16899 = vmatmul.mubr.msk.bf16.gmra.mrb[124].mxu0 %vm1857_vm4, %v22692_v9 }
 0x2d6   :  { %2303 = vmatprep.mubr.bf16.mxu1 %v25374_v52  ;;  %2769 = vmatprep.mubr.bf16.mxu0 %v25374_v52 }
 0x2dd   :  { %16880 = vmatmul.mubr.msk.bf16.gmra.mrb[88].mxu1 %vm1857_vm4, %v22715_v33  ;;  %16900 = vmatmul.mubr.msk.bf16.gmra.mrb[128].mxu0 %vm1857_vm4, %v22715_v33 }
 0x2de   :  { %2313 = vmatprep.mubr.bf16.mxu1 %v25374_v52  ;;  %2779 = vmatprep.mubr.bf16.mxu0 %v25374_v52 }
 0x2e5   :  { %16881 = vmatmul.mubr.msk.bf16.gmra.mrb[92].mxu1 %vm1857_vm4, %v22712_v28  ;;  %16901 = vmatmul.mubr.msk.bf16.gmra.mrb[132].mxu0 %vm1857_vm4, %v22712_v28 }
 0x2e6   :  { %2323 = vmatprep.mubr.bf16.mxu1 %v25374_v52  ;;  %2789 = vmatprep.mubr.bf16.mxu0 %v25374_v52 }
 0x2ed   :  { %16882 = vmatmul.mubr.msk.bf16.gmra.mrb[96].mxu1 %vm1857_vm4, %v22735_v31  ;;  %16902 = vmatmul.mubr.msk.bf16.gmra.mrb[136].mxu0 %vm1857_vm4, %v22735_v31 }
 0x2ee   :  { %2333 = vmatprep.mubr.bf16.mxu1 %v25374_v52  ;;  %2799 = vmatprep.mubr.bf16.mxu0 %v25374_v52 }
 0x2f5   :  { %16883 = vmatmul.mubr.msk.bf16.gmra.mrb[100].mxu1 %vm1857_vm4, %v22732_v24  ;;  %16903 = vmatmul.mubr.msk.bf16.gmra.mrb[140].mxu0 %vm1857_vm4, %v22732_v24 }
 0x2f6   :  { %2343 = vmatprep.mubr.bf16.mxu1 %v25374_v52  ;;  %2809 = vmatprep.mubr.bf16.mxu0 %v25374_v52 }
 0x2fd   :  { %16884 = vmatmul.mubr.msk.bf16.gmra.mrb[104].mxu1 %vm1857_vm4, %v22755_v39  ;;  %16904 = vmatmul.mubr.msk.bf16.gmra.mrb[144].mxu0 %vm1857_vm4, %v22755_v39 }
 0x2fe   :  { %2353 = vmatprep.mubr.bf16.mxu1 %v25374_v52  ;;  %2819 = vmatprep.mubr.bf16.mxu0 %v25374_v52 }
 0x305   :  { %16885 = vmatmul.mubr.msk.bf16.gmra.mrb[108].mxu1 %vm1857_vm4, %v22752_v38  ;;  %16905 = vmatmul.mubr.msk.bf16.gmra.mrb[148].mxu0 %vm1857_vm4, %v22752_v38 }
 0x306   :  { %2363 = vmatprep.mubr.bf16.mxu1 %v25374_v52  ;;  %2829 = vmatprep.mubr.bf16.mxu0 %v25374_v52 }
 0x30d   :  { %16886 = vmatmul.mubr.msk.bf16.gmra.mrb[112].mxu1 %vm1857_vm4, %v22775_v62  ;;  %16906 = vmatmul.mubr.msk.bf16.gmra.mrb[152].mxu0 %vm1857_vm4, %v22775_v62 }
 0x30e   :  { %2373 = vmatprep.mubr.bf16.mxu1 %v25374_v52  ;;  %2839 = vmatprep.mubr.bf16.mxu0 %v25374_v52 }
 0x315   :  { %16887 = vmatmul.mubr.msk.bf16.gmra.mrb[116].mxu1 %vm1857_vm4, %v22772_v49  ;;  %16907 = vmatmul.mubr.msk.bf16.gmra.mrb[156].mxu0 %vm1857_vm4, %v22772_v49 }
 0x316   :  { %2882 = vmatprep.mubr.bf16.mxu1 %v22589_v26  ;;  %19251 = vmatprep.mubr.msk.bf16.mxu0 %vm1857_vm4, %v22593_v25 }
 0x31d   :  { %2883 = vmatmul.mubr.bf16.vlgmr.msra.gmra.mrb[120].mxu1 %v22587_v22  ;;  %19252 = vmatmul.mubr.msk.bf16.vlgmr.msra.gmra.mrb[160].mxu0 %vm1857_vm4, %v22591_v56 }
 0x31e   :  { %3759 = vmatpush1.bf16.msra.mxu1 %v20753_v40  ;;  %2890 = vmatprep.mubr.bf16.mxu1 %v22609_v6  ;;  %v20776_v40 = vld [vmem:[#allocation7 + $0xac] ss:$20 sps:$4 sm:$0xff]  }
 0x31f   :  { %19255 = vmatprep.mubr.msk.bf16.mxu0 %vm1857_vm4, %v22614_v12  ;;  %4225 = vmatpush1.bf16.msra.mxu0 %v20756_v43  ;;  %v20777_v43 = vld [vmem:[#allocation7 + $0x78] ss:$20 sps:$4 sm:$0xff]  }
 0x320   :  { %3760 = vmatprep.subr.bf16.mxu1 %v20761_v58  ;;  %4226 = vmatprep.subr.bf16.mxu0 %v20764_v18  ;;  %v20788_v58 = vld [vmem:[#allocation7 + $0xa4] ss:$20 sps:$4 sm:$0xff]   ;;  %v20774_v18 = vld [vmem:[#allocation7 + $0xa8] ss:$20 sps:$4 sm:$0xff]  }
 0x322   :  { %3761 = vmatpush1.bf16.msra.mxu1 %v20759_v54  ;;  %v20786_v54 = vld [vmem:[#allocation7 + $0xa0] ss:$20 sps:$4 sm:$0xff]  }
 0x323   :  { %4227 = vmatpush1.bf16.msra.mxu0 %v20762_v29  ;;  %3762 = vmatprep.subr.bf16.mxu1 %v20770_v41  ;;  %v20782_v29 = vld [vmem:[#allocation7 + $0xd4] ss:$20 sps:$4 sm:$0xff]   ;;  %v20780_v41 = vld [vmem:[#allocation7 + $0xd0] ss:$20 sps:$4 sm:$0xff]  }
 0x324   :  { %4228 = vmatprep.subr.bf16.mxu0 %v20767_v46  ;;  %v20797_v46 = vld [vmem:[#allocation7 + $0xcc] ss:$20 sps:$4 sm:$0xff]  }
 0x325   :  { %2891 = vmatmul.mubr.bf16.gmra.mrb[124].mxu1 %v22607_v61  ;;  %19256 = vmatmul.mubr.msk.bf16.gmra.mrb[164].mxu0 %vm1857_vm4, %v22611_v7 }
 0x326   :  { %2898 = vmatprep.mubr.bf16.mxu1 %v22629_v23  ;;  %19259 = vmatprep.mubr.msk.bf16.mxu0 %vm1857_vm4, %v22634_v4 }
 0x327   :  { %4229 = vmatpush1.bf16.msra.mxu0 %v20765_v36  ;;  %3763 = vmatpush1.bf16.msra.mxu1 %v20768_v45  ;;  %v20785_v36 = vld [vmem:[#allocation7 + $0xfc] ss:$20 sps:$4 sm:$0xff]  }
 0x328   :  { %4230 = vmatprep.subr.bf16.mxu0 %v20773_v53  ;;  %3764 = vmatprep.subr.bf16.mxu1 %v20779_v3  ;;  %v20795_v45 = vld [vmem:[#allocation7 + $0xc8] ss:$20 sps:$4 sm:$0xff]   ;;  %v20783_v3 = vld [vmem:[#allocation7 + $0xf8] ss:$20 sps:$4 sm:$0xff]  }
 0x329   :  { %v20806_v53 = vld [vmem:[#allocation7 + $0xf4] ss:$20 sps:$4 sm:$0xff]  }
 0x32b   :  { %4231 = vmatpush1.bf16.msra.mxu0 %v20771_v44  ;;  %3765 = vmatpush1.bf16.msra.mxu1 %v20777_v43  ;;  %v20804_v44 = vld [vmem:[#allocation7 + $0xf0] ss:$20 sps:$4 sm:$0xff]  }
 0x32c   :  { %4232 = vmatprep.subr.bf16.mxu0 %v20776_v40  ;;  %3766 = vmatprep.subr.bf16.mxu1 %v20788_v58  ;;  %v20791_v40 = vld [vmem:[#allocation7 + $0x124] ss:$20 sps:$4 sm:$0xff]   ;;  %v20818_v43 = vld [vmem:[#allocation7 + $0x11c] ss:$20 sps:$4 sm:$0xff]   ;;  %v20789_v58 = vld [vmem:[#allocation7 + $0x120] ss:$20 sps:$4 sm:$0xff]  }
 0x32d   :  { %2899 = vmatmul.mubr.bf16.gmra.mrb[128].mxu1 %v22627_v63  ;;  %19260 = vmatmul.mubr.msk.bf16.gmra.mrb[168].mxu0 %vm1857_vm4, %v22631_v37 }
 0x32e   :  { %2906 = vmatprep.mubr.bf16.mxu1 %v22650_v2  ;;  %19263 = vmatprep.mubr.msk.bf16.mxu0 %vm1857_vm4, %v22655_v21 }
 0x32f   :  { %4233 = vmatpush1.bf16.msra.mxu0 %v20774_v18  ;;  %3767 = vmatpush1.bf16.msra.mxu1 %v20786_v54  ;;  %v20794_v18 = vld [vmem:[#allocation7 + $0x14c] ss:$20 sps:$4 sm:$0xff]  }
 0x330   :  { %4234 = vmatprep.subr.bf16.mxu0 %v20782_v29  ;;  %3768 = vmatprep.subr.bf16.mxu1 %v20797_v46  ;;  %v20816_v54 = vld [vmem:[#allocation7 + $0x118] ss:$20 sps:$4 sm:$0xff]   ;;  %v20792_v46 = vld [vmem:[#allocation7 + $0x148] ss:$20 sps:$4 sm:$0xff]  }
 0x331   :  { %v20827_v29 = vld [vmem:[#allocation7 + $0x144] ss:$20 sps:$4 sm:$0xff]  }
 0x333   :  { %4235 = vmatpush1.bf16.msra.mxu0 %v20780_v41  ;;  %3769 = vmatpush1.bf16.msra.mxu1 %v20795_v45  ;;  %v20825_v41 = vld [vmem:[#allocation7 + $0x140] ss:$20 sps:$4 sm:$0xff]  }
 0x334   :  { %4236 = vmatprep.subr.bf16.mxu0 %v20785_v36  ;;  %3770 = vmatprep.subr.bf16.mxu1 %v20806_v53  ;;  %v20800_v36 = vld [vmem:[#allocation7 + $0x174] ss:$20 sps:$4 sm:$0xff]   ;;  %v20833_v45 = vld [vmem:[#allocation7 + $0x16c] ss:$20 sps:$4 sm:$0xff]   ;;  %v20798_v53 = vld [vmem:[#allocation7 + $0x170] ss:$20 sps:$4 sm:$0xff]  }
 0x335   :  { %2907 = vmatmul.mubr.bf16.gmra.mrb[132].mxu1 %v22648_v15  ;;  %19264 = vmatmul.mubr.msk.bf16.gmra.mrb[172].mxu0 %vm1857_vm4, %v22652_v19 }
 0x336   :  { %2914 = vmatprep.mubr.bf16.mxu1 %v22670_v51  ;;  %19267 = vmatprep.mubr.msk.bf16.mxu0 %vm1857_vm4, %v22675_v60 }
 0x337   :  { %4237 = vmatpush1.bf16.msra.mxu0 %v20783_v3  ;;  %3771 = vmatpush1.bf16.msra.mxu1 %v20804_v44  ;;  %v20803_v3 = vld [vmem:[#allocation7 + $0x19c] ss:$20 sps:$4 sm:$0xff]  }
 0x338   :  { %4238 = vmatprep.subr.bf16.mxu0 %v20791_v40  ;;  %3772 = vmatprep.subr.bf16.mxu1 %v20818_v43  ;;  %v20831_v44 = vld [vmem:[#allocation7 + $0x168] ss:$20 sps:$4 sm:$0xff]   ;;  %v20801_v43 = vld [vmem:[#allocation7 + $0x198] ss:$20 sps:$4 sm:$0xff]  }
 0x339   :  { %v20836_v40 = vld [vmem:[#allocation7 + $0x194] ss:$20 sps:$4 sm:$0xff]  }
 0x33b   :  { %4239 = vmatpush1.bf16.msra.mxu0 %v20789_v58  ;;  %3773 = vmatpush1.bf16.msra.mxu1 %v20816_v54  ;;  %v20834_v58 = vld [vmem:[#allocation7 + $0x190] ss:$20 sps:$4 sm:$0xff]  }
 0x33c   :  { %4240 = vmatprep.subr.bf16.mxu0 %v20794_v18  ;;  %3774 = vmatprep.subr.bf16.mxu1 %v20827_v29  ;;  %v20809_v18 = vld [vmem:[#allocation7 + $0x1c4] ss:$20 sps:$4 sm:$0xff]   ;;  %v20839_v54 = vld [vmem:[#allocation7 + $0x1bc] ss:$20 sps:$4 sm:$0xff]   ;;  %v20807_v29 = vld [vmem:[#allocation7 + $0x1c0] ss:$20 sps:$4 sm:$0xff]  }
 0x33d   :  { %2915 = vmatmul.mubr.bf16.gmra.mrb[136].mxu1 %v22668_v10  ;;  %19268 = vmatmul.mubr.msk.bf16.gmra.mrb[176].mxu0 %vm1857_vm4, %v22672_v57 }
 0x33e   :  { %2922 = vmatprep.mubr.bf16.mxu1 %v22690_v34  ;;  %19271 = vmatprep.mubr.msk.bf16.mxu0 %vm1857_vm4, %v22695_v30 }
 0x33f   :  { %4241 = vmatpush1.bf16.msra.mxu0 %v20792_v46  ;;  %3775 = vmatpush1.bf16.msra.mxu1 %v20825_v41  ;;  %v20837_v46 = vld [vmem:[#allocation7 + $0x1b8] ss:$20 sps:$4 sm:$0xff]  }
 0x340   :  { %4242 = vmatprep.subr.bf16.mxu0 %v20800_v36  ;;  %3776 = vmatprep.subr.bf16.mxu1 %v20833_v45  ;;  %v20812_v41 = vld [vmem:[#allocation7 + $0x1ec] ss:$20 sps:$4 sm:$0xff]   ;;  %v20842_v36 = vld [vmem:[#allocation7 + $0x1e4] ss:$20 sps:$4 sm:$0xff]   ;;  %v20810_v45 = vld [vmem:[#allocation7 + $0x1e8] ss:$20 sps:$4 sm:$0xff]  }
 0x343   :  { %4243 = vmatpush1.bf16.msra.mxu0 %v20798_v53  ;;  %3777 = vmatpush1.bf16.msra.mxu1 %v20831_v44  ;;  %v20840_v53 = vld [vmem:[#allocation7 + $0x1e0] ss:$20 sps:$4 sm:$0xff]  }
 0x344   :  { %4244 = vmatprep.subr.bf16.mxu0 %v20803_v3  ;;  %3778 = vmatprep.subr.bf16.mxu1 %v20836_v40  ;;  %v20815_v3 = vld [vmem:[#allocation7 + $0x214] ss:$20 sps:$4 sm:$0xff]   ;;  %v20848_v44 = vld [vmem:[#allocation7 + $0x20c] ss:$20 sps:$4 sm:$0xff]   ;;  %v20813_v40 = vld [vmem:[#allocation7 + $0x210] ss:$20 sps:$4 sm:$0xff]  }
 0x345   :  { %2923 = vmatmul.mubr.bf16.gmra.mrb[140].mxu1 %v22688_v59  ;;  %19272 = vmatmul.mubr.msk.bf16.gmra.mrb[180].mxu0 %vm1857_vm4, %v22692_v9 }
 0x346   :  { %2930 = vmatprep.mubr.bf16.mxu1 %v22710_v27  ;;  %19275 = vmatprep.mubr.msk.bf16.mxu0 %vm1857_vm4, %v22715_v33  ;;  %v20846_v33 = vld [vmem:[#allocation7 + $0x208] ss:$20 sps:$4 sm:$0xff]  }
 0x347   :  { %4245 = vmatpush1.bf16.msra.mxu0 %v20801_v43  ;;  %3779 = vmatpush1.bf16.msra.mxu1 %v20834_v58  ;;  %v20821_v43 = vld [vmem:[#allocation7 + $0x23c] ss:$20 sps:$4 sm:$0xff]   ;;  %v20851_v58 = vld [vmem:[#allocation7 + $0x234] ss:$20 sps:$4 sm:$0xff]  }
 0x348   :  { %4246 = vmatprep.subr.bf16.mxu0 %v20809_v18  ;;  %3780 = vmatprep.subr.bf16.mxu1 %v20839_v54  ;;  %v20819_v18 = vld [vmem:[#allocation7 + $0x238] ss:$20 sps:$4 sm:$0xff]   ;;  %v20849_v54 = vld [vmem:[#allocation7 + $0x230] ss:$20 sps:$4 sm:$0xff]  }
 0x34b   :  { %4247 = vmatpush1.bf16.msra.mxu0 %v20807_v29  ;;  %3781 = vmatpush1.bf16.msra.mxu1 %v20837_v46  ;;  %v20824_v29 = vld [vmem:[#allocation7 + $0x264] ss:$20 sps:$4 sm:$0xff]   ;;  %v20854_v46 = vld [vmem:[#allocation7 + $0x25c] ss:$20 sps:$4 sm:$0xff]  }
 0x34c   :  { %4248 = vmatprep.subr.bf16.mxu0 %v20812_v41  ;;  %3782 = vmatprep.subr.bf16.mxu1 %v20842_v36  ;;  %v20822_v41 = vld [vmem:[#allocation7 + $0x260] ss:$20 sps:$4 sm:$0xff]   ;;  %v20852_v36 = vld [vmem:[#allocation7 + $0x258] ss:$20 sps:$4 sm:$0xff]  }
 0x34d   :  { %2931 = vmatmul.mubr.bf16.gmra.mrb[144].mxu1 %v22708_v5  ;;  %19276 = vmatmul.mubr.msk.bf16.gmra.mrb[184].mxu0 %vm1857_vm4, %v22712_v28 }
 0x34e   :  { %2938 = vmatprep.mubr.bf16.mxu1 %v22730_v20  ;;  %19279 = vmatprep.mubr.msk.bf16.mxu0 %vm1857_vm4, %v22735_v31 }
 0x34f   :  { %4249 = vmatpush1.bf16.msra.mxu0 %v20810_v45  ;;  %3783 = vmatpush1.bf16.msra.mxu1 %v20840_v53  ;;  %v20830_v45 = vld [vmem:[#allocation7 + $0x28c] ss:$20 sps:$4 sm:$0xff]   ;;  %v20857_v53 = vld [vmem:[#allocation7 + $0x284] ss:$20 sps:$4 sm:$0xff]  }
 0x350   :  { %4250 = vmatprep.subr.bf16.mxu0 %v20815_v3  ;;  %3784 = vmatprep.subr.bf16.mxu1 %v20848_v44  ;;  %v20845_v3 = vld [vmem:[#allocation7 + $0x2b4] ss:$20 sps:$4 sm:$0xff]   ;;  %v20843_v44 = vld [vmem:[#allocation7 + $0x2b0] ss:$20 sps:$4 sm:$0xff]  }
 0x353   :  { %4251 = vmatpush1.bf16.msra.mxu0 %v20813_v40  ;;  %3785 = vmatpush1.bf16.msra.mxu1 %v20846_v33  ;;  %v20828_v33 = vld [vmem:[#allocation7 + $0x288] ss:$20 sps:$4 sm:$0xff]  }
 0x354   :  { %4252 = vmatprep.subr.bf16.mxu0 %v20821_v43  ;;  %3786 = vmatprep.subr.bf16.mxu1 %v20851_v58  ;;  %v20860_v40 = vld [vmem:[#allocation7 + $0x2dc] ss:$20 sps:$4 sm:$0xff]   ;;  %v20858_v43 = vld [vmem:[#allocation7 + $0x2d8] ss:$20 sps:$4 sm:$0xff]  }
 0x355   :  { %2939 = vmatmul.mubr.bf16.gmra.mrb[148].mxu1 %v22728_v17  ;;  %19280 = vmatmul.mubr.msk.bf16.gmra.mrb[188].mxu0 %vm1857_vm4, %v22732_v24  ;;  %v20866_v58 = vld [vmem:[#allocation7 + $0x304] ss:$20 sps:$4 sm:$0xff]  }
 0x356   :  { %2946 = vmatprep.mubr.bf16.mxu1 %v22750_v35  ;;  %19283 = vmatprep.mubr.msk.bf16.mxu0 %vm1857_vm4, %v22755_v39 }
 0x357   :  { %4253 = vmatpush1.bf16.msra.mxu0 %v20819_v18  ;;  %3787 = vmatpush1.bf16.msra.mxu1 %v20849_v54  ;;  %v20864_v18 = vld [vmem:[#allocation7 + $0x300] ss:$20 sps:$4 sm:$0xff]   ;;  %v25375_v54 = vld [vmem:[#allocation50_spill] sm:$0xff] }
 0x358   :  { %4254 = vmatprep.subr.bf16.mxu0 %v20824_v29  ;;  %3788 = vmatprep.subr.bf16.mxu1 %v20854_v46  ;;  %v25376_v29 = vld [vmem:[#allocation53_spill] sm:$0xff]  ;;  %v25377_v46 = vld [vmem:[#allocation52_spill] sm:$0xff] }
 0x35b   :  { %4255 = vmatpush1.bf16.msra.mxu0 %v20822_v41  ;;  %3789 = vmatpush1.bf16.msra.mxu1 %v20852_v36  ;;  %v25378_v41 = vld [vmem:[#allocation55_spill] sm:$0xff]  ;;  %v25379_v36 = vld [vmem:[#allocation54_spill] sm:$0xff] }
 0x35c   :  { %4457 = vmatprep.subr.bf16.mxu0 %v20830_v45  ;;  %3991 = vmatprep.subr.bf16.mxu1 %v20857_v53  ;;  %v25380_v45 = vld [vmem:[#allocation57_spill] sm:$0xff]  ;;  %v25381_v53 = vld [vmem:[#allocation56_spill] sm:$0xff] }
 0x35d   :  { %2947 = vmatmul.mubr.bf16.gmra.mrb[152].mxu1 %v22748_v32  ;;  %19284 = vmatmul.mubr.msk.bf16.gmra.mrb[192].mxu0 %vm1857_vm4, %v22752_v38 }
 0x35e   :  { %2954 = vmatprep.mubr.bf16.mxu1 %v22770_v48  ;;  %19287 = vmatprep.mubr.msk.bf16.mxu0 %vm1857_vm4, %v22775_v62 }
 0x365   :  { %2955 = vmatmul.mubr.bf16.gmra.mrb[156].mxu1 %v22768_v42  ;;  %19288 = vmatmul.mubr.msk.bf16.gmra.mrb[196].mxu0 %vm1857_vm4, %v22772_v49  ;;  %v20867_v49 = vld [vmem:[#allocation7 + $0x2d0] ss:$20 sps:$4 sm:$0xff]  }
 0x366   :  { %2962 = vmatprep.mubr.bf16.mxu1 %v22786_v16  ;;  %4256 = vmatprep.mubr.bf16.mxu0 %v25374_v52 }
 0x36d   :  { %2963 = vmatmul.mubr.bf16.gmra.mrb[160].mxu1 %v22784_v50  ;;  %4257 = vmatmul.mubr.bf16.vlgmr.msra.gmra.mrb[80].mxu0 %v25374_v52 }
 0x36e   :  { %2970 = vmatprep.mubr.bf16.mxu1 %v22798_v47  ;;  %4266 = vmatprep.mubr.bf16.mxu0 %v22589_v26 }
 0x36f   :  { %4458 = vmatpush1.bf16.msra.mxu0 %v20828_v33  ;;  %v25382_v33 = vld [vmem:[#allocation59_spill] sm:$0xff] }
 0x370   :  { %4459 = vmatprep.subr.bf16.mxu0 %v20845_v3  ;;  %v25383_v3 = vld [vmem:[#allocation58_spill] sm:$0xff] }
 0x373   :  { %4460 = vmatpush1.bf16.msra.mxu0 %v20843_v44  ;;  %v25384_v44 = vld [vmem:[#allocation61_spill] sm:$0xff] }
 0x374   :  { %4461 = vmatprep.subr.bf16.mxu0 %v20860_v40  ;;  %v20855_v40 = vld [vmem:[#allocation7 + $0x280] ss:$20 sps:$4 sm:$0xff]  }
 0x375   :  { %2971 = vmatmul.mubr.bf16.gmra.mrb[164].mxu1 %v22796_v0  ;;  %4267 = vmatmul.mubr.bf16.gmra.mrb[84].mxu0 %v22587_v22 }
 0x376   :  { %2978 = vmatprep.mubr.bf16.mxu1 %v22810_v55  ;;  %4276 = vmatprep.mubr.bf16.mxu0 %v22609_v6 }
 0x377   :  { %4462 = vmatpush1.bf16.msra.mxu0 %v20858_v43  ;;  %v20863_v43 = vld [vmem:[#allocation7 + $0x2ac] ss:$20 sps:$4 sm:$0xff]  }
 0x378   :  { %4463 = vmatprep.subr.bf16.mxu0 %v20866_v58  ;;  %v20861_v58 = vld [vmem:[#allocation7 + $0x2a8] ss:$20 sps:$4 sm:$0xff]  }
 0x37b   :  { %4464 = vmatpush1.bf16.msra.mxu0 %v20864_v18  ;;  %v20869_v18 = vld [vmem:[#allocation7 + $0x2d4] ss:$20 sps:$4 sm:$0xff]  }
 0x37c   :  { %4690 = vmatprep.subr.bf16.mxu0 %v25374_v52 }
 0x37d   :  { %2979 = vmatmul.mubr.bf16.gmra.mrb[168].mxu1 %v25375_v54  ;;  %4277 = vmatmul.mubr.bf16.gmra.mrb[88].mxu0 %v22607_v61 }
 0x37e   :  { %2986 = vmatprep.mubr.bf16.mxu1 %v25376_v29  ;;  %4286 = vmatprep.mubr.bf16.mxu0 %v22629_v23 }
 0x385   :  { %2987 = vmatmul.mubr.bf16.gmra.mrb[172].mxu1 %v25377_v46  ;;  %4287 = vmatmul.mubr.bf16.gmra.mrb[92].mxu0 %v22627_v63 }
 0x386   :  { %2994 = vmatprep.mubr.bf16.mxu1 %v25378_v41  ;;  %4296 = vmatprep.mubr.bf16.mxu0 %v22650_v2 }
 0x38d   :  { %2995 = vmatmul.mubr.bf16.gmra.mrb[176].mxu1 %v25379_v36  ;;  %4297 = vmatmul.mubr.bf16.gmra.mrb[96].mxu0 %v22648_v15 }
 0x38e   :  { %3002 = vmatprep.mubr.bf16.mxu1 %v25380_v45  ;;  %4306 = vmatprep.mubr.bf16.mxu0 %v22670_v51 }
 0x395   :  { %3003 = vmatmul.mubr.bf16.gmra.mrb[180].mxu1 %v25381_v53  ;;  %4307 = vmatmul.mubr.bf16.gmra.mrb[100].mxu0 %v22668_v10 }
 0x396   :  { %3010 = vmatprep.mubr.bf16.mxu1 %v25382_v33  ;;  %4316 = vmatprep.mubr.bf16.mxu0 %v22690_v34 }
 0x39d   :  { %3011 = vmatmul.mubr.bf16.gmra.mrb[184].mxu1 %v25383_v3  ;;  %4317 = vmatmul.mubr.bf16.gmra.mrb[104].mxu0 %v22688_v59 }
 0x39e   :  { %3018 = vmatprep.mubr.bf16.mxu1 %v25384_v44  ;;  %4326 = vmatprep.mubr.bf16.mxu0 %v22710_v27 }
 0x3a5   :  { %3019 = vmatmul.mubr.bf16.gmra.mrb[188].mxu1 %v22868_v11  ;;  %4327 = vmatmul.mubr.bf16.gmra.mrb[108].mxu0 %v22708_v5 }
 0x3a6   :  { %3026 = vmatprep.mubr.bf16.mxu1 %v22882_v1  ;;  %4336 = vmatprep.mubr.bf16.mxu0 %v22730_v20 }
 0x3ad   :  { %3027 = vmatmul.mubr.bf16.gmra.mrb[192].mxu1 %v22880_v8  ;;  %4337 = vmatmul.mubr.bf16.gmra.mrb[112].mxu0 %v22728_v17 }
 0x3ae   :  { %3034 = vmatprep.mubr.bf16.mxu1 %v22894_v13  ;;  %4346 = vmatprep.mubr.bf16.mxu0 %v22750_v35 }
 0x3b5   :  { %3035 = vmatmul.mubr.bf16.gmra.mrb[196].mxu1 %v22892_v14  ;;  %4347 = vmatmul.mubr.bf16.gmra.mrb[116].mxu0 %v22748_v32  ;;  %v20876_v14 = vld [vmem:[#allocation7 + $0x2fc] ss:$20 sps:$4 sm:$0xff]  }
 0x3b6   :  { %4356 = vmatprep.mubr.bf16.mxu0 %v22770_v48  ;;  %3790 = vmatprep.mubr.bf16.mxu1 %v25374_v52 }
 0x3bd   :  { %3791 = vmatmul.mubr.bf16.vlgmr.msra.gmra.mrb[40].mxu1 %v25374_v52  ;;  %4357 = vmatmul.mubr.bf16.gmra.mrb[120].mxu0 %v22768_v42 }
 0x3be   :  { %3992 = vmatpush1.bf16.msra.mxu1 %v20855_v40  ;;  %3800 = vmatprep.mubr.bf16.mxu1 %v22589_v26  ;;  %v20874_v40 = vld [vmem:[#allocation7 + $0x2f8] ss:$20 sps:$4 sm:$0xff]  }
 0x3bf   :  { %4366 = vmatprep.mubr.bf16.mxu0 %v22786_v16  ;;  %3993 = vmatprep.subr.bf16.mxu1 %v20863_v43 }
 0x3c2   :  { %3994 = vmatpush1.bf16.msra.mxu1 %v20861_v58 }
 0x3c3   :  { %3995 = vmatprep.subr.bf16.mxu1 %v20869_v18 }
 0x3c5   :  { %3801 = vmatmul.mubr.bf16.gmra.mrb[44].mxu1 %v22587_v22  ;;  %4367 = vmatmul.mubr.bf16.gmra.mrb[124].mxu0 %v22784_v50 }
 0x3c6   :  { %3810 = vmatprep.mubr.bf16.mxu1 %v22609_v6  ;;  %4376 = vmatprep.mubr.bf16.mxu0 %v22798_v47 }
 0x3c7   :  { %3996 = vmatpush1.bf16.msra.mxu1 %v20867_v49  ;;  %v23154_v49 = vld [vmem:[#allocation7 + $0x290] ss:$20 sps:$4 sm:$0xff]  }
 0x3c8   :  { %3997 = vmatprep.subr.bf16.mxu1 %v20876_v14 }
 0x3cb   :  { %3998 = vmatpush1.bf16.msra.mxu1 %v20874_v40 }
 0x3cc   :  { %19291 = vmatprep.subr.bf16.mxu1 %v23154_v49 }
 0x3cd   :  { %3811 = vmatmul.mubr.bf16.gmra.mrb[48].mxu1 %v22607_v61  ;;  %4377 = vmatmul.mubr.bf16.gmra.mrb[128].mxu0 %v22796_v0 }
 0x3ce   :  { %3820 = vmatprep.mubr.bf16.mxu1 %v22629_v23  ;;  %4386 = vmatprep.mubr.bf16.mxu0 %v22810_v55 }
 0x3d5   :  { %3821 = vmatmul.mubr.bf16.gmra.mrb[52].mxu1 %v22627_v63  ;;  %4387 = vmatmul.mubr.bf16.gmra.mrb[132].mxu0 %v25375_v54 }
 0x3d6   :  { %3830 = vmatprep.mubr.bf16.mxu1 %v22650_v2  ;;  %4396 = vmatprep.mubr.bf16.mxu0 %v25376_v29 }
 0x3dd   :  { %3831 = vmatmul.mubr.bf16.gmra.mrb[56].mxu1 %v22648_v15  ;;  %4397 = vmatmul.mubr.bf16.gmra.mrb[136].mxu0 %v25377_v46 }
 0x3de   :  { %3840 = vmatprep.mubr.bf16.mxu1 %v22670_v51  ;;  %4406 = vmatprep.mubr.bf16.mxu0 %v25378_v41 }
 0x3e5   :  { %3841 = vmatmul.mubr.bf16.gmra.mrb[60].mxu1 %v22668_v10  ;;  %4407 = vmatmul.mubr.bf16.gmra.mrb[140].mxu0 %v25379_v36 }
 0x3e6   :  { %3850 = vmatprep.mubr.bf16.mxu1 %v22690_v34  ;;  %4416 = vmatprep.mubr.bf16.mxu0 %v25380_v45 }
 0x3ed   :  { %3851 = vmatmul.mubr.bf16.gmra.mrb[64].mxu1 %v22688_v59  ;;  %4417 = vmatmul.mubr.bf16.gmra.mrb[144].mxu0 %v25381_v53 }
 0x3ee   :  { %3860 = vmatprep.mubr.bf16.mxu1 %v22710_v27  ;;  %4426 = vmatprep.mubr.bf16.mxu0 %v25382_v33 }
 0x3f0   :  { %v2884_v14 = vpop.f32.mrb[120].mxu1  ;;  %v19253_v43 = vpop.f32.mrb[160].mxu0 }
 0x3f1   :  { %v2886_v58 = vpop.f32.mrb[121].mxu1  ;;  %v3077_v18 = vpop.f32.mrb[161].mxu0 }
 0x3f2   :  { %v23169_v40 = vadd.f32 %v3077_v18, %v2884_v14  ;;  %v2887_v13 = vpop.f32.mrb[122].mxu1  ;;  %v19254_v10 = vpop.f32.mrb[162].mxu0 }
 0x3f3   :  { %v2889_v51 = vpop.f32.mrb[123].mxu1  ;;  %v3080_v34 = vpop.f32.mrb[163].mxu0 }
 0x3f4   :  { %25385 = vst [vmem:[#allocation65_spill] sm:$0xff] %v23169_v40  ;;  %v23171_v15 = vadd.f32 %v3080_v34, %v2887_v13 }
 0x3f5   :  { %3861 = vmatmul.mubr.bf16.gmra.mrb[68].mxu1 %v22708_v5  ;;  %4427 = vmatmul.mubr.bf16.gmra.mrb[148].mxu0 %v25383_v3 }
 0x3f6   :  { %25386 = vst [vmem:[#allocation66_spill] sm:$0xff] %v23171_v15  ;;  %3870 = vmatprep.mubr.bf16.mxu1 %v22730_v20  ;;  %4436 = vmatprep.mubr.bf16.mxu0 %v25384_v44 }
 0x3f8   :  { %v2892_v27 = vpop.f32.mrb[124].mxu1  ;;  %v19257_v59 = vpop.f32.mrb[164].mxu0 }
 0x3f9   :  { %v23177_v58 = vadd.f32 %v19253_v43, %v2892_v27  ;;  %v2894_v14 = vpop.f32.mrb[125].mxu1  ;;  %v3093_v18 = vpop.f32.mrb[165].mxu0 }
 0x3fa   :  { %v2895_v40 = vpop.f32.mrb[126].mxu1  ;;  %v19258_v2 = vpop.f32.mrb[166].mxu0 }
 0x3fb   :  { %25387 = vst [vmem:[#allocation67_spill] sm:$0xff] %v23177_v58  ;;  %v23179_v51 = vadd.f32 %v19254_v10, %v2895_v40  ;;  %v2897_v34 = vpop.f32.mrb[127].mxu1  ;;  %v3096_v13 = vpop.f32.mrb[167].mxu0 }
 0x3fd   :  { %25388 = vst [vmem:[#allocation68_spill] sm:$0xff] %v23179_v51  ;;  %3871 = vmatmul.mubr.bf16.gmra.mrb[72].mxu1 %v22728_v17  ;;  %4437 = vmatmul.mubr.bf16.gmra.mrb[152].mxu0 %v22868_v11 }
 0x3fe   :  { %3880 = vmatprep.mubr.bf16.mxu1 %v22750_v35  ;;  %4446 = vmatprep.mubr.bf16.mxu0 %v22882_v1 }
 0x400   :  { %v2900_v15 = vpop.f32.mrb[128].mxu1  ;;  %v19261_v20 = vpop.f32.mrb[168].mxu0 }
 0x401   :  { %v23185_v27 = vadd.f32 %v3093_v18, %v2900_v15  ;;  %v2902_v43 = vpop.f32.mrb[129].mxu1  ;;  %v3109_v14 = vpop.f32.mrb[169].mxu0 }
 0x402   :  { %v2903_v58 = vpop.f32.mrb[130].mxu1  ;;  %v19262_v5 = vpop.f32.mrb[170].mxu0 }
 0x403   :  { %25389 = vst [vmem:[#allocation69_spill] sm:$0xff] %v23185_v27  ;;  %v23187_v10 = vadd.f32 %v3096_v13, %v2903_v58  ;;  %v2905_v40 = vpop.f32.mrb[131].mxu1  ;;  %v3112_v34 = vpop.f32.mrb[171].mxu0 }
 0x405   :  { %25390 = vst [vmem:[#allocation70_spill] sm:$0xff] %v23187_v10  ;;  %3881 = vmatmul.mubr.bf16.gmra.mrb[76].mxu1 %v22748_v32  ;;  %4447 = vmatmul.mubr.bf16.gmra.mrb[156].mxu0 %v22880_v8  ;;  %v20870_v32 = vld [vmem:[#allocation7 + $0x10] ss:$20 sps:$4 sm:$0xff]  }
 0x406   :  { %3890 = vmatprep.mubr.bf16.mxu1 %v22770_v48  ;;  %4489 = vmatprep.mubr.bf16.mxu0 %v25374_v52 }
 0x408   :  { %v2908_v51 = vpop.f32.mrb[132].mxu1  ;;  %v23193_v35 = vpop.f32.mrb[172].mxu0 }
 0x409   :  { %v23195_v15 = vadd.f32 %v19257_v59, %v2908_v51  ;;  %v2910_v18 = vpop.f32.mrb[133].mxu1  ;;  %v3125_v43 = vpop.f32.mrb[173].mxu0  ;;  %v20871_v59 = vld [vmem:[#allocation7 + $0x38] ss:$20 sps:$4 sm:$0xff]  }
 0x40a   :  { %v2911_v27 = vpop.f32.mrb[134].mxu1  ;;  %v23197_v58 = vpop.f32.mrb[174].mxu0 }
 0x40b   :  { %25391 = vst [vmem:[#allocation71_spill] sm:$0xff] %v23195_v15  ;;  %v23199_v13 = vadd.f32 %v19258_v2, %v2911_v27  ;;  %v2913_v40 = vpop.f32.mrb[135].mxu1  ;;  %v3128_v10 = vpop.f32.mrb[175].mxu0 }
 0x40d   :  { %25392 = vst [vmem:[#allocation72_spill] sm:$0xff] %v23199_v13  ;;  %3891 = vmatmul.mubr.bf16.gmra.mrb[80].mxu1 %v22768_v42  ;;  %4490 = vmatmul.mubr.bf16.vlgmr.msra.gmra.mrb[80].mxu0 %v25374_v52 }
 0x40e   :  { %3900 = vmatprep.mubr.bf16.mxu1 %v22786_v16  ;;  %4499 = vmatprep.mubr.bf16.mxu0 %v25374_v52 }
 0x40f   :  { %4691 = vmatpush1.bf16.msra.mxu0 %v20870_v32  ;;  %v20872_v32 = vld [vmem:[#allocation7 + $0x60] ss:$20 sps:$4 sm:$0xff]  }
 0x410   :  { %v2916_v51 = vpop.f32.mrb[136].mxu1  ;;  %v23205_v18 = vpop.f32.mrb[176].mxu0  ;;  %4692 = vmatprep.subr.bf16.mxu0 %v25374_v52 }
 0x411   :  { %v23208_v2 = vadd.f32 %v3109_v14, %v2916_v51  ;;  %v2918_v27 = vpop.f32.mrb[137].mxu1  ;;  %v23210_v40 = vpop.f32.mrb[177].mxu0  ;;  %v20873_v14 = vld [vmem:[#allocation7 + $0x88] ss:$20 sps:$4 sm:$0xff]  }
 0x412   :  { %v2919_v13 = vpop.f32.mrb[138].mxu1  ;;  %v23212_v15 = vpop.f32.mrb[178].mxu0 }
 0x413   :  { %25393 = vst [vmem:[#allocation73_spill] sm:$0xff] %v23208_v2  ;;  %v23214_v42 = vadd.f32 %v3112_v34, %v2919_v13  ;;  %v2921_v16 = vpop.f32.mrb[139].mxu1  ;;  %v23216_v48 = vpop.f32.mrb[179].mxu0  ;;  %4693 = vmatpush1.bf16.msra.mxu0 %v20871_v59 }
 0x414   :  { %4694 = vmatprep.subr.bf16.mxu0 %v25374_v52 }
 0x415   :  { %25394 = vst [vmem:[#allocation74_spill] sm:$0xff] %v23214_v42  ;;  %3901 = vmatmul.mubr.bf16.gmra.mrb[84].mxu1 %v22784_v50  ;;  %17047 = vmatmul.mubr.msk.bf16.gmra.mrb[84].mxu0 %vm1857_vm4, %v22593_v25 }
 0x416   :  { %3910 = vmatprep.mubr.bf16.mxu1 %v22798_v47  ;;  %4509 = vmatprep.mubr.bf16.mxu0 %v25374_v52 }
 0x417   :  { %4695 = vmatpush1.bf16.msra.mxu0 %v20872_v32  ;;  %v20877_v32 = vld [vmem:[#allocation7 + $0xb0] ss:$20 sps:$4 sm:$0xff]  }
 0x418   :  { %v2924_v34 = vpop.f32.mrb[140].mxu1  ;;  %v23224_v13 = vpop.f32.mrb[180].mxu0  ;;  %4696 = vmatprep.subr.bf16.mxu0 %v25374_v52 }
 0x419   :  { %v23227_v16 = vadd.f32 %v19261_v20, %v2924_v34  ;;  %v2926_v59 = vpop.f32.mrb[141].mxu1  ;;  %v23229_v51 = vpop.f32.mrb[181].mxu0  ;;  %v20878_v20 = vld [vmem:[#allocation7 + $0xd8] ss:$20 sps:$4 sm:$0xff]  }
 0x41a   :  { %v2927_v27 = vpop.f32.mrb[142].mxu1  ;;  %v23231_v42 = vpop.f32.mrb[182].mxu0 }
 0x41b   :  { %25395 = vst [vmem:[#allocation75_spill] sm:$0xff] %v23227_v16  ;;  %v23233_v2 = vadd.f32 %v19262_v5, %v2927_v27  ;;  %v2929_v47 = vpop.f32.mrb[143].mxu1  ;;  %v23235_v50 = vpop.f32.mrb[183].mxu0  ;;  %4697 = vmatpush1.bf16.msra.mxu0 %v20873_v14 }
 0x41c   :  { %4698 = vmatprep.subr.bf16.mxu0 %v25374_v52 }
 0x41d   :  { %25396 = vst [vmem:[#allocation76_spill] sm:$0xff] %v23233_v2  ;;  %3911 = vmatmul.mubr.bf16.gmra.mrb[88].mxu1 %v22796_v0  ;;  %17048 = vmatmul.mubr.msk.bf16.gmra.mrb[88].mxu0 %vm1857_vm4, %v22591_v56 }
 0x41e   :  { %3920 = vmatprep.mubr.bf16.mxu1 %v22810_v55  ;;  %4519 = vmatprep.mubr.bf16.mxu0 %v25374_v52 }
 0x41f   :  { %4699 = vmatpush1.bf16.msra.mxu0 %v20877_v32  ;;  %v20879_v32 = vld [vmem:[#allocation7 + $0x100] ss:$20 sps:$4 sm:$0xff]  }
 0x420   :  { %v2932_v5 = vpop.f32.mrb[144].mxu1  ;;  %v23243_v34 = vpop.f32.mrb[184].mxu0  ;;  %4700 = vmatprep.subr.bf16.mxu0 %v25374_v52 }
 0x421   :  { %v23246_v47 = vadd.f32 %v3125_v43, %v2932_v5  ;;  %v2934_v14 = vpop.f32.mrb[145].mxu1  ;;  %v23248_v59 = vpop.f32.mrb[185].mxu0  ;;  %v20880_v43 = vld [vmem:[#allocation7 + $0x128] ss:$20 sps:$4 sm:$0xff]  }
 0x422   :  { %v2935_v27 = vpop.f32.mrb[146].mxu1  ;;  %v23250_v2 = vpop.f32.mrb[186].mxu0 }
 0x423   :  { %25397 = vst [vmem:[#allocation77_spill] sm:$0xff] %v23246_v47  ;;  %v23252_v16 = vadd.f32 %v3128_v10, %v2935_v27  ;;  %v2937_v55 = vpop.f32.mrb[147].mxu1  ;;  %v23254_v0 = vpop.f32.mrb[187].mxu0  ;;  %4701 = vmatpush1.bf16.msra.mxu0 %v20878_v20 }
 0x424   :  { %4702 = vmatprep.subr.bf16.mxu0 %v25374_v52 }
 0x425   :  { %25398 = vst [vmem:[#allocation78_spill] sm:$0xff] %v23252_v16  ;;  %3921 = vmatmul.mubr.bf16.gmra.mrb[92].mxu1 %v25375_v54  ;;  %17049 = vmatmul.mubr.msk.bf16.gmra.mrb[92].mxu0 %vm1857_vm4, %v22614_v12  ;;  %v20882_v54 = vld [vmem:[#allocation7 + $0x150] ss:$20 sps:$4 sm:$0xff]  }
 0x426   :  { %3930 = vmatprep.mubr.bf16.mxu1 %v25376_v29  ;;  %4529 = vmatprep.mubr.bf16.mxu0 %v25374_v52 }
 0x427   :  { %4703 = vmatpush1.bf16.msra.mxu0 %v20879_v32 }
 0x428   :  { %v2940_v10 = vpop.f32.mrb[148].mxu1  ;;  %v23262_v5 = vpop.f32.mrb[188].mxu0  ;;  %4704 = vmatprep.subr.bf16.mxu0 %v25374_v52 }
 0x429   :  { %v23266_v55 = vadd.f32 %v23193_v35, %v2940_v10  ;;  %v2942_v20 = vpop.f32.mrb[149].mxu1  ;;  %v23268_v14 = vpop.f32.mrb[189].mxu0  ;;  %v20883_v35 = vld [vmem:[#allocation7 + $0x178] ss:$20 sps:$4 sm:$0xff]  }
 0x42a   :  { %v2943_v27 = vpop.f32.mrb[150].mxu1  ;;  %v23270_v16 = vpop.f32.mrb[190].mxu0 }
 0x42b   :  { %25399 = vst [vmem:[#allocation79_spill] sm:$0xff] %v23266_v55  ;;  %v23273_v47 = vadd.f32 %v23197_v58, %v2943_v27  ;;  %v2945_v29 = vpop.f32.mrb[151].mxu1  ;;  %v23275_v32 = vpop.f32.mrb[191].mxu0  ;;  %4705 = vmatpush1.bf16.msra.mxu0 %v20880_v43 }
 0x42c   :  { %4706 = vmatprep.subr.bf16.mxu0 %v25374_v52 }
 0x42d   :  { %25400 = vst [vmem:[#allocation80_spill] sm:$0xff] %v23273_v47  ;;  %3931 = vmatmul.mubr.bf16.gmra.mrb[96].mxu1 %v25377_v46  ;;  %17050 = vmatmul.mubr.msk.bf16.gmra.mrb[96].mxu0 %vm1857_vm4, %v22611_v7  ;;  %v20884_v46 = vld [vmem:[#allocation7 + $0x1a0] ss:$20 sps:$4 sm:$0xff]  }
 0x42e   :  { %3940 = vmatprep.mubr.bf16.mxu1 %v25378_v41  ;;  %4539 = vmatprep.mubr.bf16.mxu0 %v25374_v52 }
 0x42f   :  { %4707 = vmatpush1.bf16.msra.mxu0 %v20882_v54 }
 0x430   :  { %v2948_v58 = vpop.f32.mrb[152].mxu1  ;;  %v23283_v10 = vpop.f32.mrb[192].mxu0  ;;  %4708 = vmatprep.subr.bf16.mxu0 %v25374_v52 }
 0x431   :  { %v23287_v29 = vadd.f32 %v23210_v40, %v2948_v58  ;;  %v2950_v43 = vpop.f32.mrb[153].mxu1  ;;  %v23289_v20 = vpop.f32.mrb[193].mxu0  ;;  %v20885_v40 = vld [vmem:[#allocation7 + $0x1c8] ss:$20 sps:$4 sm:$0xff]  }
 0x432   :  { %v2951_v27 = vpop.f32.mrb[154].mxu1  ;;  %v23291_v47 = vpop.f32.mrb[194].mxu0 }
 0x433   :  { %25401 = vst [vmem:[#allocation81_spill] sm:$0xff] %v23287_v29  ;;  %v23294_v55 = vadd.f32 %v23216_v48, %v2951_v27  ;;  %v2953_v41 = vpop.f32.mrb[155].mxu1  ;;  %v23296_v54 = vpop.f32.mrb[195].mxu0  ;;  %4709 = vmatpush1.bf16.msra.mxu0 %v20883_v35 }
 0x434   :  { %4710 = vmatprep.subr.bf16.mxu0 %v25374_v52 }
 0x435   :  { %25402 = vst [vmem:[#allocation82_spill] sm:$0xff] %v23294_v55  ;;  %3941 = vmatmul.mubr.bf16.gmra.mrb[100].mxu1 %v25379_v36  ;;  %17051 = vmatmul.mubr.msk.bf16.gmra.mrb[100].mxu0 %vm1857_vm4, %v22634_v4  ;;  %v20887_v36 = vld [vmem:[#allocation7 + $0x1f0] ss:$20 sps:$4 sm:$0xff]  }
 0x436   :  { %3950 = vmatprep.mubr.bf16.mxu1 %v25380_v45  ;;  %4549 = vmatprep.mubr.bf16.mxu0 %v25374_v52 }
 0x437   :  { %4711 = vmatpush1.bf16.msra.mxu0 %v20884_v46 }
 0x438   :  { %v2956_v48 = vpop.f32.mrb[156].mxu1  ;;  %v23304_v58 = vpop.f32.mrb[196].mxu0  ;;  %4712 = vmatprep.subr.bf16.mxu0 %v25374_v52 }
 0x439   :  { %v23308_v41 = vadd.f32 %v23205_v18, %v2956_v48  ;;  %v2958_v35 = vpop.f32.mrb[157].mxu1  ;;  %v23310_v43 = vpop.f32.mrb[197].mxu0  ;;  %v20888_v18 = vld [vmem:[#allocation7 + $0x218] ss:$20 sps:$4 sm:$0xff]  }
 0x43a   :  { %v2959_v27 = vpop.f32.mrb[158].mxu1  ;;  %v23312_v55 = vpop.f32.mrb[198].mxu0 }
 0x43b   :  { %v23315_v29 = vadd.f32 %v23212_v15, %v2959_v27  ;;  %v2961_v45 = vpop.f32.mrb[159].mxu1  ;;  %v23317_v46 = vpop.f32.mrb[199].mxu0  ;;  %4713 = vmatpush1.bf16.msra.mxu0 %v20885_v40 }
 0x43c   :  { %4714 = vmatprep.subr.bf16.mxu0 %v25374_v52 }
 0x43d   :  { %25403 = vst [vmem:[#allocation83_spill] sm:$0xff] %v23315_v29  ;;  %3951 = vmatmul.mubr.bf16.gmra.mrb[104].mxu1 %v25381_v53  ;;  %17052 = vmatmul.mubr.msk.bf16.gmra.mrb[104].mxu0 %vm1857_vm4, %v22631_v37  ;;  %v20889_v29 = vld [vmem:[#allocation7 + $0x240] ss:$20 sps:$4 sm:$0xff]  }
 0x43e   :  { %3960 = vmatprep.mubr.bf16.mxu1 %v25382_v33  ;;  %4559 = vmatprep.mubr.bf16.mxu0 %v25374_v52 }
 0x43f   :  { %4715 = vmatpush1.bf16.msra.mxu0 %v20887_v36  ;;  %v20890_v36 = vld [vmem:[#allocation7 + $0x268] ss:$20 sps:$4 sm:$0xff]  }
 0x440   :  { %v2964_v15 = vpop.f32.mrb[160].mxu1  ;;  %4716 = vmatprep.subr.bf16.mxu0 %v25374_v52 }
 0x441   :  { %v23327_v45 = vadd.f32 %v23229_v51, %v2964_v15  ;;  %v2966_v40 = vpop.f32.mrb[161].mxu1 }
 0x442   :  { %v2967_v48 = vpop.f32.mrb[162].mxu1 }
 0x443   :  { %v23330_v35 = vadd.f32 %v23235_v50, %v2967_v48  ;;  %v2969_v27 = vpop.f32.mrb[163].mxu1  ;;  %4717 = vmatpush1.bf16.msra.mxu0 %v20888_v18  ;;  %v20894_v50 = vld [vmem:[#allocation7 + $0x64c] ss:$20 sps:$4 sm:$0xff]  }
 0x444   :  { %4718 = vmatprep.subr.bf16.mxu0 %v25374_v52 }
 0x445   :  { %3961 = vmatmul.mubr.bf16.gmra.mrb[108].mxu1 %v25383_v3  ;;  %17053 = vmatmul.mubr.msk.bf16.gmra.mrb[108].mxu0 %vm1857_vm4, %v22655_v21 }
 0x446   :  { %3970 = vmatprep.mubr.bf16.mxu1 %v25384_v44  ;;  %4569 = vmatprep.mubr.bf16.mxu0 %v25374_v52 }
 0x447   :  { %4719 = vmatpush1.bf16.msra.mxu0 %v20889_v29 }
 0x448   :  { %v2972_v51 = vpop.f32.mrb[164].mxu1  ;;  %4720 = vmatprep.subr.bf16.mxu0 %v25374_v52 }
 0x449   :  { %v23340_v18 = vadd.f32 %v23224_v13, %v2972_v51  ;;  %v2974_v15 = vpop.f32.mrb[165].mxu1 }
 0x44a   :  { %v2975_v40 = vpop.f32.mrb[166].mxu1 }
 0x44b   :  { %v23343_v48 = vadd.f32 %v23231_v42, %v2975_v40  ;;  %v2977_v27 = vpop.f32.mrb[167].mxu1  ;;  %4721 = vmatpush1.bf16.msra.mxu0 %v20890_v36 }
 0x44c   :  { %6183 = vmatprep.subr.bf16.mxu0 %v20894_v50 }
 0x44d   :  { %3971 = vmatmul.mubr.bf16.gmra.mrb[112].mxu1 %v22868_v11  ;;  %17054 = vmatmul.mubr.msk.bf16.gmra.mrb[112].mxu0 %vm1857_vm4, %v22652_v19 }
 0x44e   :  { %3980 = vmatprep.mubr.bf16.mxu1 %v22882_v1  ;;  %4579 = vmatprep.mubr.bf16.mxu0 %v25374_v52 }
 0x450   :  { %v2980_v29 = vpop.f32.mrb[168].mxu1 }
 0x451   :  { %v23351_v13 = vadd.f32 %v23248_v59, %v2980_v29  ;;  %v2982_v51 = vpop.f32.mrb[169].mxu1 }
 0x452   :  { %v2983_v15 = vpop.f32.mrb[170].mxu1  ;;  %v20886_v51 = vld [vmem:[#allocation7 + $0x2b8] ss:$20 sps:$4 sm:$0xff]  }
 0x453   :  { %v23354_v42 = vadd.f32 %v23254_v0, %v2983_v15  ;;  %v2985_v36 = vpop.f32.mrb[171].mxu1 }
 0x455   :  { %3981 = vmatmul.mubr.bf16.gmra.mrb[116].mxu1 %v22880_v8  ;;  %17055 = vmatmul.mubr.msk.bf16.gmra.mrb[116].mxu0 %vm1857_vm4, %v22675_v60 }
 0x456   :  { %4023 = vmatprep.mubr.bf16.mxu1 %v25374_v52  ;;  %4589 = vmatprep.mubr.bf16.mxu0 %v25374_v52 }
 0x458   :  { %v2988_v50 = vpop.f32.mrb[172].mxu1 }
 0x459   :  { %v23362_v40 = vadd.f32 %v23243_v34, %v2988_v50  ;;  %v2990_v59 = vpop.f32.mrb[173].mxu1  ;;  %v20891_v34 = vld [vmem:[#allocation7 + $0x2e0] ss:$20 sps:$4 sm:$0xff]  }
 0x45a   :  { %v2991_v27 = vpop.f32.mrb[174].mxu1 }
 0x45b   :  { %v23365_v29 = vadd.f32 %v23250_v2, %v2991_v27  ;;  %v2993_v0 = vpop.f32.mrb[175].mxu1 }
 0x45c   :  { %v20904_v0 = vld [vmem:[#allocation7 + $0x308] ss:$20 sps:$4 sm:$0xff]  }
 0x45d   :  { %4024 = vmatmul.mubr.bf16.vlgmr.msra.gmra.mrb[40].mxu1 %v25374_v52  ;;  %17056 = vmatmul.mubr.msk.bf16.gmra.mrb[120].mxu0 %vm1857_vm4, %v22672_v57 }
 0x45e   :  { %19292 = vmatpush3.bf16.msra.mxu1 %v23154_v49  ;;  %4033 = vmatprep.mubr.bf16.mxu1 %v25374_v52 }
 0x45f   :  { %4599 = vmatprep.mubr.bf16.mxu0 %v25374_v52  ;;  %19293 = vmatprep.subr.bf16.mxu1 %v20886_v51 }
 0x460   :  { %v2996_v15 = vpop.f32.mrb[176].mxu1 }
 0x461   :  { %v23374_v36 = vadd.f32 %v23268_v14, %v2996_v15  ;;  %v2998_v2 = vpop.f32.mrb[177].mxu1 }
 0x462   :  { %v2999_v50 = vpop.f32.mrb[178].mxu1  ;;  %19294 = vmatpush3.bf16.msra.mxu1 %v20886_v51 }
 0x463   :  { %25404 = vst [vmem:[#allocation84_spill] sm:$0xff] %v23374_v36  ;;  %v23377_v59 = vadd.f32 %v23275_v32, %v2999_v50  ;;  %v3001_v27 = vpop.f32.mrb[179].mxu1  ;;  %19295 = vmatprep.subr.bf16.mxu1 %v20891_v34  ;;  %v25434_v36 = vld [vmem:[#allocation51_spill] sm:$0xff] }
 0x465   :  { %25405 = vst [vmem:[#allocation85_spill] sm:$0xff] %v23377_v59  ;;  %17028 = vmatmul.mubr.msk.bf16.gmra.mrb[44].mxu1 %vm1857_vm4, %v22593_v25  ;;  %17057 = vmatmul.mubr.msk.bf16.gmra.mrb[124].mxu0 %vm1857_vm4, %v22695_v30  ;;  %v25432_v59 = vld [vmem:[#allocation49_spill] sm:$0xff] }
 0x466   :  { %4043 = vmatprep.mubr.bf16.mxu1 %v25374_v52  ;;  %4609 = vmatprep.mubr.bf16.mxu0 %v25374_v52 }
 0x467   :  { %19296 = vmatpush3.bf16.msra.mxu1 %v20891_v34 }
 0x468   :  { %v3004_v49 = vpop.f32.mrb[180].mxu1  ;;  %19297 = vmatprep.subr.bf16.mxu1 %v20904_v0 }
 0x469   :  { %v23386_v14 = vadd.f32 %v23262_v5, %v3004_v49  ;;  %v3006_v32 = vpop.f32.mrb[181].mxu1 }
 0x46a   :  { %v3007_v51 = vpop.f32.mrb[182].mxu1  ;;  %v20919_v32 = vld [vmem:[#allocation7 + $0x644] ss:$20 sps:$4 sm:$0xff]  }
 0x46b   :  { %25406 = vst [vmem:[#allocation86_spill] sm:$0xff] %v23386_v14  ;;  %v23389_v15 = vadd.f32 %v23270_v16, %v3007_v51  ;;  %v3009_v2 = vpop.f32.mrb[183].mxu1  ;;  %19298 = vmatpush3.bf16.msra.mxu1 %v20904_v0  ;;  %v25410_v0 = vld [vmem:[#allocation36_spill] sm:$0xff]  ;;  %v25431_v14 = vld [vmem:[#allocation46_spill] sm:$0xff] }
 0x46c   :  { %5717 = vmatprep.subr.bf16.mxu1 %v20919_v32 }
 0x46d   :  { %25407 = vst [vmem:[#allocation87_spill] sm:$0xff] %v23389_v15  ;;  %17029 = vmatmul.mubr.msk.bf16.gmra.mrb[48].mxu1 %vm1857_vm4, %v22591_v56  ;;  %17058 = vmatmul.mubr.msk.bf16.gmra.mrb[128].mxu0 %vm1857_vm4, %v22692_v9  ;;  %v20931_v15 = vld [vmem:[#allocation7 + $0x6bc] ss:$20 sps:$4 sm:$0xff]  }
 0x46e   :  { %4053 = vmatprep.mubr.bf16.mxu1 %v25374_v52  ;;  %4619 = vmatprep.mubr.bf16.mxu0 %v25374_v52 }
 0x470   :  { %v3012_v34 = vpop.f32.mrb[184].mxu1 }
 0x471   :  { %v3014_v5 = vpop.f32.mrb[185].mxu1  ;;  %v23398_v50 = vadd.f32 %v23289_v20, %v3012_v34 }
 0x472   :  { %v3015_v27 = vpop.f32.mrb[186].mxu1 }
 0x473   :  { %25408 = vst [vmem:[#allocation88_spill] sm:$0xff] %v23398_v50  ;;  %v3017_v16 = vpop.f32.mrb[187].mxu1  ;;  %v23401_v49 = vadd.f32 %v23296_v54, %v3015_v27  ;;  %v20926_v50 = vld [vmem:[#allocation7 + $0x690] ss:$20 sps:$4 sm:$0xff]  }
 0x475   :  { %25409 = vst [vmem:[#allocation89_spill] sm:$0xff] %v23401_v49  ;;  %17030 = vmatmul.mubr.msk.bf16.gmra.mrb[52].mxu1 %vm1857_vm4, %v22614_v12  ;;  %17059 = vmatmul.mubr.msk.bf16.gmra.mrb[132].mxu0 %vm1857_vm4, %v25410_v0  ;;  %v20928_v49 = vld [vmem:[#allocation7 + $0x694] ss:$20 sps:$4 sm:$0xff]  }
 0x476   :  { %4063 = vmatprep.mubr.bf16.mxu1 %v25374_v52  ;;  %4629 = vmatprep.mubr.bf16.mxu0 %v25374_v52 }
 0x478   :  { %v3020_v51 = vpop.f32.mrb[188].mxu1 }
 0x479   :  { %v3022_v2 = vpop.f32.mrb[189].mxu1  ;;  %v23410_v20 = vadd.f32 %v23283_v10, %v3020_v51 }
 0x47a   :  { %v3023_v34 = vpop.f32.mrb[190].mxu1 }
 0x47b   :  { %25411 = vst [vmem:[#allocation36_spill] sm:$0xff] %v23410_v20  ;;  %v3025_v54 = vpop.f32.mrb[191].mxu1  ;;  %v23413_v5 = vadd.f32 %v23291_v47, %v3023_v34  ;;  %v20920_v20 = vld [vmem:[#allocation7 + $0x668] ss:$20 sps:$4 sm:$0xff]  }
 0x47d   :  { %25412 = vst [vmem:[#allocation90_spill] sm:$0xff] %v23413_v5  ;;  %17031 = vmatmul.mubr.msk.bf16.gmra.mrb[56].mxu1 %vm1857_vm4, %v22611_v7  ;;  %17060 = vmatmul.mubr.msk.bf16.gmra.mrb[136].mxu0 %vm1857_vm4, %v22712_v28  ;;  %v20986_v5 = vld [vmem:[#allocation7 + $0x8a0] ss:$20 sps:$4 sm:$0xff]  }
 0x47e   :  { %4073 = vmatprep.mubr.bf16.mxu1 %v25374_v52  ;;  %4639 = vmatprep.mubr.bf16.mxu0 %v25374_v52 }
 0x480   :  { %v3028_v27 = vpop.f32.mrb[192].mxu1 }
 0x481   :  { %v3030_v16 = vpop.f32.mrb[193].mxu1  ;;  %v23422_v10 = vadd.f32 %v23310_v43, %v3028_v27 }
 0x482   :  { %v3031_v32 = vpop.f32.mrb[194].mxu1  ;;  %v20895_v16 = vld [vmem:[#allocation7 + $0x670] ss:$20 sps:$4 sm:$0xff]  }
 0x483   :  { %25413 = vst [vmem:[#allocation91_spill] sm:$0xff] %v23422_v10  ;;  %v3033_v51 = vpop.f32.mrb[195].mxu1  ;;  %v23425_v47 = vadd.f32 %v23317_v46, %v3031_v32  ;;  %v20900_v32 = vld [vmem:[#allocation7 + $0x69c] ss:$20 sps:$4 sm:$0xff]   ;;  %v25425_v10 = vld [vmem:[#allocation37_spill] sm:$0xff] }
 0x484   :  { %v20898_v51 = vld [vmem:[#allocation7 + $0x698] ss:$20 sps:$4 sm:$0xff]  }
 0x485   :  { %25414 = vst [vmem:[#allocation92_spill] sm:$0xff] %v23425_v47  ;;  %17032 = vmatmul.mubr.msk.bf16.gmra.mrb[60].mxu1 %vm1857_vm4, %v22634_v4  ;;  %17061 = vmatmul.mubr.msk.bf16.gmra.mrb[140].mxu0 %vm1857_vm4, %v22735_v31  ;;  %v20968_v47 = vld [vmem:[#allocation7 + $0x850] ss:$20 sps:$4 sm:$0xff]  }
 0x486   :  { %4083 = vmatprep.mubr.bf16.mxu1 %v25374_v52  ;;  %4649 = vmatprep.mubr.bf16.mxu0 %v25374_v52 }
 0x488   :  { %v3036_v2 = vpop.f32.mrb[196].mxu1 }
 0x489   :  { %v3038_v34 = vpop.f32.mrb[197].mxu1  ;;  %v23434_v43 = vadd.f32 %v23304_v58, %v3036_v2  ;;  %v20897_v58 = vld [vmem:[#allocation7 + $0x674] ss:$20 sps:$4 sm:$0xff]   ;;  %v20903_v2 = vld [vmem:[#allocation7 + $0x6c4] ss:$20 sps:$4 sm:$0xff]  }
 0x48a   :  { %v3039_v54 = vpop.f32.mrb[198].mxu1  ;;  %v20907_v34 = vld [vmem:[#allocation7 + $0x6ec] ss:$20 sps:$4 sm:$0xff]  }
 0x48b   :  { %25415 = vst [vmem:[#allocation93_spill] sm:$0xff] %v23434_v43  ;;  %v3041_v27 = vpop.f32.mrb[199].mxu1  ;;  %v23437_v46 = vadd.f32 %v23312_v55, %v3039_v54  ;;  %v20892_v55 = vld [vmem:[#allocation7 + $0x648] ss:$20 sps:$4 sm:$0xff]   ;;  %v25423_v43 = vld [vmem:[#allocation35_spill] sm:$0xff] }
 0x48c   :  { %v20905_v54 = vld [vmem:[#allocation7 + $0x6e8] ss:$20 sps:$4 sm:$0xff]  }
 0x48d   :  { %25416 = vst [vmem:[#allocation94_spill] sm:$0xff] %v23437_v46  ;;  %17033 = vmatmul.mubr.msk.bf16.gmra.mrb[64].mxu1 %vm1857_vm4, %v22631_v37  ;;  %17062 = vmatmul.mubr.msk.bf16.gmra.mrb[144].mxu0 %vm1857_vm4, %v22732_v24  ;;  %v20910_v27 = vld [vmem:[#allocation7 + $0x714] ss:$20 sps:$4 sm:$0xff]  }
 0x48e   :  { %4093 = vmatprep.mubr.bf16.mxu1 %v25374_v52  ;;  %4659 = vmatprep.mubr.bf16.mxu0 %v25374_v52  ;;  %v20950_v46 = vld [vmem:[#allocation7 + $0x800] ss:$20 sps:$4 sm:$0xff]  }
 0x495   :  { %17034 = vmatmul.mubr.msk.bf16.gmra.mrb[68].mxu1 %vm1857_vm4, %v22655_v21  ;;  %17063 = vmatmul.mubr.msk.bf16.gmra.mrb[148].mxu0 %vm1857_vm4, %v22755_v39 }
 0x496   :  { %4103 = vmatprep.mubr.bf16.mxu1 %v25374_v52  ;;  %4669 = vmatprep.mubr.bf16.mxu0 %v25374_v52 }
 0x49d   :  { %17035 = vmatmul.mubr.msk.bf16.gmra.mrb[72].mxu1 %vm1857_vm4, %v22652_v19  ;;  %17064 = vmatmul.mubr.msk.bf16.gmra.mrb[152].mxu0 %vm1857_vm4, %v22752_v38 }
 0x49e   :  { %4113 = vmatprep.mubr.bf16.mxu1 %v25374_v52  ;;  %4679 = vmatprep.mubr.bf16.mxu0 %v25374_v52 }
 0x4a5   :  { %17036 = vmatmul.mubr.msk.bf16.gmra.mrb[76].mxu1 %vm1857_vm4, %v22675_v60  ;;  %17065 = vmatmul.mubr.msk.bf16.gmra.mrb[156].mxu0 %vm1857_vm4, %v22775_v62 }
 0x4a6   :  { %4123 = vmatprep.mubr.bf16.mxu1 %v25374_v52  ;;  %4722 = vmatprep.mubr.bf16.mxu0 %v25374_v52 }
 0x4ad   :  { %17037 = vmatmul.mubr.msk.bf16.gmra.mrb[80].mxu1 %vm1857_vm4, %v22672_v57  ;;  %4723 = vmatmul.mubr.bf16.vlgmr.msra.gmra.mrb[200].mxu0 %v25374_v52 }
 0x4ae   :  { %4730 = vmatprep.mubr.bf16.mxu0 %v22589_v26  ;;  %4133 = vmatprep.mubr.bf16.mxu1 %v25374_v52  ;;  %v20901_v26 = vld [vmem:[#allocation7 + $0x6c0] ss:$20 sps:$4 sm:$0xff]  }
 0x4af   :  { %6184 = vmatpush1.bf16.msra.mxu0 %v20892_v55  ;;  %v20913_v55 = vld [vmem:[#allocation7 + $0x73c] ss:$20 sps:$4 sm:$0xff]  }
 0x4b0   :  { %6185 = vmatprep.subr.bf16.mxu0 %v20897_v58  ;;  %v20911_v58 = vld [vmem:[#allocation7 + $0x738] ss:$20 sps:$4 sm:$0xff]  }
 0x4b3   :  { %6186 = vmatpush1.bf16.msra.mxu0 %v20895_v16  ;;  %v20916_v16 = vld [vmem:[#allocation7 + $0x764] ss:$20 sps:$4 sm:$0xff]  }
 0x4b4   :  { %6187 = vmatprep.subr.bf16.mxu0 %v20900_v32  ;;  %v25417_v32 = vld [vmem:[#allocation26_spill] sm:$0xff] }
 0x4b5   :  { %17038 = vmatmul.mubr.msk.bf16.gmra.mrb[84].mxu1 %vm1857_vm4, %v22695_v30  ;;  %4731 = vmatmul.mubr.bf16.gmra.mrb[204].mxu0 %v22587_v22  ;;  %v20908_v22 = vld [vmem:[#allocation7 + $0x710] ss:$20 sps:$4 sm:$0xff]  }
 0x4b6   :  { %4738 = vmatprep.mubr.bf16.mxu0 %v22609_v6  ;;  %4143 = vmatprep.mubr.bf16.mxu1 %v25374_v52 }
 0x4b7   :  { %6188 = vmatpush1.bf16.msra.mxu0 %v20898_v51  ;;  %v20914_v51 = vld [vmem:[#allocation7 + $0x760] ss:$20 sps:$4 sm:$0xff]  }
 0x4b8   :  { %6189 = vmatprep.subr.bf16.mxu0 %v20903_v2  ;;  %v20925_v2 = vld [vmem:[#allocation7 + $0x78c] ss:$20 sps:$4 sm:$0xff]  }
 0x4bb   :  { %6190 = vmatpush1.bf16.msra.mxu0 %v20901_v26  ;;  %v20923_v26 = vld [vmem:[#allocation7 + $0x788] ss:$20 sps:$4 sm:$0xff]  }
 0x4bc   :  { %6191 = vmatprep.subr.bf16.mxu0 %v20907_v34  ;;  %v20934_v34 = vld [vmem:[#allocation7 + $0x7b4] ss:$20 sps:$4 sm:$0xff]  }
 0x4bd   :  { %17039 = vmatmul.mubr.msk.bf16.gmra.mrb[88].mxu1 %vm1857_vm4, %v22692_v9  ;;  %4739 = vmatmul.mubr.bf16.gmra.mrb[208].mxu0 %v22607_v61 }
 0x4be   :  { %4746 = vmatprep.mubr.bf16.mxu0 %v22629_v23  ;;  %4153 = vmatprep.mubr.bf16.mxu1 %v25374_v52 }
 0x4bf   :  { %6192 = vmatpush1.bf16.msra.mxu0 %v20905_v54  ;;  %v25418_v54 = vld [vmem:[#allocation25_spill] sm:$0xff] }
 0x4c0   :  { %6193 = vmatprep.subr.bf16.mxu0 %v20910_v27  ;;  %v25419_v27 = vld [vmem:[#allocation30_spill] sm:$0xff] }
 0x4c3   :  { %6194 = vmatpush1.bf16.msra.mxu0 %v20908_v22  ;;  %v20932_v22 = vld [vmem:[#allocation7 + $0x7b0] ss:$20 sps:$4 sm:$0xff]  }
 0x4c4   :  { %6195 = vmatprep.subr.bf16.mxu0 %v20913_v55  ;;  %v20943_v55 = vld [vmem:[#allocation7 + $0x7dc] ss:$20 sps:$4 sm:$0xff]  }
 0x4c5   :  { %17040 = vmatmul.mubr.msk.bf16.gmra.mrb[92].mxu1 %vm1857_vm4, %v25410_v0  ;;  %4747 = vmatmul.mubr.bf16.gmra.mrb[212].mxu0 %v22627_v63 }
 0x4c6   :  { %4754 = vmatprep.mubr.bf16.mxu0 %v25417_v32  ;;  %4163 = vmatprep.mubr.bf16.mxu1 %v25374_v52 }
 0x4c7   :  { %6196 = vmatpush1.bf16.msra.mxu0 %v20911_v58  ;;  %v20941_v58 = vld [vmem:[#allocation7 + $0x7d8] ss:$20 sps:$4 sm:$0xff]  }
 0x4c8   :  { %6197 = vmatprep.subr.bf16.mxu0 %v20916_v16  ;;  %v20952_v16 = vld [vmem:[#allocation7 + $0x804] ss:$20 sps:$4 sm:$0xff]  }
 0x4cb   :  { %6198 = vmatpush1.bf16.msra.mxu0 %v20914_v51  ;;  %v25420_v51 = vld [vmem:[#allocation29_spill] sm:$0xff] }
 0x4cc   :  { %6199 = vmatprep.subr.bf16.mxu0 %v20925_v2  ;;  %v25421_v2 = vld [vmem:[#allocation33_spill] sm:$0xff] }
 0x4cd   :  { %17041 = vmatmul.mubr.msk.bf16.gmra.mrb[96].mxu1 %vm1857_vm4, %v22712_v28  ;;  %4755 = vmatmul.mubr.bf16.gmra.mrb[216].mxu0 %v25418_v54 }
 0x4ce   :  { %4762 = vmatprep.mubr.bf16.mxu0 %v25419_v27  ;;  %4173 = vmatprep.mubr.bf16.mxu1 %v25374_v52 }
 0x4cf   :  { %6200 = vmatpush1.bf16.msra.mxu0 %v20923_v26  ;;  %v20961_v26 = vld [vmem:[#allocation7 + $0x82c] ss:$20 sps:$4 sm:$0xff]  }
 0x4d0   :  { %6201 = vmatprep.subr.bf16.mxu0 %v20934_v34  ;;  %v20959_v34 = vld [vmem:[#allocation7 + $0x828] ss:$20 sps:$4 sm:$0xff]  }
 0x4d3   :  { %6202 = vmatpush1.bf16.msra.mxu0 %v20932_v22  ;;  %v20970_v22 = vld [vmem:[#allocation7 + $0x854] ss:$20 sps:$4 sm:$0xff]  }
 0x4d4   :  { %6203 = vmatprep.subr.bf16.mxu0 %v20943_v55  ;;  %v25422_v55 = vld [vmem:[#allocation32_spill] sm:$0xff] }
 0x4d5   :  { %17042 = vmatmul.mubr.msk.bf16.gmra.mrb[100].mxu1 %vm1857_vm4, %v22735_v31  ;;  %4763 = vmatmul.mubr.bf16.gmra.mrb[220].mxu0 %v25420_v51 }
 0x4d6   :  { %4770 = vmatprep.mubr.bf16.mxu0 %v25421_v2  ;;  %4183 = vmatprep.mubr.bf16.mxu1 %v25374_v52 }
 0x4d7   :  { %6204 = vmatpush1.bf16.msra.mxu0 %v20941_v58  ;;  %v20979_v58 = vld [vmem:[#allocation7 + $0x87c] ss:$20 sps:$4 sm:$0xff]  }
 0x4d8   :  { %6205 = vmatprep.subr.bf16.mxu0 %v20952_v16  ;;  %v20977_v16 = vld [vmem:[#allocation7 + $0x878] ss:$20 sps:$4 sm:$0xff]  }
 0x4db   :  { %6206 = vmatpush1.bf16.msra.mxu0 %v20950_v46  ;;  %v20988_v46 = vld [vmem:[#allocation7 + $0x8a4] ss:$20 sps:$4 sm:$0xff]  }
 0x4dc   :  { %6207 = vmatprep.subr.bf16.mxu0 %v20961_v26  ;;  %v25424_v26 = vld [vmem:[#allocation34_spill] sm:$0xff] }
 0x4dd   :  { %17043 = vmatmul.mubr.msk.bf16.gmra.mrb[104].mxu1 %vm1857_vm4, %v22732_v24  ;;  %4771 = vmatmul.mubr.bf16.gmra.mrb[224].mxu0 %v25422_v55 }
 0x4de   :  { %4778 = vmatprep.mubr.bf16.mxu0 %v25423_v43  ;;  %4193 = vmatprep.mubr.bf16.mxu1 %v25374_v52 }
 0x4df   :  { %6208 = vmatpush1.bf16.msra.mxu0 %v20959_v34  ;;  %v20994_v34 = vld [vmem:[#allocation7 + $0x8cc] ss:$20 sps:$4 sm:$0xff]  }
 0x4e0   :  { %6209 = vmatprep.subr.bf16.mxu0 %v20970_v22  ;;  %v25427_v22 = vld [vmem:[#allocation38_spill] sm:$0xff] }
 0x4e3   :  { %6210 = vmatpush1.bf16.msra.mxu0 %v20968_v47  ;;  %v25426_v47 = vld [vmem:[#allocation39_spill] sm:$0xff] }
 0x4e4   :  { %6211 = vmatprep.subr.bf16.mxu0 %v20979_v58  ;;  %v25428_v58 = vld [vmem:[#allocation43_spill] sm:$0xff] }
 0x4e5   :  { %17044 = vmatmul.mubr.msk.bf16.gmra.mrb[108].mxu1 %vm1857_vm4, %v22755_v39  ;;  %4779 = vmatmul.mubr.bf16.gmra.mrb[228].mxu0 %v25424_v26 }
 0x4e6   :  { %4786 = vmatprep.mubr.bf16.mxu0 %v25425_v10  ;;  %4203 = vmatprep.mubr.bf16.mxu1 %v25374_v52 }
 0x4e7   :  { %6212 = vmatpush1.bf16.msra.mxu0 %v20977_v16  ;;  %v20922_v16 = vld [vmem:[#allocation7 + $0x66c] ss:$20 sps:$4 sm:$0xff]  }
 0x4e8   :  { %6213 = vmatprep.subr.bf16.mxu0 %v20988_v46  ;;  %v25429_v46 = vld [vmem:[#allocation42_spill] sm:$0xff] }
 0x4eb   :  { %6214 = vmatpush1.bf16.msra.mxu0 %v20986_v5  ;;  %v20917_v5 = vld [vmem:[#allocation7 + $0x640] ss:$20 sps:$4 sm:$0xff]  }
 0x4ec   :  { %6416 = vmatprep.subr.bf16.mxu0 %v20994_v34  ;;  %v25430_v34 = vld [vmem:[#allocation47_spill] sm:$0xff] }
 0x4ed   :  { %17045 = vmatmul.mubr.msk.bf16.gmra.mrb[112].mxu1 %vm1857_vm4, %v22752_v38  ;;  %4787 = vmatmul.mubr.bf16.gmra.mrb[232].mxu0 %v22728_v17 }
 0x4ee   :  { %4794 = vmatprep.mubr.bf16.mxu0 %v25426_v47  ;;  %4213 = vmatprep.mubr.bf16.mxu1 %v25374_v52 }
 0x4f5   :  { %17046 = vmatmul.mubr.msk.bf16.gmra.mrb[116].mxu1 %vm1857_vm4, %v22775_v62  ;;  %4795 = vmatmul.mubr.bf16.gmra.mrb[236].mxu0 %v25427_v22 }
 0x4f6   :  { %4802 = vmatprep.mubr.bf16.mxu0 %v25428_v58  ;;  %19299 = vmatprep.mubr.bf16.mxu1 %v25374_v52 }
 0x4fd   :  { %4803 = vmatmul.mubr.bf16.gmra.mrb[240].mxu0 %v25429_v46  ;;  %19300 = vmatmul.mubr.msk.bf16.vlgmr.msra.gmra.mrb[200].mxu1 %vm1857_vm4, %v22593_v25  ;;  %v20929_v25 = vld [vmem:[#allocation7 + $0x6b8] ss:$20 sps:$4 sm:$0xff]  }
 0x4fe   :  { %5718 = vmatpush1.bf16.msra.mxu1 %v20917_v5  ;;  %4810 = vmatprep.mubr.bf16.mxu0 %v25430_v34  ;;  %v20937_v5 = vld [vmem:[#allocation7 + $0x6e4] ss:$20 sps:$4 sm:$0xff]  }
 0x4ff   :  { %19303 = vmatprep.mubr.msk.bf16.mxu1 %vm1857_vm4, %v22591_v56  ;;  %5719 = vmatprep.subr.bf16.mxu1 %v20922_v16  ;;  %v20935_v16 = vld [vmem:[#allocation7 + $0x6e0] ss:$20 sps:$4 sm:$0xff]  }
 0x502   :  { %5720 = vmatpush1.bf16.msra.mxu1 %v20920_v20  ;;  %v20940_v20 = vld [vmem:[#allocation7 + $0x70c] ss:$20 sps:$4 sm:$0xff]  }
 0x503   :  { %5721 = vmatprep.subr.bf16.mxu1 %v20928_v49  ;;  %v25433_v49 = vld [vmem:[#allocation48_spill] sm:$0xff] }
 0x505   :  { %4811 = vmatmul.mubr.bf16.gmra.mrb[244].mxu0 %v25431_v14  ;;  %19304 = vmatmul.mubr.msk.bf16.gmra.mrb[204].mxu1 %vm1857_vm4, %v22614_v12  ;;  %v25436_v12 = vld [vmem:[#allocation53_spill] sm:$0xff] }
 0x506   :  { %4818 = vmatprep.mubr.bf16.mxu0 %v25432_v59  ;;  %19307 = vmatprep.mubr.msk.bf16.mxu1 %vm1857_vm4, %v22611_v7  ;;  %v20938_v7 = vld [vmem:[#allocation7 + $0x708] ss:$20 sps:$4 sm:$0xff]  }
 0x507   :  { %5722 = vmatpush1.bf16.msra.mxu1 %v20926_v50  ;;  %v20946_v50 = vld [vmem:[#allocation7 + $0x734] ss:$20 sps:$4 sm:$0xff]  }
 0x508   :  { %5723 = vmatprep.subr.bf16.mxu1 %v20931_v15  ;;  %v20944_v15 = vld [vmem:[#allocation7 + $0x730] ss:$20 sps:$4 sm:$0xff]  }
 0x50b   :  { %5724 = vmatpush1.bf16.msra.mxu1 %v20929_v25  ;;  %v20949_v25 = vld [vmem:[#allocation7 + $0x75c] ss:$20 sps:$4 sm:$0xff]  }
 0x50c   :  { %5725 = vmatprep.subr.bf16.mxu1 %v20937_v5  ;;  %v25435_v5 = vld [vmem:[#allocation50_spill] sm:$0xff] }
 0x50d   :  { %4819 = vmatmul.mubr.bf16.gmra.mrb[248].mxu0 %v25433_v49  ;;  %19308 = vmatmul.mubr.msk.bf16.gmra.mrb[208].mxu1 %vm1857_vm4, %v22634_v4  ;;  %v25438_v4 = vld [vmem:[#allocation55_spill] sm:$0xff] }
 0x50e   :  { %4826 = vmatprep.mubr.bf16.mxu0 %v25434_v36  ;;  %19311 = vmatprep.mubr.msk.bf16.mxu1 %vm1857_vm4, %v22631_v37  ;;  %v20947_v37 = vld [vmem:[#allocation7 + $0x758] ss:$20 sps:$4 sm:$0xff]  }
 0x50f   :  { %5726 = vmatpush1.bf16.msra.mxu1 %v20935_v16  ;;  %v20955_v16 = vld [vmem:[#allocation7 + $0x784] ss:$20 sps:$4 sm:$0xff]  }
 0x510   :  { %5727 = vmatprep.subr.bf16.mxu1 %v20940_v20  ;;  %v20953_v20 = vld [vmem:[#allocation7 + $0x780] ss:$20 sps:$4 sm:$0xff]  }
 0x513   :  { %5728 = vmatpush1.bf16.msra.mxu1 %v20938_v7  ;;  %v20958_v7 = vld [vmem:[#allocation7 + $0x7ac] ss:$20 sps:$4 sm:$0xff]  }
 0x514   :  { %5729 = vmatprep.subr.bf16.mxu1 %v20946_v50  ;;  %v25437_v50 = vld [vmem:[#allocation52_spill] sm:$0xff] }
 0x515   :  { %4827 = vmatmul.mubr.bf16.gmra.mrb[252].mxu0 %v25435_v5  ;;  %19312 = vmatmul.mubr.msk.bf16.gmra.mrb[212].mxu1 %vm1857_vm4, %v22655_v21  ;;  %v25440_v21 = vld [vmem:[#allocation57_spill] sm:$0xff] }
 0x516   :  { %4834 = vmatprep.mubr.bf16.mxu0 %v25436_v12  ;;  %19315 = vmatprep.mubr.msk.bf16.mxu1 %vm1857_vm4, %v22652_v19  ;;  %v20956_v19 = vld [vmem:[#allocation7 + $0x7a8] ss:$20 sps:$4 sm:$0xff]  }
 0x517   :  { %5730 = vmatpush1.bf16.msra.mxu1 %v20944_v15  ;;  %v20964_v15 = vld [vmem:[#allocation7 + $0x7d4] ss:$20 sps:$4 sm:$0xff]  }
 0x518   :  { %5731 = vmatprep.subr.bf16.mxu1 %v20949_v25  ;;  %v20962_v25 = vld [vmem:[#allocation7 + $0x7d0] ss:$20 sps:$4 sm:$0xff]  }
 0x51b   :  { %5732 = vmatpush1.bf16.msra.mxu1 %v20947_v37  ;;  %v20967_v37 = vld [vmem:[#allocation7 + $0x7fc] ss:$20 sps:$4 sm:$0xff]  }
 0x51c   :  { %5733 = vmatprep.subr.bf16.mxu1 %v20955_v16  ;;  %v25439_v16 = vld [vmem:[#allocation54_spill] sm:$0xff] }
 0x51d   :  { %4835 = vmatmul.mubr.bf16.gmra.mrb[0].mxu0 %v25437_v50  ;;  %19316 = vmatmul.mubr.msk.bf16.gmra.mrb[216].mxu1 %vm1857_vm4, %v22675_v60 }
 0x51e   :  { %4842 = vmatprep.mubr.bf16.mxu0 %v25438_v4  ;;  %19319 = vmatprep.mubr.msk.bf16.mxu1 %vm1857_vm4, %v22672_v57  ;;  %v20965_v57 = vld [vmem:[#allocation7 + $0x7f8] ss:$20 sps:$4 sm:$0xff]  }
 0x51f   :  { %5734 = vmatpush1.bf16.msra.mxu1 %v20953_v20  ;;  %v20973_v20 = vld [vmem:[#allocation7 + $0x824] ss:$20 sps:$4 sm:$0xff]  }
 0x520   :  { %5735 = vmatprep.subr.bf16.mxu1 %v20958_v7  ;;  %v20971_v7 = vld [vmem:[#allocation7 + $0x820] ss:$20 sps:$4 sm:$0xff]  }
 0x523   :  { %5736 = vmatpush1.bf16.msra.mxu1 %v20956_v19  ;;  %v20976_v19 = vld [vmem:[#allocation7 + $0x84c] ss:$20 sps:$4 sm:$0xff]  }
 0x524   :  { %5737 = vmatprep.subr.bf16.mxu1 %v20964_v15  ;;  %v20974_v15 = vld [vmem:[#allocation7 + $0x848] ss:$20 sps:$4 sm:$0xff]  }
 0x525   :  { %4843 = vmatmul.mubr.bf16.gmra.mrb[4].mxu0 %v25439_v16  ;;  %19320 = vmatmul.mubr.msk.bf16.gmra.mrb[220].mxu1 %vm1857_vm4, %v22695_v30 }
 0x526   :  { %4850 = vmatprep.mubr.bf16.mxu0 %v25440_v21  ;;  %19323 = vmatprep.mubr.msk.bf16.mxu1 %vm1857_vm4, %v22692_v9 }
 0x527   :  { %5738 = vmatpush1.bf16.msra.mxu1 %v20962_v25  ;;  %v20982_v25 = vld [vmem:[#allocation7 + $0x874] ss:$20 sps:$4 sm:$0xff]  }
 0x528   :  { %5739 = vmatprep.subr.bf16.mxu1 %v20967_v37  ;;  %v20980_v37 = vld [vmem:[#allocation7 + $0x870] ss:$20 sps:$4 sm:$0xff]  }
 0x52b   :  { %5740 = vmatpush1.bf16.msra.mxu1 %v20965_v57  ;;  %v20985_v57 = vld [vmem:[#allocation7 + $0x89c] ss:$20 sps:$4 sm:$0xff]  }
 0x52c   :  { %5741 = vmatprep.subr.bf16.mxu1 %v20973_v20  ;;  %v20983_v20 = vld [vmem:[#allocation7 + $0x898] ss:$20 sps:$4 sm:$0xff]  }
 0x52d   :  { %4851 = vmatmul.mubr.bf16.gmra.mrb[8].mxu0 %v25381_v53  ;;  %19324 = vmatmul.mubr.msk.bf16.gmra.mrb[224].mxu1 %vm1857_vm4, %v25410_v0 }
 0x52e   :  { %4858 = vmatprep.mubr.bf16.mxu0 %v25382_v33  ;;  %19327 = vmatprep.mubr.msk.bf16.mxu1 %vm1857_vm4, %v22712_v28 }
 0x52f   :  { %5742 = vmatpush1.bf16.msra.mxu1 %v20971_v7  ;;  %v20991_v7 = vld [vmem:[#allocation7 + $0x8c4] ss:$20 sps:$4 sm:$0xff]  }
 0x530   :  { %5743 = vmatprep.subr.bf16.mxu1 %v20976_v19  ;;  %v20989_v19 = vld [vmem:[#allocation7 + $0x8c0] ss:$20 sps:$4 sm:$0xff]  }
 0x533   :  { %5744 = vmatpush1.bf16.msra.mxu1 %v20974_v15  ;;  %v20992_v15 = vld [vmem:[#allocation7 + $0x8c8] ss:$20 sps:$4 sm:$0xff]  }
 0x534   :  { %5745 = vmatprep.subr.bf16.mxu1 %v20982_v25  ;;  %v20997_v25 = vld [vmem:[#allocation7 + $0x8ec] ss:$20 sps:$4 sm:$0xff]  }
 0x535   :  { %4859 = vmatmul.mubr.bf16.gmra.mrb[12].mxu0 %v25383_v3  ;;  %19328 = vmatmul.mubr.msk.bf16.gmra.mrb[228].mxu1 %vm1857_vm4, %v22735_v31 }
 0x536   :  { %4866 = vmatprep.mubr.bf16.mxu0 %v25384_v44  ;;  %19331 = vmatprep.mubr.msk.bf16.mxu1 %vm1857_vm4, %v22732_v24 }
 0x537   :  { %5746 = vmatpush1.bf16.msra.mxu1 %v20980_v37  ;;  %v21000_v37 = vld [vmem:[#allocation7 + $0x8f4] ss:$20 sps:$4 sm:$0xff]  }
 0x538   :  { %5747 = vmatprep.subr.bf16.mxu1 %v20985_v57  ;;  %v20995_v57 = vld [vmem:[#allocation7 + $0x8e8] ss:$20 sps:$4 sm:$0xff]  }
 0x53b   :  { %5748 = vmatpush1.bf16.msra.mxu1 %v20983_v20  ;;  %v20998_v20 = vld [vmem:[#allocation7 + $0x8f0] ss:$20 sps:$4 sm:$0xff]  }
 0x53c   :  { %5950 = vmatprep.subr.bf16.mxu1 %v20991_v7  ;;  %v21003_v7 = vld [vmem:[#allocation7 + $0x914] ss:$20 sps:$4 sm:$0xff]  }
 0x53d   :  { %4867 = vmatmul.mubr.bf16.gmra.mrb[16].mxu0 %v22868_v11  ;;  %19332 = vmatmul.mubr.msk.bf16.gmra.mrb[232].mxu1 %vm1857_vm4, %v22755_v39  ;;  %v21009_v39 = vld [vmem:[#allocation7 + $0x93c] ss:$20 sps:$4 sm:$0xff]  }
 0x53e   :  { %4874 = vmatprep.mubr.bf16.mxu0 %v22882_v1  ;;  %19335 = vmatprep.mubr.msk.bf16.mxu1 %vm1857_vm4, %v22752_v38  ;;  %v21004_v38 = vld [vmem:[#allocation7 + $0x918] ss:$20 sps:$4 sm:$0xff]  }
 0x545   :  { %4875 = vmatmul.mubr.bf16.gmra.mrb[20].mxu0 %v22880_v8  ;;  %19336 = vmatmul.mubr.msk.bf16.gmra.mrb[236].mxu1 %vm1857_vm4, %v22775_v62  ;;  %v21001_v62 = vld [vmem:[#allocation7 + $0x910] ss:$20 sps:$4 sm:$0xff]  }
 0x546   :  { %5749 = vmatprep.mubr.bf16.mxu1 %v22609_v6  ;;  %6215 = vmatprep.mubr.bf16.mxu0 %v22609_v6  ;;  %v21006_v6 = vld [vmem:[#allocation7 + $0x91c] ss:$20 sps:$4 sm:$0xff]  }
 0x54d   :  { %5750 = vmatmul.mubr.bf16.vlgmr.msra.gmra.mrb[40].mxu1 %v22607_v61  ;;  %6216 = vmatmul.mubr.bf16.vlgmr.msra.gmra.mrb[80].mxu0 %v22607_v61  ;;  %v21012_v61 = vld [vmem:[#allocation7 + $0x944] ss:$20 sps:$4 sm:$0xff]  }
 0x54e   :  { %5951 = vmatpush1.bf16.msra.mxu1 %v20989_v19  ;;  %5759 = vmatprep.mubr.bf16.mxu1 %v22629_v23  ;;  %v21007_v19 = vld [vmem:[#allocation7 + $0x938] ss:$20 sps:$4 sm:$0xff]  }
 0x54f   :  { %6225 = vmatprep.mubr.bf16.mxu0 %v22629_v23  ;;  %6417 = vmatpush1.bf16.msra.mxu0 %v20992_v15  ;;  %v21010_v15 = vld [vmem:[#allocation7 + $0x940] ss:$20 sps:$4 sm:$0xff]  }
 0x550   :  { %5952 = vmatprep.subr.bf16.mxu1 %v20997_v25  ;;  %6418 = vmatprep.subr.bf16.mxu0 %v21000_v37  ;;  %v25442_v37 = vld [vmem:[#allocation66_spill] sm:$0xff] }
 0x552   :  { %5953 = vmatpush1.bf16.msra.mxu1 %v20995_v57 }
 0x553   :  { %6419 = vmatpush1.bf16.msra.mxu0 %v20998_v20  ;;  %5954 = vmatprep.subr.bf16.mxu1 %v21003_v7 }
 0x554   :  { %6420 = vmatprep.subr.bf16.mxu0 %v21006_v6 }
 0x555   :  { %5760 = vmatmul.mubr.bf16.gmra.mrb[44].mxu1 %v22627_v63  ;;  %6226 = vmatmul.mubr.bf16.gmra.mrb[84].mxu0 %v22627_v63 }
 0x556   :  { %5769 = vmatprep.mubr.bf16.mxu1 %v25417_v32  ;;  %6235 = vmatprep.mubr.bf16.mxu0 %v25417_v32 }
 0x557   :  { %5955 = vmatpush1.bf16.msra.mxu1 %v21001_v62  ;;  %6421 = vmatpush1.bf16.msra.mxu0 %v21004_v38  ;;  %v25441_v38 = vld [vmem:[#allocation65_spill] sm:$0xff] }
 0x558   :  { %5956 = vmatprep.subr.bf16.mxu1 %v21009_v39  ;;  %6422 = vmatprep.subr.bf16.mxu0 %v21012_v61  ;;  %v23593_v61 = vld [vmem:[#allocation7 + $0x8d0] ss:$20 sps:$4 sm:$0xff]  }
 0x55b   :  { %5957 = vmatpush1.bf16.msra.mxu1 %v21007_v19  ;;  %6423 = vmatpush1.bf16.msra.mxu0 %v21010_v15  ;;  %v25443_v19 = vld [vmem:[#allocation67_spill] sm:$0xff] }
 0x55c   :  { %6649 = vmatprep.subr.bf16.mxu1 %v25374_v52  ;;  %19339 = vmatprep.subr.bf16.mxu0 %v23593_v61 }
 0x55d   :  { %5770 = vmatmul.mubr.bf16.gmra.mrb[48].mxu1 %v25418_v54  ;;  %6236 = vmatmul.mubr.bf16.gmra.mrb[88].mxu0 %v25418_v54 }
 0x55e   :  { %5779 = vmatprep.mubr.bf16.mxu1 %v25419_v27  ;;  %6245 = vmatprep.mubr.bf16.mxu0 %v25419_v27 }
 0x565   :  { %5780 = vmatmul.mubr.bf16.gmra.mrb[52].mxu1 %v25420_v51  ;;  %6246 = vmatmul.mubr.bf16.gmra.mrb[92].mxu0 %v25420_v51 }
 0x566   :  { %5789 = vmatprep.mubr.bf16.mxu1 %v25421_v2  ;;  %6255 = vmatprep.mubr.bf16.mxu0 %v25421_v2 }
 0x56d   :  { %5790 = vmatmul.mubr.bf16.gmra.mrb[56].mxu1 %v25422_v55  ;;  %6256 = vmatmul.mubr.bf16.gmra.mrb[96].mxu0 %v25422_v55 }
 0x56e   :  { %5799 = vmatprep.mubr.bf16.mxu1 %v25423_v43  ;;  %6265 = vmatprep.mubr.bf16.mxu0 %v25423_v43 }
 0x575   :  { %5800 = vmatmul.mubr.bf16.gmra.mrb[60].mxu1 %v25424_v26  ;;  %6266 = vmatmul.mubr.bf16.gmra.mrb[100].mxu0 %v25424_v26 }
 0x576   :  { %5809 = vmatprep.mubr.bf16.mxu1 %v25425_v10  ;;  %6275 = vmatprep.mubr.bf16.mxu0 %v25425_v10 }
 0x57d   :  { %5810 = vmatmul.mubr.bf16.gmra.mrb[64].mxu1 %v22728_v17  ;;  %6276 = vmatmul.mubr.bf16.gmra.mrb[104].mxu0 %v22728_v17 }
 0x57e   :  { %5819 = vmatprep.mubr.bf16.mxu1 %v25426_v47  ;;  %6285 = vmatprep.mubr.bf16.mxu0 %v25426_v47 }
 0x580   :  { %v4724_v6 = vpop.f32.mrb[200].mxu0 }
 0x581   :  { %v23605_v39 = vadd.f32 %v4724_v6, %v25441_v38  ;;  %v4726_v62 = vpop.f32.mrb[201].mxu0 }
 0x582   :  { %v4727_v25 = vpop.f32.mrb[202].mxu0  ;;  %v25444_v62 = vld [vmem:[#allocation68_spill] sm:$0xff] }
 0x583   :  { %v23608_v57 = vadd.f32 %v4727_v25, %v25442_v37  ;;  %v4729_v20 = vpop.f32.mrb[203].mxu0 }
 0x584   :  { %v25445_v20 = vld [vmem:[#allocation69_spill] sm:$0xff] }
 0x585   :  { %5820 = vmatmul.mubr.bf16.gmra.mrb[68].mxu1 %v25427_v22  ;;  %6286 = vmatmul.mubr.bf16.gmra.mrb[108].mxu0 %v25427_v22 }
 0x586   :  { %5829 = vmatprep.mubr.bf16.mxu1 %v25428_v58  ;;  %6295 = vmatprep.mubr.bf16.mxu0 %v25428_v58 }
 0x588   :  { %v4732_v7 = vpop.f32.mrb[204].mxu0 }
 0x589   :  { %v23615_v15 = vadd.f32 %v4732_v7, %v25443_v19  ;;  %v4734_v6 = vpop.f32.mrb[205].mxu0 }
 0x58a   :  { %v4735_v38 = vpop.f32.mrb[206].mxu0  ;;  %v25446_v6 = vld [vmem:[#allocation70_spill] sm:$0xff] }
 0x58b   :  { %v23618_v47 = vadd.f32 %v4735_v38, %v25444_v62  ;;  %v4737_v25 = vpop.f32.mrb[207].mxu0 }
 0x58c   :  { %v25447_v25 = vld [vmem:[#allocation71_spill] sm:$0xff] }
 0x58d   :  { %5830 = vmatmul.mubr.bf16.gmra.mrb[72].mxu1 %v25429_v46  ;;  %6296 = vmatmul.mubr.bf16.gmra.mrb[112].mxu0 %v25429_v46 }
 0x58e   :  { %5839 = vmatprep.mubr.bf16.mxu1 %v25430_v34  ;;  %6305 = vmatprep.mubr.bf16.mxu0 %v25430_v34 }
 0x590   :  { %v4740_v37 = vpop.f32.mrb[208].mxu0 }
 0x591   :  { %v23625_v58 = vadd.f32 %v4740_v37, %v25445_v20  ;;  %v4742_v7 = vpop.f32.mrb[209].mxu0 }
 0x592   :  { %v4743_v19 = vpop.f32.mrb[210].mxu0  ;;  %v25448_v7 = vld [vmem:[#allocation72_spill] sm:$0xff] }
 0x593   :  { %v23628_v22 = vadd.f32 %v4743_v19, %v25446_v6  ;;  %v4745_v38 = vpop.f32.mrb[211].mxu0 }
 0x594   :  { %v25449_v38 = vld [vmem:[#allocation73_spill] sm:$0xff] }
 0x595   :  { %5840 = vmatmul.mubr.bf16.gmra.mrb[76].mxu1 %v25431_v14  ;;  %6306 = vmatmul.mubr.bf16.gmra.mrb[116].mxu0 %v25431_v14 }
 0x596   :  { %5849 = vmatprep.mubr.bf16.mxu1 %v25432_v59  ;;  %6315 = vmatprep.mubr.bf16.mxu0 %v25432_v59 }
 0x598   :  { %v4748_v62 = vpop.f32.mrb[212].mxu0 }
 0x599   :  { %v23635_v34 = vadd.f32 %v4748_v62, %v25447_v25  ;;  %v4750_v37 = vpop.f32.mrb[213].mxu0 }
 0x59a   :  { %v4751_v20 = vpop.f32.mrb[214].mxu0  ;;  %v25450_v37 = vld [vmem:[#allocation74_spill] sm:$0xff] }
 0x59b   :  { %v23638_v46 = vadd.f32 %v4751_v20, %v25448_v7  ;;  %v4753_v19 = vpop.f32.mrb[215].mxu0 }
 0x59c   :  { %v25451_v19 = vld [vmem:[#allocation75_spill] sm:$0xff] }
 0x59d   :  { %5850 = vmatmul.mubr.bf16.gmra.mrb[80].mxu1 %v25433_v49  ;;  %6316 = vmatmul.mubr.bf16.gmra.mrb[120].mxu0 %v25433_v49 }
 0x59e   :  { %5859 = vmatprep.mubr.bf16.mxu1 %v25434_v36  ;;  %6325 = vmatprep.mubr.bf16.mxu0 %v25434_v36 }
 0x5a0   :  { %v4756_v6 = vpop.f32.mrb[216].mxu0 }
 0x5a1   :  { %v23645_v59 = vadd.f32 %v4756_v6, %v25449_v38  ;;  %v4758_v62 = vpop.f32.mrb[217].mxu0 }
 0x5a2   :  { %v4759_v25 = vpop.f32.mrb[218].mxu0  ;;  %v25452_v62 = vld [vmem:[#allocation76_spill] sm:$0xff] }
 0x5a3   :  { %v23648_v14 = vadd.f32 %v4759_v25, %v25450_v37  ;;  %v4761_v20 = vpop.f32.mrb[219].mxu0 }
 0x5a4   :  { %v25453_v20 = vld [vmem:[#allocation77_spill] sm:$0xff] }
 0x5a5   :  { %5860 = vmatmul.mubr.bf16.gmra.mrb[84].mxu1 %v25435_v5  ;;  %6326 = vmatmul.mubr.bf16.gmra.mrb[124].mxu0 %v25435_v5 }
 0x5a6   :  { %5869 = vmatprep.mubr.bf16.mxu1 %v25436_v12  ;;  %6335 = vmatprep.mubr.bf16.mxu0 %v25436_v12 }
 0x5a8   :  { %v4764_v7 = vpop.f32.mrb[220].mxu0 }
 0x5a9   :  { %v23655_v36 = vadd.f32 %v4764_v7, %v25451_v19  ;;  %v4766_v6 = vpop.f32.mrb[221].mxu0 }
 0x5aa   :  { %v4767_v38 = vpop.f32.mrb[222].mxu0  ;;  %v25454_v6 = vld [vmem:[#allocation78_spill] sm:$0xff] }
 0x5ab   :  { %v23658_v49 = vadd.f32 %v4767_v38, %v25452_v62  ;;  %v4769_v25 = vpop.f32.mrb[223].mxu0 }
 0x5ac   :  { %v25455_v25 = vld [vmem:[#allocation79_spill] sm:$0xff] }
 0x5ad   :  { %5870 = vmatmul.mubr.bf16.gmra.mrb[88].mxu1 %v25437_v50  ;;  %6336 = vmatmul.mubr.bf16.gmra.mrb[128].mxu0 %v25437_v50 }
 0x5ae   :  { %5879 = vmatprep.mubr.bf16.mxu1 %v25438_v4  ;;  %6345 = vmatprep.mubr.bf16.mxu0 %v25438_v4 }
 0x5b0   :  { %v4772_v37 = vpop.f32.mrb[224].mxu0 }
 0x5b1   :  { %v23665_v12 = vadd.f32 %v4772_v37, %v25453_v20  ;;  %v4774_v7 = vpop.f32.mrb[225].mxu0 }
 0x5b2   :  { %v4775_v19 = vpop.f32.mrb[226].mxu0  ;;  %v25456_v7 = vld [vmem:[#allocation80_spill] sm:$0xff] }
 0x5b3   :  { %v23668_v5 = vadd.f32 %v4775_v19, %v25454_v6  ;;  %v4777_v38 = vpop.f32.mrb[227].mxu0 }
 0x5b4   :  { %v25457_v38 = vld [vmem:[#allocation81_spill] sm:$0xff] }
 0x5b5   :  { %5880 = vmatmul.mubr.bf16.gmra.mrb[92].mxu1 %v25439_v16  ;;  %6346 = vmatmul.mubr.bf16.gmra.mrb[132].mxu0 %v25439_v16 }
 0x5b6   :  { %5889 = vmatprep.mubr.bf16.mxu1 %v25440_v21  ;;  %6355 = vmatprep.mubr.bf16.mxu0 %v25440_v21 }
 0x5b8   :  { %v4780_v62 = vpop.f32.mrb[228].mxu0 }
 0x5b9   :  { %v23675_v4 = vadd.f32 %v4780_v62, %v25455_v25  ;;  %v4782_v37 = vpop.f32.mrb[229].mxu0 }
 0x5ba   :  { %v4783_v20 = vpop.f32.mrb[230].mxu0  ;;  %v25458_v37 = vld [vmem:[#allocation82_spill] sm:$0xff] }
 0x5bb   :  { %v23678_v50 = vadd.f32 %v4783_v20, %v25456_v7  ;;  %v4785_v19 = vpop.f32.mrb[231].mxu0 }
 0x5bd   :  { %5890 = vmatmul.mubr.bf16.gmra.mrb[96].mxu1 %v25381_v53  ;;  %6356 = vmatmul.mubr.bf16.gmra.mrb[136].mxu0 %v25381_v53 }
 0x5be   :  { %5899 = vmatprep.mubr.bf16.mxu1 %v25382_v33  ;;  %6365 = vmatprep.mubr.bf16.mxu0 %v25382_v33 }
 0x5c0   :  { %v4788_v6 = vpop.f32.mrb[232].mxu0 }
 0x5c1   :  { %v23685_v21 = vadd.f32 %v4788_v6, %v25457_v38  ;;  %v4790_v62 = vpop.f32.mrb[233].mxu0 }
 0x5c2   :  { %v4791_v25 = vpop.f32.mrb[234].mxu0  ;;  %v25459_v62 = vld [vmem:[#allocation83_spill] sm:$0xff] }
 0x5c3   :  { %v23688_v16 = vadd.f32 %v4791_v25, %v25458_v37  ;;  %v4793_v20 = vpop.f32.mrb[235].mxu0 }
 0x5c5   :  { %5900 = vmatmul.mubr.bf16.gmra.mrb[100].mxu1 %v25383_v3  ;;  %6366 = vmatmul.mubr.bf16.gmra.mrb[140].mxu0 %v25383_v3 }
 0x5c6   :  { %5909 = vmatprep.mubr.bf16.mxu1 %v25384_v44  ;;  %6375 = vmatprep.mubr.bf16.mxu0 %v25384_v44 }
 0x5c8   :  { %v4796_v7 = vpop.f32.mrb[236].mxu0 }
 0x5c9   :  { %v23695_v19 = vadd.f32 %v4796_v7, %v23308_v41  ;;  %v4798_v6 = vpop.f32.mrb[237].mxu0 }
 0x5ca   :  { %v4799_v38 = vpop.f32.mrb[238].mxu0 }
 0x5cb   :  { %v23698_v33 = vadd.f32 %v4799_v38, %v25459_v62  ;;  %v4801_v25 = vpop.f32.mrb[239].mxu0 }
 0x5cd   :  { %5910 = vmatmul.mubr.bf16.gmra.mrb[104].mxu1 %v22868_v11  ;;  %6376 = vmatmul.mubr.bf16.gmra.mrb[144].mxu0 %v22868_v11 }
 0x5ce   :  { %5919 = vmatprep.mubr.bf16.mxu1 %v22882_v1  ;;  %6385 = vmatprep.mubr.bf16.mxu0 %v22882_v1 }
 0x5d0   :  { %v4804_v37 = vpop.f32.mrb[240].mxu0  ;;  %v19301_v20 = vpop.f32.mrb[200].mxu1 }
 0x5d1   :  { %v23705_v44 = vadd.f32 %v4804_v37, %v23327_v45  ;;  %v23708_v41 = vadd.f32 %v19301_v20, %v23615_v15  ;;  %v4806_v7 = vpop.f32.mrb[241].mxu0  ;;  %v4917_v6 = vpop.f32.mrb[201].mxu1  ;;  %v25461_v15 = vld [vmem:[#allocation64_spill] sm:$0xff] }
 0x5d2   :  { %v23711_v38 = vadd.f32 %v4917_v6, %v23605_v39  ;;  %v4807_v62 = vpop.f32.mrb[242].mxu0  ;;  %v19302_v25 = vpop.f32.mrb[202].mxu1 }
 0x5d3   :  { %v23714_v11 = vadd.f32 %v4807_v62, %v23330_v35  ;;  %v23717_v1 = vadd.f32 %v19302_v25, %v23618_v47  ;;  %v4809_v3 = vpop.f32.mrb[243].mxu0  ;;  %v4920_v53 = vpop.f32.mrb[203].mxu1 }
 0x5d4   :  { %v23720_v45 = vadd.f32 %v4920_v53, %v23608_v57 }
 0x5d5   :  { %25460 = vst [vmem:[#allocation26_spill] sm:$0xff] %v23717_v1  ;;  %5920 = vmatmul.mubr.bf16.gmra.mrb[108].mxu1 %v22880_v8  ;;  %6386 = vmatmul.mubr.bf16.gmra.mrb[148].mxu0 %v22880_v8 }
 0x5d6   :  { %5929 = vmatprep.mubr.bf16.mxu1 %v25461_v15  ;;  %6395 = vmatprep.mubr.bf16.mxu0 %v25461_v15 }
 0x5d8   :  { %v4812_v39 = vpop.f32.mrb[244].mxu0  ;;  %v19305_v37 = vpop.f32.mrb[204].mxu1 }
 0x5d9   :  { %v23727_v35 = vadd.f32 %v4812_v39, %v23340_v18  ;;  %v23730_v47 = vadd.f32 %v19305_v37, %v23635_v34  ;;  %v4814_v3 = vpop.f32.mrb[245].mxu0  ;;  %v4933_v20 = vpop.f32.mrb[205].mxu1  ;;  %v25463_v34 = vld [vmem:[#allocation63_spill] sm:$0xff] }
 0x5da   :  { %v23733_v53 = vadd.f32 %v4933_v20, %v23625_v58  ;;  %v4815_v57 = vpop.f32.mrb[246].mxu0  ;;  %v19306_v7 = vpop.f32.mrb[206].mxu1 }
 0x5db   :  { %v23736_v6 = vadd.f32 %v4815_v57, %v23343_v48  ;;  %v23739_v62 = vadd.f32 %v19306_v7, %v23638_v46  ;;  %v4817_v25 = vpop.f32.mrb[247].mxu0  ;;  %v4936_v1 = vpop.f32.mrb[207].mxu1 }
 0x5dc   :  { %v23742_v18 = vadd.f32 %v4936_v1, %v23628_v22 }
 0x5dd   :  { %25462 = vst [vmem:[#allocation25_spill] sm:$0xff] %v23739_v62  ;;  %5930 = vmatmul.mubr.bf16.gmra.mrb[112].mxu1 %v25463_v34  ;;  %6396 = vmatmul.mubr.bf16.gmra.mrb[152].mxu0 %v25463_v34 }
 0x5de   :  { %5939 = vmatprep.mubr.bf16.mxu1 %v25374_v52  ;;  %6405 = vmatprep.mubr.bf16.mxu0 %v25374_v52 }
 0x5e0   :  { %v4820_v58 = vpop.f32.mrb[248].mxu0  ;;  %v19309_v39 = vpop.f32.mrb[208].mxu1 }
 0x5e1   :  { %v23749_v48 = vadd.f32 %v4820_v58, %v23351_v13  ;;  %v23752_v46 = vadd.f32 %v19309_v39, %v23655_v36  ;;  %v4822_v37 = vpop.f32.mrb[249].mxu0  ;;  %v4949_v3 = vpop.f32.mrb[209].mxu1 }
 0x5e2   :  { %v23755_v1 = vadd.f32 %v4949_v3, %v23645_v59  ;;  %v4823_v22 = vpop.f32.mrb[250].mxu0  ;;  %v19310_v20 = vpop.f32.mrb[210].mxu1  ;;  %v21013_v3 = vld [vmem:[#allocation7 + $0x650] ss:$20 sps:$4 sm:$0xff]  }
 0x5e3   :  { %v23758_v57 = vadd.f32 %v4823_v22, %v23354_v42  ;;  %v23761_v7 = vadd.f32 %v19310_v20, %v23658_v49  ;;  %v4825_v25 = vpop.f32.mrb[251].mxu0  ;;  %v4952_v62 = vpop.f32.mrb[211].mxu1 }
 0x5e4   :  { %v23764_v13 = vadd.f32 %v4952_v62, %v23648_v14 }
 0x5e5   :  { %5940 = vmatmul.mubr.bf16.gmra.mrb[116].mxu1 %v25374_v52  ;;  %6406 = vmatmul.mubr.bf16.gmra.mrb[156].mxu0 %v25374_v52 }
 0x5e6   :  { %5982 = vmatprep.mubr.bf16.mxu1 %v25374_v52  ;;  %6448 = vmatprep.mubr.bf16.mxu0 %v25374_v52 }
 0x5e8   :  { %v4828_v36 = vpop.f32.mrb[252].mxu0  ;;  %v19313_v59 = vpop.f32.mrb[212].mxu1 }
 0x5e9   :  { %v23771_v42 = vadd.f32 %v4828_v36, %v23362_v40  ;;  %v23774_v49 = vadd.f32 %v19313_v59, %v23675_v4  ;;  %v4830_v58 = vpop.f32.mrb[253].mxu0  ;;  %v4965_v39 = vpop.f32.mrb[213].mxu1  ;;  %v21019_v4 = vld [vmem:[#allocation7 + $0x8f8] ss:$20 sps:$4 sm:$0xff]  }
 0x5ea   :  { %v23777_v14 = vadd.f32 %v4965_v39, %v23665_v12  ;;  %v4831_v62 = vpop.f32.mrb[254].mxu0  ;;  %v19314_v37 = vpop.f32.mrb[214].mxu1  ;;  %v21015_v12 = vld [vmem:[#allocation7 + $0x678] ss:$20 sps:$4 sm:$0xff]  }
 0x5eb   :  { %25464 = vst [vmem:[#allocation30_spill] sm:$0xff] %v23774_v49  ;;  %v23780_v22 = vadd.f32 %v4831_v62, %v23365_v29  ;;  %v23783_v20 = vadd.f32 %v19314_v37, %v23678_v50  ;;  %v4833_v25 = vpop.f32.mrb[255].mxu0  ;;  %v4968_v40 = vpop.f32.mrb[215].mxu1  ;;  %v25467_v59 = vld [vmem:[#allocation84_spill] sm:$0xff] }
 0x5ec   :  { %v23786_v36 = vadd.f32 %v4968_v40, %v23668_v5  ;;  %v21024_v5 = vld [vmem:[#allocation7 + $0x920] ss:$20 sps:$4 sm:$0xff]  }
 0x5ed   :  { %25465 = vst [vmem:[#allocation29_spill] sm:$0xff] %v23783_v20  ;;  %17185 = vmatmul.mubr.msk.bf16.vlgmr.msra.gmra.mrb[40].mxu1 %vm1857_vm4, %v22591_v56  ;;  %17204 = vmatmul.mubr.msk.bf16.vlgmr.msra.gmra.mrb[80].mxu0 %vm1857_vm4, %v22591_v56 }
 0x5ee   :  { %25466 = vst [vmem:[#allocation33_spill] sm:$0xff] %v23786_v36  ;;  %6650 = vmatpush1.bf16.msra.mxu1 %v21013_v3  ;;  %5992 = vmatprep.mubr.bf16.mxu1 %v25374_v52 }
 0x5ef   :  { %6458 = vmatprep.mubr.bf16.mxu0 %v25374_v52  ;;  %19340 = vmatpush3.bf16.msra.mxu0 %v23593_v61  ;;  %v25470_v61 = vld [vmem:[#allocation85_spill] sm:$0xff] }
 0x5f0   :  { %v4836_v29 = vpop.f32.mrb[0].mxu0  ;;  %v19317_v50 = vpop.f32.mrb[216].mxu1  ;;  %6651 = vmatprep.subr.bf16.mxu1 %v25374_v52  ;;  %19341 = vmatprep.subr.bf16.mxu0 %v21019_v4 }
 0x5f1   :  { %v23797_v58 = vadd.f32 %v4836_v29, %v25467_v59  ;;  %v23800_v39 = vadd.f32 %v19317_v50, %v23695_v19  ;;  %v4838_v62 = vpop.f32.mrb[1].mxu0  ;;  %v4981_v37 = vpop.f32.mrb[217].mxu1  ;;  %v21016_v19 = vld [vmem:[#allocation7 + $0x6a0] ss:$20 sps:$4 sm:$0xff]   ;;  %v25473_v59 = vld [vmem:[#allocation22_spill] sm:$0xff] }
 0x5f2   :  { %v23803_v3 = vadd.f32 %v4981_v37, %v23685_v21  ;;  %v4839_v25 = vpop.f32.mrb[2].mxu0  ;;  %v19318_v40 = vpop.f32.mrb[218].mxu1  ;;  %6652 = vmatpush1.bf16.msra.mxu1 %v21015_v12  ;;  %v21029_v21 = vld [vmem:[#allocation7 + $0x948] ss:$20 sps:$4 sm:$0xff]  }
 0x5f3   :  { %25468 = vst [vmem:[#allocation32_spill] sm:$0xff] %v23800_v39  ;;  %v23806_v20 = vadd.f32 %v4839_v25, %v25470_v61  ;;  %v23809_v49 = vadd.f32 %v19318_v40, %v23698_v33  ;;  %v4841_v36 = vpop.f32.mrb[3].mxu0  ;;  %v4984_v29 = vpop.f32.mrb[219].mxu1  ;;  %6653 = vmatprep.subr.bf16.mxu1 %v25374_v52  ;;  %19342 = vmatpush3.bf16.msra.mxu0 %v21019_v4  ;;  %v21017_v33 = vld [vmem:[#allocation7 + $0x6c8] ss:$20 sps:$4 sm:$0xff]  }
 0x5f4   :  { %25469 = vst [vmem:[#allocation35_spill] sm:$0xff] %v23803_v3  ;;  %v23813_v50 = vadd.f32 %v4984_v29, %v23688_v16  ;;  %19343 = vmatprep.subr.bf16.mxu0 %v21024_v5  ;;  %v25474_v16 = vld [vmem:[#allocation86_spill] sm:$0xff] }
 0x5f5   :  { %25471 = vst [vmem:[#allocation34_spill] sm:$0xff] %v23809_v49  ;;  %17186 = vmatmul.mubr.msk.bf16.gmra.mrb[44].mxu1 %vm1857_vm4, %v25473_v59  ;;  %17205 = vmatmul.mubr.msk.bf16.gmra.mrb[84].mxu0 %vm1857_vm4, %v25473_v59  ;;  %v21018_v3 = vld [vmem:[#allocation7 + $0x6f0] ss:$20 sps:$4 sm:$0xff]  }
 0x5f6   :  { %25472 = vst [vmem:[#allocation37_spill] sm:$0xff] %v23813_v50  ;;  %6002 = vmatprep.mubr.bf16.mxu1 %v25374_v52  ;;  %6468 = vmatprep.mubr.bf16.mxu0 %v25374_v52 }
 0x5f7   :  { %6654 = vmatpush1.bf16.msra.mxu1 %v21016_v19  ;;  %19344 = vmatpush3.bf16.msra.mxu0 %v21024_v5  ;;  %v25476_v19 = vld [vmem:[#allocation87_spill] sm:$0xff] }
 0x5f8   :  { %v4844_v36 = vpop.f32.mrb[4].mxu0  ;;  %v19321_v4 = vpop.f32.mrb[220].mxu1  ;;  %6655 = vmatprep.subr.bf16.mxu1 %v25374_v52  ;;  %19345 = vmatprep.subr.bf16.mxu0 %v21029_v21 }
 0x5f9   :  { %v4845_v12 = vadd.f32 %v4844_v36, %v25474_v16  ;;  %v23824_v62 = vadd.f32 %v19321_v4, %v23727_v35  ;;  %v4846_v37 = vpop.f32.mrb[5].mxu0  ;;  %v4997_v25 = vpop.f32.mrb[221].mxu1  ;;  %v25478_v36 = vld [vmem:[#allocation21_spill] sm:$0xff] }
 0x5fa   :  { %v23827_v40 = vadd.f32 %v4997_v25, %v23705_v44  ;;  %v4847_v61 = vpop.f32.mrb[6].mxu0  ;;  %v19322_v29 = vpop.f32.mrb[222].mxu1  ;;  %v21020_v44 = vld [vmem:[#allocation7 + $0x718] ss:$20 sps:$4 sm:$0xff]  }
 0x5fb   :  { %25475 = vst [vmem:[#allocation65_spill] sm:$0xff] %v23824_v62  ;;  %v4848_v49 = vadd.f32 %v4847_v61, %v25476_v19  ;;  %v23831_v5 = vadd.f32 %v19322_v29, %v23736_v6  ;;  %v4849_v39 = vpop.f32.mrb[7].mxu0  ;;  %v5000_v50 = vpop.f32.mrb[223].mxu1  ;;  %6656 = vmatpush1.bf16.msra.mxu1 %v21017_v33  ;;  %19346 = vmatpush3.bf16.msra.mxu0 %v21029_v21  ;;  %v25482_v61 = vld [vmem:[#allocation89_spill] sm:$0xff] }
 0x5fc   :  { %v23834_v35 = vadd.f32 %v5000_v50, %v23714_v11  ;;  %6657 = vmatprep.subr.bf16.mxu1 %v25374_v52  ;;  %v25479_v11 = vld [vmem:[#allocation88_spill] sm:$0xff] }
 0x5fd   :  { %25477 = vst [vmem:[#allocation66_spill] sm:$0xff] %v23831_v5  ;;  %17187 = vmatmul.mubr.msk.bf16.gmra.mrb[48].mxu1 %vm1857_vm4, %v25478_v36  ;;  %17206 = vmatmul.mubr.msk.bf16.gmra.mrb[88].mxu0 %vm1857_vm4, %v25478_v36  ;;  %v21021_v62 = vld [vmem:[#allocation7 + $0x740] ss:$20 sps:$4 sm:$0xff]  }
 0x5fe   :  { %6012 = vmatprep.mubr.bf16.mxu1 %v25374_v52  ;;  %6478 = vmatprep.mubr.bf16.mxu0 %v25374_v52 }
 0x5ff   :  { %6658 = vmatpush1.bf16.msra.mxu1 %v21018_v3 }
 0x600   :  { %v4852_v6 = vpop.f32.mrb[8].mxu0  ;;  %v19325_v39 = vpop.f32.mrb[224].mxu1  ;;  %6659 = vmatprep.subr.bf16.mxu1 %v25374_v52 }
 0x601   :  { %v4853_v50 = vadd.f32 %v4852_v6, %v25479_v11  ;;  %v23846_v21 = vadd.f32 %v19325_v39, %v23771_v42  ;;  %v4854_v33 = vpop.f32.mrb[9].mxu0  ;;  %v5013_v4 = vpop.f32.mrb[225].mxu1  ;;  %v25485_v42 = vld [vmem:[#allocation24_spill] sm:$0xff] }
 0x602   :  { %v23849_v16 = vadd.f32 %v5013_v4, %v23749_v48  ;;  %v4855_v37 = vpop.f32.mrb[10].mxu0  ;;  %v19326_v25 = vpop.f32.mrb[226].mxu1  ;;  %v21022_v48 = vld [vmem:[#allocation7 + $0x768] ss:$20 sps:$4 sm:$0xff]  }
 0x603   :  { %25480 = vst [vmem:[#allocation67_spill] sm:$0xff] %v23846_v21  ;;  %v4856_v29 = vadd.f32 %v4855_v37, %v25482_v61  ;;  %v23853_v3 = vadd.f32 %v19326_v25, %v23780_v22  ;;  %v4857_v19 = vpop.f32.mrb[11].mxu0  ;;  %v5016_v5 = vpop.f32.mrb[227].mxu1  ;;  %6660 = vmatpush1.bf16.msra.mxu1 %v21020_v44  ;;  %v25488_v61 = vld [vmem:[#allocation90_spill] sm:$0xff] }
 0x604   :  { %25481 = vst [vmem:[#allocation68_spill] sm:$0xff] %v23849_v16  ;;  %v23856_v6 = vadd.f32 %v5016_v5, %v23758_v57  ;;  %6661 = vmatprep.subr.bf16.mxu1 %v25374_v52  ;;  %v25486_v57 = vld [vmem:[#allocation36_spill] sm:$0xff] }
 0x605   :  { %25483 = vst [vmem:[#allocation69_spill] sm:$0xff] %v23853_v3  ;;  %17188 = vmatmul.mubr.msk.bf16.gmra.mrb[52].mxu1 %vm1857_vm4, %v25485_v42  ;;  %17207 = vmatmul.mubr.msk.bf16.gmra.mrb[92].mxu0 %vm1857_vm4, %v25485_v42 }
 0x606   :  { %25484 = vst [vmem:[#allocation70_spill] sm:$0xff] %v23856_v6  ;;  %6022 = vmatprep.mubr.bf16.mxu1 %v25374_v52  ;;  %6488 = vmatprep.mubr.bf16.mxu0 %v25374_v52  ;;  %v21023_v6 = vld [vmem:[#allocation7 + $0x790] ss:$20 sps:$4 sm:$0xff]  }
 0x607   :  { %6662 = vmatpush1.bf16.msra.mxu1 %v21021_v62 }
 0x608   :  { %v4860_v22 = vpop.f32.mrb[12].mxu0  ;;  %v19329_v44 = vpop.f32.mrb[228].mxu1  ;;  %6663 = vmatprep.subr.bf16.mxu1 %v25374_v52 }
 0x609   :  { %v4861_v5 = vadd.f32 %v4860_v22, %v25486_v57  ;;  %v23867_v39 = vadd.f32 %v19329_v44, %v4845_v12  ;;  %v4862_v11 = vpop.f32.mrb[13].mxu0  ;;  %v5029_v33 = vpop.f32.mrb[229].mxu1  ;;  %v25491_v12 = vld [vmem:[#allocation23_spill] sm:$0xff] }
 0x60a   :  { %v23870_v4 = vadd.f32 %v5029_v33, %v23797_v58  ;;  %v4863_v37 = vpop.f32.mrb[14].mxu0  ;;  %v19330_v25 = vpop.f32.mrb[230].mxu1 }
 0x60b   :  { %25487 = vst [vmem:[#allocation71_spill] sm:$0xff] %v23867_v39  ;;  %v4864_v19 = vadd.f32 %v4863_v37, %v25488_v61  ;;  %v23873_v3 = vadd.f32 %v19330_v25, %v4848_v49  ;;  %v4865_v62 = vpop.f32.mrb[15].mxu0  ;;  %v5032_v21 = vpop.f32.mrb[231].mxu1  ;;  %6664 = vmatpush1.bf16.msra.mxu1 %v21022_v48  ;;  %v21025_v49 = vld [vmem:[#allocation7 + $0x7b8] ss:$20 sps:$4 sm:$0xff]  }
 0x60c   :  { %v23876_v16 = vadd.f32 %v5032_v21, %v23806_v20  ;;  %6665 = vmatprep.subr.bf16.mxu1 %v25374_v52  ;;  %v25492_v20 = vld [vmem:[#allocation91_spill] sm:$0xff]  ;;  %v25494_v25 = vld [vmem:[#allocation92_spill] sm:$0xff] }
 0x60d   :  { %25489 = vst [vmem:[#allocation72_spill] sm:$0xff] %v23873_v3  ;;  %17189 = vmatmul.mubr.msk.bf16.gmra.mrb[56].mxu1 %vm1857_vm4, %v25491_v12  ;;  %17208 = vmatmul.mubr.msk.bf16.gmra.mrb[96].mxu0 %vm1857_vm4, %v25491_v12  ;;  %v21026_v39 = vld [vmem:[#allocation7 + $0x7e0] ss:$20 sps:$4 sm:$0xff]  }
 0x60e   :  { %25490 = vst [vmem:[#allocation73_spill] sm:$0xff] %v23876_v16  ;;  %6032 = vmatprep.mubr.bf16.mxu1 %v25374_v52  ;;  %6498 = vmatprep.mubr.bf16.mxu0 %v25374_v52 }
 0x60f   :  { %6666 = vmatpush1.bf16.msra.mxu1 %v21023_v6 }
 0x610   :  { %v4868_v58 = vpop.f32.mrb[16].mxu0  ;;  %v19333_v48 = vpop.f32.mrb[232].mxu1  ;;  %6667 = vmatprep.subr.bf16.mxu1 %v25374_v52 }
 0x611   :  { %v4869_v21 = vadd.f32 %v4868_v58, %v25492_v20  ;;  %v23887_v22 = vadd.f32 %v19333_v48, %v4861_v5  ;;  %v4870_v44 = vpop.f32.mrb[17].mxu0  ;;  %v5045_v57 = vpop.f32.mrb[233].mxu1  ;;  %v25497_v5 = vld [vmem:[#allocation28_spill] sm:$0xff] }
 0x612   :  { %v23889_v11 = vadd.f32 %v5045_v57, %v4853_v50  ;;  %v4871_v33 = vpop.f32.mrb[18].mxu0  ;;  %v19334_v37 = vpop.f32.mrb[234].mxu1  ;;  %v21027_v50 = vld [vmem:[#allocation7 + $0x808] ss:$20 sps:$4 sm:$0xff]  }
 0x613   :  { %25493 = vst [vmem:[#allocation74_spill] sm:$0xff] %v23887_v22  ;;  %v4872_v61 = vadd.f32 %v4871_v33, %v25494_v25  ;;  %v23892_v62 = vadd.f32 %v19334_v37, %v4864_v19  ;;  %v4873_v6 = vpop.f32.mrb[19].mxu0  ;;  %v5048_v3 = vpop.f32.mrb[235].mxu1  ;;  %6668 = vmatpush1.bf16.msra.mxu1 %v21025_v49  ;;  %v25501_v37 = vld [vmem:[#allocation94_spill] sm:$0xff] }
 0x614   :  { %v23894_v16 = vadd.f32 %v5048_v3, %v4856_v29  ;;  %6669 = vmatprep.subr.bf16.mxu1 %v25374_v52  ;;  %v25498_v29 = vld [vmem:[#allocation93_spill] sm:$0xff] }
 0x615   :  { %25495 = vst [vmem:[#allocation75_spill] sm:$0xff] %v23892_v62  ;;  %17190 = vmatmul.mubr.msk.bf16.gmra.mrb[60].mxu1 %vm1857_vm4, %v25497_v5  ;;  %17209 = vmatmul.mubr.msk.bf16.gmra.mrb[100].mxu0 %vm1857_vm4, %v25497_v5 }
 0x616   :  { %25496 = vst [vmem:[#allocation76_spill] sm:$0xff] %v23894_v16  ;;  %6042 = vmatprep.mubr.bf16.mxu1 %v25374_v52  ;;  %6508 = vmatprep.mubr.bf16.mxu0 %v25374_v52 }
 0x617   :  { %6670 = vmatpush1.bf16.msra.mxu1 %v21026_v39  ;;  %v21028_v39 = vld [vmem:[#allocation7 + $0x830] ss:$20 sps:$4 sm:$0xff]  }
 0x618   :  { %v4876_v19 = vpop.f32.mrb[20].mxu0  ;;  %v19337_v58 = vpop.f32.mrb[236].mxu1  ;;  %6671 = vmatprep.subr.bf16.mxu1 %v25374_v52 }
 0x619   :  { %v4877_v3 = vadd.f32 %v4876_v19, %v25498_v29  ;;  %v4878_v49 = vpop.f32.mrb[21].mxu0  ;;  %v5061_v48 = vpop.f32.mrb[237].mxu1  ;;  %v25504_v19 = vld [vmem:[#allocation27_spill] sm:$0xff]  ;;  %v21035_v29 = vld [vmem:[#allocation10 + $0x180] sm:$0xff]  }
 0x61a   :  { %v23905_v20 = vadd.f32 %v5061_v48, %v4869_v21  ;;  %v4879_v44 = vpop.f32.mrb[22].mxu0  ;;  %v19338_v57 = vpop.f32.mrb[238].mxu1  ;;  %v21030_v21 = vld [vmem:[#allocation7 + $0x858] ss:$20 sps:$4 sm:$0xff]   ;;  %18139 = vmatprep.subr.bf16.mxu0 %v21035_v29  ;;  %v25508_v48 = vld [vmem:[#allocation45_spill] sm:$0xff] }
 0x61b   :  { %v23907_v33 = vadd.f32 %v19337_v58, %v4877_v3  ;;  %v4880_v25 = vadd.f32 %v4879_v44, %v25501_v37  ;;  %v4881_v6 = vpop.f32.mrb[23].mxu0  ;;  %v5064_v62 = vpop.f32.mrb[239].mxu1  ;;  %6672 = vmatpush1.bf16.msra.mxu1 %v21027_v50  ;;  %v25505_v50 = vld [vmem:[#allocation31_spill] sm:$0xff]  ;;  %v21033_v58 = vld [vmem:[#allocation10 + $0x200] sm:$0xff]   ;;  %v25507_v49 = vld [vmem:[#allocation40_spill] sm:$0xff] }
 0x61c   :  { %25499 = vst [vmem:[#allocation77_spill] sm:$0xff] %v23905_v20  ;;  %v23910_v22 = vadd.f32 %v5064_v62, %v4872_v61  ;;  %6673 = vmatprep.subr.bf16.mxu1 %v25374_v52  ;;  %v21031_v61 = vld [vmem:[#allocation7 + $0x880] ss:$20 sps:$4 sm:$0xff]   ;;  %v21032_v62 = vld [vmem:[#allocation7 + $0x8a8] ss:$20 sps:$4 sm:$0xff]  }
 0x61d   :  { %25500 = vst [vmem:[#allocation78_spill] sm:$0xff] %v23907_v33  ;;  %v23913_v16 = vadd.f32 %v19338_v57, %v4880_v25  ;;  %17191 = vmatmul.mubr.msk.bf16.gmra.mrb[64].mxu1 %vm1857_vm4, %v25504_v19  ;;  %17210 = vmatmul.mubr.msk.bf16.gmra.mrb[104].mxu0 %vm1857_vm4, %v25504_v19  ;;  %v25506_v3 = vld [vmem:[#allocation41_spill] sm:$0xff]  ;;  %v25509_v44 = vld [vmem:[#allocation44_spill] sm:$0xff]  ;;  %v21037_v6 = vld [vmem:[#allocation10 + $0x188] sm:$0xff]  }
 0x61e   :  { %25502 = vst [vmem:[#allocation79_spill] sm:$0xff] %v23910_v22  ;;  %6052 = vmatprep.mubr.bf16.mxu1 %v25374_v52  ;;  %6518 = vmatprep.mubr.bf16.mxu0 %v25374_v52  ;;  %v25510_v57 = vld [vmem:[#allocation20_spill] sm:$0xff]  ;;  %v21034_v37 = vld [vmem:[#allocation10 + $0x1c0] sm:$0xff]  }
 0x61f   :  { %25503 = vst [vmem:[#allocation80_spill] sm:$0xff] %v23913_v16  ;;  %6674 = vmatpush1.bf16.msra.mxu1 %v21028_v39  ;;  %v21036_v25 = vld [vmem:[#allocation10 + $0x140] sm:$0xff]   ;;  %v21044_v39 = vld [vmem:[#allocation10 + $0x208] sm:$0xff]   ;;  %v21040_v29 = vld [vmem:[#allocation10 + $0x150] sm:$0xff]  }
 0x620   :  { %6675 = vmatprep.subr.bf16.mxu1 %v25374_v52  ;;  %v25527_v16 = vld [vmem:[#allocation53_spill] sm:$0xff] }
 0x623   :  { %6676 = vmatpush1.bf16.msra.mxu1 %v21030_v21  ;;  %v25511_v21 = vld [vmem:[#allocation19_spill] sm:$0xff] }
 0x624   :  { %6677 = vmatprep.subr.bf16.mxu1 %v25374_v52 }
 0x625   :  { %17192 = vmatmul.mubr.msk.bf16.gmra.mrb[68].mxu1 %vm1857_vm4, %v22675_v60  ;;  %17211 = vmatmul.mubr.msk.bf16.gmra.mrb[108].mxu0 %vm1857_vm4, %v22675_v60 }
 0x626   :  { %6062 = vmatprep.mubr.bf16.mxu1 %v25374_v52  ;;  %6528 = vmatprep.mubr.bf16.mxu0 %v25374_v52 }
 0x627   :  { %6678 = vmatpush1.bf16.msra.mxu1 %v21031_v61  ;;  %v21038_v61 = vld [vmem:[#allocation10 + $0x148] sm:$0xff]  }
 0x628   :  { %6679 = vmatprep.subr.bf16.mxu1 %v25374_v52 }
 0x62b   :  { %6680 = vmatpush1.bf16.msra.mxu1 %v21032_v62  ;;  %v21046_v62 = vld [vmem:[#allocation10 + $0x1c8] sm:$0xff]  }
 0x62c   :  { %18161 = vmatprep.subr.bf16.mxu1 %v21033_v58  ;;  %v21053_v58 = vld [vmem:[#allocation10 + $0x210] sm:$0xff]  }
 0x62d   :  { %17193 = vmatmul.mubr.msk.bf16.gmra.mrb[72].mxu1 %vm1857_vm4, %v25505_v50  ;;  %17212 = vmatmul.mubr.msk.bf16.gmra.mrb[112].mxu0 %vm1857_vm4, %v25505_v50 }
 0x62e   :  { %6072 = vmatprep.mubr.bf16.mxu1 %v25374_v52  ;;  %6538 = vmatprep.mubr.bf16.mxu0 %v25374_v52 }
 0x635   :  { %17194 = vmatmul.mubr.msk.bf16.gmra.mrb[76].mxu1 %vm1857_vm4, %v22695_v30  ;;  %17213 = vmatmul.mubr.msk.bf16.gmra.mrb[116].mxu0 %vm1857_vm4, %v22695_v30 }
 0x636   :  { %6082 = vmatprep.mubr.bf16.mxu1 %v25374_v52  ;;  %6548 = vmatprep.mubr.bf16.mxu0 %v25374_v52 }
 0x63d   :  { %17195 = vmatmul.mubr.msk.bf16.gmra.mrb[80].mxu1 %vm1857_vm4, %v22692_v9  ;;  %17214 = vmatmul.mubr.msk.bf16.gmra.mrb[120].mxu0 %vm1857_vm4, %v22692_v9 }
 0x63e   :  { %6092 = vmatprep.mubr.bf16.mxu1 %v25374_v52  ;;  %6558 = vmatprep.mubr.bf16.mxu0 %v25374_v52 }
 0x645   :  { %17196 = vmatmul.mubr.msk.bf16.gmra.mrb[84].mxu1 %vm1857_vm4, %v25410_v0  ;;  %17215 = vmatmul.mubr.msk.bf16.gmra.mrb[124].mxu0 %vm1857_vm4, %v25410_v0 }
 0x646   :  { %6102 = vmatprep.mubr.bf16.mxu1 %v25374_v52  ;;  %6568 = vmatprep.mubr.bf16.mxu0 %v25374_v52 }
 0x64d   :  { %17197 = vmatmul.mubr.msk.bf16.gmra.mrb[88].mxu1 %vm1857_vm4, %v22712_v28  ;;  %17216 = vmatmul.mubr.msk.bf16.gmra.mrb[128].mxu0 %vm1857_vm4, %v22712_v28 }
 0x64e   :  { %6112 = vmatprep.mubr.bf16.mxu1 %v25374_v52  ;;  %6578 = vmatprep.mubr.bf16.mxu0 %v25374_v52 }
 0x655   :  { %17198 = vmatmul.mubr.msk.bf16.gmra.mrb[92].mxu1 %vm1857_vm4, %v22735_v31  ;;  %17217 = vmatmul.mubr.msk.bf16.gmra.mrb[132].mxu0 %vm1857_vm4, %v22735_v31 }
 0x656   :  { %6122 = vmatprep.mubr.bf16.mxu1 %v25374_v52  ;;  %6588 = vmatprep.mubr.bf16.mxu0 %v25374_v52 }
 0x65d   :  { %17199 = vmatmul.mubr.msk.bf16.gmra.mrb[96].mxu1 %vm1857_vm4, %v22732_v24  ;;  %17218 = vmatmul.mubr.msk.bf16.gmra.mrb[136].mxu0 %vm1857_vm4, %v22732_v24 }
 0x65e   :  { %6132 = vmatprep.mubr.bf16.mxu1 %v25374_v52  ;;  %6598 = vmatprep.mubr.bf16.mxu0 %v25374_v52 }
 0x665   :  { %17200 = vmatmul.mubr.msk.bf16.gmra.mrb[100].mxu1 %vm1857_vm4, %v25506_v3  ;;  %17219 = vmatmul.mubr.msk.bf16.gmra.mrb[140].mxu0 %vm1857_vm4, %v25506_v3 }
 0x666   :  { %6142 = vmatprep.mubr.bf16.mxu1 %v25374_v52  ;;  %6608 = vmatprep.mubr.bf16.mxu0 %v25374_v52 }
 0x66d   :  { %17201 = vmatmul.mubr.msk.bf16.gmra.mrb[104].mxu1 %vm1857_vm4, %v25507_v49  ;;  %17220 = vmatmul.mubr.msk.bf16.gmra.mrb[144].mxu0 %vm1857_vm4, %v25507_v49 }
 0x66e   :  { %6152 = vmatprep.mubr.bf16.mxu1 %v25374_v52  ;;  %6618 = vmatprep.mubr.bf16.mxu0 %v25374_v52 }
 0x675   :  { %17202 = vmatmul.mubr.msk.bf16.gmra.mrb[108].mxu1 %vm1857_vm4, %v25508_v48  ;;  %17221 = vmatmul.mubr.msk.bf16.gmra.mrb[148].mxu0 %vm1857_vm4, %v25508_v48 }
 0x676   :  { %6162 = vmatprep.mubr.bf16.mxu1 %v25374_v52  ;;  %6628 = vmatprep.mubr.bf16.mxu0 %v25374_v52 }
 0x67d   :  { %17203 = vmatmul.mubr.msk.bf16.gmra.mrb[112].mxu1 %vm1857_vm4, %v25509_v44  ;;  %17222 = vmatmul.mubr.msk.bf16.gmra.mrb[152].mxu0 %vm1857_vm4, %v25509_v44 }
 0x67e   :  { %6172 = vmatprep.mubr.bf16.mxu1 %v25374_v52  ;;  %6638 = vmatprep.mubr.bf16.mxu0 %v25374_v52 }
 0x685   :  { %6173 = vmatmul.mubr.bf16.gmra.mrb[116].mxu1 %v25374_v52  ;;  %6639 = vmatmul.mubr.bf16.gmra.mrb[156].mxu0 %v25374_v52 }
 0x686   :  { %6681 = vmatprep.mubr.bf16.mxu1 %v25510_v57  ;;  %19347 = vmatprep.mubr.msk.bf16.mxu0 %vm1857_vm4, %v22591_v56  ;;  %v21039_v56 = vld [vmem:[#allocation10 + $0x190] sm:$0xff]  }
 0x687   :  { %v21054_v57 = vld [vmem:[#allocation10 + $0x1d0] sm:$0xff]  }
 0x68d   :  { %6682 = vmatmul.mubr.bf16.vlgmr.msra.gmra.mrb[240].mxu1 %v25511_v21  ;;  %19348 = vmatmul.mubr.msk.bf16.vlgmr.msra.gmra.mrb[24].mxu0 %vm1857_vm4, %v25473_v59  ;;  %v21041_v21 = vld [vmem:[#allocation10 + $0x198] sm:$0xff]  }
 0x68e   :  { %6689 = vmatprep.mubr.bf16.mxu1 %v22629_v23  ;;  %19351 = vmatprep.mubr.msk.bf16.mxu0 %vm1857_vm4, %v25478_v36  ;;  %v21055_v59 = vld [vmem:[#allocation10 + $0x218] sm:$0xff]  }
 0x68f   :  { %18162 = vmatpush3.bf16.msra.mxu1 %v21034_v37  ;;  %18140 = vmatpush3.bf16.msra.mxu0 %v21036_v25  ;;  %v21042_v23 = vld [vmem:[#allocation10 + $0x158] sm:$0xff]   ;;  %v21043_v37 = vld [vmem:[#allocation10 + $0x1a0] sm:$0xff]  }
 0x690   :  { %18141 = vmatprep.subr.bf16.mxu0 %v21037_v6  ;;  %18163 = vmatprep.subr.bf16.mxu1 %v21044_v39  ;;  %v21056_v36 = vld [vmem:[#allocation10 + $0x1d8] sm:$0xff]   ;;  %v21057_v25 = vld [vmem:[#allocation10 + $0x220] sm:$0xff]   ;;  %v21047_v39 = vld [vmem:[#allocation10 + $0x1a8] sm:$0xff]  }
 0x691   :  { %v21045_v6 = vld [vmem:[#allocation10 + $0x160] sm:$0xff]  }
 0x693   :  { %18142 = vmatpush3.bf16.msra.mxu0 %v21038_v61  ;;  %18164 = vmatpush3.bf16.msra.mxu1 %v21046_v62  ;;  %v21060_v61 = vld [vmem:[#allocation10 + $0x1e8] sm:$0xff]   ;;  %v21050_v62 = vld [vmem:[#allocation10 + $0x170] sm:$0xff]  }
 0x694   :  { %18143 = vmatprep.subr.bf16.mxu0 %v21039_v56  ;;  %18165 = vmatprep.subr.bf16.mxu1 %v21053_v58  ;;  %v21051_v56 = vld [vmem:[#allocation10 + $0x1b8] sm:$0xff]  }
 0x695   :  { %6690 = vmatmul.mubr.bf16.gmra.mrb[244].mxu1 %v22627_v63  ;;  %19352 = vmatmul.mubr.msk.bf16.gmra.mrb[28].mxu0 %vm1857_vm4, %v25485_v42  ;;  %v21058_v63 = vld [vmem:[#allocation10 + $0x1e0] sm:$0xff]   ;;  %v21059_v42 = vld [vmem:[#allocation10 + $0x228] sm:$0xff]   ;;  %v21064_v58 = vld [vmem:[#allocation10 + $0x1f8] sm:$0xff]  }
 0x696   :  { %6697 = vmatprep.mubr.bf16.mxu1 %v25417_v32  ;;  %19355 = vmatprep.mubr.msk.bf16.mxu0 %vm1857_vm4, %v25491_v12  ;;  %v21048_v32 = vld [vmem:[#allocation10 + $0x168] sm:$0xff]   ;;  %v21049_v12 = vld [vmem:[#allocation10 + $0x1b0] sm:$0xff]  }
 0x697   :  { %18144 = vmatpush3.bf16.msra.mxu0 %v21040_v29  ;;  %18166 = vmatpush3.bf16.msra.mxu1 %v21054_v57  ;;  %v21065_v29 = vld [vmem:[#allocation10 + $0x40] sm:$0xff]  }
 0x698   :  { %18145 = vmatprep.subr.bf16.mxu0 %v21041_v21  ;;  %18167 = vmatprep.subr.bf16.mxu1 %v21055_v59 }
 0x69b   :  { %18146 = vmatpush3.bf16.msra.mxu0 %v21042_v23  ;;  %18168 = vmatpush3.bf16.msra.mxu1 %v21056_v36 }
 0x69c   :  { %18147 = vmatprep.subr.bf16.mxu0 %v21043_v37  ;;  %18169 = vmatprep.subr.bf16.mxu1 %v21057_v25 }
 0x69d   :  { %6698 = vmatmul.mubr.bf16.gmra.mrb[248].mxu1 %v25418_v54  ;;  %19356 = vmatmul.mubr.msk.bf16.gmra.mrb[32].mxu0 %vm1857_vm4, %v25497_v5  ;;  %v21061_v54 = vld [vmem:[#allocation10 + $0x230] sm:$0xff]  }
 0x69e   :  { %6705 = vmatprep.mubr.bf16.mxu1 %v25419_v27  ;;  %19359 = vmatprep.mubr.msk.bf16.mxu0 %vm1857_vm4, %v25504_v19  ;;  %v21062_v5 = vld [vmem:[#allocation10 + $0x1f0] sm:$0xff]   ;;  %v21052_v27 = vld [vmem:[#allocation10 + $0x178] sm:$0xff]  }
 0x69f   :  { %18148 = vmatpush3.bf16.msra.mxu0 %v21045_v6  ;;  %18170 = vmatpush3.bf16.msra.mxu1 %v21058_v63  ;;  %v21063_v19 = vld [vmem:[#allocation10 + $0x238] sm:$0xff]  }
 0x6a0   :  { %18149 = vmatprep.subr.bf16.mxu0 %v21047_v39  ;;  %18171 = vmatprep.subr.bf16.mxu1 %v21059_v42 }
 0x6a3   :  { %18150 = vmatpush3.bf16.msra.mxu0 %v21048_v32  ;;  %18172 = vmatpush3.bf16.msra.mxu1 %v21060_v61 }
 0x6a4   :  { %18151 = vmatprep.subr.bf16.mxu0 %v21049_v12  ;;  %18173 = vmatprep.subr.bf16.mxu1 %v21061_v54 }
 0x6a5   :  { %6706 = vmatmul.mubr.bf16.gmra.mrb[252].mxu1 %v25420_v51  ;;  %19360 = vmatmul.mubr.msk.bf16.gmra.mrb[36].mxu0 %vm1857_vm4, %v22675_v60  ;;  %v7235_v60 = vld [vmem:[#allocation8] sm:$0x1f]  ;;  %v25512_v51 = vld [vmem:[#allocation18_spill] sm:$0xff] }
 0x6a6   :  { %6713 = vmatprep.mubr.bf16.mxu1 %v25421_v2  ;;  %19363 = vmatprep.mubr.msk.bf16.mxu0 %vm1857_vm4, %v25505_v50  ;;  %v7251_v2 = vsub.s32 3, %v25512_v51 }
 0x6a7   :  { %18152 = vmatpush3.bf16.msra.mxu0 %v21050_v62  ;;  %18174 = vmatpush3.bf16.msra.mxu1 %v21062_v5 }
 0x6a8   :  { %18153 = vmatprep.subr.bf16.mxu0 %v21051_v56  ;;  %18175 = vmatprep.subr.bf16.mxu1 %v21063_v19  ;;  %v25517_v56 = vld [vmem:[#allocation38_spill] sm:$0xff] }
 0x6ab   :  { %18154 = vmatpush3.bf16.msra.mxu0 %v21052_v27  ;;  %18176 = vmatpush3.bf16.msra.mxu1 %v21064_v58 }
 0x6ac   :  { %18192 = vmatprep.subr.bf16.mxu1 %v21065_v29  ;;  %v25518_v29 = vld [vmem:[#allocation43_spill] sm:$0xff] }
 0x6ad   :  { %6714 = vmatmul.mubr.bf16.gmra.mrb[0].mxu1 %v25422_v55  ;;  %19364 = vmatmul.mubr.msk.bf16.gmra.mrb[40].mxu0 %vm1857_vm4, %v22695_v30 }
 0x6ae   :  { %6721 = vmatprep.mubr.bf16.mxu1 %v25423_v43  ;;  %19367 = vmatprep.mubr.msk.bf16.mxu0 %vm1857_vm4, %v22692_v9  ;;  %v25513_v9 = vsub.s32 0, %v25512_v51  ;;  %v25514_v43 = vsub.s32 2, %v25512_v51 }
 0x6b0   :  { %v24043_v30 = vrot.slane %v7235_v60, %v25513_v9 }
 0x6b5   :  { %6722 = vmatmul.mubr.bf16.gmra.mrb[4].mxu1 %v25424_v26  ;;  %19368 = vmatmul.mubr.msk.bf16.gmra.mrb[44].mxu0 %vm1857_vm4, %v25410_v0  ;;  %v24047_v0 = vrot.slane %v7235_v60, %v25514_v43 }
 0x6b6   :  { %6729 = vmatprep.mubr.bf16.mxu1 %v25425_v10  ;;  %19371 = vmatprep.mubr.msk.bf16.mxu0 %vm1857_vm4, %v22712_v28  ;;  %v25515_v10 = vld [vmem:[#allocation39_spill] sm:$0xff]  ;;  %v25516_v28 = vsub.s32 1, %v25512_v51 }
 0x6b8   :  { %v24054_v55 = vrot.slane %v7235_v60, %v25516_v28 }
 0x6bd   :  { %6730 = vmatmul.mubr.bf16.gmra.mrb[8].mxu1 %v22728_v17  ;;  %19372 = vmatmul.mubr.msk.bf16.gmra.mrb[48].mxu0 %vm1857_vm4, %v22735_v31  ;;  %v24056_v17 = vrot.slane %v7235_v60, %v7251_v2 }
 0x6be   :  { %6737 = vmatprep.mubr.bf16.mxu1 %v25515_v10  ;;  %19375 = vmatprep.mubr.msk.bf16.mxu0 %vm1857_vm4, %v22732_v24 }
 0x6c0   :  { %v5984_v31 = vpop.f32.mrb[40].mxu1  ;;  %v6450_v26 = vpop.f32.mrb[80].mxu0 }
 0x6c1   :  { %v7262_v50 = vadd.f32 %v24043_v30, %v5984_v31  ;;  %v7264_v57 = vadd.f32 %v24047_v0, %v6450_v26  ;;  %v5986_v21 = vpop.f32.mrb[41].mxu1  ;;  %v6452_v59 = vpop.f32.mrb[81].mxu0 }
 0x6c2   :  { %v7263_v23 = vadd.f32 %v24054_v55, %v5986_v21  ;;  %v7265_v36 = vadd.f32 %v24056_v17, %v6452_v59  ;;  %v5988_v37 = vpop.f32.mrb[42].mxu1  ;;  %v6454_v24 = vpop.f32.mrb[82].mxu0 }
 0x6c3   :  { %v7267_v25 = vadd.f32 %v24043_v30, %v5988_v37  ;;  %v7269_v6 = vadd.f32 %v24047_v0, %v6454_v24  ;;  %v5990_v63 = vpop.f32.mrb[43].mxu1  ;;  %v6456_v39 = vpop.f32.mrb[83].mxu0  ;;  %v7462_v12 = vmax.f32 %v7262_v50, 0.0  ;;  %v7464_v61 = vmax.f32 %v7264_v57, 0.0 }
 0x6c4   :  { %v7268_v32 = vadd.f32 %v24054_v55, %v5990_v63  ;;  %v7270_v42 = vadd.f32 %v24056_v17, %v6456_v39  ;;  %v7463_v5 = vmax.f32 %v7263_v23, 0.0  ;;  %v7465_v27 = vmax.f32 %v7265_v36, 0.0 }
 0x6c5   :  { %v7467_v62 = vmax.f32 %v7267_v25, 0.0  ;;  %v7469_v54 = vmax.f32 %v7269_v6, 0.0  ;;  %6738 = vmatmul.mubr.bf16.gmra.mrb[12].mxu1 %v25517_v56  ;;  %19376 = vmatmul.mubr.msk.bf16.gmra.mrb[52].mxu0 %vm1857_vm4, %v25506_v3 }
 0x6c6   :  { %v7468_v19 = vmax.f32 %v7268_v32, 0.0  ;;  %v7470_v58 = vmax.f32 %v7270_v42, 0.0  ;;  %6745 = vmatprep.mubr.bf16.mxu1 %v25518_v29  ;;  %19379 = vmatprep.mubr.msk.bf16.mxu0 %vm1857_vm4, %v25507_v49 }
 0x6c7   :  { %v24072_v60 = vpack.c.bf16 %v7467_v62, %v7462_v12  ;;  %v24074_v2 = vpack.c.bf16 %v7469_v54, %v7464_v61  ;;  %v25519_v61 = vld [vmem:[#allocation42_spill] sm:$0xff] }
 0x6c8   :  { %v24076_v9 = vpack.c.bf16 %v7470_v58, %v7465_v27  ;;  %v5994_v43 = vpop.f32.mrb[44].mxu1  ;;  %v6460_v10 = vpop.f32.mrb[84].mxu0  ;;  %v24078_v28 = vpack.c.bf16 %v7468_v19, %v7463_v5  ;;  %v25520_v5 = vld [vmem:[#allocation47_spill] sm:$0xff]  ;;  %v25325_v58 = vmov 0.0  }
 0x6c9   :  { %v7272_v3 = vadd.f32 %v24043_v30, %v5994_v43  ;;  %v7274_v31 = vadd.f32 %v24047_v0, %v6460_v10  ;;  %v5996_v26 = vpop.f32.mrb[45].mxu1  ;;  %v6462_v50 = vpop.f32.mrb[85].mxu0  ;;  %19387 = vmatprep.subr.bf16.mxu0 %v25325_v58 }
 0x6ca   :  { %v7273_v57 = vadd.f32 %v24054_v55, %v5996_v26  ;;  %v7275_v49 = vadd.f32 %v24056_v17, %v6462_v50  ;;  %v5998_v21 = vpop.f32.mrb[46].mxu1  ;;  %v6464_v59 = vpop.f32.mrb[86].mxu0 }
 0x6cb   :  { %v7277_v23 = vadd.f32 %v24043_v30, %v5998_v21  ;;  %v7279_v36 = vadd.f32 %v24047_v0, %v6464_v59  ;;  %v6000_v37 = vpop.f32.mrb[47].mxu1  ;;  %v6466_v24 = vpop.f32.mrb[87].mxu0  ;;  %v7472_v25 = vmax.f32 %v7272_v3, 0.0  ;;  %v7474_v39 = vmax.f32 %v7274_v31, 0.0 }
 0x6cc   :  { %v7278_v6 = vadd.f32 %v24054_v55, %v6000_v37  ;;  %v7280_v63 = vadd.f32 %v24056_v17, %v6466_v24  ;;  %v7473_v32 = vmax.f32 %v7273_v57, 0.0  ;;  %v7475_v62 = vmax.f32 %v7275_v49, 0.0 }
 0x6cd   :  { %v7477_v42 = vmax.f32 %v7277_v23, 0.0  ;;  %v7479_v12 = vmax.f32 %v7279_v36, 0.0  ;;  %6746 = vmatmul.mubr.bf16.gmra.mrb[16].mxu1 %v25519_v61  ;;  %19380 = vmatmul.mubr.msk.bf16.gmra.mrb[56].mxu0 %vm1857_vm4, %v25508_v48 }
 0x6ce   :  { %v7478_v54 = vmax.f32 %v7278_v6, 0.0  ;;  %v7480_v56 = vmax.f32 %v7280_v63, 0.0  ;;  %6753 = vmatprep.mubr.bf16.mxu1 %v25520_v5  ;;  %19383 = vmatprep.mubr.msk.bf16.mxu0 %vm1857_vm4, %v25509_v44 }
 0x6cf   :  { %v7667_v27 = vpack.c.bf16 %v7477_v42, %v7472_v25  ;;  %v24094_v19 = vpack.c.bf16 %v7479_v12, %v7474_v39  ;;  %v25521_v42 = vld [vmem:[#allocation46_spill] sm:$0xff] }
 0x6d0   :  { %v24097_v29 = vpack.c.bf16 %v7480_v56, %v7475_v62  ;;  %v6004_v43 = vpop.f32.mrb[48].mxu1  ;;  %v6470_v10 = vpop.f32.mrb[88].mxu0  ;;  %v7668_v3 = vpack.c.bf16 %v7478_v54, %v7473_v32  ;;  %v25522_v56 = vld [vmem:[#allocation49_spill] sm:$0xff] }
 0x6d1   :  { %v7282_v48 = vadd.f32 %v24043_v30, %v6004_v43  ;;  %v7284_v31 = vadd.f32 %v24047_v0, %v6470_v10  ;;  %v6006_v26 = vpop.f32.mrb[49].mxu1  ;;  %v6472_v50 = vpop.f32.mrb[89].mxu0 }
 0x6d2   :  { %v7283_v57 = vadd.f32 %v24054_v55, %v6006_v26  ;;  %v7285_v44 = vadd.f32 %v24056_v17, %v6472_v50  ;;  %v6008_v49 = vpop.f32.mrb[50].mxu1  ;;  %v6474_v21 = vpop.f32.mrb[90].mxu0 }
 0x6d3   :  { %v7287_v59 = vadd.f32 %v24043_v30, %v6008_v49  ;;  %v7289_v23 = vadd.f32 %v24047_v0, %v6474_v21  ;;  %v6010_v36 = vpop.f32.mrb[51].mxu1  ;;  %v6476_v37 = vpop.f32.mrb[91].mxu0  ;;  %v7482_v6 = vmax.f32 %v7282_v48, 0.0  ;;  %v7484_v63 = vmax.f32 %v7284_v31, 0.0 }
 0x6d4   :  { %v7288_v24 = vadd.f32 %v24054_v55, %v6010_v36  ;;  %v7290_v25 = vadd.f32 %v24056_v17, %v6476_v37  ;;  %v7483_v12 = vmax.f32 %v7283_v57, 0.0  ;;  %v7485_v61 = vmax.f32 %v7285_v44, 0.0  ;;  %v21083_v36 = vld [vmem:[#allocation10 + $0x240] sm:$0xff]  }
 0x6d5   :  { %v7487_v39 = vmax.f32 %v7287_v59, 0.0  ;;  %v7489_v32 = vmax.f32 %v7289_v23, 0.0  ;;  %6754 = vmatmul.mubr.bf16.gmra.mrb[20].mxu1 %v25521_v42  ;;  %19384 = vmatmul.mubr.bf16.gmra.mrb[60].mxu0 %v25374_v52 }
 0x6d6   :  { %v7488_v62 = vmax.f32 %v7288_v24, 0.0  ;;  %v7490_v54 = vmax.f32 %v7290_v25, 0.0  ;;  %6761 = vmatprep.mubr.bf16.mxu1 %v25522_v56  ;;  %8195 = vmatprep.mubr.bf16.mxu0 %v7668_v3 }
 0x6d7   :  { %v24110_v5 = vpack.c.bf16 %v7487_v39, %v7482_v6  ;;  %v24112_v43 = vpack.c.bf16 %v7489_v32, %v7484_v63 }
 0x6d8   :  { %v24114_v10 = vpack.c.bf16 %v7490_v54, %v7485_v61  ;;  %v6014_v48 = vpop.f32.mrb[52].mxu1  ;;  %v6480_v31 = vpop.f32.mrb[92].mxu0  ;;  %v24116_v26 = vpack.c.bf16 %v7488_v62, %v7483_v12  ;;  %v25523_v62 = vld [vmem:[#allocation48_spill] sm:$0xff] }
 0x6d9   :  { %v7292_v50 = vadd.f32 %v24043_v30, %v6014_v48  ;;  %v7294_v57 = vadd.f32 %v24047_v0, %v6480_v31  ;;  %v6016_v44 = vpop.f32.mrb[53].mxu1  ;;  %v6482_v49 = vpop.f32.mrb[93].mxu0 }
 0x6da   :  { %v7293_v21 = vadd.f32 %v24054_v55, %v6016_v44  ;;  %v7295_v3 = vadd.f32 %v24056_v17, %v6482_v49  ;;  %v6018_v59 = vpop.f32.mrb[54].mxu1  ;;  %v6484_v23 = vpop.f32.mrb[94].mxu0  ;;  %v25524_v44 = vld [vmem:[#allocation51_spill] sm:$0xff] }
 0x6db   :  { %v7297_v37 = vadd.f32 %v24043_v30, %v6018_v59  ;;  %v7299_v24 = vadd.f32 %v24047_v0, %v6484_v23  ;;  %v6020_v25 = vpop.f32.mrb[55].mxu1  ;;  %v6486_v6 = vpop.f32.mrb[95].mxu0  ;;  %v7492_v32 = vmax.f32 %v7292_v50, 0.0  ;;  %v7494_v42 = vmax.f32 %v7294_v57, 0.0  ;;  %v21085_v49 = vld [vmem:[#allocation10 + $0x248] sm:$0xff]  }
 0x6dc   :  { %v7298_v63 = vadd.f32 %v24054_v55, %v6020_v25  ;;  %v7300_v39 = vadd.f32 %v24056_v17, %v6486_v6  ;;  %v7493_v54 = vmax.f32 %v7293_v21, 0.0  ;;  %v7495_v56 = vmax.f32 %v7295_v3, 0.0 }
 0x6dd   :  { %v7497_v12 = vmax.f32 %v7297_v37, 0.0  ;;  %v7499_v61 = vmax.f32 %v7299_v24, 0.0  ;;  %6762 = vmatmul.mubr.bf16.gmra.mrb[24].mxu1 %v25523_v62  ;;  %8196 = vmatmul.mubr.bf16.vlgmr.msra.gmra.mrb[64].mxu0 %v7667_v27 }
 0x6de   :  { %v7498_v48 = vmax.f32 %v7298_v63, 0.0  ;;  %v7500_v31 = vmax.f32 %v7300_v39, 0.0  ;;  %6769 = vmatprep.mubr.bf16.mxu1 %v25524_v44  ;;  %19388 = vmatpush3.bf16.msra.mxu0 %v21083_v36 }
 0x6df   :  { %v24128_v59 = vpack.c.bf16 %v7497_v12, %v7492_v32  ;;  %v24130_v23 = vpack.c.bf16 %v7499_v61, %v7494_v42  ;;  %19389 = vmatprep.subr.bf16.mxu0 %v25325_v58  ;;  %v21087_v32 = vld [vmem:[#allocation10 + $0x250] sm:$0xff]  }
 0x6e0   :  { %v24133_v50 = vpack.c.bf16 %v7500_v31, %v7495_v56  ;;  %v6024_v57 = vpop.f32.mrb[56].mxu1  ;;  %v6490_v37 = vpop.f32.mrb[96].mxu0  ;;  %v24135_v24 = vpack.c.bf16 %v7498_v48, %v7493_v54 }
 0x6e1   :  { %25525 = vst [vmem:[#allocation81_spill] sm:$0xff] %v24130_v23  ;;  %v7302_v27 = vadd.f32 %v24043_v30, %v6024_v57  ;;  %v7304_v21 = vadd.f32 %v24047_v0, %v6490_v37  ;;  %v6026_v3 = vpop.f32.mrb[57].mxu1  ;;  %v6492_v25 = vpop.f32.mrb[97].mxu0  ;;  %v25526_v37 = vld [vmem:[#allocation50_spill] sm:$0xff]  ;;  %v25532_v23 = vld [vmem:[#allocation55_spill] sm:$0xff] }
 0x6e2   :  { %v7303_v36 = vadd.f32 %v24054_v55, %v6026_v3  ;;  %v7305_v6 = vadd.f32 %v24056_v17, %v6492_v25  ;;  %v6028_v63 = vpop.f32.mrb[58].mxu1  ;;  %v6494_v39 = vpop.f32.mrb[98].mxu0  ;;  %19390 = vmatpush3.bf16.msra.mxu0 %v21085_v49 }
 0x6e3   :  { %v7307_v42 = vadd.f32 %v24043_v30, %v6028_v63  ;;  %v7309_v12 = vadd.f32 %v24047_v0, %v6494_v39  ;;  %v6030_v61 = vpop.f32.mrb[59].mxu1  ;;  %v6496_v62 = vpop.f32.mrb[99].mxu0  ;;  %19391 = vmatprep.subr.bf16.mxu0 %v25325_v58  ;;  %v7502_v48 = vmax.f32 %v7302_v27, 0.0  ;;  %v7504_v31 = vmax.f32 %v7304_v21, 0.0  ;;  %v21089_v39 = vld [vmem:[#allocation10 + $0x258] sm:$0xff]  }
 0x6e4   :  { %v7308_v54 = vadd.f32 %v24054_v55, %v6030_v61  ;;  %v7310_v56 = vadd.f32 %v24056_v17, %v6496_v62  ;;  %v7503_v49 = vmax.f32 %v7303_v36, 0.0  ;;  %v7505_v3 = vmax.f32 %v7305_v6, 0.0 }
 0x6e5   :  { %v7507_v44 = vmax.f32 %v7307_v42, 0.0  ;;  %v7509_v57 = vmax.f32 %v7309_v12, 0.0  ;;  %6770 = vmatmul.mubr.bf16.gmra.mrb[28].mxu1 %v25526_v37  ;;  %v25529_v61 = vmov 0.0  }
 0x6e6   :  { %v7508_v25 = vmax.f32 %v7308_v54, 0.0  ;;  %v7510_v63 = vmax.f32 %v7310_v56, 0.0  ;;  %6777 = vmatprep.mubr.bf16.mxu1 %v25527_v16  ;;  %19392 = vmatpush3.bf16.msra.mxu0 %v21087_v32 }
 0x6e7   :  { %v24148_v33 = vpack.c.bf16 %v7507_v44, %v7502_v48  ;;  %v24150_v58 = vpack.c.bf16 %v7509_v57, %v7504_v31  ;;  %19393 = vmatprep.subr.bf16.mxu0 %v25529_v61  ;;  %v21091_v31 = vld [vmem:[#allocation10 + $0x260] sm:$0xff]   ;;  %19403 = vmatprep.mubr.msk.bf16.mxu0 %vm22013_vm5, %v25529_v61 }
 0x6e8   :  { %v24153_v27 = vpack.c.bf16 %v7510_v63, %v7505_v3  ;;  %v6034_v21 = vpop.f32.mrb[60].mxu1  ;;  %v6500_v42 = vpop.f32.mrb[100].mxu0  ;;  %v24155_v12 = vpack.c.bf16 %v7508_v25, %v7503_v49 }
 0x6e9   :  { %25528 = vst [vmem:[#allocation82_spill] sm:$0xff] %v24148_v33  ;;  %v7312_v36 = vadd.f32 %v24043_v30, %v6034_v21  ;;  %v7314_v6 = vadd.f32 %v24047_v0, %v6500_v42  ;;  %v6036_v62 = vpop.f32.mrb[61].mxu1  ;;  %v6502_v16 = vpop.f32.mrb[101].mxu0  ;;  %v25531_v33 = vld [vmem:[#allocation52_spill] sm:$0xff] }
 0x6ea   :  { %25530 = vst [vmem:[#allocation83_spill] sm:$0xff] %v24155_v12  ;;  %v7313_v32 = vadd.f32 %v24054_v55, %v6036_v62  ;;  %v7315_v54 = vadd.f32 %v24056_v17, %v6502_v16  ;;  %v6038_v56 = vpop.f32.mrb[62].mxu1  ;;  %v6504_v48 = vpop.f32.mrb[102].mxu0  ;;  %19394 = vmatpush3.bf16.msra.mxu0 %v21089_v39 }
 0x6eb   :  { %v7317_v44 = vadd.f32 %v24043_v30, %v6038_v56  ;;  %v7319_v57 = vadd.f32 %v24047_v0, %v6504_v48  ;;  %v6040_v37 = vpop.f32.mrb[63].mxu1  ;;  %v6506_v49 = vpop.f32.mrb[103].mxu0  ;;  %19395 = vmatprep.subr.bf16.mxu0 %v25529_v61  ;;  %v7512_v3 = vmax.f32 %v7312_v36, 0.0  ;;  %v7514_v21 = vmax.f32 %v7314_v6, 0.0  ;;  %v21093_v48 = vld [vmem:[#allocation10 + $0x268] sm:$0xff]  }
 0x6ec   :  { %v7318_v25 = vadd.f32 %v24054_v55, %v6040_v37  ;;  %v7320_v63 = vadd.f32 %v24056_v17, %v6506_v49  ;;  %v7513_v42 = vmax.f32 %v7313_v32, 0.0  ;;  %v7515_v39 = vmax.f32 %v7315_v54, 0.0 }
 0x6ed   :  { %v7517_v62 = vmax.f32 %v7317_v44, 0.0  ;;  %v7519_v16 = vmax.f32 %v7319_v57, 0.0  ;;  %6778 = vmatmul.mubr.bf16.gmra.mrb[32].mxu1 %v25531_v33 }
 0x6ee   :  { %v7518_v12 = vmax.f32 %v7318_v25, 0.0  ;;  %v7520_v56 = vmax.f32 %v7320_v63, 0.0  ;;  %6785 = vmatprep.mubr.bf16.mxu1 %v25532_v23  ;;  %19396 = vmatpush3.bf16.msra.mxu0 %v21091_v31  ;;  %v21095_v63 = vld [vmem:[#allocation10 + $0x270] sm:$0xff]  }
 0x6ef   :  { %v24168_v22 = vpack.c.bf16 %v7517_v62, %v7512_v3  ;;  %v24170_v36 = vpack.c.bf16 %v7519_v16, %v7514_v21  ;;  %19397 = vmatprep.subr.bf16.mxu0 %v25529_v61 }
 0x6f0   :  { %v24175_v6 = vpack.c.bf16 %v7520_v56, %v7515_v39  ;;  %v6044_v33 = vpop.f32.mrb[64].mxu1  ;;  %v6510_v32 = vpop.f32.mrb[104].mxu0  ;;  %v24177_v54 = vpack.c.bf16 %v7518_v12, %v7513_v42 }
 0x6f1   :  { %25533 = vst [vmem:[#allocation64_spill] sm:$0xff] %v24168_v22  ;;  %25534 = vst [vmem:[#allocation63_spill] sm:$0xff] %v24170_v36  ;;  %v7322_v23 = vadd.f32 %v24043_v30, %v6044_v33  ;;  %v7324_v31 = vadd.f32 %v24047_v0, %v6510_v32  ;;  %v6046_v44 = vpop.f32.mrb[65].mxu1  ;;  %v6512_v57 = vpop.f32.mrb[105].mxu0  ;;  %v25538_v22 = vld [vmem:[#allocation57_spill] sm:$0xff] }
 0x6f2   :  { %25535 = vst [vmem:[#allocation84_spill] sm:$0xff] %v24175_v6  ;;  %25536 = vst [vmem:[#allocation85_spill] sm:$0xff] %v24177_v54  ;;  %v7323_v37 = vadd.f32 %v24054_v55, %v6046_v44  ;;  %v7325_v49 = vadd.f32 %v24056_v17, %v6512_v57  ;;  %v6048_v3 = vpop.f32.mrb[66].mxu1  ;;  %v6514_v25 = vpop.f32.mrb[106].mxu0  ;;  %19398 = vmatpush3.bf16.msra.mxu0 %v21093_v48  ;;  %v25537_v57 = vld [vmem:[#allocation54_spill] sm:$0xff] }
 0x6f3   :  { %v7327_v21 = vadd.f32 %v24043_v30, %v6048_v3  ;;  %v7329_v62 = vadd.f32 %v24047_v0, %v6514_v25  ;;  %v6050_v12 = vpop.f32.mrb[67].mxu1  ;;  %v6516_v42 = vpop.f32.mrb[107].mxu0  ;;  %19399 = vmatprep.subr.bf16.mxu0 %v25529_v61  ;;  %v7522_v56 = vmax.f32 %v7322_v23, 0.0  ;;  %v7524_v33 = vmax.f32 %v7324_v31, 0.0  ;;  %v21098_v25 = vld [vmem:[#allocation10 + $0x278] sm:$0xff]   ;;  %v21101_v23 = vld [vmem:[#allocation10 + $0xc0] sm:$0xff]  }
 0x6f4   :  { %v7328_v16 = vadd.f32 %v24054_v55, %v6050_v12  ;;  %v7330_v39 = vadd.f32 %v24056_v17, %v6516_v42  ;;  %v7523_v48 = vmax.f32 %v7323_v37, 0.0  ;;  %v7525_v36 = vmax.f32 %v7325_v49, 0.0 }
 0x6f5   :  { %v7527_v32 = vmax.f32 %v7327_v21, 0.0  ;;  %v7529_v44 = vmax.f32 %v7329_v62, 0.0  ;;  %6786 = vmatmul.mubr.bf16.gmra.mrb[36].mxu1 %v25537_v57 }
 0x6f6   :  { %v7528_v6 = vmax.f32 %v7328_v16, 0.0  ;;  %v7530_v3 = vmax.f32 %v7330_v39, 0.0  ;;  %6793 = vmatprep.mubr.bf16.mxu1 %v25538_v22  ;;  %19400 = vmatpush3.bf16.msra.mxu0 %v21095_v63 }
 0x6f7   :  { %v24190_v20 = vpack.c.bf16 %v7527_v32, %v7522_v56  ;;  %v24192_v54 = vpack.c.bf16 %v7529_v44, %v7524_v33  ;;  %19401 = vmatprep.subr.bf16.mxu0 %v25529_v61 }
 0x6f8   :  { %v24195_v31 = vpack.c.bf16 %v7528_v6, %v7523_v48  ;;  %v24197_v21 = vpack.c.bf16 %v7530_v3, %v7525_v36  ;;  %v6054_v62 = vpop.f32.mrb[68].mxu1  ;;  %v6520_v37 = vpop.f32.mrb[108].mxu0 }
 0x6f9   :  { %25539 = vst [vmem:[#allocation22_spill] sm:$0xff] %v24190_v20  ;;  %25540 = vst [vmem:[#allocation86_spill] sm:$0xff] %v24192_v54  ;;  %v7332_v49 = vadd.f32 %v24043_v30, %v6054_v62  ;;  %v7334_v12 = vadd.f32 %v24047_v0, %v6520_v37  ;;  %v6056_v22 = vpop.f32.mrb[69].mxu1  ;;  %v6522_v63 = vpop.f32.mrb[109].mxu0 }
 0x6fa   :  { %25541 = vst [vmem:[#allocation87_spill] sm:$0xff] %v24195_v31  ;;  %v7333_v42 = vadd.f32 %v24054_v55, %v6056_v22  ;;  %v7335_v16 = vadd.f32 %v24056_v17, %v6522_v63  ;;  %v6058_v39 = vpop.f32.mrb[70].mxu1  ;;  %v6524_v56 = vpop.f32.mrb[110].mxu0  ;;  %19402 = vmatpush3.bf16.msra.mxu0 %v21098_v25  ;;  %v25542_v22 = vld [vmem:[#allocation56_spill] sm:$0xff] }
 0x6fb   :  { %v7337_v6 = vadd.f32 %v24043_v30, %v6058_v39  ;;  %v7339_v36 = vadd.f32 %v24047_v0, %v6524_v56  ;;  %v6060_v33 = vpop.f32.mrb[71].mxu1  ;;  %v6526_v32 = vpop.f32.mrb[111].mxu0  ;;  %18214 = vmatprep.subr.bf16.mxu0 %v21101_v23  ;;  %v7532_v48 = vmax.f32 %v7332_v49, 0.0  ;;  %v7534_v3 = vmax.f32 %v7334_v12, 0.0  ;;  %v25543_v39 = vld [vmem:[#allocation59_spill] sm:$0xff] }
 0x6fc   :  { %v7338_v44 = vadd.f32 %v24054_v55, %v6060_v33  ;;  %v7340_v57 = vadd.f32 %v24056_v17, %v6526_v32  ;;  %v7533_v63 = vmax.f32 %v7333_v42, 0.0  ;;  %v7535_v20 = vmax.f32 %v7335_v16, 0.0 }
 0x6fd   :  { %v7537_v62 = vmax.f32 %v7337_v6, 0.0  ;;  %v7539_v37 = vmax.f32 %v7339_v36, 0.0  ;;  %6794 = vmatmul.mubr.bf16.gmra.mrb[120].mxu1 %v25542_v22 }
 0x6fe   :  { %v7538_v25 = vmax.f32 %v7338_v44, 0.0  ;;  %v7540_v31 = vmax.f32 %v7340_v57, 0.0  ;;  %6801 = vmatprep.mubr.bf16.mxu1 %v25543_v39 }
 0x6ff   :  { %v24209_v56 = vpack.c.bf16 %v7537_v62, %v7532_v48  ;;  %v24211_v54 = vpack.c.bf16 %v7539_v37, %v7534_v3 }
 0x700   :  { %v24213_v23 = vpack.c.bf16 %v7538_v25, %v7533_v63  ;;  %v24215_v33 = vpack.c.bf16 %v7540_v31, %v7535_v20  ;;  %v6064_v49 = vpop.f32.mrb[72].mxu1  ;;  %v6530_v12 = vpop.f32.mrb[112].mxu0 }
 0x701   :  { %25544 = vst [vmem:[#allocation21_spill] sm:$0xff] %v24209_v56  ;;  %25545 = vst [vmem:[#allocation88_spill] sm:$0xff] %v24211_v54  ;;  %v7342_v6 = vadd.f32 %v24043_v30, %v6064_v49  ;;  %v7344_v36 = vadd.f32 %v24047_v0, %v6530_v12  ;;  %v6066_v42 = vpop.f32.mrb[73].mxu1  ;;  %v6532_v16 = vpop.f32.mrb[113].mxu0  ;;  %v25548_v12 = vld [vmem:[#allocation58_spill] sm:$0xff]  ;;  %v25549_v56 = vld [vmem:[#allocation61_spill] sm:$0xff] }
 0x702   :  { %25546 = vst [vmem:[#allocation89_spill] sm:$0xff] %v24213_v23  ;;  %25547 = vst [vmem:[#allocation24_spill] sm:$0xff] %v24215_v33  ;;  %v7343_v32 = vadd.f32 %v24054_v55, %v6066_v42  ;;  %v7345_v44 = vadd.f32 %v24056_v17, %v6532_v16  ;;  %v6068_v57 = vpop.f32.mrb[74].mxu1  ;;  %v6534_v48 = vpop.f32.mrb[114].mxu0 }
 0x703   :  { %v7347_v3 = vadd.f32 %v24043_v30, %v6068_v57  ;;  %v7349_v62 = vadd.f32 %v24047_v0, %v6534_v48  ;;  %v6070_v20 = vpop.f32.mrb[75].mxu1  ;;  %v6536_v31 = vpop.f32.mrb[115].mxu0  ;;  %v7542_v63 = vmax.f32 %v7342_v6, 0.0  ;;  %v7544_v25 = vmax.f32 %v7344_v36, 0.0 }
 0x704   :  { %v7348_v37 = vadd.f32 %v24054_v55, %v6070_v20  ;;  %v7350_v22 = vadd.f32 %v24056_v17, %v6536_v31  ;;  %v7543_v42 = vmax.f32 %v7343_v32, 0.0  ;;  %v7545_v16 = vmax.f32 %v7345_v44, 0.0 }
 0x705   :  { %v7547_v39 = vmax.f32 %v7347_v3, 0.0  ;;  %v7549_v49 = vmax.f32 %v7349_v62, 0.0  ;;  %6802 = vmatmul.mubr.bf16.gmra.mrb[124].mxu1 %v25548_v12 }
 0x706   :  { %v7548_v54 = vmax.f32 %v7348_v37, 0.0  ;;  %v7550_v33 = vmax.f32 %v7350_v22, 0.0  ;;  %6809 = vmatprep.mubr.bf16.mxu1 %v25549_v56 }
 0x707   :  { %v24227_v57 = vpack.c.bf16 %v7547_v39, %v7542_v63  ;;  %v24229_v48 = vpack.c.bf16 %v7549_v49, %v7544_v25 }
 0x708   :  { %v24231_v23 = vpack.c.bf16 %v7548_v54, %v7543_v42  ;;  %v24233_v20 = vpack.c.bf16 %v7550_v33, %v7545_v16  ;;  %v6074_v6 = vpop.f32.mrb[76].mxu1  ;;  %v6540_v36 = vpop.f32.mrb[116].mxu0 }
 0x709   :  { %25550 = vst [vmem:[#allocation36_spill] sm:$0xff] %v24227_v57  ;;  %25551 = vst [vmem:[#allocation90_spill] sm:$0xff] %v24229_v48  ;;  %v7352_v3 = vadd.f32 %v24043_v30, %v6074_v6  ;;  %v7354_v62 = vadd.f32 %v24047_v0, %v6540_v36  ;;  %v6076_v32 = vpop.f32.mrb[77].mxu1  ;;  %v6542_v44 = vpop.f32.mrb[117].mxu0  ;;  %v25554_v36 = vld [vmem:[#allocation60_spill] sm:$0xff]  ;;  %v25555_v48 = vld [vmem:[#allocation62_spill] sm:$0xff] }
 0x70a   :  { %25552 = vst [vmem:[#allocation23_spill] sm:$0xff] %v24231_v23  ;;  %25553 = vst [vmem:[#allocation91_spill] sm:$0xff] %v24233_v20  ;;  %v7353_v31 = vadd.f32 %v24054_v55, %v6076_v32  ;;  %v7355_v56 = vadd.f32 %v24056_v17, %v6542_v44  ;;  %v6078_v37 = vpop.f32.mrb[78].mxu1  ;;  %v6544_v22 = vpop.f32.mrb[118].mxu0 }
 0x70b   :  { %v7357_v63 = vadd.f32 %v24043_v30, %v6078_v37  ;;  %v7359_v54 = vadd.f32 %v24047_v0, %v6544_v22  ;;  %v6080_v33 = vpop.f32.mrb[79].mxu1  ;;  %v6546_v25 = vpop.f32.mrb[119].mxu0  ;;  %v7552_v12 = vmax.f32 %v7352_v3, 0.0  ;;  %v7554_v42 = vmax.f32 %v7354_v62, 0.0 }
 0x70c   :  { %v7358_v39 = vadd.f32 %v24054_v55, %v6080_v33  ;;  %v7360_v49 = vadd.f32 %v24056_v17, %v6546_v25  ;;  %v7553_v32 = vmax.f32 %v7353_v31, 0.0  ;;  %v7555_v44 = vmax.f32 %v7355_v56, 0.0 }
 0x70d   :  { %v7557_v16 = vmax.f32 %v7357_v63, 0.0  ;;  %v7559_v6 = vmax.f32 %v7359_v54, 0.0  ;;  %6810 = vmatmul.mubr.bf16.gmra.mrb[128].mxu1 %v25554_v36 }
 0x70e   :  { %v7558_v57 = vmax.f32 %v7358_v39, 0.0  ;;  %v7560_v23 = vmax.f32 %v7360_v49, 0.0  ;;  %6817 = vmatprep.mubr.bf16.mxu1 %v25555_v48 }
 0x70f   :  { %v24245_v37 = vpack.c.bf16 %v7557_v16, %v7552_v12  ;;  %v24247_v22 = vpack.c.bf16 %v7559_v6, %v7554_v42 }
 0x710   :  { %v24249_v20 = vpack.c.bf16 %v7558_v57, %v7553_v32  ;;  %v24251_v33 = vpack.c.bf16 %v7560_v23, %v7555_v44  ;;  %v6084_v3 = vpop.f32.mrb[80].mxu1  ;;  %v6550_v62 = vpop.f32.mrb[120].mxu0 }
 0x711   :  { %25556 = vst [vmem:[#allocation92_spill] sm:$0xff] %v24247_v22  ;;  %v7362_v63 = vadd.f32 %v24043_v30, %v6084_v3  ;;  %v7364_v54 = vadd.f32 %v24047_v0, %v6550_v62  ;;  %v6086_v31 = vpop.f32.mrb[81].mxu1  ;;  %v6552_v56 = vpop.f32.mrb[121].mxu0 }
 0x712   :  { %25557 = vst [vmem:[#allocation28_spill] sm:$0xff] %v24251_v33  ;;  %v7363_v25 = vadd.f32 %v24054_v55, %v6086_v31  ;;  %v7365_v48 = vadd.f32 %v24056_v17, %v6552_v56  ;;  %v6088_v39 = vpop.f32.mrb[82].mxu1  ;;  %v6554_v49 = vpop.f32.mrb[122].mxu0 }
 0x713   :  { %v7367_v12 = vadd.f32 %v24043_v30, %v6088_v39  ;;  %v7369_v57 = vadd.f32 %v24047_v0, %v6554_v49  ;;  %v6090_v23 = vpop.f32.mrb[83].mxu1  ;;  %v6556_v42 = vpop.f32.mrb[123].mxu0  ;;  %v7562_v36 = vmax.f32 %v7362_v63, 0.0  ;;  %v7564_v32 = vmax.f32 %v7364_v54, 0.0 }
 0x714   :  { %v7368_v16 = vadd.f32 %v24054_v55, %v6090_v23  ;;  %v7370_v6 = vadd.f32 %v24056_v17, %v6556_v42  ;;  %v7563_v62 = vmax.f32 %v7363_v25, 0.0  ;;  %v7565_v31 = vmax.f32 %v7365_v48, 0.0 }
 0x715   :  { %v7567_v44 = vmax.f32 %v7367_v12, 0.0  ;;  %v7569_v3 = vmax.f32 %v7369_v57, 0.0  ;;  %6818 = vmatmul.mubr.bf16.gmra.mrb[132].mxu1 %v22880_v8 }
 0x716   :  { %v7568_v56 = vmax.f32 %v7368_v16, 0.0  ;;  %v7570_v22 = vmax.f32 %v7370_v6, 0.0  ;;  %6825 = vmatprep.mubr.bf16.mxu1 %v25461_v15 }
 0x717   :  { %v24263_v39 = vpack.c.bf16 %v7567_v44, %v7562_v36  ;;  %v24265_v49 = vpack.c.bf16 %v7569_v3, %v7564_v32 }
 0x718   :  { %v24267_v33 = vpack.c.bf16 %v7568_v56, %v7563_v62  ;;  %v24269_v23 = vpack.c.bf16 %v7570_v22, %v7565_v31  ;;  %v6094_v63 = vpop.f32.mrb[84].mxu1  ;;  %v6560_v54 = vpop.f32.mrb[124].mxu0 }
 0x719   :  { %25558 = vst [vmem:[#allocation93_spill] sm:$0xff] %v24263_v39  ;;  %v7372_v12 = vadd.f32 %v24043_v30, %v6094_v63  ;;  %v7374_v8 = vadd.f32 %v24047_v0, %v6560_v54  ;;  %v6096_v25 = vpop.f32.mrb[85].mxu1  ;;  %v6562_v48 = vpop.f32.mrb[125].mxu0 }
 0x71a   :  { %25559 = vst [vmem:[#allocation94_spill] sm:$0xff] %v24267_v33  ;;  %v7373_v57 = vadd.f32 %v24054_v55, %v6096_v25  ;;  %v7375_v15 = vadd.f32 %v24056_v17, %v6562_v48  ;;  %v6098_v42 = vpop.f32.mrb[86].mxu1  ;;  %v6564_v16 = vpop.f32.mrb[126].mxu0 }
 0x71b   :  { %v7377_v6 = vadd.f32 %v24043_v30, %v6098_v42  ;;  %v7379_v36 = vadd.f32 %v24047_v0, %v6564_v16  ;;  %v6100_v22 = vpop.f32.mrb[87].mxu1  ;;  %v6566_v32 = vpop.f32.mrb[127].mxu0  ;;  %v7572_v62 = vmax.f32 %v7372_v12, 0.0  ;;  %v7574_v31 = vmax.f32 %v7374_v8, 0.0 }
 0x71c   :  { %v7378_v44 = vadd.f32 %v24054_v55, %v6100_v22  ;;  %v7380_v3 = vadd.f32 %v24056_v17, %v6566_v32  ;;  %v7573_v54 = vmax.f32 %v7373_v57, 0.0  ;;  %v7575_v25 = vmax.f32 %v7375_v15, 0.0 }
 0x71d   :  { %v7577_v56 = vmax.f32 %v7377_v6, 0.0  ;;  %v7579_v63 = vmax.f32 %v7379_v36, 0.0  ;;  %6826 = vmatmul.mubr.bf16.gmra.mrb[136].mxu1 %v25463_v34 }
 0x71e   :  { %v7578_v48 = vmax.f32 %v7378_v44, 0.0  ;;  %v7580_v39 = vmax.f32 %v7380_v3, 0.0  ;;  %6833 = vmatprep.mubr.bf16.mxu1 %v25374_v52 }
 0x71f   :  { %v24281_v42 = vpack.c.bf16 %v7577_v56, %v7572_v62  ;;  %v24283_v16 = vpack.c.bf16 %v7579_v63, %v7574_v31 }
 0x720   :  { %v24285_v33 = vpack.c.bf16 %v7578_v48, %v7573_v54  ;;  %v24287_v22 = vpack.c.bf16 %v7580_v39, %v7575_v25  ;;  %v6104_v12 = vpop.f32.mrb[88].mxu1  ;;  %v6570_v8 = vpop.f32.mrb[128].mxu0 }
 0x721   :  { %25560 = vst [vmem:[#allocation27_spill] sm:$0xff] %v24281_v42  ;;  %25561 = vst [vmem:[#allocation31_spill] sm:$0xff] %v24283_v16  ;;  %v7382_v6 = vadd.f32 %v24043_v30, %v6104_v12  ;;  %v7384_v34 = vadd.f32 %v24047_v0, %v6570_v8  ;;  %v6106_v57 = vpop.f32.mrb[89].mxu1  ;;  %v6572_v15 = vpop.f32.mrb[129].mxu0 }
 0x722   :  { %25562 = vst [vmem:[#allocation41_spill] sm:$0xff] %v24287_v22  ;;  %v7383_v36 = vadd.f32 %v24054_v55, %v6106_v57  ;;  %v7385_v32 = vadd.f32 %v24056_v17, %v6572_v15  ;;  %v6108_v44 = vpop.f32.mrb[90].mxu1  ;;  %v6574_v3 = vpop.f32.mrb[130].mxu0 }
 0x723   :  { %v7387_v62 = vadd.f32 %v24043_v30, %v6108_v44  ;;  %v7389_v31 = vadd.f32 %v24047_v0, %v6574_v3  ;;  %v6110_v39 = vpop.f32.mrb[91].mxu1  ;;  %v6576_v56 = vpop.f32.mrb[131].mxu0  ;;  %v7582_v25 = vmax.f32 %v7382_v6, 0.0  ;;  %v7584_v48 = vmax.f32 %v7384_v34, 0.0 }
 0x724   :  { %v7388_v63 = vadd.f32 %v24054_v55, %v6110_v39  ;;  %v7390_v54 = vadd.f32 %v24056_v17, %v6576_v56  ;;  %v7583_v57 = vmax.f32 %v7383_v36, 0.0  ;;  %v7585_v15 = vmax.f32 %v7385_v32, 0.0 }
 0x725   :  { %v7587_v12 = vmax.f32 %v7387_v62, 0.0  ;;  %v7589_v8 = vmax.f32 %v7389_v31, 0.0  ;;  %6834 = vmatmul.mubr.bf16.gmra.mrb[140].mxu1 %v25374_v52 }
 0x726   :  { %v7588_v16 = vmax.f32 %v7388_v63, 0.0  ;;  %v7590_v22 = vmax.f32 %v7390_v54, 0.0  ;;  %8236 = vmatprep.mubr.bf16.mxu1 %v24097_v29  ;;  %v21066_v54 = vld [vmem:[#allocation10] sm:$0xff]  }
 0x727   :  { %v24299_v44 = vpack.c.bf16 %v7587_v12, %v7582_v25  ;;  %v24301_v3 = vpack.c.bf16 %v7589_v8, %v7584_v48  ;;  %v21067_v12 = vld [vmem:[#allocation10 + $0x48] sm:$0xff]  }
 0x728   :  { %v24303_v42 = vpack.c.bf16 %v7588_v16, %v7583_v57  ;;  %v24305_v39 = vpack.c.bf16 %v7590_v22, %v7585_v15  ;;  %v6114_v6 = vpop.f32.mrb[92].mxu1  ;;  %v6580_v34 = vpop.f32.mrb[132].mxu0 }
 0x729   :  { %25563 = vst [vmem:[#allocation40_spill] sm:$0xff] %v24299_v44  ;;  %25564 = vst [vmem:[#allocation45_spill] sm:$0xff] %v24301_v3  ;;  %v7392_v62 = vadd.f32 %v24043_v30, %v6114_v6  ;;  %v7394_v52 = vadd.f32 %v24047_v0, %v6580_v34  ;;  %v6116_v36 = vpop.f32.mrb[93].mxu1  ;;  %v6582_v32 = vpop.f32.mrb[133].mxu0 }
 0x72a   :  { %25565 = vst [vmem:[#allocation44_spill] sm:$0xff] %v24303_v42  ;;  %25566 = vst [vmem:[#allocation20_spill] sm:$0xff] %v24305_v39  ;;  %v7393_v31 = vadd.f32 %v24054_v55, %v6116_v36  ;;  %v7395_v29 = vadd.f32 %v24056_v17, %v6582_v32  ;;  %v6118_v56 = vpop.f32.mrb[94].mxu1  ;;  %v6584_v63 = vpop.f32.mrb[134].mxu0 }
 0x72b   :  { %v7397_v16 = vadd.f32 %v24043_v30, %v6118_v56  ;;  %v7399_v22 = vadd.f32 %v24047_v0, %v6584_v63  ;;  %v6120_v25 = vpop.f32.mrb[95].mxu1  ;;  %v6586_v48 = vpop.f32.mrb[135].mxu0  ;;  %v7592_v15 = vmax.f32 %v7392_v62, 0.0  ;;  %v7594_v6 = vmax.f32 %v7394_v52, 0.0  ;;  %v21068_v56 = vld [vmem:[#allocation10 + $0x8] sm:$0xff]  }
 0x72c   :  { %v7398_v8 = vadd.f32 %v24054_v55, %v6120_v25  ;;  %v7400_v57 = vadd.f32 %v24056_v17, %v6586_v48  ;;  %v7593_v32 = vmax.f32 %v7393_v31, 0.0  ;;  %v7595_v44 = vmax.f32 %v7395_v29, 0.0  ;;  %v21069_v25 = vld [vmem:[#allocation10 + $0x50] sm:$0xff]  }
 0x72d   :  { %v7597_v34 = vmax.f32 %v7397_v16, 0.0  ;;  %v7599_v36 = vmax.f32 %v7399_v22, 0.0  ;;  %8237 = vmatmul.mubr.bf16.vlgmr.msra.gmra.mrb[144].mxu1 %v24094_v19 }
 0x72e   :  { %v7598_v42 = vmax.f32 %v7398_v8, 0.0  ;;  %v7600_v3 = vmax.f32 %v7400_v57, 0.0  ;;  %18193 = vmatpush3.bf16.msra.mxu1 %v21066_v54  ;;  %8558 = vmatprep.mubr.bf16.mxu1 %v24078_v28  ;;  %v21070_v57 = vld [vmem:[#allocation10 + $0x10] sm:$0xff]  }
 0x72f   :  { %v24317_v63 = vpack.c.bf16 %v7597_v34, %v7592_v15  ;;  %v24319_v39 = vpack.c.bf16 %v7599_v36, %v7594_v6  ;;  %18194 = vmatprep.subr.bf16.mxu1 %v21067_v12  ;;  %v21071_v6 = vld [vmem:[#allocation10 + $0x58] sm:$0xff]  }
 0x730   :  { %v24321_v62 = vpack.c.bf16 %v7598_v42, %v7593_v32  ;;  %v24323_v52 = vpack.c.bf16 %v7600_v3, %v7595_v44  ;;  %v6124_v16 = vpop.f32.mrb[96].mxu1  ;;  %v6590_v19 = vpop.f32.mrb[136].mxu0 }
 0x731   :  { %25567 = vst [vmem:[#allocation19_spill] sm:$0xff] %v24317_v63  ;;  %25568 = vst [vmem:[#allocation18_spill] sm:$0xff] %v24319_v39  ;;  %v7402_v31 = vadd.f32 %v24043_v30, %v6124_v16  ;;  %v7404_v29 = vadd.f32 %v24047_v0, %v6590_v19  ;;  %v6126_v54 = vpop.f32.mrb[97].mxu1  ;;  %v6592_v22 = vpop.f32.mrb[137].mxu0 }
 0x732   :  { %25569 = vst [vmem:[#allocation39_spill] sm:$0xff] %v24321_v62  ;;  %25570 = vst [vmem:[#allocation38_spill] sm:$0xff] %v24323_v52  ;;  %v7403_v28 = vadd.f32 %v24054_v55, %v6126_v54  ;;  %v7405_v48 = vadd.f32 %v24056_v17, %v6592_v22  ;;  %18195 = vmatpush3.bf16.msra.mxu1 %v21068_v56  ;;  %v6128_v8 = vpop.f32.mrb[98].mxu1  ;;  %v6594_v12 = vpop.f32.mrb[138].mxu0 }
 0x733   :  { %v7407_v42 = vadd.f32 %v24043_v30, %v6128_v8  ;;  %v7409_v44 = vadd.f32 %v24047_v0, %v6594_v12  ;;  %v6130_v3 = vpop.f32.mrb[99].mxu1  ;;  %v6596_v15 = vpop.f32.mrb[139].mxu0  ;;  %18196 = vmatprep.subr.bf16.mxu1 %v21069_v25  ;;  %v7602_v32 = vmax.f32 %v7402_v31, 0.0  ;;  %v7604_v16 = vmax.f32 %v7404_v29, 0.0  ;;  %v21072_v8 = vld [vmem:[#allocation10 + $0x18] sm:$0xff]   ;;  %v21073_v25 = vld [vmem:[#allocation10 + $0x60] sm:$0xff]  }
 0x734   :  { %v7408_v34 = vadd.f32 %v24054_v55, %v6130_v3  ;;  %v7410_v36 = vadd.f32 %v24056_v17, %v6596_v15  ;;  %v7603_v56 = vmax.f32 %v7403_v28, 0.0  ;;  %v7605_v22 = vmax.f32 %v7405_v48, 0.0 }
 0x735   :  { %v7607_v19 = vmax.f32 %v7407_v42, 0.0  ;;  %v7609_v54 = vmax.f32 %v7409_v44, 0.0 }
 0x736   :  { %v7608_v39 = vmax.f32 %v7408_v34, 0.0  ;;  %v7610_v52 = vmax.f32 %v7410_v36, 0.0  ;;  %18197 = vmatpush3.bf16.msra.mxu1 %v21070_v57  ;;  %v21074_v36 = vld [vmem:[#allocation10 + $0x20] sm:$0xff]  }
 0x737   :  { %v24333_v63 = vpack.c.bf16 %v7607_v19, %v7602_v32  ;;  %v24335_v12 = vpack.c.bf16 %v7609_v54, %v7604_v16  ;;  %18198 = vmatprep.subr.bf16.mxu1 %v21071_v6  ;;  %v21075_v19 = vld [vmem:[#allocation10 + $0x68] sm:$0xff]  }
 0x738   :  { %v24337_v62 = vpack.c.bf16 %v7608_v39, %v7603_v56  ;;  %v24339_v3 = vpack.c.bf16 %v7610_v52, %v7605_v22  ;;  %v6134_v31 = vpop.f32.mrb[100].mxu1  ;;  %v6600_v29 = vpop.f32.mrb[140].mxu0 }
 0x739   :  { %25571 = vst [vmem:[#allocation43_spill] sm:$0xff] %v24333_v63  ;;  %25572 = vst [vmem:[#allocation42_spill] sm:$0xff] %v24335_v12  ;;  %v7412_v42 = vadd.f32 %v24043_v30, %v6134_v31  ;;  %v7414_v28 = vadd.f32 %v24047_v0, %v6600_v29  ;;  %v6136_v48 = vpop.f32.mrb[101].mxu1  ;;  %v6602_v44 = vpop.f32.mrb[141].mxu0 }
 0x73a   :  { %25573 = vst [vmem:[#allocation47_spill] sm:$0xff] %v24337_v62  ;;  %25574 = vst [vmem:[#allocation46_spill] sm:$0xff] %v24339_v3  ;;  %v7413_v57 = vadd.f32 %v24054_v55, %v6136_v48  ;;  %v7415_v15 = vadd.f32 %v24056_v17, %v6602_v44  ;;  %18199 = vmatpush3.bf16.msra.mxu1 %v21072_v8  ;;  %v6138_v34 = vpop.f32.mrb[102].mxu1  ;;  %v6604_v6 = vpop.f32.mrb[142].mxu0 }
 0x73b   :  { %v7417_v39 = vadd.f32 %v24043_v30, %v6138_v34  ;;  %v7419_v52 = vadd.f32 %v24047_v0, %v6604_v6  ;;  %v6140_v32 = vpop.f32.mrb[103].mxu1  ;;  %v6606_v16 = vpop.f32.mrb[143].mxu0  ;;  %18200 = vmatprep.subr.bf16.mxu1 %v21073_v25  ;;  %v7612_v22 = vmax.f32 %v7412_v42, 0.0  ;;  %v7614_v31 = vmax.f32 %v7414_v28, 0.0  ;;  %v21076_v34 = vld [vmem:[#allocation10 + $0x28] sm:$0xff]   ;;  %v21077_v25 = vld [vmem:[#allocation10 + $0x70] sm:$0xff]  }
 0x73c   :  { %v7418_v54 = vadd.f32 %v24054_v55, %v6140_v32  ;;  %v7420_v56 = vadd.f32 %v24056_v17, %v6606_v16  ;;  %v7613_v8 = vmax.f32 %v7413_v57, 0.0  ;;  %v7615_v44 = vmax.f32 %v7415_v15, 0.0 }
 0x73d   :  { %v7617_v29 = vmax.f32 %v7417_v39, 0.0  ;;  %v7619_v48 = vmax.f32 %v7419_v52, 0.0 }
 0x73e   :  { %v7618_v63 = vmax.f32 %v7418_v54, 0.0  ;;  %v7620_v62 = vmax.f32 %v7420_v56, 0.0  ;;  %18201 = vmatpush3.bf16.msra.mxu1 %v21074_v36  ;;  %v21078_v56 = vld [vmem:[#allocation10 + $0x30] sm:$0xff]  }
 0x73f   :  { %v24349_v12 = vpack.c.bf16 %v7617_v29, %v7612_v22  ;;  %v24351_v6 = vpack.c.bf16 %v7619_v48, %v7614_v31  ;;  %18202 = vmatprep.subr.bf16.mxu1 %v21075_v19  ;;  %v21079_v29 = vld [vmem:[#allocation10 + $0x78] sm:$0xff]  }
 0x740   :  { %v24353_v3 = vpack.c.bf16 %v7618_v63, %v7613_v8  ;;  %v24355_v32 = vpack.c.bf16 %v7620_v62, %v7615_v44  ;;  %v6144_v42 = vpop.f32.mrb[104].mxu1  ;;  %v6610_v28 = vpop.f32.mrb[144].mxu0 }
 0x741   :  { %25575 = vst [vmem:[#allocation49_spill] sm:$0xff] %v24349_v12  ;;  %25576 = vst [vmem:[#allocation48_spill] sm:$0xff] %v24351_v6  ;;  %v7422_v39 = vadd.f32 %v24043_v30, %v6144_v42  ;;  %v7424_v57 = vadd.f32 %v24047_v0, %v6610_v28  ;;  %v6146_v15 = vpop.f32.mrb[105].mxu1  ;;  %v6612_v52 = vpop.f32.mrb[145].mxu0 }
 0x742   :  { %25577 = vst [vmem:[#allocation51_spill] sm:$0xff] %v24355_v32  ;;  %v7423_v36 = vadd.f32 %v24054_v55, %v6146_v15  ;;  %v7425_v16 = vadd.f32 %v24056_v17, %v6612_v52  ;;  %18203 = vmatpush3.bf16.msra.mxu1 %v21076_v34  ;;  %v6148_v54 = vpop.f32.mrb[106].mxu1  ;;  %v6614_v19 = vpop.f32.mrb[146].mxu0 }
 0x743   :  { %v7427_v63 = vadd.f32 %v24043_v30, %v6148_v54  ;;  %v7429_v62 = vadd.f32 %v24047_v0, %v6614_v19  ;;  %v6150_v22 = vpop.f32.mrb[107].mxu1  ;;  %v6616_v31 = vpop.f32.mrb[147].mxu0  ;;  %18204 = vmatprep.subr.bf16.mxu1 %v21077_v25  ;;  %v7622_v44 = vmax.f32 %v7422_v39, 0.0  ;;  %v7624_v42 = vmax.f32 %v7424_v57, 0.0  ;;  %v21080_v54 = vld [vmem:[#allocation10 + $0x38] sm:$0xff]  }
 0x744   :  { %v7428_v48 = vadd.f32 %v24054_v55, %v6150_v22  ;;  %v7430_v8 = vadd.f32 %v24056_v17, %v6616_v31  ;;  %v7623_v34 = vmax.f32 %v7423_v36, 0.0  ;;  %v7625_v52 = vmax.f32 %v7425_v16, 0.0 }
 0x745   :  { %v7627_v28 = vmax.f32 %v7427_v63, 0.0  ;;  %v7629_v15 = vmax.f32 %v7429_v62, 0.0 }
 0x746   :  { %v7628_v6 = vmax.f32 %v7428_v48, 0.0  ;;  %v7630_v32 = vmax.f32 %v7430_v8, 0.0  ;;  %18205 = vmatpush3.bf16.msra.mxu1 %v21078_v56 }
 0x747   :  { %v24365_v12 = vpack.c.bf16 %v7627_v28, %v7622_v44  ;;  %v24367_v19 = vpack.c.bf16 %v7629_v15, %v7624_v42  ;;  %18206 = vmatprep.subr.bf16.mxu1 %v21079_v29  ;;  %v21081_v29 = vld [vmem:[#allocation10 + $0x100] sm:$0xff]  }
 0x748   :  { %v24369_v25 = vpack.c.bf16 %v7628_v6, %v7623_v34  ;;  %v24371_v22 = vpack.c.bf16 %v7630_v32, %v7625_v52  ;;  %v6154_v31 = vpop.f32.mrb[108].mxu1  ;;  %v6620_v39 = vpop.f32.mrb[148].mxu0 }
 0x749   :  { %25578 = vst [vmem:[#allocation50_spill] sm:$0xff] %v24365_v12  ;;  %25579 = vst [vmem:[#allocation53_spill] sm:$0xff] %v24367_v19  ;;  %v7432_v57 = vadd.f32 %v24043_v30, %v6154_v31  ;;  %v7434_v36 = vadd.f32 %v24047_v0, %v6620_v39  ;;  %v6156_v16 = vpop.f32.mrb[109].mxu1  ;;  %v6622_v63 = vpop.f32.mrb[149].mxu0 }
 0x74a   :  { %25580 = vst [vmem:[#allocation52_spill] sm:$0xff] %v24369_v25  ;;  %v7433_v56 = vadd.f32 %v24054_v55, %v6156_v16  ;;  %v7435_v62 = vadd.f32 %v24056_v17, %v6622_v63  ;;  %18207 = vmatpush3.bf16.msra.mxu1 %v21080_v54  ;;  %v6158_v48 = vpop.f32.mrb[110].mxu1  ;;  %v6624_v8 = vpop.f32.mrb[150].mxu0 }
 0x74b   :  { %v7437_v6 = vadd.f32 %v24043_v30, %v6158_v48  ;;  %v7439_v32 = vadd.f32 %v24047_v0, %v6624_v8  ;;  %v6160_v44 = vpop.f32.mrb[111].mxu1  ;;  %v6626_v42 = vpop.f32.mrb[151].mxu0  ;;  %19407 = vmatprep.subr.bf16.mxu1 %v25529_v61  ;;  %v7632_v34 = vmax.f32 %v7432_v57, 0.0  ;;  %v7634_v52 = vmax.f32 %v7434_v36, 0.0  ;;  %v21082_v8 = vld [vmem:[#allocation10 + $0x108] sm:$0xff]  }
 0x74c   :  { %v7438_v28 = vadd.f32 %v24054_v55, %v6160_v44  ;;  %v7440_v15 = vadd.f32 %v24056_v17, %v6626_v42  ;;  %v7633_v54 = vmax.f32 %v7433_v56, 0.0  ;;  %v7635_v16 = vmax.f32 %v7435_v62, 0.0 }
 0x74d   :  { %v7637_v31 = vmax.f32 %v7437_v6, 0.0  ;;  %v7639_v39 = vmax.f32 %v7439_v32, 0.0  ;;  %8559 = vmatmul.mubr.bf16.vlgmr.msra.gmra.mrb[148].mxu1 %v24072_v60 }
 0x74e   :  { %v7638_v63 = vmax.f32 %v7438_v28, 0.0  ;;  %v7640_v48 = vmax.f32 %v7440_v15, 0.0  ;;  %19408 = vmatpush3.bf16.msra.mxu1 %v21081_v29  ;;  %19423 = vmatprep.mubr.msk.bf16.mxu1 %vm22013_vm5, %v25529_v61 }
 0x74f   :  { %v24385_v12 = vpack.c.bf16 %v7637_v31, %v7632_v34  ;;  %v24387_v44 = vpack.c.bf16 %v7639_v39, %v7634_v52  ;;  %19409 = vmatprep.subr.bf16.mxu1 %v25529_v61  ;;  %v21084_v52 = vld [vmem:[#allocation10 + $0x110] sm:$0xff]  }
 0x750   :  { %v24390_v57 = vpack.c.bf16 %v7638_v63, %v7633_v54  ;;  %v24392_v36 = vpack.c.bf16 %v7640_v48, %v7635_v16  ;;  %v6164_v60 = vpop.f32.mrb[112].mxu1  ;;  %v6630_v56 = vpop.f32.mrb[152].mxu0 }
 0x751   :  { %25581 = vst [vmem:[#allocation55_spill] sm:$0xff] %v24385_v12  ;;  %25582 = vst [vmem:[#allocation54_spill] sm:$0xff] %v24387_v44  ;;  %v7442_v62 = vadd.f32 %v24043_v30, %v6164_v60  ;;  %v7444_v29 = vadd.f32 %v24047_v0, %v6630_v56  ;;  %v6166_v6 = vpop.f32.mrb[113].mxu1  ;;  %v6632_v32 = vpop.f32.mrb[153].mxu0 }
 0x752   :  { %25583 = vst [vmem:[#allocation57_spill] sm:$0xff] %v24390_v57  ;;  %25584 = vst [vmem:[#allocation56_spill] sm:$0xff] %v24392_v36  ;;  %v7443_v42 = vadd.f32 %v24054_v55, %v6166_v6  ;;  %v7445_v28 = vadd.f32 %v24056_v17, %v6632_v32  ;;  %v6168_v15 = vpop.f32.mrb[114].mxu1  ;;  %v6634_v34 = vpop.f32.mrb[154].mxu0  ;;  %19410 = vmatpush3.bf16.msra.mxu1 %v21082_v8 }
 0x753   :  { %v7447_v31 = vadd.f32 %v24043_v30, %v6168_v15  ;;  %v7449_v39 = vadd.f32 %v24047_v0, %v6634_v34  ;;  %v6170_v54 = vpop.f32.mrb[115].mxu1  ;;  %v6636_v16 = vpop.f32.mrb[155].mxu0  ;;  %19411 = vmatprep.subr.bf16.mxu1 %v25529_v61  ;;  %v7642_v60 = vmax.f32 %v7442_v62, 0.0  ;;  %v7644_v56 = vmax.f32 %v7444_v29, 0.0  ;;  %v21086_v15 = vld [vmem:[#allocation10 + $0x118] sm:$0xff]  }
 0x754   :  { %v7448_v63 = vadd.f32 %v24054_v55, %v6170_v54  ;;  %v7450_v48 = vadd.f32 %v24056_v17, %v6636_v16  ;;  %v7643_v44 = vmax.f32 %v7443_v42, 0.0  ;;  %v7645_v36 = vmax.f32 %v7445_v28, 0.0 }
 0x755   :  { %v7647_v6 = vmax.f32 %v7447_v31, 0.0  ;;  %v7649_v32 = vmax.f32 %v7449_v39, 0.0 }
 0x756   :  { %v7648_v8 = vmax.f32 %v7448_v63, 0.0  ;;  %v7650_v12 = vmax.f32 %v7450_v48, 0.0  ;;  %19412 = vmatpush3.bf16.msra.mxu1 %v21084_v52 }
 0x757   :  { %v24403_v25 = vpack.c.bf16 %v7647_v6, %v7642_v60  ;;  %v24405_v34 = vpack.c.bf16 %v7649_v32, %v7644_v56  ;;  %19413 = vmatprep.subr.bf16.mxu1 %v25529_v61  ;;  %v21088_v60 = vld [vmem:[#allocation10 + $0x120] sm:$0xff]  }
 0x758   :  { %v24408_v57 = vpack.c.bf16 %v7648_v8, %v7643_v44  ;;  %v24410_v54 = vpack.c.bf16 %v7650_v12, %v7645_v36  ;;  %v6174_v62 = vpop.f32.mrb[116].mxu1  ;;  %v6640_v29 = vpop.f32.mrb[156].mxu0  ;;  %v7255_v8 = vsub.s32 4, %v25512_v51 }
 0x759   :  { %25585 = vst [vmem:[#allocation59_spill] sm:$0xff] %v24403_v25  ;;  %25586 = vst [vmem:[#allocation58_spill] sm:$0xff] %v24405_v34  ;;  %v7452_v31 = vadd.f32 %v24043_v30, %v6174_v62  ;;  %v7454_v42 = vadd.f32 %v24047_v0, %v6640_v29  ;;  %v6176_v28 = vpop.f32.mrb[117].mxu1  ;;  %v6642_v39 = vpop.f32.mrb[157].mxu0 }
 0x75a   :  { %25587 = vst [vmem:[#allocation61_spill] sm:$0xff] %v24408_v57  ;;  %25588 = vst [vmem:[#allocation60_spill] sm:$0xff] %v24410_v54  ;;  %v7453_v52 = vadd.f32 %v24054_v55, %v6176_v28  ;;  %v7455_v16 = vadd.f32 %v24056_v17, %v6642_v39  ;;  %v6178_v63 = vpop.f32.mrb[118].mxu1  ;;  %v6644_v48 = vpop.f32.mrb[158].mxu0  ;;  %19414 = vmatpush3.bf16.msra.mxu1 %v21086_v15 }
 0x75b   :  { %v7457_v44 = vadd.f32 %v24043_v30, %v6178_v63  ;;  %v7459_v12 = vadd.f32 %v24047_v0, %v6644_v48  ;;  %v6180_v36 = vpop.f32.mrb[119].mxu1  ;;  %v6646_v56 = vpop.f32.mrb[159].mxu0  ;;  %19415 = vmatprep.subr.bf16.mxu1 %v25529_v61  ;;  %v7652_v62 = vmax.f32 %v7452_v31, 0.0  ;;  %v7654_v29 = vmax.f32 %v7454_v42, 0.0  ;;  %v21090_v0 = vld [vmem:[#allocation10 + $0x128] sm:$0xff]  }
 0x75c   :  { %v7458_v6 = vadd.f32 %v24054_v55, %v6180_v36  ;;  %v7460_v32 = vadd.f32 %v24056_v17, %v6646_v56  ;;  %v7653_v15 = vmax.f32 %v7453_v52, 0.0  ;;  %v7655_v25 = vmax.f32 %v7455_v16, 0.0  ;;  %v21834_v16 = vld [vmem:[#allocation8] sm:$0x1f]  ;;  %v21092_v56 = vld [vmem:[#allocation10 + $0x130] sm:$0xff]  }
 0x75d   :  { %v7657_v28 = vmax.f32 %v7457_v44, 0.0  ;;  %v7659_v39 = vmax.f32 %v7459_v12, 0.0  ;;  %v24431_v12 = vrot.slane %v21834_v16, %v7255_v8  ;;  %v21096_v8 = vld [vmem:[#allocation10 + $0x340] sm:$0xff]  }
 0x75e   :  { %v7658_v57 = vmax.f32 %v7458_v6, 0.0  ;;  %v7660_v30 = vmax.f32 %v7460_v32, 0.0  ;;  %19416 = vmatpush3.bf16.msra.mxu1 %v21088_v60 }
 0x75f   :  { %v24422_v63 = vpack.c.bf16 %v7657_v28, %v7652_v62  ;;  %v24424_v48 = vpack.c.bf16 %v7659_v39, %v7654_v29  ;;  %19417 = vmatprep.subr.bf16.mxu1 %v25529_v61  ;;  %v21094_v28 = vld [vmem:[#allocation10 + $0x138] sm:$0xff]  }
 0x760   :  { %v24427_v55 = vpack.c.bf16 %v7658_v57, %v7653_v15  ;;  %v24429_v17 = vpack.c.bf16 %v7660_v30, %v7655_v25  ;;  %v6683_v51 = vpop.f32.mrb[240].mxu1  ;;  %v19349_v31 = vpop.f32.mrb[24].mxu0 }
 0x761   :  { %25589 = vst [vmem:[#allocation62_spill] sm:$0xff] %v24422_v63  ;;  %25590 = vst [vmem:[#allocation95_spill] sm:$0xff] %v24424_v48  ;;  %v6685_v42 = vpop.f32.mrb[241].mxu1  ;;  %v6876_v44 = vpop.f32.mrb[25].mxu0 }
 0x762   :  { %25591 = vst [vmem:[#allocation96_spill] sm:$0xff] %v24427_v55  ;;  %25592 = vst [vmem:[#allocation97_spill] sm:$0xff] %v24429_v17  ;;  %v6877_v52 = vadd.f32 %v6876_v44, %v6683_v51  ;;  %v6686_v60 = vpop.f32.mrb[242].mxu1  ;;  %v19350_v36 = vpop.f32.mrb[26].mxu0  ;;  %19418 = vmatpush3.bf16.msra.mxu1 %v21090_v0 }
 0x763   :  { %v6688_v6 = vpop.f32.mrb[243].mxu1  ;;  %v6879_v32 = vpop.f32.mrb[27].mxu0  ;;  %19419 = vmatprep.subr.bf16.mxu1 %v25529_v61 }
 0x764   :  { %v7039_v57 = vadd.f32 %v6877_v52, %v23711_v38  ;;  %v6880_v25 = vadd.f32 %v6879_v32, %v6686_v60  ;;  %v21097_v32 = vld [vmem:[#allocation10 + $0x300] sm:$0xff]  }
 0x766   :  { %v7266_v62 = vadd.f32 %v24431_v12, %v7039_v57  ;;  %v7044_v29 = vadd.f32 %v6880_v25, %v23720_v45  ;;  %19420 = vmatpush3.bf16.msra.mxu1 %v21092_v56  ;;  %v21099_v25 = vld [vmem:[#allocation10 + $0x348] sm:$0xff]  }
 0x767   :  { %19421 = vmatprep.subr.bf16.mxu1 %v25529_v61 }
 0x768   :  { %v7271_v39 = vadd.f32 %v24431_v12, %v7044_v29  ;;  %v6691_v15 = vpop.f32.mrb[244].mxu1  ;;  %v24439_v30 = vpop.f32.mrb[28].mxu0  ;;  %v7466_v44 = vmax.f32 %v7266_v62, 0.0 }
 0x769   :  { %v6885_v0 = vadd.f32 %v19349_v31, %v6691_v15  ;;  %v6693_v51 = vpop.f32.mrb[245].mxu1  ;;  %v6892_v42 = vpop.f32.mrb[29].mxu0  ;;  %v25593_v31 = vld [vmem:[#allocation26_spill] sm:$0xff] }
 0x76a   :  { %v7471_v38 = vmax.f32 %v7271_v39, 0.0  ;;  %v6694_v52 = vpop.f32.mrb[246].mxu1  ;;  %v24441_v16 = vpop.f32.mrb[30].mxu0  ;;  %19422 = vmatpush3.bf16.msra.mxu1 %v21094_v28  ;;  %v21100_v28 = vld [vmem:[#allocation10 + $0x308] sm:$0xff]  }
 0x76b   :  { %v7049_v45 = vadd.f32 %v6885_v0, %v23708_v41  ;;  %v6888_v60 = vadd.f32 %v19350_v36, %v6694_v52  ;;  %v6696_v56 = vpop.f32.mrb[247].mxu1  ;;  %v6895_v6 = vpop.f32.mrb[31].mxu0  ;;  %18267 = vmatprep.subr.bf16.mxu1 %v21096_v8  ;;  %v21103_v36 = vld [vmem:[#allocation10 + $0x350] sm:$0xff]  }
 0x76c   :  { %v7666_v57 = vpack.c.bf16 %v7471_v38, %v7466_v44 }
 0x76d   :  { %v7276_v29 = vadd.f32 %v24431_v12, %v7049_v45  ;;  %v7054_v15 = vadd.f32 %v6888_v60, %v25593_v31  ;;  %v21102_v60 = vld [vmem:[#allocation10 + $0x80] sm:$0xff]  }
 0x76e   :  { %19424 = vmatmul.mubr.bf16.vlgmr.msra.gmra.mrb[152].mxu1 %v7666_v57 }
 0x76f   :  { %v7281_v62 = vadd.f32 %v24431_v12, %v7054_v15  ;;  %18268 = vmatpush3.bf16.msra.mxu1 %v21097_v32  ;;  %9043 = vmatprep.mubr.bf16.mxu1 %v24114_v10  ;;  %v7476_v8 = vmax.f32 %v7276_v29, 0.0  ;;  %v21105_v15 = vld [vmem:[#allocation10 + $0xc8] sm:$0xff]   ;;  %v21107_v29 = vld [vmem:[#allocation10 + $0x358] sm:$0xff]  }
 0x770   :  { %v6699_v39 = vpop.f32.mrb[248].mxu1  ;;  %v24448_v41 = vpop.f32.mrb[32].mxu0  ;;  %18269 = vmatprep.subr.bf16.mxu1 %v21099_v25  ;;  %v21104_v25 = vld [vmem:[#allocation10 + $0x310] sm:$0xff]  }
 0x771   :  { %v7481_v0 = vmax.f32 %v7281_v62, 0.0  ;;  %v6893_v51 = vadd.f32 %v6892_v42, %v6699_v39  ;;  %v6701_v44 = vpop.f32.mrb[249].mxu1  ;;  %v24450_v38 = vpop.f32.mrb[33].mxu0  ;;  %v21106_v39 = vld [vmem:[#allocation10 + $0x88] sm:$0xff]  }
 0x772   :  { %v6702_v52 = vpop.f32.mrb[250].mxu1  ;;  %v24452_v45 = vpop.f32.mrb[34].mxu0 }
 0x773   :  { %v7671_v56 = vpack.c.bf16 %v7481_v0, %v7476_v8  ;;  %v7059_v32 = vadd.f32 %v6893_v51, %v23733_v53  ;;  %v6896_v10 = vadd.f32 %v6895_v6, %v6702_v52  ;;  %18270 = vmatpush3.bf16.msra.mxu1 %v21100_v28  ;;  %v6704_v57 = vpop.f32.mrb[251].mxu1  ;;  %v24455_v31 = vpop.f32.mrb[35].mxu0  ;;  %v21108_v6 = vld [vmem:[#allocation10 + $0x318] sm:$0xff]   ;;  %v21109_v28 = vld [vmem:[#allocation10 + $0xd0] sm:$0xff]  }
 0x774   :  { %18271 = vmatprep.subr.bf16.mxu1 %v21103_v36  ;;  %v21111_v36 = vld [vmem:[#allocation10 + $0x360] sm:$0xff]  }
 0x775   :  { %v7286_v42 = vadd.f32 %v24431_v12, %v7059_v32  ;;  %v7064_v62 = vadd.f32 %v6896_v10, %v23742_v18  ;;  %19404 = vmatmul.mubr.bf16.vlgmr.msra.gmra.mrb[68].mxu0 %v7671_v56  ;;  %v21110_v32 = vld [vmem:[#allocation10 + $0x90] sm:$0xff]  }
 0x776   :  { %18215 = vmatpush3.bf16.msra.mxu0 %v21102_v60  ;;  %8599 = vmatprep.mubr.bf16.mxu0 %v24076_v9 }
 0x777   :  { %v7291_v53 = vadd.f32 %v24431_v12, %v7064_v62  ;;  %18272 = vmatpush3.bf16.msra.mxu1 %v21104_v25  ;;  %18216 = vmatprep.subr.bf16.mxu0 %v21105_v15  ;;  %v7486_v51 = vmax.f32 %v7286_v42, 0.0  ;;  %v21113_v42 = vld [vmem:[#allocation10 + $0xd8] sm:$0xff]   ;;  %v21115_v62 = vld [vmem:[#allocation10 + $0x368] sm:$0xff]  }
 0x778   :  { %v6707_v8 = vpop.f32.mrb[252].mxu1  ;;  %v24461_v0 = vpop.f32.mrb[36].mxu0  ;;  %18273 = vmatprep.subr.bf16.mxu1 %v21107_v29 }
 0x779   :  { %v7491_v44 = vmax.f32 %v7291_v53, 0.0  ;;  %v6901_v18 = vadd.f32 %v24439_v30, %v6707_v8  ;;  %v6709_v52 = vpop.f32.mrb[253].mxu1  ;;  %v24464_v60 = vpop.f32.mrb[37].mxu0  ;;  %v21112_v30 = vld [vmem:[#allocation10 + $0x320] sm:$0xff]  }
 0x77a   :  { %18217 = vmatpush3.bf16.msra.mxu0 %v21106_v39  ;;  %v6710_v9 = vpop.f32.mrb[254].mxu1  ;;  %v24466_v56 = vpop.f32.mrb[38].mxu0  ;;  %v25594_v53 = vld [vmem:[#allocation25_spill] sm:$0xff] }
 0x77b   :  { %v24468_v10 = vpack.c.bf16 %v7491_v44, %v7486_v51  ;;  %v7069_v57 = vadd.f32 %v6901_v18, %v23730_v47  ;;  %v6904_v25 = vadd.f32 %v24441_v16, %v6710_v9  ;;  %18274 = vmatpush3.bf16.msra.mxu1 %v21108_v6  ;;  %v6712_v15 = vpop.f32.mrb[255].mxu1  ;;  %v24472_v29 = vpop.f32.mrb[39].mxu0  ;;  %18218 = vmatprep.subr.bf16.mxu0 %v21109_v28  ;;  %v21114_v51 = vld [vmem:[#allocation10 + $0x98] sm:$0xff]   ;;  %v21116_v47 = vld [vmem:[#allocation10 + $0x328] sm:$0xff]   ;;  %v21117_v16 = vld [vmem:[#allocation10 + $0xe0] sm:$0xff]  }
 0x77c   :  { %18275 = vmatprep.subr.bf16.mxu1 %v21111_v36  ;;  %v21119_v28 = vld [vmem:[#allocation10 + $0x370] sm:$0xff]  }
 0x77d   :  { %v7296_v39 = vadd.f32 %v24431_v12, %v7069_v57  ;;  %v7074_v8 = vadd.f32 %v6904_v25, %v25594_v53 }
 0x77e   :  { %18219 = vmatpush3.bf16.msra.mxu0 %v21110_v32 }
 0x77f   :  { %v7301_v44 = vadd.f32 %v24431_v12, %v7074_v8  ;;  %18276 = vmatpush3.bf16.msra.mxu1 %v21112_v30  ;;  %18220 = vmatprep.subr.bf16.mxu0 %v21113_v42  ;;  %v7496_v52 = vmax.f32 %v7296_v39, 0.0  ;;  %v21118_v30 = vld [vmem:[#allocation10 + $0xa0] sm:$0xff]  }
 0x780   :  { %v6715_v6 = vpop.f32.mrb[0].mxu1  ;;  %v24477_v18 = vpop.f32.mrb[40].mxu0  ;;  %18277 = vmatprep.subr.bf16.mxu1 %v21115_v62 }
 0x781   :  { %v7501_v36 = vmax.f32 %v7301_v44, 0.0  ;;  %v6909_v9 = vadd.f32 %v24450_v38, %v6715_v6  ;;  %v6717_v57 = vpop.f32.mrb[1].mxu1  ;;  %v24480_v15 = vpop.f32.mrb[41].mxu0  ;;  %v21120_v38 = vld [vmem:[#allocation10 + $0x330] sm:$0xff]   ;;  %v21121_v44 = vld [vmem:[#allocation10 + $0xe8] sm:$0xff]   ;;  %v21123_v6 = vld [vmem:[#allocation10 + $0x378] sm:$0xff]  }
 0x782   :  { %18221 = vmatpush3.bf16.msra.mxu0 %v21114_v51  ;;  %v6718_v32 = vpop.f32.mrb[2].mxu1  ;;  %v24482_v25 = vpop.f32.mrb[42].mxu0 }
 0x783   :  { %v24484_v42 = vpack.c.bf16 %v7501_v36, %v7496_v52  ;;  %v7079_v53 = vadd.f32 %v6909_v9, %v23755_v1  ;;  %v6912_v8 = vadd.f32 %v24455_v31, %v6718_v32  ;;  %18278 = vmatpush3.bf16.msra.mxu1 %v21116_v47  ;;  %v6720_v62 = vpop.f32.mrb[3].mxu1  ;;  %v24488_v39 = vpop.f32.mrb[43].mxu0  ;;  %18222 = vmatprep.subr.bf16.mxu0 %v21117_v16  ;;  %v21122_v52 = vld [vmem:[#allocation10 + $0xa8] sm:$0xff]   ;;  %v21124_v1 = vld [vmem:[#allocation10 + $0x338] sm:$0xff]   ;;  %v21125_v31 = vld [vmem:[#allocation10 + $0xf0] sm:$0xff]  }
 0x784   :  { %18279 = vmatprep.subr.bf16.mxu1 %v21119_v28  ;;  %v21127_v16 = vld [vmem:[#allocation10 + $0x400] sm:$0xff]  }
 0x785   :  { %v7306_v51 = vadd.f32 %v24431_v12, %v7079_v53  ;;  %v7084_v57 = vadd.f32 %v6912_v8, %v23764_v13  ;;  %v21126_v8 = vld [vmem:[#allocation10 + $0xb0] sm:$0xff]  }
 0x786   :  { %18223 = vmatpush3.bf16.msra.mxu0 %v21118_v30 }
 0x787   :  { %v7311_v36 = vadd.f32 %v24431_v12, %v7084_v57  ;;  %18280 = vmatpush3.bf16.msra.mxu1 %v21120_v38  ;;  %18224 = vmatprep.subr.bf16.mxu0 %v21121_v44  ;;  %v7506_v32 = vmax.f32 %v7306_v51, 0.0 }
 0x788   :  { %v6723_v47 = vpop.f32.mrb[4].mxu1  ;;  %v24493_v9 = vpop.f32.mrb[44].mxu0  ;;  %18281 = vmatprep.subr.bf16.mxu1 %v21123_v6 }
 0x789   :  { %v7511_v28 = vmax.f32 %v7311_v36, 0.0  ;;  %v6917_v62 = vadd.f32 %v24448_v41, %v6723_v47  ;;  %v6725_v53 = vpop.f32.mrb[5].mxu1  ;;  %v24496_v48 = vpop.f32.mrb[45].mxu0  ;;  %v21128_v41 = vld [vmem:[#allocation10 + $0x3c0] sm:$0xff]   ;;  %v21129_v36 = vld [vmem:[#allocation10 + $0xf8] sm:$0xff]   ;;  %v21131_v47 = vld [vmem:[#allocation10 + $0x408] sm:$0xff]  }
 0x78a   :  { %18225 = vmatpush3.bf16.msra.mxu0 %v21122_v52  ;;  %v6726_v13 = vpop.f32.mrb[6].mxu1  ;;  %v24498_v30 = vpop.f32.mrb[46].mxu0 }
 0x78b   :  { %v24500_v38 = vpack.c.bf16 %v7511_v28, %v7506_v32  ;;  %v7089_v44 = vadd.f32 %v6917_v62, %v23752_v46  ;;  %v6920_v57 = vadd.f32 %v24452_v45, %v6726_v13  ;;  %18282 = vmatpush3.bf16.msra.mxu1 %v21124_v1  ;;  %v6728_v6 = vpop.f32.mrb[7].mxu1  ;;  %v24504_v51 = vpop.f32.mrb[47].mxu0  ;;  %18226 = vmatprep.subr.bf16.mxu0 %v21125_v31  ;;  %v21130_v32 = vld [vmem:[#allocation10 + $0xb8] sm:$0xff]   ;;  %v21132_v45 = vld [vmem:[#allocation10 + $0x3c8] sm:$0xff]   ;;  %v21133_v1 = vld [vmem:[#allocation10 + $0x2c0] sm:$0xff]  }
 0x78c   :  { %18298 = vmatprep.subr.bf16.mxu1 %v21127_v16  ;;  %v21135_v16 = vld [vmem:[#allocation10 + $0x410] sm:$0xff]  }
 0x78d   :  { %v7316_v52 = vadd.f32 %v24431_v12, %v7089_v44  ;;  %v7094_v53 = vadd.f32 %v6920_v57, %v23761_v7 }
 0x78e   :  { %18227 = vmatpush3.bf16.msra.mxu0 %v21126_v8  ;;  %9044 = vmatmul.mubr.bf16.vlgmr.msra.gmra.mrb[156].mxu1 %v24112_v43 }
 0x78f   :  { %v7321_v46 = vadd.f32 %v24431_v12, %v7094_v53  ;;  %18299 = vmatpush3.bf16.msra.mxu1 %v21128_v41  ;;  %9448 = vmatprep.mubr.bf16.mxu1 %v24135_v24  ;;  %v7516_v62 = vmax.f32 %v7316_v52, 0.0  ;;  %v21134_v24 = vld [vmem:[#allocation10 + $0x280] sm:$0xff]   ;;  %v21137_v53 = vld [vmem:[#allocation10 + $0x2c8] sm:$0xff]  }
 0x790   :  { %v6731_v31 = vpop.f32.mrb[8].mxu1  ;;  %v24511_v28 = vpop.f32.mrb[48].mxu0  ;;  %18228 = vmatprep.subr.bf16.mxu0 %v21129_v36  ;;  %18300 = vmatprep.subr.bf16.mxu1 %v21131_v47 }
 0x791   :  { %v7521_v13 = vmax.f32 %v7321_v46, 0.0  ;;  %v6925_v7 = vadd.f32 %v24464_v60, %v6731_v31  ;;  %v6733_v8 = vpop.f32.mrb[9].mxu1  ;;  %v24514_v43 = vpop.f32.mrb[49].mxu0  ;;  %v21136_v60 = vld [vmem:[#allocation10 + $0x3d0] sm:$0xff]   ;;  %v21139_v46 = vld [vmem:[#allocation10 + $0x418] sm:$0xff]  }
 0x792   :  { %18229 = vmatpush3.bf16.msra.mxu0 %v21130_v32  ;;  %v6734_v44 = vpop.f32.mrb[10].mxu1  ;;  %v24516_v57 = vpop.f32.mrb[50].mxu0  ;;  %v25595_v31 = vld [vmem:[#allocation33_spill] sm:$0xff] }
 0x793   :  { %v24518_v6 = vpack.c.bf16 %v7521_v13, %v7516_v62  ;;  %v7099_v41 = vadd.f32 %v6925_v7, %v23777_v14  ;;  %v6928_v36 = vadd.f32 %v24472_v29, %v6734_v44  ;;  %18301 = vmatpush3.bf16.msra.mxu1 %v21132_v45  ;;  %v6736_v47 = vpop.f32.mrb[11].mxu1  ;;  %v24522_v52 = vpop.f32.mrb[51].mxu0  ;;  %18245 = vmatprep.subr.bf16.mxu0 %v21133_v1  ;;  %v21138_v14 = vld [vmem:[#allocation10 + $0x288] sm:$0xff]   ;;  %v21140_v45 = vld [vmem:[#allocation10 + $0x3d8] sm:$0xff]   ;;  %v21141_v1 = vld [vmem:[#allocation10 + $0x2d0] sm:$0xff]  }
 0x794   :  { %18302 = vmatprep.subr.bf16.mxu1 %v21135_v16  ;;  %v21143_v16 = vld [vmem:[#allocation10 + $0x420] sm:$0xff]   ;;  %v21142_v47 = vld [vmem:[#allocation10 + $0x290] sm:$0xff]  }
 0x795   :  { %v7326_v32 = vadd.f32 %v24431_v12, %v7099_v41  ;;  %v7104_v8 = vadd.f32 %v6928_v36, %v25595_v31  ;;  %8600 = vmatmul.mubr.bf16.vlgmr.msra.gmra.mrb[72].mxu0 %v24074_v2 }
 0x796   :  { %18246 = vmatpush3.bf16.msra.mxu0 %v21134_v24  ;;  %9002 = vmatprep.mubr.bf16.mxu0 %v24116_v26 }
 0x797   :  { %v7331_v29 = vadd.f32 %v24431_v12, %v7104_v8  ;;  %18303 = vmatpush3.bf16.msra.mxu1 %v21136_v60  ;;  %18247 = vmatprep.subr.bf16.mxu0 %v21137_v53  ;;  %v7526_v7 = vmax.f32 %v7326_v32, 0.0  ;;  %v25596_v53 = vld [vmem:[#allocation30_spill] sm:$0xff] }
 0x798   :  { %v6739_v62 = vpop.f32.mrb[12].mxu1  ;;  %v24529_v13 = vpop.f32.mrb[52].mxu0  ;;  %18304 = vmatprep.subr.bf16.mxu1 %v21139_v46 }
 0x799   :  { %v7531_v44 = vmax.f32 %v7331_v29, 0.0  ;;  %v6933_v41 = vadd.f32 %v24461_v0, %v6739_v62  ;;  %v6741_v2 = vpop.f32.mrb[13].mxu1  ;;  %v24532_v24 = vpop.f32.mrb[53].mxu0  ;;  %v21144_v0 = vld [vmem:[#allocation10 + $0x3e0] sm:$0xff]   ;;  %v21145_v29 = vld [vmem:[#allocation10 + $0x2d8] sm:$0xff]   ;;  %v21147_v62 = vld [vmem:[#allocation10 + $0x428] sm:$0xff]  }
 0x79a   :  { %18248 = vmatpush3.bf16.msra.mxu0 %v21138_v14  ;;  %v6742_v26 = vpop.f32.mrb[14].mxu1  ;;  %v24534_v36 = vpop.f32.mrb[54].mxu0  ;;  %v25597_v2 = vld [vmem:[#allocation29_spill] sm:$0xff] }
 0x79b   :  { %v24536_v60 = vpack.c.bf16 %v7531_v44, %v7526_v7  ;;  %v7109_v31 = vadd.f32 %v6933_v41, %v25596_v53  ;;  %v6936_v8 = vadd.f32 %v24466_v56, %v6742_v26  ;;  %18305 = vmatpush3.bf16.msra.mxu1 %v21140_v45  ;;  %v6744_v46 = vpop.f32.mrb[15].mxu1  ;;  %v24540_v32 = vpop.f32.mrb[55].mxu0  ;;  %18249 = vmatprep.subr.bf16.mxu0 %v21141_v1  ;;  %v21146_v7 = vld [vmem:[#allocation10 + $0x298] sm:$0xff]   ;;  %v21148_v56 = vld [vmem:[#allocation10 + $0x3e8] sm:$0xff]   ;;  %v21149_v45 = vld [vmem:[#allocation10 + $0x2e0] sm:$0xff]  }
 0x79c   :  { %18306 = vmatprep.subr.bf16.mxu1 %v21143_v16  ;;  %v21151_v1 = vld [vmem:[#allocation10 + $0x430] sm:$0xff]  }
 0x79d   :  { %v7336_v14 = vadd.f32 %v24431_v12, %v7109_v31  ;;  %v7114_v17 = vadd.f32 %v6936_v8, %v25597_v2 }
 0x79e   :  { %18250 = vmatpush3.bf16.msra.mxu0 %v21142_v47 }
 0x79f   :  { %v7341_v44 = vadd.f32 %v24431_v12, %v7114_v17  ;;  %18307 = vmatpush3.bf16.msra.mxu1 %v21144_v0  ;;  %18251 = vmatprep.subr.bf16.mxu0 %v21145_v29  ;;  %v7536_v53 = vmax.f32 %v7336_v14, 0.0  ;;  %v21150_v17 = vld [vmem:[#allocation10 + $0x2a0] sm:$0xff]   ;;  %v25598_v29 = vld [vmem:[#allocation35_spill] sm:$0xff] }
 0x7a0   :  { %v6747_v41 = vpop.f32.mrb[16].mxu1  ;;  %v24545_v26 = vpop.f32.mrb[56].mxu0  ;;  %18308 = vmatprep.subr.bf16.mxu1 %v21147_v62 }
 0x7a1   :  { %v7541_v16 = vmax.f32 %v7341_v44, 0.0  ;;  %v6941_v46 = vadd.f32 %v24480_v15, %v6747_v41  ;;  %v6749_v31 = vpop.f32.mrb[17].mxu1  ;;  %v24548_v63 = vpop.f32.mrb[57].mxu0  ;;  %v21152_v15 = vld [vmem:[#allocation10 + $0x3f0] sm:$0xff]   ;;  %v21153_v44 = vld [vmem:[#allocation10 + $0x2e8] sm:$0xff]   ;;  %v21155_v41 = vld [vmem:[#allocation10 + $0x438] sm:$0xff]  }
 0x7a2   :  { %18252 = vmatpush3.bf16.msra.mxu0 %v21146_v7  ;;  %v6750_v47 = vpop.f32.mrb[18].mxu1  ;;  %v24550_v8 = vpop.f32.mrb[58].mxu0  ;;  %v25599_v31 = vld [vmem:[#allocation37_spill] sm:$0xff] }
 0x7a3   :  { %v24552_v0 = vpack.c.bf16 %v7541_v16, %v7536_v53  ;;  %v7119_v2 = vadd.f32 %v6941_v46, %v25598_v29  ;;  %v6944_v55 = vadd.f32 %v24488_v39, %v6750_v47  ;;  %18309 = vmatpush3.bf16.msra.mxu1 %v21148_v56  ;;  %v6752_v62 = vpop.f32.mrb[19].mxu1  ;;  %v24556_v14 = vpop.f32.mrb[59].mxu0  ;;  %18253 = vmatprep.subr.bf16.mxu0 %v21149_v45  ;;  %v21154_v53 = vld [vmem:[#allocation10 + $0x2a8] sm:$0xff]   ;;  %v21156_v39 = vld [vmem:[#allocation10 + $0x3f8] sm:$0xff]   ;;  %v21157_v56 = vld [vmem:[#allocation10 + $0x2f0] sm:$0xff]  }
 0x7a4   :  { %18310 = vmatprep.subr.bf16.mxu1 %v21151_v1 }
 0x7a5   :  { %v7346_v7 = vadd.f32 %v24431_v12, %v7119_v2  ;;  %v7124_v34 = vadd.f32 %v6944_v55, %v25599_v31 }
 0x7a6   :  { %18254 = vmatpush3.bf16.msra.mxu0 %v21150_v17  ;;  %v21158_v17 = vld [vmem:[#allocation10 + $0x2b0] sm:$0xff]  }
 0x7a7   :  { %v7351_v16 = vadd.f32 %v24431_v12, %v7124_v34  ;;  %18311 = vmatpush3.bf16.msra.mxu1 %v21152_v15  ;;  %18255 = vmatprep.subr.bf16.mxu0 %v21153_v44  ;;  %v7546_v45 = vmax.f32 %v7346_v7, 0.0  ;;  %v25600_v15 = vld [vmem:[#allocation32_spill] sm:$0xff]  ;;  %v21159_v7 = vld [vmem:[#allocation10 + $0x4c0] sm:$0xff]  }
 0x7a8   :  { %v6755_v46 = vpop.f32.mrb[20].mxu1  ;;  %18312 = vmatprep.subr.bf16.mxu1 %v21155_v41  ;;  %v24561_v47 = vpop.f32.mrb[60].mxu0 }
 0x7a9   :  { %v7551_v29 = vmax.f32 %v7351_v16, 0.0  ;;  %v6949_v1 = vadd.f32 %v24477_v18, %v6755_v46  ;;  %v6757_v62 = vpop.f32.mrb[21].mxu1  ;;  %v24564_v2 = vpop.f32.mrb[61].mxu0  ;;  %v21160_v18 = vld [vmem:[#allocation10 + $0x2f8] sm:$0xff]   ;;  %v25601_v46 = vld [vmem:[#allocation34_spill] sm:$0xff] }
 0x7aa   :  { %18256 = vmatpush3.bf16.msra.mxu0 %v21154_v53  ;;  %v6758_v55 = vpop.f32.mrb[22].mxu1  ;;  %v24566_v31 = vpop.f32.mrb[62].mxu0 }
 0x7ab   :  { %v24568_v34 = vpack.c.bf16 %v7551_v29, %v7546_v45  ;;  %v7129_v44 = vadd.f32 %v6949_v1, %v25600_v15  ;;  %v6952_v41 = vadd.f32 %v24482_v25, %v6758_v55  ;;  %18313 = vmatpush3.bf16.msra.mxu1 %v21156_v39  ;;  %v6760_v54 = vpop.f32.mrb[23].mxu1  ;;  %18257 = vmatprep.subr.bf16.mxu0 %v21157_v56  ;;  %v24572_v16 = vpop.f32.mrb[63].mxu0  ;;  %v21161_v45 = vld [vmem:[#allocation10 + $0x2b8] sm:$0xff]  }
 0x7ac   :  { %19447 = vmatprep.subr.bf16.mxu1 %v25529_v61  ;;  %v21162_v54 = vld [vmem:[#allocation10 + $0x4c8] sm:$0xff]  }
 0x7ad   :  { %v7356_v53 = vadd.f32 %v24431_v12, %v7129_v44  ;;  %v7134_v62 = vadd.f32 %v6952_v41, %v25601_v46 }
 0x7ae   :  { %18258 = vmatpush3.bf16.msra.mxu0 %v21158_v17  ;;  %9449 = vmatmul.mubr.bf16.vlgmr.msra.gmra.mrb[160].mxu1 %v24128_v59 }
 0x7af   :  { %v7361_v29 = vadd.f32 %v24431_v12, %v7134_v62  ;;  %19448 = vmatpush3.bf16.msra.mxu1 %v21159_v7  ;;  %18259 = vmatprep.subr.bf16.mxu0 %v21160_v18  ;;  %v7556_v56 = vmax.f32 %v7356_v53, 0.0  ;;  %v21163_v7 = vld [vmem:[#allocation10 + $0x380] sm:$0xff]  }
 0x7b0   :  { %v6763_v25 = vpop.f32.mrb[24].mxu1  ;;  %v18155_v39 = vpop.f32.mrb[64].mxu0  ;;  %19449 = vmatprep.subr.bf16.mxu1 %v25529_v61  ;;  %19463 = vmatprep.mubr.msk.bf16.mxu1 %vm22013_vm5, %v25529_v61 }
 0x7b1   :  { %v7561_v1 = vmax.f32 %v7361_v29, 0.0  ;;  %v6957_v55 = vadd.f32 %v24496_v48, %v6763_v25  ;;  %v6765_v17 = vpop.f32.mrb[25].mxu1  ;;  %v18156_v15 = vpop.f32.mrb[65].mxu0  ;;  %v21164_v48 = vld [vmem:[#allocation10 + $0x4d0] sm:$0xff]  }
 0x7b2   :  { %v24583_v59 = vadd.f32 %v18156_v15, %v18155_v39  ;;  %18260 = vmatpush3.bf16.msra.mxu0 %v21161_v45  ;;  %v6766_v44 = vpop.f32.mrb[26].mxu1  ;;  %v18158_v41 = vpop.f32.mrb[66].mxu0  ;;  %v25602_v15 = vld [vmem:[#allocation65_spill] sm:$0xff] }
 0x7b3   :  { %v24585_v18 = vpack.c.bf16 %v7561_v1, %v7556_v56  ;;  %v7139_v46 = vadd.f32 %v6957_v55, %v23827_v40  ;;  %v6960_v62 = vadd.f32 %v24504_v51, %v6766_v44  ;;  %19450 = vmatpush3.bf16.msra.mxu1 %v21162_v54  ;;  %v6768_v19 = vpop.f32.mrb[27].mxu1  ;;  %v18159_v53 = vpop.f32.mrb[67].mxu0  ;;  %19427 = vmatprep.subr.bf16.mxu0 %v25529_v61  ;;  %v21165_v40 = vld [vmem:[#allocation10 + $0x388] sm:$0xff]   ;;  %v21166_v51 = vld [vmem:[#allocation10 + $0x4d8] sm:$0xff]   ;;  %v21167_v55 = vld [vmem:[#allocation10 + $0x390] sm:$0xff]  }
 0x7b4   :  { %v24590_v29 = vadd.f32 %v18159_v53, %v18158_v41  ;;  %19451 = vmatprep.subr.bf16.mxu1 %v25529_v61 }
 0x7b5   :  { %v7366_v45 = vadd.f32 %v24431_v12, %v7139_v46  ;;  %v7144_v25 = vadd.f32 %v6960_v62, %v23834_v35  ;;  %9003 = vmatmul.mubr.bf16.vlgmr.msra.gmra.mrb[76].mxu0 %v24110_v5  ;;  %v21168_v46 = vld [vmem:[#allocation10 + $0x4e0] sm:$0xff]  }
 0x7b6   :  { %19428 = vmatpush3.bf16.msra.mxu0 %v21163_v7  ;;  %19443 = vmatprep.mubr.msk.bf16.mxu0 %vm22013_vm5, %v25529_v61 }
 0x7b7   :  { %v7371_v19 = vadd.f32 %v24431_v12, %v7144_v25  ;;  %19452 = vmatpush3.bf16.msra.mxu1 %v21164_v48  ;;  %19429 = vmatprep.subr.bf16.mxu0 %v25529_v61  ;;  %v7566_v39 = vmax.f32 %v7366_v45, 0.0  ;;  %v21169_v48 = vld [vmem:[#allocation10 + $0x398] sm:$0xff]   ;;  %v21170_v25 = vld [vmem:[#allocation10 + $0x4e8] sm:$0xff]  }
 0x7b8   :  { %v6771_v54 = vpop.f32.mrb[28].mxu1  ;;  %19453 = vmatprep.subr.bf16.mxu1 %v25529_v61 }
 0x7b9   :  { %v7571_v56 = vmax.f32 %v7371_v19, 0.0  ;;  %v6965_v35 = vadd.f32 %v24493_v9, %v6771_v54  ;;  %v6773_v1 = vpop.f32.mrb[29].mxu1  ;;  %v25603_v9 = vld [vmem:[#allocation66_spill] sm:$0xff] }
 0x7ba   :  { %19430 = vmatpush3.bf16.msra.mxu0 %v21165_v40  ;;  %v6774_v5 = vpop.f32.mrb[30].mxu1  ;;  %v25604_v1 = vld [vmem:[#allocation68_spill] sm:$0xff] }
 0x7bb   :  { %v24602_v17 = vpack.c.bf16 %v7571_v56, %v7566_v39  ;;  %v7149_v44 = vadd.f32 %v6965_v35, %v25602_v15  ;;  %v6968_v41 = vadd.f32 %v24498_v30, %v6774_v5  ;;  %19454 = vmatpush3.bf16.msra.mxu1 %v21166_v51  ;;  %v6776_v7 = vpop.f32.mrb[31].mxu1  ;;  %19431 = vmatprep.subr.bf16.mxu0 %v25529_v61  ;;  %v21171_v56 = vld [vmem:[#allocation10 + $0x3a0] sm:$0xff]  }
 0x7bc   :  { %19455 = vmatprep.subr.bf16.mxu1 %v25529_v61 }
 0x7bd   :  { %v7376_v62 = vadd.f32 %v24431_v12, %v7149_v44  ;;  %v7154_v53 = vadd.f32 %v6968_v41, %v25603_v9  ;;  %v21172_v44 = vld [vmem:[#allocation10 + $0x4f0] sm:$0xff]   ;;  %v21174_v9 = vld [vmem:[#allocation10 + $0x4f8] sm:$0xff]  }
 0x7be   :  { %19432 = vmatpush3.bf16.msra.mxu0 %v21167_v55 }
 0x7bf   :  { %v7381_v45 = vadd.f32 %v24431_v12, %v7154_v53  ;;  %19456 = vmatpush3.bf16.msra.mxu1 %v21168_v46  ;;  %19433 = vmatprep.subr.bf16.mxu0 %v25529_v61  ;;  %v7576_v40 = vmax.f32 %v7376_v62, 0.0  ;;  %v21173_v46 = vld [vmem:[#allocation10 + $0x3a8] sm:$0xff]   ;;  %v21176_v53 = vld [vmem:[#allocation10 + $0x5c0] sm:$0xff]  }
 0x7c0   :  { %v6779_v30 = vpop.f32.mrb[32].mxu1  ;;  %19457 = vmatprep.subr.bf16.mxu1 %v25529_v61 }
 0x7c1   :  { %v7581_v19 = vmax.f32 %v7381_v45, 0.0  ;;  %v6973_v51 = vadd.f32 %v24514_v43, %v6779_v30  ;;  %v6781_v54 = vpop.f32.mrb[33].mxu1  ;;  %v25605_v43 = vld [vmem:[#allocation70_spill] sm:$0xff] }
 0x7c2   :  { %19434 = vmatpush3.bf16.msra.mxu0 %v21169_v48  ;;  %v6782_v39 = vpop.f32.mrb[34].mxu1  ;;  %v25606_v54 = vld [vmem:[#allocation67_spill] sm:$0xff] }
 0x7c3   :  { %v24614_v35 = vpack.c.bf16 %v7581_v19, %v7576_v40  ;;  %v7159_v5 = vadd.f32 %v6973_v51, %v25604_v1  ;;  %v6976_v55 = vadd.f32 %v24522_v52, %v6782_v39  ;;  %19458 = vmatpush3.bf16.msra.mxu1 %v21170_v25  ;;  %v6784_v15 = vpop.f32.mrb[35].mxu1  ;;  %19435 = vmatprep.subr.bf16.mxu0 %v25529_v61  ;;  %v21175_v19 = vld [vmem:[#allocation10 + $0x3b0] sm:$0xff]  }
 0x7c4   :  { %19459 = vmatprep.subr.bf16.mxu1 %v25529_v61 }
 0x7c5   :  { %v7386_v41 = vadd.f32 %v24431_v12, %v7159_v5  ;;  %v7164_v7 = vadd.f32 %v6976_v55, %v25605_v43  ;;  %v21177_v5 = vld [vmem:[#allocation10 + $0x580] sm:$0xff]   ;;  %v21179_v55 = vld [vmem:[#allocation10 + $0x5c8] sm:$0xff]  }
 0x7c6   :  { %19436 = vmatpush3.bf16.msra.mxu0 %v21171_v56 }
 0x7c7   :  { %v7391_v62 = vadd.f32 %v24431_v12, %v7164_v7  ;;  %19460 = vmatpush3.bf16.msra.mxu1 %v21172_v44  ;;  %19437 = vmatprep.subr.bf16.mxu0 %v25529_v61  ;;  %v7586_v48 = vmax.f32 %v7386_v41, 0.0  ;;  %v21178_v41 = vld [vmem:[#allocation10 + $0x3b8] sm:$0xff]   ;;  %v21181_v7 = vld [vmem:[#allocation10 + $0x480] sm:$0xff]  }
 0x7c8   :  { %v6787_v52 = vpop.f32.mrb[36].mxu1  ;;  %19461 = vmatprep.subr.bf16.mxu1 %v25529_v61 }
 0x7c9   :  { %v7591_v45 = vmax.f32 %v7391_v62, 0.0  ;;  %v6981_v25 = vadd.f32 %v24511_v28, %v6787_v52  ;;  %v6789_v30 = vpop.f32.mrb[37].mxu1  ;;  %v25607_v28 = vld [vmem:[#allocation69_spill] sm:$0xff]  ;;  %v21183_v62 = vld [vmem:[#allocation10 + $0x5d0] sm:$0xff]  }
 0x7ca   :  { %19438 = vmatpush3.bf16.msra.mxu0 %v21173_v46  ;;  %v6790_v40 = vpop.f32.mrb[38].mxu1 }
 0x7cb   :  { %v24626_v51 = vpack.c.bf16 %v7591_v45, %v7586_v48  ;;  %v7169_v39 = vadd.f32 %v6981_v25, %v25606_v54  ;;  %v6984_v56 = vadd.f32 %v24516_v57, %v6790_v40  ;;  %19462 = vmatpush3.bf16.msra.mxu1 %v21174_v9  ;;  %v6792_v1 = vpop.f32.mrb[39].mxu1  ;;  %19439 = vmatprep.subr.bf16.mxu0 %v25529_v61  ;;  %v21180_v57 = vld [vmem:[#allocation10 + $0x588] sm:$0xff]   ;;  %v21182_v45 = vld [vmem:[#allocation10 + $0x440] sm:$0xff]  }
 0x7cc   :  { %18373 = vmatprep.subr.bf16.mxu1 %v21176_v53  ;;  %v21185_v54 = vld [vmem:[#allocation10 + $0x488] sm:$0xff]  }
 0x7cd   :  { %v7396_v15 = vadd.f32 %v24431_v12, %v7169_v39  ;;  %v7174_v44 = vadd.f32 %v6984_v56, %v25607_v28  ;;  %v21187_v39 = vld [vmem:[#allocation10 + $0x5d8] sm:$0xff]   ;;  %v21191_v28 = vld [vmem:[#allocation10 + $0x5e0] sm:$0xff]  }
 0x7ce   :  { %19440 = vmatpush3.bf16.msra.mxu0 %v21175_v19  ;;  %19464 = vmatmul.mubr.bf16.vlgmr.msra.gmra.mrb[164].mxu1 %v24484_v42  ;;  %v21184_v19 = vld [vmem:[#allocation10 + $0x590] sm:$0xff]  }
 0x7cf   :  { %v7401_v43 = vadd.f32 %v24431_v12, %v7174_v44  ;;  %18374 = vmatpush3.bf16.msra.mxu1 %v21177_v5  ;;  %9935 = vmatprep.mubr.bf16.mxu1 %v24153_v27  ;;  %v7596_v9 = vmax.f32 %v7396_v15, 0.0  ;;  %v21186_v5 = vld [vmem:[#allocation10 + $0x448] sm:$0xff]  }
 0x7d0   :  { %v6795_v46 = vpop.f32.mrb[120].mxu1  ;;  %19441 = vmatprep.subr.bf16.mxu0 %v25529_v61  ;;  %18375 = vmatprep.subr.bf16.mxu1 %v21179_v55  ;;  %v21189_v55 = vld [vmem:[#allocation10 + $0x490] sm:$0xff]  }
 0x7d1   :  { %v7601_v52 = vmax.f32 %v7401_v43, 0.0  ;;  %v6989_v53 = vadd.f32 %v24532_v24, %v6795_v46  ;;  %v6797_v48 = vpop.f32.mrb[121].mxu1  ;;  %v25608_v24 = vld [vmem:[#allocation73_spill] sm:$0xff] }
 0x7d2   :  { %19442 = vmatpush3.bf16.msra.mxu0 %v21178_v41  ;;  %v6798_v42 = vpop.f32.mrb[122].mxu1  ;;  %v21193_v48 = vld [vmem:[#allocation10 + $0x498] sm:$0xff]  }
 0x7d3   :  { %v24638_v25 = vpack.c.bf16 %v7601_v52, %v7596_v9  ;;  %v7179_v30 = vadd.f32 %v6989_v53, %v23870_v4  ;;  %v6992_v27 = vadd.f32 %v24540_v32, %v6798_v42  ;;  %18376 = vmatpush3.bf16.msra.mxu1 %v21180_v57  ;;  %v6800_v40 = vpop.f32.mrb[123].mxu1  ;;  %18320 = vmatprep.subr.bf16.mxu0 %v21181_v7  ;;  %v21188_v32 = vld [vmem:[#allocation10 + $0x598] sm:$0xff]   ;;  %v21190_v7 = vld [vmem:[#allocation10 + $0x450] sm:$0xff]   ;;  %v21192_v53 = vld [vmem:[#allocation10 + $0x5a0] sm:$0xff]  }
 0x7d4   :  { %18377 = vmatprep.subr.bf16.mxu1 %v21183_v62  ;;  %v21195_v42 = vld [vmem:[#allocation10 + $0x5e8] sm:$0xff]  }
 0x7d5   :  { %v7406_v56 = vadd.f32 %v24431_v12, %v7179_v30  ;;  %v7184_v1 = vadd.f32 %v6992_v27, %v25608_v24  ;;  %19444 = vmatmul.mubr.bf16.vlgmr.msra.gmra.mrb[160].mxu0 %v24468_v10  ;;  %v21194_v27 = vld [vmem:[#allocation10 + $0x458] sm:$0xff]  }
 0x7d6   :  { %18321 = vmatpush3.bf16.msra.mxu0 %v21182_v45  ;;  %9489 = vmatprep.mubr.bf16.mxu0 %v24133_v50  ;;  %v25609_v50 = vld [vmem:[#allocation71_spill] sm:$0xff] }
 0x7d7   :  { %v7411_v4 = vadd.f32 %v24431_v12, %v7184_v1  ;;  %18378 = vmatpush3.bf16.msra.mxu1 %v21184_v19  ;;  %18322 = vmatprep.subr.bf16.mxu0 %v21185_v54  ;;  %v7606_v44 = vmax.f32 %v7406_v56, 0.0  ;;  %v21196_v19 = vld [vmem:[#allocation10 + $0x5a8] sm:$0xff]   ;;  %v21197_v54 = vld [vmem:[#allocation10 + $0x4a0] sm:$0xff]  }
 0x7d8   :  { %v6803_v15 = vpop.f32.mrb[124].mxu1  ;;  %18379 = vmatprep.subr.bf16.mxu1 %v21187_v39  ;;  %v21199_v39 = vld [vmem:[#allocation10 + $0x5f0] sm:$0xff]  }
 0x7d9   :  { %v7611_v41 = vmax.f32 %v7411_v4, 0.0  ;;  %v6997_v43 = vadd.f32 %v24529_v13, %v6803_v15  ;;  %v6805_v57 = vpop.f32.mrb[125].mxu1  ;;  %v25610_v13 = vld [vmem:[#allocation72_spill] sm:$0xff] }
 0x7da   :  { %18323 = vmatpush3.bf16.msra.mxu0 %v21186_v5  ;;  %v6806_v10 = vpop.f32.mrb[126].mxu1  ;;  %v21203_v57 = vld [vmem:[#allocation10 + $0x5f8] sm:$0xff]  }
 0x7db   :  { %v24648_v46 = vpack.c.bf16 %v7611_v41, %v7606_v44  ;;  %v7189_v62 = vadd.f32 %v6997_v43, %v25609_v50  ;;  %v7000_v9 = vadd.f32 %v24534_v36, %v6806_v10  ;;  %18380 = vmatpush3.bf16.msra.mxu1 %v21188_v32  ;;  %v6808_v52 = vpop.f32.mrb[127].mxu1  ;;  %18324 = vmatprep.subr.bf16.mxu0 %v21189_v55  ;;  %v21198_v32 = vld [vmem:[#allocation10 + $0x460] sm:$0xff]   ;;  %v21200_v41 = vld [vmem:[#allocation10 + $0x5b0] sm:$0xff]   ;;  %v21201_v43 = vld [vmem:[#allocation10 + $0x4a8] sm:$0xff]  }
 0x7dc   :  { %18381 = vmatprep.subr.bf16.mxu1 %v21191_v28  ;;  %v21202_v50 = vld [vmem:[#allocation10 + $0x468] sm:$0xff]   ;;  %v21207_v52 = vld [vmem:[#allocation10 + $0x680] sm:$0xff]  }
 0x7dd   :  { %v7416_v45 = vadd.f32 %v24431_v12, %v7189_v62  ;;  %v7194_v30 = vadd.f32 %v7000_v9, %v25610_v13  ;;  %v21205_v9 = vld [vmem:[#allocation10 + $0x4b0] sm:$0xff]  }
 0x7de   :  { %18325 = vmatpush3.bf16.msra.mxu0 %v21190_v7 }
 0x7df   :  { %v7421_v40 = vadd.f32 %v24431_v12, %v7194_v30  ;;  %18382 = vmatpush3.bf16.msra.mxu1 %v21192_v53  ;;  %18326 = vmatprep.subr.bf16.mxu0 %v21193_v48  ;;  %v7616_v56 = vmax.f32 %v7416_v45, 0.0  ;;  %v21206_v30 = vld [vmem:[#allocation10 + $0x470] sm:$0xff]  }
 0x7e0   :  { %v6811_v36 = vpop.f32.mrb[128].mxu1  ;;  %18383 = vmatprep.subr.bf16.mxu1 %v21195_v42 }
 0x7e1   :  { %v7621_v24 = vmax.f32 %v7421_v40, 0.0  ;;  %v7005_v1 = vadd.f32 %v24548_v63, %v6811_v36  ;;  %v6813_v5 = vpop.f32.mrb[129].mxu1  ;;  %v25611_v63 = vld [vmem:[#allocation76_spill] sm:$0xff]  ;;  %v25612_v40 = vld [vmem:[#allocation74_spill] sm:$0xff] }
 0x7e2   :  { %18327 = vmatpush3.bf16.msra.mxu0 %v21194_v27  ;;  %v6814_v4 = vpop.f32.mrb[130].mxu1 }
 0x7e3   :  { %v24656_v55 = vpack.c.bf16 %v7621_v24, %v7616_v56  ;;  %v7199_v15 = vadd.f32 %v7005_v1, %v23889_v11  ;;  %v7008_v28 = vadd.f32 %v24556_v14, %v6814_v4  ;;  %18384 = vmatpush3.bf16.msra.mxu1 %v21196_v19  ;;  %v6816_v44 = vpop.f32.mrb[131].mxu1  ;;  %18328 = vmatprep.subr.bf16.mxu0 %v21197_v54  ;;  %v21204_v11 = vld [vmem:[#allocation10 + $0x5b8] sm:$0xff]   ;;  %v21211_v24 = vld [vmem:[#allocation10 + $0x688] sm:$0xff]  }
 0x7e4   :  { %18385 = vmatprep.subr.bf16.mxu1 %v21199_v39  ;;  %v21208_v39 = vld [vmem:[#allocation10 + $0x640] sm:$0xff]   ;;  %v21209_v56 = vld [vmem:[#allocation10 + $0x4b8] sm:$0xff]  }
 0x7e5   :  { %v7426_v10 = vadd.f32 %v24431_v12, %v7199_v15  ;;  %v7204_v7 = vadd.f32 %v7008_v28, %v25611_v63  ;;  %v21210_v4 = vld [vmem:[#allocation10 + $0x478] sm:$0xff]   ;;  %v21213_v28 = vld [vmem:[#allocation10 + $0x540] sm:$0xff]  }
 0x7e6   :  { %18329 = vmatpush3.bf16.msra.mxu0 %v21198_v32  ;;  %v25614_v15 = vld [vmem:[#allocation85_spill] sm:$0xff] }
 0x7e7   :  { %v7431_v62 = vadd.f32 %v24431_v12, %v7204_v7  ;;  %18386 = vmatpush3.bf16.msra.mxu1 %v21200_v41  ;;  %18330 = vmatprep.subr.bf16.mxu0 %v21201_v43  ;;  %v7626_v53 = vmax.f32 %v7426_v10, 0.0  ;;  %v21215_v41 = vld [vmem:[#allocation10 + $0x690] sm:$0xff]  }
 0x7e8   :  { %v6819_v14 = vpop.f32.mrb[132].mxu1  ;;  %18387 = vmatprep.subr.bf16.mxu1 %v21203_v57 }
 0x7e9   :  { %v7631_v48 = vmax.f32 %v7431_v62, 0.0  ;;  %v7013_v42 = vadd.f32 %v24545_v26, %v6819_v14  ;;  %v6821_v45 = vpop.f32.mrb[133].mxu1  ;;  %v25613_v26 = vld [vmem:[#allocation75_spill] sm:$0xff]  ;;  %v25615_v62 = vld [vmem:[#allocation77_spill] sm:$0xff] }
 0x7ea   :  { %18331 = vmatpush3.bf16.msra.mxu0 %v21202_v50  ;;  %v6822_v13 = vpop.f32.mrb[134].mxu1 }
 0x7eb   :  { %v24664_v27 = vpack.c.bf16 %v7631_v48, %v7626_v53  ;;  %v7209_v19 = vadd.f32 %v7013_v42, %v25612_v40  ;;  %v7016_v54 = vadd.f32 %v24550_v8, %v6822_v13  ;;  %18388 = vmatpush3.bf16.msra.mxu1 %v21204_v11  ;;  %v6824_v36 = vpop.f32.mrb[135].mxu1  ;;  %18332 = vmatprep.subr.bf16.mxu0 %v21205_v9  ;;  %v21212_v8 = vld [vmem:[#allocation10 + $0x648] sm:$0xff]   ;;  %v21219_v48 = vld [vmem:[#allocation10 + $0x698] sm:$0xff]  }
 0x7ec   :  { %18404 = vmatprep.subr.bf16.mxu1 %v21207_v52  ;;  %v21216_v52 = vld [vmem:[#allocation10 + $0x650] sm:$0xff]   ;;  %v21217_v53 = vld [vmem:[#allocation10 + $0x548] sm:$0xff]   ;;  %v25617_v13 = vld [vmem:[#allocation81_spill] sm:$0xff] }
 0x7ed   :  { %v7436_v1 = vadd.f32 %v24431_v12, %v7209_v19  ;;  %v7214_v5 = vadd.f32 %v7016_v54, %v25613_v26  ;;  %v21218_v40 = vld [vmem:[#allocation10 + $0x508] sm:$0xff]   ;;  %v21221_v54 = vld [vmem:[#allocation10 + $0x550] sm:$0xff]  }
 0x7ee   :  { %18333 = vmatpush3.bf16.msra.mxu0 %v21206_v30  ;;  %9936 = vmatmul.mubr.bf16.vlgmr.msra.gmra.mrb[168].mxu1 %v24150_v58  ;;  %v21214_v58 = vld [vmem:[#allocation10 + $0x500] sm:$0xff]   ;;  %v25618_v30 = vld [vmem:[#allocation83_spill] sm:$0xff] }
 0x7ef   :  { %v7441_v32 = vadd.f32 %v24431_v12, %v7214_v5  ;;  %18405 = vmatpush3.bf16.msra.mxu1 %v21208_v39  ;;  %10340 = vmatprep.mubr.bf16.mxu1 %v25614_v15  ;;  %v7636_v43 = vmax.f32 %v7436_v1, 0.0  ;;  %v21223_v39 = vld [vmem:[#allocation10 + $0x6a0] sm:$0xff]  }
 0x7f0   :  { %v6827_v44 = vpop.f32.mrb[136].mxu1  ;;  %18334 = vmatprep.subr.bf16.mxu0 %v21209_v56  ;;  %18406 = vmatprep.subr.bf16.mxu1 %v21211_v24  ;;  %v25619_v15 = vld [vmem:[#allocation78_spill] sm:$0xff] }
 0x7f1   :  { %v7641_v57 = vmax.f32 %v7441_v32, 0.0  ;;  %v7021_v10 = vadd.f32 %v24564_v2, %v6827_v44  ;;  %v6829_v63 = vpop.f32.mrb[137].mxu1  ;;  %v25616_v2 = vld [vmem:[#allocation79_spill] sm:$0xff]  ;;  %v21224_v44 = vld [vmem:[#allocation10 + $0x660] sm:$0xff]  }
 0x7f2   :  { %18335 = vmatpush3.bf16.msra.mxu0 %v21210_v4  ;;  %v6830_v7 = vpop.f32.mrb[138].mxu1  ;;  %v21222_v4 = vld [vmem:[#allocation10 + $0x510] sm:$0xff]  }
 0x7f3   :  { %v24674_v50 = vpack.c.bf16 %v7641_v57, %v7636_v43  ;;  %v7219_v11 = vadd.f32 %v7021_v10, %v25615_v62  ;;  %v7024_v9 = vadd.f32 %v24572_v16, %v6830_v7  ;;  %18407 = vmatpush3.bf16.msra.mxu1 %v21212_v8  ;;  %v6832_v14 = vpop.f32.mrb[139].mxu1  ;;  %18351 = vmatprep.subr.bf16.mxu0 %v21213_v28  ;;  %v21220_v16 = vld [vmem:[#allocation10 + $0x658] sm:$0xff]   ;;  %v21227_v57 = vld [vmem:[#allocation10 + $0x6a8] sm:$0xff]  }
 0x7f4   :  { %18408 = vmatprep.subr.bf16.mxu1 %v21215_v41  ;;  %v21225_v43 = vld [vmem:[#allocation10 + $0x558] sm:$0xff]   ;;  %v21228_v62 = vld [vmem:[#allocation10 + $0x668] sm:$0xff]  }
 0x7f5   :  { %v7446_v42 = vadd.f32 %v24431_v12, %v7219_v11  ;;  %v7224_v45 = vadd.f32 %v7024_v9, %v25616_v2  ;;  %9490 = vmatmul.mubr.bf16.vlgmr.msra.gmra.mrb[164].mxu0 %v25617_v13  ;;  %v21226_v7 = vld [vmem:[#allocation10 + $0x518] sm:$0xff]   ;;  %v21229_v11 = vld [vmem:[#allocation10 + $0x560] sm:$0xff]   ;;  %v21231_v9 = vld [vmem:[#allocation10 + $0x6b0] sm:$0xff]  }
 0x7f6   :  { %18352 = vmatpush3.bf16.msra.mxu0 %v21214_v58  ;;  %9894 = vmatprep.mubr.bf16.mxu0 %v25618_v30  ;;  %v21230_v2 = vld [vmem:[#allocation10 + $0x520] sm:$0xff]   ;;  %v21233_v30 = vld [vmem:[#allocation10 + $0x568] sm:$0xff]  }
 0x7f7   :  { %v7451_v19 = vadd.f32 %v24431_v12, %v7224_v45  ;;  %18409 = vmatpush3.bf16.msra.mxu1 %v21216_v52  ;;  %18353 = vmatprep.subr.bf16.mxu0 %v21217_v53  ;;  %v7646_v56 = vmax.f32 %v7446_v42, 0.0 }
 0x7f8   :  { %v6835_v36 = vpop.f32.mrb[140].mxu1  ;;  %18410 = vmatprep.subr.bf16.mxu1 %v21219_v48 }
 0x7f9   :  { %v7651_v24 = vmax.f32 %v7451_v19, 0.0  ;;  %v7029_v1 = vadd.f32 %v24561_v47, %v6835_v36  ;;  %v6837_v26 = vpop.f32.mrb[141].mxu1  ;;  %v25620_v47 = vld [vmem:[#allocation80_spill] sm:$0xff] }
 0x7fa   :  { %18354 = vmatpush3.bf16.msra.mxu0 %v21218_v40  ;;  %v6838_v5 = vpop.f32.mrb[142].mxu1  ;;  %v21235_v19 = vld [vmem:[#allocation10 + $0x6b8] sm:$0xff]  }
 0x7fb   :  { %v24684_v32 = vpack.c.bf16 %v7651_v24, %v7646_v56  ;;  %v7229_v8 = vadd.f32 %v7029_v1, %v25619_v15  ;;  %v7032_v28 = vadd.f32 %v24566_v31, %v6838_v5  ;;  %18411 = vmatpush3.bf16.msra.mxu1 %v21220_v16  ;;  %18355 = vmatprep.subr.bf16.mxu0 %v21221_v54  ;;  %v6840_v41 = vpop.f32.mrb[143].mxu1  ;;  %v21234_v54 = vld [vmem:[#allocation10 + $0x528] sm:$0xff]   ;;  %v21237_v56 = vld [vmem:[#allocation10 + $0x570] sm:$0xff]   ;;  %v21239_v1 = vld [vmem:[#allocation10 + $0x740] sm:$0xff]  }
 0x7fc   :  { %18412 = vmatprep.subr.bf16.mxu1 %v21223_v39  ;;  %v21236_v39 = vld [vmem:[#allocation10 + $0x678] sm:$0xff]   ;;  %v21238_v24 = vld [vmem:[#allocation10 + $0x530] sm:$0xff]  }
 0x7fd   :  { %v7456_v10 = vadd.f32 %v24431_v12, %v7229_v8  ;;  %v7234_v63 = vadd.f32 %v7032_v28, %v25620_v47  ;;  %v21240_v26 = vld [vmem:[#allocation10 + $0x578] sm:$0xff]   ;;  %v21244_v15 = vld [vmem:[#allocation10 + $0x750] sm:$0xff]   ;;  %v25622_v8 = vld [vmem:[#allocation82_spill] sm:$0xff] }
 0x7fe   :  { %18356 = vmatpush3.bf16.msra.mxu0 %v21222_v4  ;;  %v21241_v5 = vld [vmem:[#allocation10 + $0x538] sm:$0xff]   ;;  %v21243_v4 = vld [vmem:[#allocation10 + $0x600] sm:$0xff]   ;;  %v21245_v28 = vld [vmem:[#allocation10 + $0x608] sm:$0xff]  }
 0x7ff   :  { %v7461_v58 = vadd.f32 %v24431_v12, %v7234_v63  ;;  %18413 = vmatpush3.bf16.msra.mxu1 %v21224_v44  ;;  %18357 = vmatprep.subr.bf16.mxu0 %v21225_v43  ;;  %v7656_v14 = vmax.f32 %v7456_v10, 0.0  ;;  %v21232_v12 = vld [vmem:[#allocation10 + $0x670] sm:$0xff]   ;;  %v21246_v44 = vld [vmem:[#allocation10 + $0x758] sm:$0xff]   ;;  %v21248_v43 = vld [vmem:[#allocation10 + $0x760] sm:$0xff]  }
 0x800   :  { %v18177_v31 = vpop.f32.mrb[144].mxu1  ;;  %18414 = vmatprep.subr.bf16.mxu1 %v21227_v57  ;;  %v21247_v41 = vld [vmem:[#allocation10 + $0x610] sm:$0xff]   ;;  %v21249_v57 = vld [vmem:[#allocation10 + $0x618] sm:$0xff]   ;;  %v21250_v10 = vld [vmem:[#allocation10 + $0x768] sm:$0xff]  }
 0x801   :  { %v7661_v52 = vmax.f32 %v7461_v58, 0.0  ;;  %v18178_v53 = vpop.f32.mrb[145].mxu1 }
 0x802   :  { %v18179_v48 = vadd.f32 %v18178_v53, %v18177_v31  ;;  %18358 = vmatpush3.bf16.msra.mxu0 %v21226_v7  ;;  %v18180_v42 = vpop.f32.mrb[146].mxu1  ;;  %v21252_v31 = vld [vmem:[#allocation10 + $0x770] sm:$0xff]   ;;  %v21256_v53 = vld [vmem:[#allocation10 + $0x840] sm:$0xff]  }
 0x803   :  { %v24691_v45 = vpack.c.bf16 %v7661_v52, %v7656_v14  ;;  %18415 = vmatpush3.bf16.msra.mxu1 %v21228_v62  ;;  %v18181_v13 = vpop.f32.mrb[147].mxu1  ;;  %18359 = vmatprep.subr.bf16.mxu0 %v21229_v11  ;;  %v21251_v62 = vld [vmem:[#allocation10 + $0x620] sm:$0xff]   ;;  %v21253_v14 = vld [vmem:[#allocation10 + $0x628] sm:$0xff]   ;;  %v21254_v52 = vld [vmem:[#allocation10 + $0x778] sm:$0xff]  }
 0x804   :  { %v18182_v40 = vadd.f32 %v18181_v13, %v18180_v42  ;;  %18416 = vmatprep.subr.bf16.mxu1 %v21231_v9  ;;  %v24694_v16 = vadd.f32 %v18179_v48, %v24583_v59  ;;  %v25621_v59 = vld [vmem:[#allocation64_spill] sm:$0xff]  ;;  %v21257_v42 = vld [vmem:[#allocation10 + $0x800] sm:$0xff]  }
 0x805   :  { %v21255_v48 = vld [vmem:[#allocation10 + $0x630] sm:$0xff]   ;;  %v21258_v13 = vld [vmem:[#allocation10 + $0x638] sm:$0xff]  }
 0x806   :  { %18360 = vmatpush3.bf16.msra.mxu0 %v21230_v2  ;;  %v24697_v36 = vadd.f32 %v18182_v40, %v24590_v29  ;;  %v21242_v29 = vld [vmem:[#allocation10 + $0x748] sm:$0xff]   ;;  %v21263_v40 = vld [vmem:[#allocation10 + $0x850] sm:$0xff]  }
 0x807   :  { %18417 = vmatpush3.bf16.msra.mxu1 %v21232_v12  ;;  %18361 = vmatprep.subr.bf16.mxu0 %v21233_v30  ;;  %v21259_v2 = vld [vmem:[#allocation10 + $0x848] sm:$0xff]   ;;  %v21261_v30 = vld [vmem:[#allocation10 + $0x700] sm:$0xff]  }
 0x808   :  { %18418 = vmatprep.subr.bf16.mxu1 %v21235_v19  ;;  %v21260_v12 = vld [vmem:[#allocation10 + $0x808] sm:$0xff]   ;;  %v21262_v19 = vld [vmem:[#allocation10 + $0x6c0] sm:$0xff]  }
 0x80a   :  { %18362 = vmatpush3.bf16.msra.mxu0 %v21234_v54  ;;  %v21264_v54 = vld [vmem:[#allocation10 + $0x810] sm:$0xff]  }
 0x80b   :  { %18419 = vmatpush3.bf16.msra.mxu1 %v21236_v39  ;;  %18363 = vmatprep.subr.bf16.mxu0 %v21237_v56  ;;  %v21265_v39 = vld [vmem:[#allocation10 + $0x708] sm:$0xff]   ;;  %v21267_v56 = vld [vmem:[#allocation10 + $0x858] sm:$0xff]  }
 0x80c   :  { %19487 = vmatprep.subr.bf16.mxu1 %v25529_v61 }
 0x80e   :  { %18364 = vmatpush3.bf16.msra.mxu0 %v21238_v24  ;;  %10341 = vmatmul.mubr.bf16.vlgmr.msra.gmra.mrb[172].mxu1 %v25621_v59  ;;  %v21268_v24 = vld [vmem:[#allocation10 + $0x818] sm:$0xff]   ;;  %v21270_v59 = vld [vmem:[#allocation10 + $0x6d0] sm:$0xff]  }
 0x80f   :  { %19488 = vmatpush3.bf16.msra.mxu1 %v21239_v1  ;;  %18365 = vmatprep.subr.bf16.mxu0 %v21240_v26  ;;  %v21269_v1 = vld [vmem:[#allocation10 + $0x710] sm:$0xff]   ;;  %v21271_v26 = vld [vmem:[#allocation10 + $0x860] sm:$0xff]  }
 0x810   :  { %19489 = vmatprep.subr.bf16.mxu1 %v25529_v61  ;;  %19503 = vmatprep.mubr.msk.bf16.mxu1 %vm22013_vm5, %v25529_v61 }
 0x812   :  { %18366 = vmatpush3.bf16.msra.mxu0 %v21241_v5  ;;  %v21272_v5 = vld [vmem:[#allocation10 + $0x820] sm:$0xff]  }
 0x813   :  { %19490 = vmatpush3.bf16.msra.mxu1 %v21242_v29  ;;  %19467 = vmatprep.subr.bf16.mxu0 %v25529_v61  ;;  %v21273_v29 = vld [vmem:[#allocation10 + $0x718] sm:$0xff]  }
 0x814   :  { %19491 = vmatprep.subr.bf16.mxu1 %v25529_v61 }
 0x815   :  { %9895 = vmatmul.mubr.bf16.vlgmr.msra.gmra.mrb[168].mxu0 %v25622_v8  ;;  %v21277_v8 = vld [vmem:[#allocation10 + $0x720] sm:$0xff]  }
 0x816   :  { %19468 = vmatpush3.bf16.msra.mxu0 %v21243_v4  ;;  %19483 = vmatprep.mubr.msk.bf16.mxu0 %vm22013_vm5, %v25529_v61  ;;  %v21275_v4 = vld [vmem:[#allocation10 + $0x868] sm:$0xff]  }
 0x817   :  { %19492 = vmatpush3.bf16.msra.mxu1 %v21244_v15  ;;  %19469 = vmatprep.subr.bf16.mxu0 %v25529_v61  ;;  %v21276_v15 = vld [vmem:[#allocation10 + $0x828] sm:$0xff]  }
 0x818   :  { %19493 = vmatprep.subr.bf16.mxu1 %v25529_v61 }
 0x81a   :  { %19470 = vmatpush3.bf16.msra.mxu0 %v21245_v28  ;;  %v21279_v28 = vld [vmem:[#allocation10 + $0x870] sm:$0xff]  }
 0x81b   :  { %19494 = vmatpush3.bf16.msra.mxu1 %v21246_v44  ;;  %19471 = vmatprep.subr.bf16.mxu0 %v25529_v61 }
 0x81c   :  { %19495 = vmatprep.subr.bf16.mxu1 %v25529_v61 }
 0x81e   :  { %19472 = vmatpush3.bf16.msra.mxu0 %v21247_v41 }
 0x81f   :  { %19496 = vmatpush3.bf16.msra.mxu1 %v21248_v43  ;;  %19473 = vmatprep.subr.bf16.mxu0 %v25529_v61  ;;  %v21278_v43 = vld [vmem:[#allocation10 + $0x6e0] sm:$0xff]  }
 0x820   :  { %v18208_v47 = vpop.f32.mrb[148].mxu1  ;;  %19497 = vmatprep.subr.bf16.mxu1 %v25529_v61 }
 0x821   :  { %v18209_v63 = vpop.f32.mrb[149].mxu1 }
 0x822   :  { %v24715_v7 = vadd.f32 %v18209_v63, %v18208_v47  ;;  %v18211_v58 = vpop.f32.mrb[150].mxu1  ;;  %19474 = vmatpush3.bf16.msra.mxu0 %v21249_v57  ;;  %v21281_v47 = vld [vmem:[#allocation10 + $0x728] sm:$0xff]  }
 0x823   :  { %v18212_v11 = vpop.f32.mrb[151].mxu1  ;;  %19498 = vmatpush3.bf16.msra.mxu1 %v21250_v10  ;;  %19475 = vmatprep.subr.bf16.mxu0 %v25529_v61  ;;  %v21280_v10 = vld [vmem:[#allocation10 + $0x830] sm:$0xff]  }
 0x824   :  { %v24718_v9 = vadd.f32 %v18212_v11, %v18211_v58  ;;  %19499 = vmatprep.subr.bf16.mxu1 %v25529_v61  ;;  %v21283_v58 = vld [vmem:[#allocation10 + $0x878] sm:$0xff]  }
 0x825   :  { %v21284_v11 = vld [vmem:[#allocation10 + $0x838] sm:$0xff]  }
 0x826   :  { %19476 = vmatpush3.bf16.msra.mxu0 %v21251_v62  ;;  %v21282_v62 = vld [vmem:[#allocation10 + $0x6e8] sm:$0xff]  }
 0x827   :  { %19500 = vmatpush3.bf16.msra.mxu1 %v21252_v31  ;;  %19477 = vmatprep.subr.bf16.mxu0 %v25529_v61  ;;  %v21285_v31 = vld [vmem:[#allocation10 + $0x730] sm:$0xff]  }
 0x828   :  { %19501 = vmatprep.subr.bf16.mxu1 %v25529_v61 }
 0x82a   :  { %19478 = vmatpush3.bf16.msra.mxu0 %v21253_v14 }
 0x82b   :  { %19502 = vmatpush3.bf16.msra.mxu1 %v21254_v52  ;;  %19479 = vmatprep.subr.bf16.mxu0 %v25529_v61  ;;  %v21287_v52 = vld [vmem:[#allocation10 + $0x900] sm:$0xff]  }
 0x82c   :  { %18479 = vmatprep.subr.bf16.mxu1 %v21256_v53 }
 0x82e   :  { %19480 = vmatpush3.bf16.msra.mxu0 %v21255_v48  ;;  %19504 = vmatmul.mubr.bf16.vlgmr.msra.gmra.mrb[176].mxu1 %v24518_v6  ;;  %v25623_v6 = vld [vmem:[#allocation84_spill] sm:$0xff] }
 0x82f   :  { %18480 = vmatpush3.bf16.msra.mxu1 %v21257_v42  ;;  %10827 = vmatprep.mubr.bf16.mxu1 %v24197_v21  ;;  %v21266_v21 = vld [vmem:[#allocation10 + $0x6c8] sm:$0xff]  }
 0x830   :  { %19481 = vmatprep.subr.bf16.mxu0 %v25529_v61  ;;  %18481 = vmatprep.subr.bf16.mxu1 %v21259_v2  ;;  %v21286_v2 = vld [vmem:[#allocation10 + $0x6f0] sm:$0xff]  }
 0x832   :  { %19482 = vmatpush3.bf16.msra.mxu0 %v21258_v13 }
 0x833   :  { %18482 = vmatpush3.bf16.msra.mxu1 %v21260_v12  ;;  %18426 = vmatprep.subr.bf16.mxu0 %v21261_v30 }
 0x834   :  { %18483 = vmatprep.subr.bf16.mxu1 %v21263_v40  ;;  %v21288_v40 = vld [vmem:[#allocation10 + $0x8c0] sm:$0xff]  }
 0x835   :  { %19484 = vmatmul.mubr.bf16.vlgmr.msra.gmra.mrb[172].mxu0 %v24500_v38  ;;  %v21274_v38 = vld [vmem:[#allocation10 + $0x6d8] sm:$0xff]  }
 0x836   :  { %18427 = vmatpush3.bf16.msra.mxu0 %v21262_v19  ;;  %10381 = vmatprep.mubr.bf16.mxu0 %v25623_v6  ;;  %v21289_v19 = vld [vmem:[#allocation10 + $0x738] sm:$0xff]  }
 0x837   :  { %18484 = vmatpush3.bf16.msra.mxu1 %v21264_v54  ;;  %18428 = vmatprep.subr.bf16.mxu0 %v21265_v39  ;;  %v21291_v54 = vld [vmem:[#allocation10 + $0x908] sm:$0xff]   ;;  %v25625_v6 = vld [vmem:[#allocation89_spill] sm:$0xff] }
 0x838   :  { %18485 = vmatprep.subr.bf16.mxu1 %v21267_v56  ;;  %v21290_v56 = vld [vmem:[#allocation10 + $0x6f8] sm:$0xff]  }
 0x83a   :  { %18429 = vmatpush3.bf16.msra.mxu0 %v21266_v21  ;;  %v21293_v21 = vld [vmem:[#allocation10 + $0x7c0] sm:$0xff]  }
 0x83b   :  { %18486 = vmatpush3.bf16.msra.mxu1 %v21268_v24  ;;  %18430 = vmatprep.subr.bf16.mxu0 %v21269_v1  ;;  %v21294_v24 = vld [vmem:[#allocation10 + $0x780] sm:$0xff]   ;;  %v21296_v1 = vld [vmem:[#allocation10 + $0x8d0] sm:$0xff]  }
 0x83c   :  { %18487 = vmatprep.subr.bf16.mxu1 %v21271_v26  ;;  %v21297_v26 = vld [vmem:[#allocation10 + $0x7c8] sm:$0xff]  }
 0x83e   :  { %18431 = vmatpush3.bf16.msra.mxu0 %v21270_v59  ;;  %v25626_v59 = vld [vmem:[#allocation63_spill] sm:$0xff] }
 0x83f   :  { %18488 = vmatpush3.bf16.msra.mxu1 %v21272_v5  ;;  %18432 = vmatprep.subr.bf16.mxu0 %v21273_v29  ;;  %v25627_v5 = vld [vmem:[#allocation87_spill] sm:$0xff] }
 0x840   :  { %18489 = vmatprep.subr.bf16.mxu1 %v21275_v4  ;;  %v21298_v29 = vld [vmem:[#allocation10 + $0x788] sm:$0xff]   ;;  %v21300_v4 = vld [vmem:[#allocation10 + $0x8d8] sm:$0xff]  }
 0x841   :  { %v24729_v44 = vpop.f32.mrb[152].mxu1 }
 0x842   :  { %18433 = vmatpush3.bf16.msra.mxu0 %v21274_v38  ;;  %v19425_v41 = vpop.f32.mrb[153].mxu1  ;;  %v21301_v38 = vld [vmem:[#allocation10 + $0x7d0] sm:$0xff]  }
 0x843   :  { %18490 = vmatpush3.bf16.msra.mxu1 %v21276_v15  ;;  %v24731_v57 = vpop.f32.mrb[154].mxu1  ;;  %18434 = vmatprep.subr.bf16.mxu0 %v21277_v8  ;;  %v21303_v15 = vld [vmem:[#allocation10 + $0x920] sm:$0xff]   ;;  %v21302_v8 = vld [vmem:[#allocation10 + $0x790] sm:$0xff]   ;;  %v21305_v41 = vld [vmem:[#allocation10 + $0x7d8] sm:$0xff]  }
 0x844   :  { %v19426_v63 = vpop.f32.mrb[155].mxu1  ;;  %18491 = vmatprep.subr.bf16.mxu1 %v21279_v28  ;;  %v21304_v28 = vld [vmem:[#allocation10 + $0x8e0] sm:$0xff]  }
 0x845   :  { %v21309_v63 = vld [vmem:[#allocation10 + $0x7e0] sm:$0xff]  }
 0x846   :  { %18435 = vmatpush3.bf16.msra.mxu0 %v21278_v43  ;;  %v21307_v43 = vld [vmem:[#allocation10 + $0x928] sm:$0xff]  }
 0x847   :  { %18492 = vmatpush3.bf16.msra.mxu1 %v21280_v10  ;;  %18436 = vmatprep.subr.bf16.mxu0 %v21281_v47  ;;  %v21306_v10 = vld [vmem:[#allocation10 + $0x798] sm:$0xff]   ;;  %v21308_v47 = vld [vmem:[#allocation10 + $0x8e8] sm:$0xff]  }
 0x848   :  { %v8279_v14 = vpop.f32.mrb[68].mxu0  ;;  %18493 = vmatprep.subr.bf16.mxu1 %v21283_v58  ;;  %v21311_v58 = vld [vmem:[#allocation10 + $0x930] sm:$0xff]  }
 0x849   :  { %v8280_v53 = vadd.f32 %v8279_v14, %v24694_v16  ;;  %v19405_v48 = vpop.f32.mrb[69].mxu0  ;;  %v25624_v16 = vld [vmem:[#allocation86_spill] sm:$0xff] }
 0x84a   :  { %18437 = vmatpush3.bf16.msra.mxu0 %v21282_v62  ;;  %v8282_v42 = vpop.f32.mrb[70].mxu0  ;;  %v21313_v48 = vld [vmem:[#allocation10 + $0x7e8] sm:$0xff]  }
 0x84b   :  { %v24735_v13 = vadd.f32 %v24715_v7, %v8280_v53  ;;  %v8283_v12 = vadd.f32 %v8282_v42, %v24697_v36  ;;  %18494 = vmatpush3.bf16.msra.mxu1 %v21284_v11  ;;  %v19406_v30 = vpop.f32.mrb[71].mxu0  ;;  %18438 = vmatprep.subr.bf16.mxu0 %v21285_v31  ;;  %v21292_v7 = vld [vmem:[#allocation10 + $0x8c8] sm:$0xff]   ;;  %v21295_v36 = vld [vmem:[#allocation10 + $0x910] sm:$0xff]   ;;  %v21310_v31 = vld [vmem:[#allocation10 + $0x7a0] sm:$0xff]  }
 0x84c   :  { %18510 = vmatprep.subr.bf16.mxu1 %v21287_v52  ;;  %v21312_v53 = vld [vmem:[#allocation10 + $0x8f0] sm:$0xff]   ;;  %v21314_v30 = vld [vmem:[#allocation10 + $0x7a8] sm:$0xff]  }
 0x84d   :  { %v24739_v39 = vadd.f32 %v24718_v9, %v8283_v12  ;;  %v21299_v9 = vld [vmem:[#allocation10 + $0x918] sm:$0xff]  }
 0x84e   :  { %18439 = vmatpush3.bf16.msra.mxu0 %v21286_v2  ;;  %10828 = vmatmul.mubr.bf16.vlgmr.msra.gmra.mrb[180].mxu1 %v25624_v16  ;;  %v21315_v2 = vld [vmem:[#allocation10 + $0x938] sm:$0xff]  }
 0x84f   :  { %18511 = vmatpush3.bf16.msra.mxu1 %v21288_v40  ;;  %11232 = vmatprep.mubr.bf16.mxu1 %v25625_v6  ;;  %v21316_v40 = vld [vmem:[#allocation10 + $0x8f8] sm:$0xff]  }
 0x850   :  { %18440 = vmatprep.subr.bf16.mxu0 %v21289_v19  ;;  %18512 = vmatprep.subr.bf16.mxu1 %v21291_v54  ;;  %v21317_v19 = vld [vmem:[#allocation10 + $0x7f0] sm:$0xff]  }
 0x852   :  { %18441 = vmatpush3.bf16.msra.mxu0 %v21290_v56 }
 0x853   :  { %18513 = vmatpush3.bf16.msra.mxu1 %v21292_v7  ;;  %18457 = vmatprep.subr.bf16.mxu0 %v21293_v21  ;;  %v21318_v7 = vld [vmem:[#allocation10 + $0x7b0] sm:$0xff]  }
 0x854   :  { %18514 = vmatprep.subr.bf16.mxu1 %v21295_v36  ;;  %v21319_v36 = vld [vmem:[#allocation10 + $0x9c0] sm:$0xff]  }
 0x855   :  { %10382 = vmatmul.mubr.bf16.vlgmr.msra.gmra.mrb[176].mxu0 %v25626_v59  ;;  %v25628_v59 = vld [vmem:[#allocation21_spill] sm:$0xff] }
 0x856   :  { %18458 = vmatpush3.bf16.msra.mxu0 %v21294_v24  ;;  %10786 = vmatprep.mubr.bf16.mxu0 %v25627_v5  ;;  %v21320_v24 = vld [vmem:[#allocation10 + $0x7f8] sm:$0xff]  }
 0x857   :  { %18515 = vmatpush3.bf16.msra.mxu1 %v21296_v1  ;;  %18459 = vmatprep.subr.bf16.mxu0 %v21297_v26  ;;  %v21321_v5 = vld [vmem:[#allocation10 + $0x7b8] sm:$0xff]  }
 0x858   :  { %18516 = vmatprep.subr.bf16.mxu1 %v21299_v9 }
 0x85a   :  { %18460 = vmatpush3.bf16.msra.mxu0 %v21298_v29 }
 0x85b   :  { %18517 = vmatpush3.bf16.msra.mxu1 %v21300_v4  ;;  %18461 = vmatprep.subr.bf16.mxu0 %v21301_v38  ;;  %v21322_v4 = vld [vmem:[#allocation10 + $0x9c8] sm:$0xff]   ;;  %v21324_v38 = vld [vmem:[#allocation10 + $0x9d0] sm:$0xff]  }
 0x85c   :  { %18518 = vmatprep.subr.bf16.mxu1 %v21303_v15  ;;  %v21325_v15 = vld [vmem:[#allocation10 + $0x888] sm:$0xff]  }
 0x85e   :  { %18462 = vmatpush3.bf16.msra.mxu0 %v21302_v8  ;;  %v21327_v8 = vld [vmem:[#allocation10 + $0x890] sm:$0xff]  }
 0x85f   :  { %18519 = vmatpush3.bf16.msra.mxu1 %v21304_v28  ;;  %18463 = vmatprep.subr.bf16.mxu0 %v21305_v41  ;;  %v21328_v28 = vld [vmem:[#allocation10 + $0x9e0] sm:$0xff]   ;;  %v21329_v41 = vld [vmem:[#allocation10 + $0x898] sm:$0xff]  }
 0x860   :  { %18520 = vmatprep.subr.bf16.mxu1 %v21307_v43  ;;  %v21330_v43 = vld [vmem:[#allocation10 + $0x9e8] sm:$0xff]  }
 0x861   :  { %v18283_v62 = vpop.f32.mrb[156].mxu1 }
 0x862   :  { %v18284_v11 = vpop.f32.mrb[157].mxu1  ;;  %18464 = vmatpush3.bf16.msra.mxu0 %v21306_v10 }
 0x863   :  { %v24745_v14 = vadd.f32 %v18284_v11, %v18283_v62  ;;  %v18286_v52 = vpop.f32.mrb[158].mxu1  ;;  %18521 = vmatpush3.bf16.msra.mxu1 %v21308_v47  ;;  %18465 = vmatprep.subr.bf16.mxu0 %v21309_v63  ;;  %v21331_v63 = vld [vmem:[#allocation10 + $0x8a0] sm:$0xff]   ;;  %v21332_v11 = vld [vmem:[#allocation10 + $0x9f0] sm:$0xff]  }
 0x864   :  { %v18287_v42 = vpop.f32.mrb[159].mxu1  ;;  %18522 = vmatprep.subr.bf16.mxu1 %v21311_v58 }
 0x865   :  { %v24747_v12 = vadd.f32 %v18287_v42, %v18286_v52 }
 0x866   :  { %18466 = vmatpush3.bf16.msra.mxu0 %v21310_v31 }
 0x867   :  { %18523 = vmatpush3.bf16.msra.mxu1 %v21312_v53  ;;  %18467 = vmatprep.subr.bf16.mxu0 %v21313_v48  ;;  %v21333_v53 = vld [vmem:[#allocation10 + $0x8a8] sm:$0xff]   ;;  %v21334_v48 = vld [vmem:[#allocation10 + $0x9f8] sm:$0xff]  }
 0x868   :  { %v18230_v54 = vpop.f32.mrb[72].mxu0  ;;  %18524 = vmatprep.subr.bf16.mxu1 %v21315_v2  ;;  %v21336_v2 = vld [vmem:[#allocation10 + $0xac0] sm:$0xff]  }
 0x869   :  { %v18231_v16 = vpop.f32.mrb[73].mxu0 }
 0x86a   :  { %v18232_v56 = vadd.f32 %v18231_v16, %v18230_v54  ;;  %v18233_v6 = vpop.f32.mrb[74].mxu0  ;;  %18468 = vmatpush3.bf16.msra.mxu0 %v21314_v30  ;;  %v21335_v54 = vld [vmem:[#allocation10 + $0x8b0] sm:$0xff]  }
 0x86b   :  { %v18234_v21 = vpop.f32.mrb[75].mxu0  ;;  %18525 = vmatpush3.bf16.msra.mxu1 %v21316_v40  ;;  %18469 = vmatprep.subr.bf16.mxu0 %v21317_v19 }
 0x86c   :  { %v8602_v1 = vadd.f32 %v18232_v56, %v24735_v13  ;;  %v18235_v26 = vadd.f32 %v18234_v21, %v18233_v6  ;;  %19527 = vmatprep.subr.bf16.mxu1 %v25529_v61  ;;  %v21337_v56 = vld [vmem:[#allocation10 + $0xa80] sm:$0xff]  }
 0x86e   :  { %v8605_v9 = vadd.f32 %v18235_v26, %v24739_v39  ;;  %18470 = vmatpush3.bf16.msra.mxu0 %v21318_v7  ;;  %11233 = vmatmul.mubr.bf16.vlgmr.msra.gmra.mrb[184].mxu1 %v25628_v59  ;;  %v24754_v29 = vadd.f32 %v24729_v44, %v8602_v1  ;;  %v21323_v39 = vld [vmem:[#allocation10 + $0x880] sm:$0xff]   ;;  %v21339_v7 = vld [vmem:[#allocation10 + $0xac8] sm:$0xff]   ;;  %v21343_v59 = vld [vmem:[#allocation10 + $0xad0] sm:$0xff]  }
 0x86f   :  { %19528 = vmatpush3.bf16.msra.mxu1 %v21319_v36  ;;  %18471 = vmatprep.subr.bf16.mxu0 %v21320_v24  ;;  %v25629_v44 = vld [vmem:[#allocation22_spill] sm:$0xff]  ;;  %v21338_v36 = vld [vmem:[#allocation10 + $0x8b8] sm:$0xff]   ;;  %v25630_v1 = vld [vmem:[#allocation91_spill] sm:$0xff] }
 0x870   :  { %19529 = vmatprep.subr.bf16.mxu1 %v25529_v61  ;;  %19543 = vmatprep.mubr.msk.bf16.mxu1 %vm22013_vm5, %v25529_v61  ;;  %v24760_v13 = vadd.f32 %v24731_v57, %v8605_v9  ;;  %v21326_v57 = vld [vmem:[#allocation10 + $0x9d8] sm:$0xff]   ;;  %v21340_v26 = vld [vmem:[#allocation10 + $0xa88] sm:$0xff]   ;;  %v21341_v9 = vld [vmem:[#allocation10 + $0x980] sm:$0xff]  }
 0x872   :  { %18472 = vmatpush3.bf16.msra.mxu0 %v21321_v5  ;;  %v21342_v5 = vld [vmem:[#allocation10 + $0x940] sm:$0xff]  }
 0x873   :  { %19530 = vmatpush3.bf16.msra.mxu1 %v21322_v4  ;;  %19507 = vmatprep.subr.bf16.mxu0 %v25529_v61  ;;  %v21345_v4 = vld [vmem:[#allocation10 + $0x988] sm:$0xff]  }
 0x874   :  { %19531 = vmatprep.subr.bf16.mxu1 %v25529_v61 }
 0x875   :  { %10787 = vmatmul.mubr.bf16.vlgmr.msra.gmra.mrb[180].mxu0 %v25629_v44  ;;  %v21349_v44 = vld [vmem:[#allocation10 + $0x990] sm:$0xff]  }
 0x876   :  { %19508 = vmatpush3.bf16.msra.mxu0 %v21323_v39  ;;  %19523 = vmatprep.mubr.msk.bf16.mxu0 %vm22013_vm5, %v25529_v61  ;;  %v21346_v39 = vld [vmem:[#allocation10 + $0x948] sm:$0xff]  }
 0x877   :  { %19532 = vmatpush3.bf16.msra.mxu1 %v21324_v38  ;;  %19509 = vmatprep.subr.bf16.mxu0 %v25529_v61  ;;  %v21348_v38 = vld [vmem:[#allocation10 + $0xa98] sm:$0xff]  }
 0x878   :  { %19533 = vmatprep.subr.bf16.mxu1 %v25529_v61 }
 0x87a   :  { %19510 = vmatpush3.bf16.msra.mxu0 %v21325_v15  ;;  %v21351_v15 = vld [vmem:[#allocation10 + $0xae0] sm:$0xff]  }
 0x87b   :  { %19534 = vmatpush3.bf16.msra.mxu1 %v21326_v57  ;;  %19511 = vmatprep.subr.bf16.mxu0 %v25529_v61  ;;  %v21350_v57 = vld [vmem:[#allocation10 + $0x950] sm:$0xff]  }
 0x87c   :  { %19535 = vmatprep.subr.bf16.mxu1 %v25529_v61 }
 0x87e   :  { %19512 = vmatpush3.bf16.msra.mxu0 %v21327_v8  ;;  %v21352_v8 = vld [vmem:[#allocation10 + $0xaa0] sm:$0xff]  }
 0x87f   :  { %19536 = vmatpush3.bf16.msra.mxu1 %v21328_v28  ;;  %19513 = vmatprep.subr.bf16.mxu0 %v25529_v61  ;;  %v21353_v28 = vld [vmem:[#allocation10 + $0x998] sm:$0xff]  }
 0x880   :  { %19537 = vmatprep.subr.bf16.mxu1 %v25529_v61 }
 0x881   :  { %v18314_v10 = vpop.f32.mrb[160].mxu1 }
 0x882   :  { %v18315_v47 = vpop.f32.mrb[161].mxu1  ;;  %19514 = vmatpush3.bf16.msra.mxu0 %v21329_v41  ;;  %v21355_v41 = vld [vmem:[#allocation10 + $0xae8] sm:$0xff]  }
 0x883   :  { %v24773_v58 = vadd.f32 %v18315_v47, %v18314_v10  ;;  %v18317_v62 = vpop.f32.mrb[162].mxu1  ;;  %19538 = vmatpush3.bf16.msra.mxu1 %v21330_v43  ;;  %19515 = vmatprep.subr.bf16.mxu0 %v25529_v61  ;;  %v21356_v43 = vld [vmem:[#allocation10 + $0xaa8] sm:$0xff]   ;;  %v21357_v10 = vld [vmem:[#allocation10 + $0x9a0] sm:$0xff]   ;;  %v21359_v47 = vld [vmem:[#allocation10 + $0xaf0] sm:$0xff]  }
 0x884   :  { %v18318_v31 = vpop.f32.mrb[163].mxu1  ;;  %19539 = vmatprep.subr.bf16.mxu1 %v25529_v61 }
 0x885   :  { %v24777_v52 = vadd.f32 %v18318_v31, %v18317_v62 }
 0x886   :  { %19516 = vmatpush3.bf16.msra.mxu0 %v21331_v63 }
 0x887   :  { %19540 = vmatpush3.bf16.msra.mxu1 %v21332_v11  ;;  %19517 = vmatprep.subr.bf16.mxu0 %v25529_v61  ;;  %v21358_v11 = vld [vmem:[#allocation10 + $0x960] sm:$0xff]  }
 0x888   :  { %v18261_v42 = vpop.f32.mrb[76].mxu0  ;;  %19541 = vmatprep.subr.bf16.mxu1 %v25529_v61 }
 0x889   :  { %v18262_v30 = vpop.f32.mrb[77].mxu0 }
 0x88a   :  { %v18263_v40 = vadd.f32 %v18262_v30, %v18261_v42  ;;  %v18264_v19 = vpop.f32.mrb[78].mxu0  ;;  %19518 = vmatpush3.bf16.msra.mxu0 %v21333_v53  ;;  %v21360_v53 = vld [vmem:[#allocation10 + $0xab0] sm:$0xff]   ;;  %v21362_v30 = vld [vmem:[#allocation10 + $0x968] sm:$0xff]  }
 0x88b   :  { %v18265_v16 = vpop.f32.mrb[79].mxu0  ;;  %19542 = vmatpush3.bf16.msra.mxu1 %v21334_v48  ;;  %19519 = vmatprep.subr.bf16.mxu0 %v25529_v61  ;;  %v21361_v48 = vld [vmem:[#allocation10 + $0x9a8] sm:$0xff]  }
 0x88c   :  { %v18266_v6 = vadd.f32 %v18265_v16, %v18264_v19  ;;  %18585 = vmatprep.subr.bf16.mxu1 %v21336_v2  ;;  %v24783_v21 = vadd.f32 %v24745_v14, %v18263_v40  ;;  %v21344_v14 = vld [vmem:[#allocation10 + $0xa90] sm:$0xff]   ;;  %v21363_v2 = vld [vmem:[#allocation10 + $0xaf8] sm:$0xff]   ;;  %v21367_v16 = vld [vmem:[#allocation10 + $0xb80] sm:$0xff]  }
 0x88d   :  { %v21364_v40 = vld [vmem:[#allocation10 + $0xab8] sm:$0xff]   ;;  %v21365_v19 = vld [vmem:[#allocation10 + $0x9b0] sm:$0xff]  }
 0x88e   :  { %19520 = vmatpush3.bf16.msra.mxu0 %v21335_v54  ;;  %19544 = vmatmul.mubr.bf16.vlgmr.msra.gmra.mrb[188].mxu1 %v24552_v0  ;;  %v24787_v24 = vadd.f32 %v24747_v12, %v18266_v6  ;;  %v21347_v0 = vld [vmem:[#allocation10 + $0xad8] sm:$0xff]  }
 0x88f   :  { %18586 = vmatpush3.bf16.msra.mxu1 %v21337_v56  ;;  %11719 = vmatprep.mubr.bf16.mxu1 %v25630_v1  ;;  %v25631_v12 = vld [vmem:[#allocation24_spill] sm:$0xff] }
 0x890   :  { %19521 = vmatprep.subr.bf16.mxu0 %v25529_v61  ;;  %18587 = vmatprep.subr.bf16.mxu1 %v21339_v7 }
 0x892   :  { %19522 = vmatpush3.bf16.msra.mxu0 %v21338_v36  ;;  %v21366_v36 = vld [vmem:[#allocation10 + $0x970] sm:$0xff]  }
 0x893   :  { %18588 = vmatpush3.bf16.msra.mxu1 %v21340_v26  ;;  %18532 = vmatprep.subr.bf16.mxu0 %v21341_v9 }
 0x894   :  { %18589 = vmatprep.subr.bf16.mxu1 %v21343_v59  ;;  %v21368_v59 = vld [vmem:[#allocation10 + $0xb40] sm:$0xff]  }
 0x895   :  { %19524 = vmatmul.mubr.bf16.vlgmr.msra.gmra.mrb[184].mxu0 %v24536_v60  ;;  %v21354_v60 = vld [vmem:[#allocation10 + $0x958] sm:$0xff]  }
 0x896   :  { %18533 = vmatpush3.bf16.msra.mxu0 %v21342_v5  ;;  %11273 = vmatprep.mubr.bf16.mxu0 %v25631_v12  ;;  %v21369_v5 = vld [vmem:[#allocation10 + $0x9b8] sm:$0xff]   ;;  %v21373_v12 = vld [vmem:[#allocation10 + $0xa40] sm:$0xff]  }
 0x897   :  { %18590 = vmatpush3.bf16.msra.mxu1 %v21344_v14  ;;  %18534 = vmatprep.subr.bf16.mxu0 %v21345_v4  ;;  %v21371_v14 = vld [vmem:[#allocation10 + $0xb88] sm:$0xff]  }
 0x898   :  { %18591 = vmatprep.subr.bf16.mxu1 %v21347_v0  ;;  %v21370_v0 = vld [vmem:[#allocation10 + $0x978] sm:$0xff]  }
 0x89a   :  { %18535 = vmatpush3.bf16.msra.mxu0 %v21346_v39  ;;  %v21374_v39 = vld [vmem:[#allocation10 + $0xa00] sm:$0xff]  }
 0x89b   :  { %18592 = vmatpush3.bf16.msra.mxu1 %v21348_v38  ;;  %18536 = vmatprep.subr.bf16.mxu0 %v21349_v44  ;;  %v21376_v38 = vld [vmem:[#allocation10 + $0xb50] sm:$0xff]   ;;  %v21377_v44 = vld [vmem:[#allocation10 + $0xa48] sm:$0xff]  }
 0x89c   :  { %18593 = vmatprep.subr.bf16.mxu1 %v21351_v15  ;;  %v25633_v15 = vld [vmem:[#allocation88_spill] sm:$0xff] }
 0x89e   :  { %18537 = vmatpush3.bf16.msra.mxu0 %v21350_v57  ;;  %v25634_v57 = vld [vmem:[#allocation23_spill] sm:$0xff] }
 0x89f   :  { %18594 = vmatpush3.bf16.msra.mxu1 %v21352_v8  ;;  %18538 = vmatprep.subr.bf16.mxu0 %v21353_v28  ;;  %v21378_v8 = vld [vmem:[#allocation10 + $0xa08] sm:$0xff]   ;;  %v21381_v28 = vld [vmem:[#allocation10 + $0xa50] sm:$0xff]  }
 0x8a0   :  { %18595 = vmatprep.subr.bf16.mxu1 %v21355_v41  ;;  %v21383_v41 = vld [vmem:[#allocation10 + $0xba0] sm:$0xff]  }
 0x8a1   :  { %v24793_v63 = vpop.f32.mrb[164].mxu1 }
 0x8a2   :  { %v19465_v62 = vpop.f32.mrb[165].mxu1  ;;  %18539 = vmatpush3.bf16.msra.mxu0 %v21354_v60  ;;  %v21382_v60 = vld [vmem:[#allocation10 + $0xa10] sm:$0xff]  }
 0x8a3   :  { %v24795_v31 = vpop.f32.mrb[166].mxu1  ;;  %18596 = vmatpush3.bf16.msra.mxu1 %v21356_v43  ;;  %18540 = vmatprep.subr.bf16.mxu0 %v21357_v10  ;;  %v21384_v43 = vld [vmem:[#allocation10 + $0xb60] sm:$0xff]   ;;  %v21385_v10 = vld [vmem:[#allocation10 + $0xa58] sm:$0xff]  }
 0x8a4   :  { %v19466_v42 = vpop.f32.mrb[167].mxu1  ;;  %18597 = vmatprep.subr.bf16.mxu1 %v21359_v47  ;;  %v21387_v47 = vld [vmem:[#allocation10 + $0xba8] sm:$0xff]   ;;  %v21386_v62 = vld [vmem:[#allocation10 + $0xa18] sm:$0xff]  }
 0x8a6   :  { %18541 = vmatpush3.bf16.msra.mxu0 %v21358_v11  ;;  %v21388_v11 = vld [vmem:[#allocation10 + $0xb68] sm:$0xff]  }
 0x8a7   :  { %18598 = vmatpush3.bf16.msra.mxu1 %v21360_v53  ;;  %18542 = vmatprep.subr.bf16.mxu0 %v21361_v48  ;;  %v21389_v53 = vld [vmem:[#allocation10 + $0xa60] sm:$0xff]   ;;  %v21391_v48 = vld [vmem:[#allocation10 + $0xbb0] sm:$0xff]  }
 0x8a8   :  { %v9086_v54 = vpop.f32.mrb[160].mxu0  ;;  %18599 = vmatprep.subr.bf16.mxu1 %v21363_v2 }
 0x8a9   :  { %v9087_v56 = vadd.f32 %v9086_v54, %v24783_v21  ;;  %v19445_v6 = vpop.f32.mrb[161].mxu0  ;;  %v25632_v21 = vld [vmem:[#allocation90_spill] sm:$0xff]  ;;  %v21392_v54 = vld [vmem:[#allocation10 + $0xb70] sm:$0xff]  }
 0x8aa   :  { %v9089_v7 = vpop.f32.mrb[162].mxu0  ;;  %18543 = vmatpush3.bf16.msra.mxu0 %v21362_v30  ;;  %v21390_v30 = vld [vmem:[#allocation10 + $0xa20] sm:$0xff]   ;;  %v21395_v6 = vld [vmem:[#allocation10 + $0xbb8] sm:$0xff]  }
 0x8ab   :  { %v24799_v1 = vadd.f32 %v9087_v56, %v24754_v29  ;;  %v9090_v26 = vadd.f32 %v9089_v7, %v24787_v24  ;;  %v19446_v9 = vpop.f32.mrb[163].mxu0  ;;  %18600 = vmatpush3.bf16.msra.mxu1 %v21364_v40  ;;  %18544 = vmatprep.subr.bf16.mxu0 %v21365_v19  ;;  %v21372_v29 = vld [vmem:[#allocation10 + $0xb48] sm:$0xff]   ;;  %v21375_v24 = vld [vmem:[#allocation10 + $0xb90] sm:$0xff]  }
 0x8ac   :  { %18616 = vmatprep.subr.bf16.mxu1 %v21367_v16  ;;  %v21393_v16 = vld [vmem:[#allocation10 + $0xa68] sm:$0xff]   ;;  %v21397_v9 = vld [vmem:[#allocation10 + $0xa70] sm:$0xff]  }
 0x8ad   :  { %v24803_v4 = vadd.f32 %v9090_v26, %v24760_v13  ;;  %v21379_v13 = vld [vmem:[#allocation10 + $0xb98] sm:$0xff]  }
 0x8ae   :  { %18545 = vmatpush3.bf16.msra.mxu0 %v21366_v36  ;;  %11720 = vmatmul.mubr.bf16.vlgmr.msra.gmra.mrb[192].mxu1 %v25632_v21  ;;  %v21394_v36 = vld [vmem:[#allocation10 + $0xa28] sm:$0xff]   ;;  %v21396_v26 = vld [vmem:[#allocation10 + $0xb78] sm:$0xff]  }
 0x8af   :  { %18617 = vmatpush3.bf16.msra.mxu1 %v21368_v59  ;;  %12124 = vmatprep.mubr.bf16.mxu1 %v24249_v20  ;;  %v21380_v20 = vld [vmem:[#allocation10 + $0xb58] sm:$0xff]  }
 0x8b0   :  { %18546 = vmatprep.subr.bf16.mxu0 %v21369_v5  ;;  %18618 = vmatprep.subr.bf16.mxu1 %v21371_v14 }
 0x8b2   :  { %18547 = vmatpush3.bf16.msra.mxu0 %v21370_v0  ;;  %v21398_v0 = vld [vmem:[#allocation10 + $0xa30] sm:$0xff]  }
 0x8b3   :  { %18619 = vmatpush3.bf16.msra.mxu1 %v21372_v29  ;;  %18563 = vmatprep.subr.bf16.mxu0 %v21373_v12  ;;  %v21399_v12 = vld [vmem:[#allocation10 + $0xc40] sm:$0xff]  }
 0x8b4   :  { %18620 = vmatprep.subr.bf16.mxu1 %v21375_v24  ;;  %v21400_v24 = vld [vmem:[#allocation10 + $0xa78] sm:$0xff]  }
 0x8b5   :  { %11274 = vmatmul.mubr.bf16.vlgmr.msra.gmra.mrb[188].mxu0 %v25633_v15  ;;  %v21401_v15 = vld [vmem:[#allocation10 + $0xa38] sm:$0xff]  }
 0x8b6   :  { %18564 = vmatpush3.bf16.msra.mxu0 %v21374_v39  ;;  %11678 = vmatprep.mubr.bf16.mxu0 %v25634_v57  ;;  %v21402_v57 = vld [vmem:[#allocation10 + $0xc48] sm:$0xff]  }
 0x8b7   :  { %18621 = vmatpush3.bf16.msra.mxu1 %v21376_v38  ;;  %18565 = vmatprep.subr.bf16.mxu0 %v21377_v44 }
 0x8b8   :  { %18622 = vmatprep.subr.bf16.mxu1 %v21379_v13 }
 0x8ba   :  { %18566 = vmatpush3.bf16.msra.mxu0 %v21378_v8 }
 0x8bb   :  { %18623 = vmatpush3.bf16.msra.mxu1 %v21380_v20  ;;  %18567 = vmatprep.subr.bf16.mxu0 %v21381_v28  ;;  %v21405_v20 = vld [vmem:[#allocation10 + $0xb08] sm:$0xff]   ;;  %v21408_v28 = vld [vmem:[#allocation10 + $0xc60] sm:$0xff]  }
 0x8bc   :  { %18624 = vmatprep.subr.bf16.mxu1 %v21383_v41  ;;  %v21409_v41 = vld [vmem:[#allocation10 + $0xb18] sm:$0xff]  }
 0x8be   :  { %18568 = vmatpush3.bf16.msra.mxu0 %v21382_v60  ;;  %v21410_v60 = vld [vmem:[#allocation10 + $0xc68] sm:$0xff]  }
 0x8bf   :  { %18625 = vmatpush3.bf16.msra.mxu1 %v21384_v43  ;;  %18569 = vmatprep.subr.bf16.mxu0 %v21385_v10 }
 0x8c0   :  { %18626 = vmatprep.subr.bf16.mxu1 %v21387_v47  ;;  %v21411_v47 = vld [vmem:[#allocation10 + $0xb20] sm:$0xff]  }
 0x8c1   :  { %v18389_v42 = vpop.f32.mrb[168].mxu1 }
 0x8c2   :  { %v18390_v2 = vpop.f32.mrb[169].mxu1  ;;  %18570 = vmatpush3.bf16.msra.mxu0 %v21386_v62 }
 0x8c3   :  { %v24809_v40 = vadd.f32 %v18390_v2, %v18389_v42  ;;  %v18392_v19 = vpop.f32.mrb[170].mxu1  ;;  %18627 = vmatpush3.bf16.msra.mxu1 %v21388_v11  ;;  %18571 = vmatprep.subr.bf16.mxu0 %v21389_v53  ;;  %v21412_v53 = vld [vmem:[#allocation10 + $0xc70] sm:$0xff]   ;;  %v21413_v2 = vld [vmem:[#allocation10 + $0xb28] sm:$0xff]  }
 0x8c4   :  { %v18393_v56 = vpop.f32.mrb[171].mxu1  ;;  %18628 = vmatprep.subr.bf16.mxu1 %v21391_v48 }
 0x8c5   :  { %v24811_v7 = vadd.f32 %v18393_v56, %v18392_v19 }
 0x8c6   :  { %18572 = vmatpush3.bf16.msra.mxu0 %v21390_v30  ;;  %v21414_v30 = vld [vmem:[#allocation10 + $0xc78] sm:$0xff]  }
 0x8c7   :  { %18629 = vmatpush3.bf16.msra.mxu1 %v21392_v54  ;;  %18573 = vmatprep.subr.bf16.mxu0 %v21393_v16  ;;  %v21416_v54 = vld [vmem:[#allocation10 + $0xd40] sm:$0xff]  }
 0x8c8   :  { %v18336_v59 = vpop.f32.mrb[164].mxu0  ;;  %18630 = vmatprep.subr.bf16.mxu1 %v21395_v6 }
 0x8c9   :  { %v18337_v5 = vpop.f32.mrb[165].mxu0 }
 0x8ca   :  { %v18338_v14 = vadd.f32 %v18337_v5, %v18336_v59  ;;  %v18339_v21 = vpop.f32.mrb[166].mxu0  ;;  %18574 = vmatpush3.bf16.msra.mxu0 %v21394_v36  ;;  %v21415_v36 = vld [vmem:[#allocation10 + $0xb30] sm:$0xff]   ;;  %v21419_v5 = vld [vmem:[#allocation10 + $0xd48] sm:$0xff]  }
 0x8cb   :  { %v18340_v29 = vpop.f32.mrb[167].mxu0  ;;  %18631 = vmatpush3.bf16.msra.mxu1 %v21396_v26  ;;  %18575 = vmatprep.subr.bf16.mxu0 %v21397_v9  ;;  %v21417_v9 = vld [vmem:[#allocation10 + $0xd00] sm:$0xff]  }
 0x8cc   :  { %v9492_v39 = vadd.f32 %v18338_v14, %v24773_v58  ;;  %v18341_v38 = vadd.f32 %v18340_v29, %v18339_v21  ;;  %19567 = vmatprep.subr.bf16.mxu1 %v25529_v61  ;;  %v21418_v21 = vld [vmem:[#allocation10 + $0xb38] sm:$0xff]   ;;  %v21420_v29 = vld [vmem:[#allocation10 + $0xd08] sm:$0xff]  }
 0x8ce   :  { %v9533_v44 = vadd.f32 %v24793_v63, %v9492_v39  ;;  %v9495_v13 = vadd.f32 %v18341_v38, %v24777_v52  ;;  %18576 = vmatpush3.bf16.msra.mxu0 %v21398_v0  ;;  %12125 = vmatmul.mubr.bf16.vlgmr.msra.gmra.mrb[196].mxu1 %v24245_v37  ;;  %v21403_v63 = vld [vmem:[#allocation10 + $0xb00] sm:$0xff]   ;;  %v21404_v37 = vld [vmem:[#allocation10 + $0xc50] sm:$0xff]   ;;  %v21425_v38 = vld [vmem:[#allocation10 + $0xc08] sm:$0xff]  }
 0x8cf   :  { %19568 = vmatpush3.bf16.msra.mxu1 %v21399_v12  ;;  %18577 = vmatprep.subr.bf16.mxu0 %v21400_v24  ;;  %v21421_v12 = vld [vmem:[#allocation10 + $0xc00] sm:$0xff]   ;;  %v21423_v24 = vld [vmem:[#allocation10 + $0xd50] sm:$0xff]  }
 0x8d0   :  { %v9536_v8 = vadd.f32 %v24795_v31, %v9495_v13  ;;  %19569 = vmatprep.subr.bf16.mxu1 %v25529_v61  ;;  %19583 = vmatprep.mubr.msk.bf16.mxu1 %vm22013_vm5, %v25529_v61  ;;  %v24823_v58 = vadd.f32 %v9533_v44, %v24799_v1  ;;  %v25635_v31 = vld [vmem:[#allocation36_spill] sm:$0xff]  ;;  %v21422_v39 = vld [vmem:[#allocation10 + $0xbc0] sm:$0xff]  }
 0x8d1   :  { %v21406_v1 = vld [vmem:[#allocation10 + $0xc58] sm:$0xff]   ;;  %v21429_v13 = vld [vmem:[#allocation10 + $0xc10] sm:$0xff]  }
 0x8d2   :  { %18578 = vmatpush3.bf16.msra.mxu0 %v21401_v15  ;;  %v24826_v52 = vadd.f32 %v9536_v8, %v24803_v4  ;;  %v21407_v4 = vld [vmem:[#allocation10 + $0xb10] sm:$0xff]   ;;  %v21428_v44 = vld [vmem:[#allocation10 + $0xd18] sm:$0xff]   ;;  %v21431_v15 = vld [vmem:[#allocation10 + $0xd60] sm:$0xff]  }
 0x8d3   :  { %19570 = vmatpush3.bf16.msra.mxu1 %v21402_v57  ;;  %19547 = vmatprep.subr.bf16.mxu0 %v25529_v61  ;;  %v21430_v57 = vld [vmem:[#allocation10 + $0xbd0] sm:$0xff]   ;;  %v21432_v8 = vld [vmem:[#allocation10 + $0xd20] sm:$0xff]  }
 0x8d4   :  { %19571 = vmatprep.subr.bf16.mxu1 %v25529_v61 }
 0x8d5   :  { %11679 = vmatmul.mubr.bf16.vlgmr.msra.gmra.mrb[192].mxu0 %v25635_v31  ;;  %v21436_v31 = vld [vmem:[#allocation10 + $0xd28] sm:$0xff]  }
 0x8d6   :  { %19548 = vmatpush3.bf16.msra.mxu0 %v21403_v63  ;;  %19563 = vmatprep.mubr.msk.bf16.mxu0 %vm22013_vm5, %v25529_v61  ;;  %v21433_v63 = vld [vmem:[#allocation10 + $0xc18] sm:$0xff]  }
 0x8d7   :  { %19572 = vmatpush3.bf16.msra.mxu1 %v21404_v37  ;;  %19549 = vmatprep.subr.bf16.mxu0 %v25529_v61  ;;  %v21435_v37 = vld [vmem:[#allocation10 + $0xd68] sm:$0xff]  }
 0x8d8   :  { %19573 = vmatprep.subr.bf16.mxu1 %v25529_v61 }
 0x8da   :  { %19550 = vmatpush3.bf16.msra.mxu0 %v21405_v20  ;;  %v21437_v20 = vld [vmem:[#allocation10 + $0xc20] sm:$0xff]  }
 0x8db   :  { %19574 = vmatpush3.bf16.msra.mxu1 %v21406_v1  ;;  %19551 = vmatprep.subr.bf16.mxu0 %v25529_v61  ;;  %v21439_v1 = vld [vmem:[#allocation10 + $0xd70] sm:$0xff]  }
 0x8dc   :  { %19575 = vmatprep.subr.bf16.mxu1 %v25529_v61 }
 0x8de   :  { %19552 = vmatpush3.bf16.msra.mxu0 %v21407_v4 }
 0x8df   :  { %19576 = vmatpush3.bf16.msra.mxu1 %v21408_v28  ;;  %19553 = vmatprep.subr.bf16.mxu0 %v25529_v61 }
 0x8e0   :  { %19577 = vmatprep.subr.bf16.mxu1 %v25529_v61 }
 0x8e1   :  { %v18420_v43 = vpop.f32.mrb[172].mxu1 }
 0x8e2   :  { %v18421_v10 = vpop.f32.mrb[173].mxu1  ;;  %19554 = vmatpush3.bf16.msra.mxu0 %v21409_v41  ;;  %v21438_v41 = vld [vmem:[#allocation10 + $0xbe0] sm:$0xff]  }
 0x8e3   :  { %v24839_v62 = vadd.f32 %v18421_v10, %v18420_v43  ;;  %v18423_v11 = vpop.f32.mrb[174].mxu1  ;;  %19578 = vmatpush3.bf16.msra.mxu1 %v21410_v60  ;;  %19555 = vmatprep.subr.bf16.mxu0 %v25529_v61  ;;  %v21440_v43 = vld [vmem:[#allocation10 + $0xd30] sm:$0xff]   ;;  %v21441_v10 = vld [vmem:[#allocation10 + $0xc28] sm:$0xff]  }
 0x8e4   :  { %v18424_v48 = vpop.f32.mrb[175].mxu1  ;;  %19579 = vmatprep.subr.bf16.mxu1 %v25529_v61 }
 0x8e5   :  { %v24843_v42 = vadd.f32 %v18424_v48, %v18423_v11  ;;  %v21443_v11 = vld [vmem:[#allocation10 + $0xd78] sm:$0xff]  }
 0x8e6   :  { %19556 = vmatpush3.bf16.msra.mxu0 %v21411_v47  ;;  %v21444_v48 = vld [vmem:[#allocation10 + $0xd38] sm:$0xff]  }
 0x8e7   :  { %19580 = vmatpush3.bf16.msra.mxu1 %v21412_v53  ;;  %19557 = vmatprep.subr.bf16.mxu0 %v25529_v61  ;;  %v21442_v53 = vld [vmem:[#allocation10 + $0xbe8] sm:$0xff]  }
 0x8e8   :  { %v18367_v19 = vpop.f32.mrb[168].mxu0  ;;  %19581 = vmatprep.subr.bf16.mxu1 %v25529_v61 }
 0x8e9   :  { %v18368_v16 = vpop.f32.mrb[169].mxu0 }
 0x8ea   :  { %v18369_v56 = vadd.f32 %v18368_v16, %v18367_v19  ;;  %v18370_v6 = vpop.f32.mrb[170].mxu0  ;;  %19558 = vmatpush3.bf16.msra.mxu0 %v21413_v2  ;;  %v21445_v2 = vld [vmem:[#allocation10 + $0xc30] sm:$0xff]   ;;  %v21447_v19 = vld [vmem:[#allocation10 + $0xe00] sm:$0xff]  }
 0x8eb   :  { %v18371_v26 = vpop.f32.mrb[171].mxu0  ;;  %19582 = vmatpush3.bf16.msra.mxu1 %v21414_v30  ;;  %19559 = vmatprep.subr.bf16.mxu0 %v25529_v61 }
 0x8ec   :  { %v18372_v59 = vadd.f32 %v18371_v26, %v18370_v6  ;;  %18691 = vmatprep.subr.bf16.mxu1 %v21416_v54  ;;  %v24849_v14 = vadd.f32 %v24809_v40, %v18369_v56  ;;  %v21424_v40 = vld [vmem:[#allocation10 + $0xd10] sm:$0xff]  }
 0x8ed   :  { %v21446_v6 = vld [vmem:[#allocation10 + $0xbf0] sm:$0xff]  }
 0x8ee   :  { %19560 = vmatpush3.bf16.msra.mxu0 %v21415_v36  ;;  %19584 = vmatmul.mubr.bf16.vlgmr.msra.gmra.mrb[200].mxu1 %v24585_v18  ;;  %v24853_v0 = vadd.f32 %v24811_v7, %v18372_v59  ;;  %v21427_v18 = vld [vmem:[#allocation10 + $0xd58] sm:$0xff]   ;;  %v21448_v59 = vld [vmem:[#allocation10 + $0xdc0] sm:$0xff]  }
 0x8ef   :  { %18692 = vmatpush3.bf16.msra.mxu1 %v21417_v9  ;;  %12611 = vmatprep.mubr.bf16.mxu1 %v24269_v23  ;;  %v25636_v7 = vld [vmem:[#allocation28_spill] sm:$0xff]  ;;  %v21426_v23 = vld [vmem:[#allocation10 + $0xbc8] sm:$0xff]  }
 0x8f0   :  { %19561 = vmatprep.subr.bf16.mxu0 %v25529_v61  ;;  %18693 = vmatprep.subr.bf16.mxu1 %v21419_v5  ;;  %v21449_v5 = vld [vmem:[#allocation10 + $0xc38] sm:$0xff]  }
 0x8f2   :  { %19562 = vmatpush3.bf16.msra.mxu0 %v21418_v21  ;;  %v21451_v21 = vld [vmem:[#allocation10 + $0xe08] sm:$0xff]  }
 0x8f3   :  { %18694 = vmatpush3.bf16.msra.mxu1 %v21420_v29  ;;  %18638 = vmatprep.subr.bf16.mxu0 %v21421_v12  ;;  %v21453_v12 = vld [vmem:[#allocation10 + $0xcc0] sm:$0xff]  }
 0x8f4   :  { %18695 = vmatprep.subr.bf16.mxu1 %v21423_v24  ;;  %v21454_v24 = vld [vmem:[#allocation10 + $0xc80] sm:$0xff]  }
 0x8f5   :  { %19564 = vmatmul.mubr.bf16.vlgmr.msra.gmra.mrb[196].mxu0 %v24568_v34  ;;  %v21434_v34 = vld [vmem:[#allocation10 + $0xbd8] sm:$0xff]  }
 0x8f6   :  { %18639 = vmatpush3.bf16.msra.mxu0 %v21422_v39  ;;  %12165 = vmatprep.mubr.bf16.mxu0 %v25636_v7  ;;  %v21456_v39 = vld [vmem:[#allocation10 + $0xdd0] sm:$0xff]  }
 0x8f7   :  { %18696 = vmatpush3.bf16.msra.mxu1 %v21424_v40  ;;  %18640 = vmatprep.subr.bf16.mxu0 %v21425_v38  ;;  %v21457_v40 = vld [vmem:[#allocation10 + $0xcc8] sm:$0xff]   ;;  %v25637_v38 = vld [vmem:[#allocation92_spill] sm:$0xff] }
 0x8f8   :  { %18697 = vmatprep.subr.bf16.mxu1 %v21427_v18  ;;  %v21458_v18 = vld [vmem:[#allocation10 + $0xc88] sm:$0xff]   ;;  %v21461_v7 = vld [vmem:[#allocation10 + $0xcd0] sm:$0xff]  }
 0x8fa   :  { %18641 = vmatpush3.bf16.msra.mxu0 %v21426_v23  ;;  %v21463_v23 = vld [vmem:[#allocation10 + $0xe20] sm:$0xff]  }
 0x8fb   :  { %18698 = vmatpush3.bf16.msra.mxu1 %v21428_v44  ;;  %18642 = vmatprep.subr.bf16.mxu0 %v21429_v13  ;;  %v21462_v44 = vld [vmem:[#allocation10 + $0xc90] sm:$0xff]   ;;  %v21464_v13 = vld [vmem:[#allocation10 + $0xde0] sm:$0xff]  }
 0x8fc   :  { %18699 = vmatprep.subr.bf16.mxu1 %v21431_v15  ;;  %v21465_v15 = vld [vmem:[#allocation10 + $0xcd8] sm:$0xff]  }
 0x8fe   :  { %18643 = vmatpush3.bf16.msra.mxu0 %v21430_v57  ;;  %v21467_v57 = vld [vmem:[#allocation10 + $0xe28] sm:$0xff]  }
 0x8ff   :  { %18700 = vmatpush3.bf16.msra.mxu1 %v21432_v8  ;;  %18644 = vmatprep.subr.bf16.mxu0 %v21433_v63  ;;  %v21466_v8 = vld [vmem:[#allocation10 + $0xc98] sm:$0xff]   ;;  %v21468_v63 = vld [vmem:[#allocation10 + $0xde8] sm:$0xff]  }
 0x900   :  { %18701 = vmatprep.subr.bf16.mxu1 %v21435_v37  ;;  %v21469_v37 = vld [vmem:[#allocation10 + $0xce0] sm:$0xff]  }
 0x901   :  { %v24859_v4 = vpop.f32.mrb[176].mxu1 }
 0x902   :  { %v19505_v28 = vpop.f32.mrb[177].mxu1  ;;  %18645 = vmatpush3.bf16.msra.mxu0 %v21434_v34  ;;  %v21471_v34 = vld [vmem:[#allocation10 + $0xe30] sm:$0xff]  }
 0x903   :  { %v24861_v60 = vpop.f32.mrb[178].mxu1  ;;  %18702 = vmatpush3.bf16.msra.mxu1 %v21436_v31  ;;  %18646 = vmatprep.subr.bf16.mxu0 %v21437_v20 }
 0x904   :  { %v19506_v47 = vpop.f32.mrb[179].mxu1  ;;  %18703 = vmatprep.subr.bf16.mxu1 %v21439_v1  ;;  %v21470_v1 = vld [vmem:[#allocation10 + $0xca0] sm:$0xff]  }
 0x906   :  { %18647 = vmatpush3.bf16.msra.mxu0 %v21438_v41 }
 0x907   :  { %18704 = vmatpush3.bf16.msra.mxu1 %v21440_v43  ;;  %18648 = vmatprep.subr.bf16.mxu0 %v21441_v10  ;;  %v21472_v43 = vld [vmem:[#allocation10 + $0xdf0] sm:$0xff]   ;;  %v21473_v10 = vld [vmem:[#allocation10 + $0xce8] sm:$0xff]  }
 0x908   :  { %v9978_v30 = vpop.f32.mrb[172].mxu0  ;;  %18705 = vmatprep.subr.bf16.mxu1 %v21443_v11  ;;  %v21475_v11 = vld [vmem:[#allocation10 + $0xe38] sm:$0xff]  }
 0x909   :  { %v9979_v54 = vadd.f32 %v9978_v30, %v24849_v14  ;;  %v19485_v16 = vpop.f32.mrb[173].mxu0  ;;  %v21450_v14 = vld [vmem:[#allocation10 + $0xbf8] sm:$0xff]   ;;  %v21477_v30 = vld [vmem:[#allocation10 + $0xcf0] sm:$0xff]  }
 0x90a   :  { %v9981_v56 = vpop.f32.mrb[174].mxu0  ;;  %18649 = vmatpush3.bf16.msra.mxu0 %v21442_v53 }
 0x90b   :  { %v24865_v36 = vadd.f32 %v9979_v54, %v24823_v58  ;;  %v9982_v26 = vadd.f32 %v9981_v56, %v24853_v0  ;;  %v19486_v9 = vpop.f32.mrb[175].mxu0  ;;  %18706 = vmatpush3.bf16.msra.mxu1 %v21444_v48  ;;  %18650 = vmatprep.subr.bf16.mxu0 %v21445_v2  ;;  %v21452_v58 = vld [vmem:[#allocation10 + $0xdc8] sm:$0xff]   ;;  %v21455_v0 = vld [vmem:[#allocation10 + $0xe10] sm:$0xff]   ;;  %v21476_v2 = vld [vmem:[#allocation10 + $0xdf8] sm:$0xff]  }
 0x90c   :  { %18722 = vmatprep.subr.bf16.mxu1 %v21447_v19  ;;  %v21474_v48 = vld [vmem:[#allocation10 + $0xca8] sm:$0xff]   ;;  %v21479_v9 = vld [vmem:[#allocation10 + $0xec0] sm:$0xff]  }
 0x90d   :  { %v24869_v29 = vadd.f32 %v9982_v26, %v24826_v52  ;;  %v21459_v52 = vld [vmem:[#allocation10 + $0xe18] sm:$0xff]  }
 0x90e   :  { %18651 = vmatpush3.bf16.msra.mxu0 %v21446_v6  ;;  %12612 = vmatmul.mubr.bf16.vlgmr.msra.gmra.mrb[204].mxu1 %v24265_v49  ;;  %v25638_v49 = vld [vmem:[#allocation94_spill] sm:$0xff]  ;;  %v21478_v6 = vld [vmem:[#allocation10 + $0xcb0] sm:$0xff]  }
 0x90f   :  { %18723 = vmatpush3.bf16.msra.mxu1 %v21448_v59  ;;  %13016 = vmatprep.mubr.bf16.mxu1 %v24285_v33  ;;  %v21460_v33 = vld [vmem:[#allocation10 + $0xdd8] sm:$0xff]  }
 0x910   :  { %18652 = vmatprep.subr.bf16.mxu0 %v21449_v5  ;;  %18724 = vmatprep.subr.bf16.mxu1 %v21451_v21  ;;  %v21480_v59 = vld [vmem:[#allocation10 + $0xcf8] sm:$0xff]  }
 0x912   :  { %18653 = vmatpush3.bf16.msra.mxu0 %v21450_v14 }
 0x913   :  { %18725 = vmatpush3.bf16.msra.mxu1 %v21452_v58  ;;  %18669 = vmatprep.subr.bf16.mxu0 %v21453_v12  ;;  %v25639_v12 = vld [vmem:[#allocation27_spill] sm:$0xff] }
 0x914   :  { %18726 = vmatprep.subr.bf16.mxu1 %v21455_v0  ;;  %v21481_v0 = vld [vmem:[#allocation10 + $0xcb8] sm:$0xff]  }
 0x915   :  { %12166 = vmatmul.mubr.bf16.vlgmr.msra.gmra.mrb[200].mxu0 %v25637_v38  ;;  %v21488_v38 = vld [vmem:[#allocation10 + $0xee0] sm:$0xff]  }
 0x916   :  { %18670 = vmatpush3.bf16.msra.mxu0 %v21454_v24  ;;  %12570 = vmatprep.mubr.bf16.mxu0 %v25638_v49  ;;  %v21482_v24 = vld [vmem:[#allocation10 + $0xec8] sm:$0xff]   ;;  %v21489_v49 = vld [vmem:[#allocation10 + $0xd98] sm:$0xff]  }
 0x917   :  { %18727 = vmatpush3.bf16.msra.mxu1 %v21456_v39  ;;  %18671 = vmatprep.subr.bf16.mxu0 %v21457_v40  ;;  %v21484_v40 = vld [vmem:[#allocation10 + $0xed0] sm:$0xff]  }
 0x918   :  { %18728 = vmatprep.subr.bf16.mxu1 %v21459_v52  ;;  %v21485_v52 = vld [vmem:[#allocation10 + $0xd88] sm:$0xff]  }
 0x91a   :  { %18672 = vmatpush3.bf16.msra.mxu0 %v21458_v18  ;;  %v21490_v18 = vld [vmem:[#allocation10 + $0xee8] sm:$0xff]  }
 0x91b   :  { %18729 = vmatpush3.bf16.msra.mxu1 %v21460_v33  ;;  %18673 = vmatprep.subr.bf16.mxu0 %v21461_v7 }
 0x91c   :  { %18730 = vmatprep.subr.bf16.mxu1 %v21463_v23  ;;  %v21491_v23 = vld [vmem:[#allocation10 + $0xda0] sm:$0xff]  }
 0x91e   :  { %18674 = vmatpush3.bf16.msra.mxu0 %v21462_v44 }
 0x91f   :  { %18731 = vmatpush3.bf16.msra.mxu1 %v21464_v13  ;;  %18675 = vmatprep.subr.bf16.mxu0 %v21465_v15  ;;  %v21492_v15 = vld [vmem:[#allocation10 + $0xef0] sm:$0xff]  }
 0x920   :  { %18732 = vmatprep.subr.bf16.mxu1 %v21467_v57 }
 0x921   :  { %v18495_v31 = vpop.f32.mrb[180].mxu1 }
 0x922   :  { %v18496_v20 = vpop.f32.mrb[181].mxu1  ;;  %18676 = vmatpush3.bf16.msra.mxu0 %v21466_v8 }
 0x923   :  { %v24875_v28 = vadd.f32 %v18496_v20, %v18495_v31  ;;  %v18498_v41 = vpop.f32.mrb[182].mxu1  ;;  %18733 = vmatpush3.bf16.msra.mxu1 %v21468_v63  ;;  %18677 = vmatprep.subr.bf16.mxu0 %v21469_v37  ;;  %v21493_v63 = vld [vmem:[#allocation10 + $0xda8] sm:$0xff]   ;;  %v21494_v37 = vld [vmem:[#allocation10 + $0xef8] sm:$0xff]   ;;  %v21496_v31 = vld [vmem:[#allocation10 + $0xfc0] sm:$0xff]  }
 0x924   :  { %v18499_v47 = vpop.f32.mrb[183].mxu1  ;;  %18734 = vmatprep.subr.bf16.mxu1 %v21471_v34 }
 0x925   :  { %v24877_v53 = vadd.f32 %v18499_v47, %v18498_v41  ;;  %v21497_v47 = vld [vmem:[#allocation10 + $0xf80] sm:$0xff]  }
 0x926   :  { %18678 = vmatpush3.bf16.msra.mxu0 %v21470_v1 }
 0x927   :  { %18735 = vmatpush3.bf16.msra.mxu1 %v21472_v43  ;;  %18679 = vmatprep.subr.bf16.mxu0 %v21473_v10  ;;  %v21495_v43 = vld [vmem:[#allocation10 + $0xdb0] sm:$0xff]  }
 0x928   :  { %v18442_v19 = vpop.f32.mrb[176].mxu0  ;;  %18736 = vmatprep.subr.bf16.mxu1 %v21475_v11 }
 0x929   :  { %v18443_v54 = vpop.f32.mrb[177].mxu0 }
 0x92a   :  { %v18444_v16 = vadd.f32 %v18443_v54, %v18442_v19  ;;  %v18445_v56 = vpop.f32.mrb[178].mxu0  ;;  %18680 = vmatpush3.bf16.msra.mxu0 %v21474_v48  ;;  %v21499_v48 = vld [vmem:[#allocation10 + $0xfc8] sm:$0xff]   ;;  %v25641_v54 = vld [vmem:[#allocation20_spill] sm:$0xff] }
 0x92b   :  { %v18446_v26 = vpop.f32.mrb[179].mxu0  ;;  %18737 = vmatpush3.bf16.msra.mxu1 %v21476_v2  ;;  %18681 = vmatprep.subr.bf16.mxu0 %v21477_v30  ;;  %v21498_v30 = vld [vmem:[#allocation10 + $0xdb8] sm:$0xff]  }
 0x92c   :  { %v10384_v5 = vadd.f32 %v18444_v16, %v24839_v62  ;;  %v18447_v21 = vadd.f32 %v18446_v26, %v18445_v56  ;;  %19607 = vmatprep.subr.bf16.mxu1 %v25529_v61  ;;  %v21500_v16 = vld [vmem:[#allocation10 + $0xf88] sm:$0xff]   ;;  %v21501_v56 = vld [vmem:[#allocation10 + $0xe80] sm:$0xff]  }
 0x92d   :  { %v21502_v26 = vld [vmem:[#allocation10 + $0xe40] sm:$0xff]  }
 0x92e   :  { %v10425_v14 = vadd.f32 %v24859_v4, %v10384_v5  ;;  %v10387_v58 = vadd.f32 %v18447_v21, %v24843_v42  ;;  %18682 = vmatpush3.bf16.msra.mxu0 %v21478_v6  ;;  %13017 = vmatmul.mubr.bf16.vlgmr.msra.gmra.mrb[208].mxu1 %v25639_v12  ;;  %v21483_v4 = vld [vmem:[#allocation10 + $0xd80] sm:$0xff]   ;;  %v21503_v6 = vld [vmem:[#allocation10 + $0xfd0] sm:$0xff]   ;;  %v21508_v5 = vld [vmem:[#allocation10 + $0xf98] sm:$0xff]  }
 0x92f   :  { %19608 = vmatpush3.bf16.msra.mxu1 %v21479_v9  ;;  %18683 = vmatprep.subr.bf16.mxu0 %v21480_v59  ;;  %v21505_v9 = vld [vmem:[#allocation10 + $0xe88] sm:$0xff]   ;;  %v21509_v21 = vld [vmem:[#allocation10 + $0xe90] sm:$0xff]   ;;  %v21512_v12 = vld [vmem:[#allocation10 + $0xfa0] sm:$0xff]  }
 0x930   :  { %v10428_v39 = vadd.f32 %v24861_v60, %v10387_v58  ;;  %19609 = vmatprep.subr.bf16.mxu1 %v25529_v61  ;;  %19623 = vmatprep.mubr.msk.bf16.mxu1 %vm22013_vm5, %v25529_v61  ;;  %v24889_v62 = vadd.f32 %v10425_v14, %v24865_v36  ;;  %v25640_v60 = vld [vmem:[#allocation93_spill] sm:$0xff]  ;;  %v21506_v59 = vld [vmem:[#allocation10 + $0xe48] sm:$0xff]   ;;  %v21510_v58 = vld [vmem:[#allocation10 + $0xe50] sm:$0xff]  }
 0x931   :  { %v21486_v36 = vld [vmem:[#allocation10 + $0xed8] sm:$0xff]   ;;  %v21511_v14 = vld [vmem:[#allocation10 + $0xfe0] sm:$0xff]  }
 0x932   :  { %18684 = vmatpush3.bf16.msra.mxu0 %v21481_v0  ;;  %v24892_v42 = vadd.f32 %v10428_v39, %v24869_v29  ;;  %v21487_v29 = vld [vmem:[#allocation10 + $0xd90] sm:$0xff]   ;;  %v21513_v0 = vld [vmem:[#allocation10 + $0xe98] sm:$0xff]   ;;  %v21516_v39 = vld [vmem:[#allocation10 + $0xfa8] sm:$0xff]  }
 0x933   :  { %19610 = vmatpush3.bf16.msra.mxu1 %v21482_v24  ;;  %19587 = vmatprep.subr.bf16.mxu0 %v25529_v61  ;;  %v21515_v24 = vld [vmem:[#allocation10 + $0xfe8] sm:$0xff]  }
 0x934   :  { %19611 = vmatprep.subr.bf16.mxu1 %v25529_v61 }
 0x935   :  { %12571 = vmatmul.mubr.bf16.vlgmr.msra.gmra.mrb[204].mxu0 %v25640_v60 }
 0x936   :  { %19588 = vmatpush3.bf16.msra.mxu0 %v21483_v4  ;;  %19603 = vmatprep.mubr.msk.bf16.mxu0 %vm22013_vm5, %v25529_v61  ;;  %v21517_v4 = vld [vmem:[#allocation10 + $0xea0] sm:$0xff]  }
 0x937   :  { %19612 = vmatpush3.bf16.msra.mxu1 %v21484_v40  ;;  %19589 = vmatprep.subr.bf16.mxu0 %v25529_v61  ;;  %v21519_v40 = vld [vmem:[#allocation10 + $0xff0] sm:$0xff]  }
 0x938   :  { %19613 = vmatprep.subr.bf16.mxu1 %v25529_v61 }
 0x93a   :  { %19590 = vmatpush3.bf16.msra.mxu0 %v21485_v52 }
 0x93b   :  { %19614 = vmatpush3.bf16.msra.mxu1 %v21486_v36  ;;  %19591 = vmatprep.subr.bf16.mxu0 %v25529_v61  ;;  %v21518_v36 = vld [vmem:[#allocation10 + $0xe60] sm:$0xff]  }
 0x93c   :  { %19615 = vmatprep.subr.bf16.mxu1 %v25529_v61 }
 0x93e   :  { %19592 = vmatpush3.bf16.msra.mxu0 %v21487_v29 }
 0x93f   :  { %19616 = vmatpush3.bf16.msra.mxu1 %v21488_v38  ;;  %19593 = vmatprep.subr.bf16.mxu0 %v25529_v61  ;;  %v21520_v38 = vld [vmem:[#allocation10 + $0xfb0] sm:$0xff]  }
 0x940   :  { %19617 = vmatprep.subr.bf16.mxu1 %v25529_v61 }
 0x941   :  { %v18526_v33 = vpop.f32.mrb[184].mxu1 }
 0x942   :  { %v18527_v7 = vpop.f32.mrb[185].mxu1  ;;  %19594 = vmatpush3.bf16.msra.mxu0 %v21489_v49  ;;  %v21521_v49 = vld [vmem:[#allocation10 + $0xea8] sm:$0xff]  }
 0x943   :  { %v24905_v44 = vadd.f32 %v18527_v7, %v18526_v33  ;;  %v18529_v13 = vpop.f32.mrb[186].mxu1  ;;  %19618 = vmatpush3.bf16.msra.mxu1 %v21490_v18  ;;  %19595 = vmatprep.subr.bf16.mxu0 %v25529_v61  ;;  %v21523_v33 = vld [vmem:[#allocation10 + $0xff8] sm:$0xff]   ;;  %v21522_v7 = vld [vmem:[#allocation10 + $0xe68] sm:$0xff]  }
 0x944   :  { %v18530_v57 = vpop.f32.mrb[187].mxu1  ;;  %19619 = vmatprep.subr.bf16.mxu1 %v25529_v61 }
 0x945   :  { %v24909_v8 = vadd.f32 %v18530_v57, %v18529_v13  ;;  %v21525_v13 = vld [vmem:[#allocation10 + $0xeb0] sm:$0xff]   ;;  %v21527_v57 = vld [vmem:[#allocation10 + $0x1080] sm:$0xff]  }
 0x946   :  { %19596 = vmatpush3.bf16.msra.mxu0 %v21491_v23  ;;  %v21524_v23 = vld [vmem:[#allocation10 + $0xfb8] sm:$0xff]  }
 0x947   :  { %19620 = vmatpush3.bf16.msra.mxu1 %v21492_v15  ;;  %19597 = vmatprep.subr.bf16.mxu0 %v25529_v61 }
 0x948   :  { %v18473_v34 = vpop.f32.mrb[180].mxu0  ;;  %19621 = vmatprep.subr.bf16.mxu1 %v25529_v61 }
 0x949   :  { %v18474_v20 = vpop.f32.mrb[181].mxu0 }
 0x94a   :  { %v18475_v1 = vadd.f32 %v18474_v20, %v18473_v34  ;;  %v18476_v41 = vpop.f32.mrb[182].mxu0  ;;  %19598 = vmatpush3.bf16.msra.mxu0 %v21493_v63 }
 0x94b   :  { %v18477_v10 = vpop.f32.mrb[183].mxu0  ;;  %19622 = vmatpush3.bf16.msra.mxu1 %v21494_v37  ;;  %19599 = vmatprep.subr.bf16.mxu0 %v25529_v61 }
 0x94c   :  { %v18478_v11 = vadd.f32 %v18477_v10, %v18476_v41  ;;  %18797 = vmatprep.subr.bf16.mxu1 %v21496_v31  ;;  %v24915_v2 = vadd.f32 %v24875_v28, %v18475_v1  ;;  %v21504_v28 = vld [vmem:[#allocation10 + $0xf90] sm:$0xff]   ;;  %v21529_v10 = vld [vmem:[#allocation10 + $0xeb8] sm:$0xff]  }
 0x94d   :  { %v21526_v31 = vld [vmem:[#allocation10 + $0xe70] sm:$0xff]  }
 0x94e   :  { %19600 = vmatpush3.bf16.msra.mxu0 %v21495_v43  ;;  %19624 = vmatmul.mubr.bf16.vlgmr.msra.gmra.mrb[212].mxu1 %v24614_v35  ;;  %v24919_v19 = vadd.f32 %v24877_v53, %v18478_v11  ;;  %v21507_v35 = vld [vmem:[#allocation10 + $0xfd8] sm:$0xff]   ;;  %v21528_v43 = vld [vmem:[#allocation10 + $0x1040] sm:$0xff]  }
 0x94f   :  { %18798 = vmatpush3.bf16.msra.mxu1 %v21497_v47  ;;  %13503 = vmatprep.mubr.bf16.mxu1 %v25641_v54  ;;  %v25642_v53 = vld [vmem:[#allocation41_spill] sm:$0xff]  ;;  %v21531_v47 = vld [vmem:[#allocation10 + $0x1088] sm:$0xff]  }
 0x950   :  { %19601 = vmatprep.subr.bf16.mxu0 %v25529_v61  ;;  %18799 = vmatprep.subr.bf16.mxu1 %v21499_v48  ;;  %v25643_v48 = vld [vmem:[#allocation45_spill] sm:$0xff] }
 0x951   :  { %v21533_v54 = vld [vmem:[#allocation10 + $0xf40] sm:$0xff]  }
 0x952   :  { %19602 = vmatpush3.bf16.msra.mxu0 %v21498_v30  ;;  %v25644_v30 = vld [vmem:[#allocation39_spill] sm:$0xff] }
 0x953   :  { %18800 = vmatpush3.bf16.msra.mxu1 %v21500_v16  ;;  %18744 = vmatprep.subr.bf16.mxu0 %v21501_v56  ;;  %v21534_v16 = vld [vmem:[#allocation10 + $0xf00] sm:$0xff]   ;;  %v21536_v56 = vld [vmem:[#allocation10 + $0x1050] sm:$0xff]  }
 0x954   :  { %18801 = vmatprep.subr.bf16.mxu1 %v21503_v6  ;;  %v21537_v6 = vld [vmem:[#allocation10 + $0xf48] sm:$0xff]  }
 0x955   :  { %19604 = vmatmul.mubr.bf16.vlgmr.msra.gmra.mrb[208].mxu0 %v24602_v17  ;;  %v21514_v17 = vld [vmem:[#allocation10 + $0xe58] sm:$0xff]  }
 0x956   :  { %18745 = vmatpush3.bf16.msra.mxu0 %v21502_v26  ;;  %13057 = vmatprep.mubr.bf16.mxu0 %v25642_v53  ;;  %v25645_v26 = vld [vmem:[#allocation31_spill] sm:$0xff] }
 0x957   :  { %18802 = vmatpush3.bf16.msra.mxu1 %v21504_v28  ;;  %18746 = vmatprep.subr.bf16.mxu0 %v21505_v9  ;;  %v25646_v28 = vld [vmem:[#allocation44_spill] sm:$0xff]  ;;  %v21538_v9 = vld [vmem:[#allocation10 + $0xf08] sm:$0xff]  }
 0x958   :  { %18803 = vmatprep.subr.bf16.mxu1 %v21507_v35  ;;  %v21540_v35 = vld [vmem:[#allocation10 + $0x1058] sm:$0xff]   ;;  %v21541_v53 = vld [vmem:[#allocation10 + $0xf50] sm:$0xff]  }
 0x95a   :  { %18747 = vmatpush3.bf16.msra.mxu0 %v21506_v59  ;;  %v21543_v59 = vld [vmem:[#allocation10 + $0x10a0] sm:$0xff]  }
 0x95b   :  { %18804 = vmatpush3.bf16.msra.mxu1 %v21508_v5  ;;  %18748 = vmatprep.subr.bf16.mxu0 %v21509_v21  ;;  %v21542_v5 = vld [vmem:[#allocation10 + $0xf10] sm:$0xff]   ;;  %v21544_v21 = vld [vmem:[#allocation10 + $0x1060] sm:$0xff]  }
 0x95c   :  { %18805 = vmatprep.subr.bf16.mxu1 %v21511_v14  ;;  %v21545_v14 = vld [vmem:[#allocation10 + $0xf58] sm:$0xff]  }
 0x95e   :  { %18749 = vmatpush3.bf16.msra.mxu0 %v21510_v58  ;;  %v21547_v58 = vld [vmem:[#allocation10 + $0x10a8] sm:$0xff]  }
 0x95f   :  { %18806 = vmatpush3.bf16.msra.mxu1 %v21512_v12  ;;  %18750 = vmatprep.subr.bf16.mxu0 %v21513_v0  ;;  %v21546_v12 = vld [vmem:[#allocation10 + $0xf18] sm:$0xff]   ;;  %v21548_v0 = vld [vmem:[#allocation10 + $0x1068] sm:$0xff]  }
 0x960   :  { %18807 = vmatprep.subr.bf16.mxu1 %v21515_v24  ;;  %v21549_v24 = vld [vmem:[#allocation10 + $0xf60] sm:$0xff]  }
 0x961   :  { %v24925_v60 = vpop.f32.mrb[188].mxu1 }
 0x962   :  { %v19545_v52 = vpop.f32.mrb[189].mxu1  ;;  %18751 = vmatpush3.bf16.msra.mxu0 %v21514_v17  ;;  %v21551_v17 = vld [vmem:[#allocation10 + $0x10b0] sm:$0xff]  }
 0x963   :  { %v24927_v29 = vpop.f32.mrb[190].mxu1  ;;  %18808 = vmatpush3.bf16.msra.mxu1 %v21516_v39  ;;  %18752 = vmatprep.subr.bf16.mxu0 %v21517_v4 }
 0x964   :  { %v19546_v18 = vpop.f32.mrb[191].mxu1  ;;  %18809 = vmatprep.subr.bf16.mxu1 %v21519_v40  ;;  %v21550_v40 = vld [vmem:[#allocation10 + $0xf20] sm:$0xff]  }
 0x966   :  { %18753 = vmatpush3.bf16.msra.mxu0 %v21518_v36 }
 0x967   :  { %18810 = vmatpush3.bf16.msra.mxu1 %v21520_v38  ;;  %18754 = vmatprep.subr.bf16.mxu0 %v21521_v49  ;;  %v21552_v38 = vld [vmem:[#allocation10 + $0x1070] sm:$0xff]   ;;  %v21553_v49 = vld [vmem:[#allocation10 + $0xf68] sm:$0xff]  }
 0x968   :  { %v10870_v15 = vpop.f32.mrb[184].mxu0  ;;  %18811 = vmatprep.subr.bf16.mxu1 %v21523_v33  ;;  %v21555_v33 = vld [vmem:[#allocation10 + $0x10b8] sm:$0xff]  }
 0x969   :  { %v10871_v63 = vadd.f32 %v10870_v15, %v24915_v2  ;;  %v19525_v37 = vpop.f32.mrb[185].mxu0  ;;  %v21530_v2 = vld [vmem:[#allocation10 + $0xe78] sm:$0xff]   ;;  %v21557_v15 = vld [vmem:[#allocation10 + $0xf70] sm:$0xff]  }
 0x96a   :  { %v10873_v34 = vpop.f32.mrb[186].mxu0  ;;  %18755 = vmatpush3.bf16.msra.mxu0 %v21522_v7 }
 0x96b   :  { %v24931_v20 = vadd.f32 %v10871_v63, %v24889_v62  ;;  %v10874_v1 = vadd.f32 %v10873_v34, %v24919_v19  ;;  %v19526_v41 = vpop.f32.mrb[187].mxu0  ;;  %18812 = vmatpush3.bf16.msra.mxu1 %v21524_v23  ;;  %18756 = vmatprep.subr.bf16.mxu0 %v21525_v13  ;;  %v21532_v62 = vld [vmem:[#allocation10 + $0x1048] sm:$0xff]   ;;  %v21535_v19 = vld [vmem:[#allocation10 + $0x1090] sm:$0xff]   ;;  %v21556_v13 = vld [vmem:[#allocation10 + $0x1078] sm:$0xff]  }
 0x96c   :  { %18828 = vmatprep.subr.bf16.mxu1 %v21527_v57  ;;  %v21554_v23 = vld [vmem:[#allocation10 + $0xf28] sm:$0xff]   ;;  %v21559_v41 = vld [vmem:[#allocation10 + $0x1140] sm:$0xff]  }
 0x96d   :  { %v24935_v11 = vadd.f32 %v10874_v1, %v24892_v42  ;;  %v21539_v42 = vld [vmem:[#allocation10 + $0x1098] sm:$0xff]  }
 0x96e   :  { %18757 = vmatpush3.bf16.msra.mxu0 %v21526_v31  ;;  %13504 = vmatmul.mubr.bf16.vlgmr.msra.gmra.mrb[216].mxu1 %v25643_v48  ;;  %v21558_v31 = vld [vmem:[#allocation10 + $0xf30] sm:$0xff]  }
 0x96f   :  { %18829 = vmatpush3.bf16.msra.mxu1 %v21528_v43  ;;  %13908 = vmatprep.mubr.bf16.mxu1 %v25644_v30  ;;  %v21560_v43 = vld [vmem:[#allocation10 + $0xf78] sm:$0xff]   ;;  %v25647_v30 = vld [vmem:[#allocation19_spill] sm:$0xff] }
 0x970   :  { %18758 = vmatprep.subr.bf16.mxu0 %v21529_v10  ;;  %18830 = vmatprep.subr.bf16.mxu1 %v21531_v47 }
 0x972   :  { %18759 = vmatpush3.bf16.msra.mxu0 %v21530_v2 }
 0x973   :  { %18831 = vmatpush3.bf16.msra.mxu1 %v21532_v62  ;;  %18775 = vmatprep.subr.bf16.mxu0 %v21533_v54  ;;  %v21561_v62 = vld [vmem:[#allocation10 + $0xf38] sm:$0xff]   ;;  %v21562_v54 = vld [vmem:[#allocation10 + $0x1148] sm:$0xff]  }
 0x974   :  { %18832 = vmatprep.subr.bf16.mxu1 %v21535_v19 }
 0x975   :  { %13058 = vmatmul.mubr.bf16.vlgmr.msra.gmra.mrb[212].mxu0 %v25645_v26  ;;  %v21570_v26 = vld [vmem:[#allocation10 + $0x1168] sm:$0xff]  }
 0x976   :  { %18776 = vmatpush3.bf16.msra.mxu0 %v21534_v16  ;;  %13462 = vmatprep.mubr.bf16.mxu0 %v25646_v28  ;;  %v21564_v16 = vld [vmem:[#allocation10 + $0x1150] sm:$0xff]  }
 0x977   :  { %18833 = vmatpush3.bf16.msra.mxu1 %v21536_v56  ;;  %18777 = vmatprep.subr.bf16.mxu0 %v21537_v6  ;;  %v21565_v56 = vld [vmem:[#allocation10 + $0x1008] sm:$0xff]   ;;  %v21568_v6 = vld [vmem:[#allocation10 + $0x1160] sm:$0xff]  }
 0x978   :  { %18834 = vmatprep.subr.bf16.mxu1 %v21539_v42  ;;  %v21569_v42 = vld [vmem:[#allocation10 + $0x1018] sm:$0xff]  }
 0x97a   :  { %18778 = vmatpush3.bf16.msra.mxu0 %v21538_v9 }
 0x97b   :  { %18835 = vmatpush3.bf16.msra.mxu1 %v21540_v35  ;;  %18779 = vmatprep.subr.bf16.mxu0 %v21541_v53  ;;  %v21571_v35 = vld [vmem:[#allocation10 + $0x1020] sm:$0xff]  }
 0x97c   :  { %18836 = vmatprep.subr.bf16.mxu1 %v21543_v59 }
 0x97e   :  { %18780 = vmatpush3.bf16.msra.mxu0 %v21542_v5  ;;  %v21572_v5 = vld [vmem:[#allocation10 + $0x1170] sm:$0xff]  }
 0x97f   :  { %18837 = vmatpush3.bf16.msra.mxu1 %v21544_v21  ;;  %18781 = vmatprep.subr.bf16.mxu0 %v21545_v14 }
 0x980   :  { %18838 = vmatprep.subr.bf16.mxu1 %v21547_v58  ;;  %v21573_v58 = vld [vmem:[#allocation10 + $0x1028] sm:$0xff]  }
 0x981   :  { %v18601_v39 = vpop.f32.mrb[192].mxu1 }
 0x982   :  { %v18602_v4 = vpop.f32.mrb[193].mxu1  ;;  %18782 = vmatpush3.bf16.msra.mxu0 %v21546_v12  ;;  %v21574_v12 = vld [vmem:[#allocation10 + $0x1178] sm:$0xff]  }
 0x983   :  { %v24941_v52 = vadd.f32 %v18602_v4, %v18601_v39  ;;  %v18604_v36 = vpop.f32.mrb[194].mxu1  ;;  %18839 = vmatpush3.bf16.msra.mxu1 %v21548_v0  ;;  %18783 = vmatprep.subr.bf16.mxu0 %v21549_v24  ;;  %v21576_v24 = vld [vmem:[#allocation10 + $0x1240] sm:$0xff]  }
 0x984   :  { %v18605_v18 = vpop.f32.mrb[195].mxu1  ;;  %18840 = vmatprep.subr.bf16.mxu1 %v21551_v17 }
 0x985   :  { %v24943_v7 = vadd.f32 %v18605_v18, %v18604_v36  ;;  %v21579_v18 = vld [vmem:[#allocation10 + $0x1248] sm:$0xff]  }
 0x986   :  { %18784 = vmatpush3.bf16.msra.mxu0 %v21550_v40  ;;  %v21575_v40 = vld [vmem:[#allocation10 + $0x1030] sm:$0xff]  }
 0x987   :  { %18841 = vmatpush3.bf16.msra.mxu1 %v21552_v38  ;;  %18785 = vmatprep.subr.bf16.mxu0 %v21553_v49  ;;  %v21577_v38 = vld [vmem:[#allocation10 + $0x1200] sm:$0xff]  }
 0x988   :  { %v18548_v57 = vpop.f32.mrb[188].mxu0  ;;  %18842 = vmatprep.subr.bf16.mxu1 %v21555_v33 }
 0x989   :  { %v18549_v63 = vpop.f32.mrb[189].mxu0 }
 0x98a   :  { %v18550_v37 = vadd.f32 %v18549_v63, %v18548_v57  ;;  %v18551_v34 = vpop.f32.mrb[190].mxu0  ;;  %18786 = vmatpush3.bf16.msra.mxu0 %v21554_v23  ;;  %v21578_v23 = vld [vmem:[#allocation10 + $0x1038] sm:$0xff]   ;;  %v21580_v57 = vld [vmem:[#allocation10 + $0x1208] sm:$0xff]   ;;  %v21581_v63 = vld [vmem:[#allocation10 + $0x1100] sm:$0xff]  }
 0x98b   :  { %v18552_v1 = vpop.f32.mrb[191].mxu0  ;;  %18843 = vmatpush3.bf16.msra.mxu1 %v21556_v13  ;;  %18787 = vmatprep.subr.bf16.mxu0 %v21557_v15  ;;  %v25649_v15 = vld [vmem:[#allocation46_spill] sm:$0xff] }
 0x98c   :  { %v11276_v10 = vadd.f32 %v18550_v37, %v24905_v44  ;;  %v18553_v47 = vadd.f32 %v18552_v1, %v18551_v34  ;;  %19647 = vmatprep.subr.bf16.mxu1 %v25529_v61  ;;  %v21583_v37 = vld [vmem:[#allocation10 + $0x1250] sm:$0xff]   ;;  %v21582_v34 = vld [vmem:[#allocation10 + $0x10c0] sm:$0xff]   ;;  %v21586_v1 = vld [vmem:[#allocation10 + $0x10c8] sm:$0xff]  }
 0x98e   :  { %v11317_v48 = vadd.f32 %v24925_v60, %v11276_v10  ;;  %v11279_v2 = vadd.f32 %v18553_v47, %v24909_v8  ;;  %18788 = vmatpush3.bf16.msra.mxu0 %v21558_v31  ;;  %13909 = vmatmul.mubr.bf16.vlgmr.msra.gmra.mrb[220].mxu1 %v25647_v30  ;;  %v21563_v60 = vld [vmem:[#allocation10 + $0x1000] sm:$0xff]   ;;  %v21585_v31 = vld [vmem:[#allocation10 + $0x1108] sm:$0xff]   ;;  %v21590_v47 = vld [vmem:[#allocation10 + $0x10d0] sm:$0xff]  }
 0x98f   :  { %19648 = vmatpush3.bf16.msra.mxu1 %v21559_v41  ;;  %18789 = vmatprep.subr.bf16.mxu0 %v21560_v43  ;;  %v21588_v41 = vld [vmem:[#allocation10 + $0x1218] sm:$0xff]   ;;  %v21589_v43 = vld [vmem:[#allocation10 + $0x1110] sm:$0xff]   ;;  %v21591_v10 = vld [vmem:[#allocation10 + $0x1260] sm:$0xff]  }
 0x990   :  { %v11320_v19 = vadd.f32 %v24927_v29, %v11279_v2  ;;  %19649 = vmatprep.subr.bf16.mxu1 %v25529_v61  ;;  %19663 = vmatprep.mubr.msk.bf16.mxu1 %vm22013_vm5, %v25529_v61  ;;  %v24955_v44 = vadd.f32 %v11317_v48, %v24931_v20  ;;  %v25648_v29 = vld [vmem:[#allocation40_spill] sm:$0xff]  ;;  %v21592_v48 = vld [vmem:[#allocation10 + $0x1220] sm:$0xff]   ;;  %v21595_v30 = vld [vmem:[#allocation10 + $0x1268] sm:$0xff]  }
 0x991   :  { %v21566_v20 = vld [vmem:[#allocation10 + $0x1158] sm:$0xff]  }
 0x992   :  { %18790 = vmatpush3.bf16.msra.mxu0 %v21561_v62  ;;  %v24958_v8 = vadd.f32 %v11320_v19, %v24935_v11  ;;  %v21567_v11 = vld [vmem:[#allocation10 + $0x1010] sm:$0xff]   ;;  %v21593_v2 = vld [vmem:[#allocation10 + $0x1118] sm:$0xff]   ;;  %v21596_v62 = vld [vmem:[#allocation10 + $0x1228] sm:$0xff]  }
 0x993   :  { %19650 = vmatpush3.bf16.msra.mxu1 %v21562_v54  ;;  %19627 = vmatprep.subr.bf16.mxu0 %v25529_v61  ;;  %v21597_v54 = vld [vmem:[#allocation10 + $0x1120] sm:$0xff]   ;;  %v21599_v19 = vld [vmem:[#allocation10 + $0x1270] sm:$0xff]  }
 0x994   :  { %19651 = vmatprep.subr.bf16.mxu1 %v25529_v61 }
 0x995   :  { %13463 = vmatmul.mubr.bf16.vlgmr.msra.gmra.mrb[216].mxu0 %v25648_v29  ;;  %v21598_v29 = vld [vmem:[#allocation10 + $0x10e0] sm:$0xff]  }
 0x996   :  { %19628 = vmatpush3.bf16.msra.mxu0 %v21563_v60  ;;  %19643 = vmatprep.mubr.msk.bf16.mxu0 %vm22013_vm5, %v25529_v61 }
 0x997   :  { %19652 = vmatpush3.bf16.msra.mxu1 %v21564_v16  ;;  %19629 = vmatprep.subr.bf16.mxu0 %v25529_v61 }
 0x998   :  { %19653 = vmatprep.subr.bf16.mxu1 %v25529_v61 }
 0x99a   :  { %19630 = vmatpush3.bf16.msra.mxu0 %v21565_v56 }
 0x99b   :  { %19654 = vmatpush3.bf16.msra.mxu1 %v21566_v20  ;;  %19631 = vmatprep.subr.bf16.mxu0 %v25529_v61  ;;  %v21600_v20 = vld [vmem:[#allocation10 + $0x1230] sm:$0xff]  }
 0x99c   :  { %19655 = vmatprep.subr.bf16.mxu1 %v25529_v61 }
 0x99e   :  { %19632 = vmatpush3.bf16.msra.mxu0 %v21567_v11  ;;  %v21601_v11 = vld [vmem:[#allocation10 + $0x1128] sm:$0xff]  }
 0x99f   :  { %19656 = vmatpush3.bf16.msra.mxu1 %v21568_v6  ;;  %19633 = vmatprep.subr.bf16.mxu0 %v25529_v61 }
 0x9a0   :  { %19657 = vmatprep.subr.bf16.mxu1 %v25529_v61 }
 0x9a1   :  { %v18632_v28 = vpop.f32.mrb[196].mxu1 }
 0x9a2   :  { %v18633_v9 = vpop.f32.mrb[197].mxu1  ;;  %19634 = vmatpush3.bf16.msra.mxu0 %v21569_v42  ;;  %v21603_v42 = vld [vmem:[#allocation10 + $0x1278] sm:$0xff]  }
 0x9a3   :  { %v24971_v53 = vadd.f32 %v18633_v9, %v18632_v28  ;;  %v18635_v59 = vpop.f32.mrb[198].mxu1  ;;  %19658 = vmatpush3.bf16.msra.mxu1 %v21570_v26  ;;  %19635 = vmatprep.subr.bf16.mxu0 %v25529_v61  ;;  %v21602_v26 = vld [vmem:[#allocation10 + $0x10e8] sm:$0xff]   ;;  %v21604_v28 = vld [vmem:[#allocation10 + $0x1238] sm:$0xff]   ;;  %v21605_v9 = vld [vmem:[#allocation10 + $0x1130] sm:$0xff]  }
 0x9a4   :  { %v18636_v21 = vpop.f32.mrb[199].mxu1  ;;  %19659 = vmatprep.subr.bf16.mxu1 %v25529_v61 }
 0x9a5   :  { %v24975_v14 = vadd.f32 %v18636_v21, %v18635_v59  ;;  %v21607_v59 = vld [vmem:[#allocation10 + $0x1300] sm:$0xff]  }
 0x9a6   :  { %19636 = vmatpush3.bf16.msra.mxu0 %v21571_v35 }
 0x9a7   :  { %19660 = vmatpush3.bf16.msra.mxu1 %v21572_v5  ;;  %19637 = vmatprep.subr.bf16.mxu0 %v25529_v61 }
 0x9a8   :  { %v18579_v0 = vpop.f32.mrb[192].mxu0  ;;  %19661 = vmatprep.subr.bf16.mxu1 %v25529_v61 }
 0x9a9   :  { %v18580_v17 = vpop.f32.mrb[193].mxu0 }
 0x9aa   :  { %v18581_v39 = vadd.f32 %v18580_v17, %v18579_v0  ;;  %v18582_v4 = vpop.f32.mrb[194].mxu0  ;;  %19638 = vmatpush3.bf16.msra.mxu0 %v21573_v58 }
 0x9ab   :  { %v18583_v36 = vpop.f32.mrb[195].mxu0  ;;  %19662 = vmatpush3.bf16.msra.mxu1 %v21574_v12  ;;  %19639 = vmatprep.subr.bf16.mxu0 %v25529_v61  ;;  %v21606_v12 = vld [vmem:[#allocation10 + $0x10f0] sm:$0xff]  }
 0x9ac   :  { %v18584_v49 = vadd.f32 %v18583_v36, %v18582_v4  ;;  %18903 = vmatprep.subr.bf16.mxu1 %v21576_v24  ;;  %v24981_v33 = vadd.f32 %v24941_v52, %v18581_v39  ;;  %v21584_v52 = vld [vmem:[#allocation10 + $0x1210] sm:$0xff]   ;;  %v21608_v39 = vld [vmem:[#allocation10 + $0x12c0] sm:$0xff]   ;;  %v21609_v4 = vld [vmem:[#allocation10 + $0x1138] sm:$0xff]  }
 0x9ae   :  { %19640 = vmatpush3.bf16.msra.mxu0 %v21575_v40  ;;  %19664 = vmatmul.mubr.bf16.vlgmr.msra.gmra.mrb[224].mxu1 %v24638_v25  ;;  %v24985_v13 = vadd.f32 %v24943_v7, %v18584_v49  ;;  %v21587_v25 = vld [vmem:[#allocation10 + $0x1258] sm:$0xff]   ;;  %v25650_v7 = vld [vmem:[#allocation38_spill] sm:$0xff] }
 0x9af   :  { %18904 = vmatpush3.bf16.msra.mxu1 %v21577_v38  ;;  %14395 = vmatprep.mubr.bf16.mxu1 %v25649_v15  ;;  %v21611_v40 = vld [vmem:[#allocation10 + $0x1308] sm:$0xff]   ;;  %v21610_v49 = vld [vmem:[#allocation10 + $0x10f8] sm:$0xff]  }
 0x9b0   :  { %19641 = vmatprep.subr.bf16.mxu0 %v25529_v61  ;;  %18905 = vmatprep.subr.bf16.mxu1 %v21579_v18  ;;  %v25651_v38 = vld [vmem:[#allocation42_spill] sm:$0xff] }
 0x9b1   :  { %v21613_v18 = vld [vmem:[#allocation10 + $0x11c0] sm:$0xff]   ;;  %v21617_v15 = vld [vmem:[#allocation10 + $0x11c8] sm:$0xff]  }
 0x9b2   :  { %19642 = vmatpush3.bf16.msra.mxu0 %v21578_v23  ;;  %v21614_v23 = vld [vmem:[#allocation10 + $0x1180] sm:$0xff]  }
 0x9b3   :  { %18906 = vmatpush3.bf16.msra.mxu1 %v21580_v57  ;;  %18850 = vmatprep.subr.bf16.mxu0 %v21581_v63  ;;  %v25652_v57 = vld [vmem:[#allocation18_spill] sm:$0xff]  ;;  %v25653_v63 = vld [vmem:[#allocation47_spill] sm:$0xff] }
 0x9b4   :  { %18907 = vmatprep.subr.bf16.mxu1 %v21583_v37  ;;  %v21618_v37 = vld [vmem:[#allocation10 + $0x1188] sm:$0xff]  }
 0x9b5   :  { %19644 = vmatmul.mubr.bf16.vlgmr.msra.gmra.mrb[220].mxu0 %v24626_v51  ;;  %v21594_v51 = vld [vmem:[#allocation10 + $0x10d8] sm:$0xff]  }
 0x9b6   :  { %18851 = vmatpush3.bf16.msra.mxu0 %v21582_v34  ;;  %13949 = vmatprep.mubr.bf16.mxu0 %v25650_v7  ;;  %v21621_v34 = vld [vmem:[#allocation10 + $0x11d0] sm:$0xff]   ;;  %v21625_v7 = vld [vmem:[#allocation10 + $0x11d8] sm:$0xff]  }
 0x9b7   :  { %18908 = vmatpush3.bf16.msra.mxu1 %v21584_v52  ;;  %18852 = vmatprep.subr.bf16.mxu0 %v21585_v31  ;;  %v21623_v52 = vld [vmem:[#allocation10 + $0x1320] sm:$0xff]   ;;  %v21622_v31 = vld [vmem:[#allocation10 + $0x1190] sm:$0xff]  }
 0x9b8   :  { %18909 = vmatprep.subr.bf16.mxu1 %v21587_v25  ;;  %v21624_v25 = vld [vmem:[#allocation10 + $0x12e0] sm:$0xff]  }
 0x9ba   :  { %18853 = vmatpush3.bf16.msra.mxu0 %v21586_v1  ;;  %v21627_v1 = vld [vmem:[#allocation10 + $0x1328] sm:$0xff]  }
 0x9bb   :  { %18910 = vmatpush3.bf16.msra.mxu1 %v21588_v41  ;;  %18854 = vmatprep.subr.bf16.mxu0 %v21589_v43  ;;  %v21626_v41 = vld [vmem:[#allocation10 + $0x1198] sm:$0xff]   ;;  %v21628_v43 = vld [vmem:[#allocation10 + $0x12e8] sm:$0xff]  }
 0x9bc   :  { %18911 = vmatprep.subr.bf16.mxu1 %v21591_v10  ;;  %v21629_v10 = vld [vmem:[#allocation10 + $0x11e0] sm:$0xff]  }
 0x9be   :  { %18855 = vmatpush3.bf16.msra.mxu0 %v21590_v47  ;;  %v21631_v47 = vld [vmem:[#allocation10 + $0x1330] sm:$0xff]  }
 0x9bf   :  { %18912 = vmatpush3.bf16.msra.mxu1 %v21592_v48  ;;  %18856 = vmatprep.subr.bf16.mxu0 %v21593_v2 }
 0x9c0   :  { %18913 = vmatprep.subr.bf16.mxu1 %v21595_v30  ;;  %v21630_v30 = vld [vmem:[#allocation10 + $0x11a0] sm:$0xff]  }
 0x9c1   :  { %v24991_v60 = vpop.f32.mrb[200].mxu1 }
 0x9c2   :  { %v19585_v16 = vpop.f32.mrb[201].mxu1  ;;  %18857 = vmatpush3.bf16.msra.mxu0 %v21594_v51 }
 0x9c3   :  { %v24993_v56 = vpop.f32.mrb[202].mxu1  ;;  %18914 = vmatpush3.bf16.msra.mxu1 %v21596_v62  ;;  %18858 = vmatprep.subr.bf16.mxu0 %v21597_v54  ;;  %v21632_v54 = vld [vmem:[#allocation10 + $0x12f0] sm:$0xff]  }
 0x9c4   :  { %v19586_v6 = vpop.f32.mrb[203].mxu1  ;;  %18915 = vmatprep.subr.bf16.mxu1 %v21599_v19  ;;  %v21633_v19 = vld [vmem:[#allocation10 + $0x11e8] sm:$0xff]  }
 0x9c5   :  { %v21636_v6 = vld [vmem:[#allocation10 + $0x12f8] sm:$0xff]  }
 0x9c6   :  { %18859 = vmatpush3.bf16.msra.mxu0 %v21598_v29  ;;  %v21635_v29 = vld [vmem:[#allocation10 + $0x1338] sm:$0xff]  }
 0x9c7   :  { %18916 = vmatpush3.bf16.msra.mxu1 %v21600_v20  ;;  %18860 = vmatprep.subr.bf16.mxu0 %v21601_v11  ;;  %v21634_v11 = vld [vmem:[#allocation10 + $0x11a8] sm:$0xff]  }
 0x9c8   :  { %v11762_v35 = vpop.f32.mrb[196].mxu0  ;;  %18917 = vmatprep.subr.bf16.mxu1 %v21603_v42  ;;  %v21637_v42 = vld [vmem:[#allocation10 + $0x11f0] sm:$0xff]  }
 0x9c9   :  { %v11763_v5 = vadd.f32 %v11762_v35, %v24981_v33  ;;  %v19565_v21 = vpop.f32.mrb[197].mxu0  ;;  %v21615_v33 = vld [vmem:[#allocation10 + $0x1310] sm:$0xff]  }
 0x9ca   :  { %v11765_v58 = vpop.f32.mrb[198].mxu0  ;;  %18861 = vmatpush3.bf16.msra.mxu0 %v21602_v26  ;;  %v21639_v21 = vld [vmem:[#allocation10 + $0x13c0] sm:$0xff]  }
 0x9cb   :  { %v24997_v0 = vadd.f32 %v11763_v5, %v24955_v44  ;;  %v11766_v24 = vadd.f32 %v11765_v58, %v24985_v13  ;;  %v19566_v17 = vpop.f32.mrb[199].mxu0  ;;  %18918 = vmatpush3.bf16.msra.mxu1 %v21604_v28  ;;  %18862 = vmatprep.subr.bf16.mxu0 %v21605_v9  ;;  %v21612_v44 = vld [vmem:[#allocation10 + $0x12c8] sm:$0xff]   ;;  %v21616_v13 = vld [vmem:[#allocation10 + $0x12d0] sm:$0xff]   ;;  %v21640_v58 = vld [vmem:[#allocation10 + $0x11f8] sm:$0xff]  }
 0x9cc   :  { %18934 = vmatprep.subr.bf16.mxu1 %v21607_v59  ;;  %v21638_v59 = vld [vmem:[#allocation10 + $0x11b0] sm:$0xff]  }
 0x9cd   :  { %v25001_v36 = vadd.f32 %v11766_v24, %v24958_v8  ;;  %v21619_v8 = vld [vmem:[#allocation10 + $0x1318] sm:$0xff]  }
 0x9ce   :  { %18863 = vmatpush3.bf16.msra.mxu0 %v21606_v12  ;;  %14396 = vmatmul.mubr.bf16.vlgmr.msra.gmra.mrb[228].mxu1 %v25651_v38  ;;  %v21642_v38 = vld [vmem:[#allocation10 + $0x13c8] sm:$0xff]  }
 0x9cf   :  { %18935 = vmatpush3.bf16.msra.mxu1 %v21608_v39  ;;  %14800 = vmatprep.mubr.bf16.mxu1 %v24353_v3  ;;  %v21620_v3 = vld [vmem:[#allocation10 + $0x12d8] sm:$0xff]  }
 0x9d0   :  { %18864 = vmatprep.subr.bf16.mxu0 %v21609_v4  ;;  %18936 = vmatprep.subr.bf16.mxu1 %v21611_v40  ;;  %v25654_v4 = vld [vmem:[#allocation49_spill] sm:$0xff] }
 0x9d1   :  { %v21641_v40 = vld [vmem:[#allocation10 + $0x11b8] sm:$0xff]  }
 0x9d2   :  { %18865 = vmatpush3.bf16.msra.mxu0 %v21610_v49 }
 0x9d3   :  { %18937 = vmatpush3.bf16.msra.mxu1 %v21612_v44  ;;  %18881 = vmatprep.subr.bf16.mxu0 %v21613_v18  ;;  %v21644_v44 = vld [vmem:[#allocation10 + $0x13d0] sm:$0xff]   ;;  %v21645_v18 = vld [vmem:[#allocation10 + $0x1288] sm:$0xff]  }
 0x9d4   :  { %18938 = vmatprep.subr.bf16.mxu1 %v21615_v33  ;;  %v21648_v33 = vld [vmem:[#allocation10 + $0x13e0] sm:$0xff]  }
 0x9d5   :  { %13950 = vmatmul.mubr.bf16.vlgmr.msra.gmra.mrb[224].mxu0 %v25652_v57  ;;  %v21651_v57 = vld [vmem:[#allocation10 + $0x12a0] sm:$0xff]  }
 0x9d6   :  { %18882 = vmatpush3.bf16.msra.mxu0 %v21614_v23  ;;  %14354 = vmatprep.mubr.bf16.mxu0 %v25653_v63  ;;  %v21649_v23 = vld [vmem:[#allocation10 + $0x1298] sm:$0xff]  }
 0x9d7   :  { %18939 = vmatpush3.bf16.msra.mxu1 %v21616_v13  ;;  %18883 = vmatprep.subr.bf16.mxu0 %v21617_v15  ;;  %v21650_v13 = vld [vmem:[#allocation10 + $0x13e8] sm:$0xff]  }
 0x9d8   :  { %18940 = vmatprep.subr.bf16.mxu1 %v21619_v8 }
 0x9da   :  { %18884 = vmatpush3.bf16.msra.mxu0 %v21618_v37 }
 0x9db   :  { %18941 = vmatpush3.bf16.msra.mxu1 %v21620_v3  ;;  %18885 = vmatprep.subr.bf16.mxu0 %v21621_v34  ;;  %v21652_v3 = vld [vmem:[#allocation10 + $0x13f0] sm:$0xff]  }
 0x9dc   :  { %18942 = vmatprep.subr.bf16.mxu1 %v21623_v52 }
 0x9de   :  { %18886 = vmatpush3.bf16.msra.mxu0 %v21622_v31  ;;  %v21653_v31 = vld [vmem:[#allocation10 + $0x12a8] sm:$0xff]  }
 0x9df   :  { %18943 = vmatpush3.bf16.msra.mxu1 %v21624_v25  ;;  %18887 = vmatprep.subr.bf16.mxu0 %v21625_v7  ;;  %v21654_v25 = vld [vmem:[#allocation10 + $0x13f8] sm:$0xff]  }
 0x9e0   :  { %18944 = vmatprep.subr.bf16.mxu1 %v21627_v1  ;;  %v21656_v1 = vld [vmem:[#allocation10 + $0x14c0] sm:$0xff]  }
 0x9e1   :  { %v18707_v48 = vpop.f32.mrb[204].mxu1 }
 0x9e2   :  { %v18708_v2 = vpop.f32.mrb[205].mxu1  ;;  %18888 = vmatpush3.bf16.msra.mxu0 %v21626_v41 }
 0x9e3   :  { %v25007_v51 = vadd.f32 %v18708_v2, %v18707_v48  ;;  %v18710_v62 = vpop.f32.mrb[206].mxu1  ;;  %18945 = vmatpush3.bf16.msra.mxu1 %v21628_v43  ;;  %18889 = vmatprep.subr.bf16.mxu0 %v21629_v10  ;;  %v21657_v2 = vld [vmem:[#allocation10 + $0x1480] sm:$0xff]  }
 0x9e4   :  { %v18711_v16 = vpop.f32.mrb[207].mxu1  ;;  %18946 = vmatprep.subr.bf16.mxu1 %v21631_v47  ;;  %v21655_v47 = vld [vmem:[#allocation10 + $0x12b0] sm:$0xff]  }
 0x9e5   :  { %v25009_v20 = vadd.f32 %v18711_v16, %v18710_v62  ;;  %v21659_v62 = vld [vmem:[#allocation10 + $0x14c8] sm:$0xff]  }
 0x9e6   :  { %18890 = vmatpush3.bf16.msra.mxu0 %v21630_v30 }
 0x9e7   :  { %18947 = vmatpush3.bf16.msra.mxu1 %v21632_v54  ;;  %18891 = vmatprep.subr.bf16.mxu0 %v21633_v19  ;;  %v21658_v19 = vld [vmem:[#allocation10 + $0x12b8] sm:$0xff]  }
 0x9e8   :  { %v18654_v26 = vpop.f32.mrb[200].mxu0  ;;  %18948 = vmatprep.subr.bf16.mxu1 %v21635_v29  ;;  %v21660_v29 = vld [vmem:[#allocation10 + $0x1488] sm:$0xff]  }
 0x9e9   :  { %v18655_v28 = vpop.f32.mrb[201].mxu0 }
 0x9ea   :  { %v18656_v9 = vadd.f32 %v18655_v28, %v18654_v26  ;;  %v18657_v35 = vpop.f32.mrb[202].mxu0  ;;  %18892 = vmatpush3.bf16.msra.mxu0 %v21634_v11  ;;  %v21661_v11 = vld [vmem:[#allocation10 + $0x1380] sm:$0xff]   ;;  %v21665_v26 = vld [vmem:[#allocation10 + $0x1388] sm:$0xff]   ;;  %v21668_v28 = vld [vmem:[#allocation10 + $0x1498] sm:$0xff]  }
 0x9eb   :  { %v18658_v5 = vpop.f32.mrb[203].mxu0  ;;  %18949 = vmatpush3.bf16.msra.mxu1 %v21636_v6  ;;  %18893 = vmatprep.subr.bf16.mxu0 %v21637_v42  ;;  %v21663_v6 = vld [vmem:[#allocation10 + $0x14d0] sm:$0xff]   ;;  %v21662_v42 = vld [vmem:[#allocation10 + $0x1340] sm:$0xff]  }
 0x9ec   :  { %v12168_v12 = vadd.f32 %v18656_v9, %v24971_v53  ;;  %v18659_v24 = vadd.f32 %v18658_v5, %v18657_v35  ;;  %19687 = vmatprep.subr.bf16.mxu1 %v25529_v61  ;;  %v21669_v9 = vld [vmem:[#allocation10 + $0x1390] sm:$0xff]   ;;  %v21671_v35 = vld [vmem:[#allocation10 + $0x14e0] sm:$0xff]  }
 0x9ed   :  { %v21672_v5 = vld [vmem:[#allocation10 + $0x14a0] sm:$0xff]  }
 0x9ee   :  { %v12209_v17 = vadd.f32 %v24991_v60, %v12168_v12  ;;  %v12171_v39 = vadd.f32 %v18659_v24, %v24975_v14  ;;  %18894 = vmatpush3.bf16.msra.mxu0 %v21638_v59  ;;  %14801 = vmatmul.mubr.bf16.vlgmr.msra.gmra.mrb[232].mxu1 %v25654_v4  ;;  %v21643_v60 = vld [vmem:[#allocation10 + $0x1280] sm:$0xff]   ;;  %v21670_v59 = vld [vmem:[#allocation10 + $0x1350] sm:$0xff]   ;;  %v21676_v12 = vld [vmem:[#allocation10 + $0x14a8] sm:$0xff]  }
 0x9ef   :  { %19688 = vmatpush3.bf16.msra.mxu1 %v21639_v21  ;;  %18895 = vmatprep.subr.bf16.mxu0 %v21640_v58  ;;  %v21673_v21 = vld [vmem:[#allocation10 + $0x1398] sm:$0xff]   ;;  %v21675_v58 = vld [vmem:[#allocation10 + $0x14e8] sm:$0xff]   ;;  %v21677_v24 = vld [vmem:[#allocation10 + $0x13a0] sm:$0xff]  }
 0x9f0   :  { %v12212_v49 = vadd.f32 %v24993_v56, %v12171_v39  ;;  %19689 = vmatprep.subr.bf16.mxu1 %v25529_v61  ;;  %19703 = vmatprep.mubr.msk.bf16.mxu1 %vm22013_vm5, %v25529_v61  ;;  %v25021_v53 = vadd.f32 %v12209_v17, %v24997_v0  ;;  %v25655_v56 = vld [vmem:[#allocation43_spill] sm:$0xff]  ;;  %v21646_v0 = vld [vmem:[#allocation10 + $0x13d8] sm:$0xff]  }
 0x9f1   :  { %v21679_v17 = vld [vmem:[#allocation10 + $0x14f0] sm:$0xff]  }
 0x9f2   :  { %18896 = vmatpush3.bf16.msra.mxu0 %v21641_v40  ;;  %v25024_v14 = vadd.f32 %v12212_v49, %v25001_v36  ;;  %v21647_v36 = vld [vmem:[#allocation10 + $0x1290] sm:$0xff]   ;;  %v21678_v40 = vld [vmem:[#allocation10 + $0x1360] sm:$0xff]  }
 0x9f3   :  { %19690 = vmatpush3.bf16.msra.mxu1 %v21642_v38  ;;  %19667 = vmatprep.subr.bf16.mxu0 %v25529_v61  ;;  %v21680_v49 = vld [vmem:[#allocation10 + $0x14b0] sm:$0xff]  }
 0x9f4   :  { %19691 = vmatprep.subr.bf16.mxu1 %v25529_v61 }
 0x9f5   :  { %14355 = vmatmul.mubr.bf16.vlgmr.msra.gmra.mrb[228].mxu0 %v25655_v56  ;;  %v21683_v56 = vld [vmem:[#allocation10 + $0x14f8] sm:$0xff]  }
 0x9f6   :  { %19668 = vmatpush3.bf16.msra.mxu0 %v21643_v60  ;;  %19683 = vmatprep.mubr.msk.bf16.mxu0 %vm22013_vm5, %v25529_v61  ;;  %v21681_v60 = vld [vmem:[#allocation10 + $0x13a8] sm:$0xff]  }
 0x9f7   :  { %19692 = vmatpush3.bf16.msra.mxu1 %v21644_v44  ;;  %19669 = vmatprep.subr.bf16.mxu0 %v25529_v61 }
 0x9f8   :  { %19693 = vmatprep.subr.bf16.mxu1 %v25529_v61 }
 0x9fa   :  { %19670 = vmatpush3.bf16.msra.mxu0 %v21645_v18  ;;  %v21682_v18 = vld [vmem:[#allocation10 + $0x1368] sm:$0xff]  }
 0x9fb   :  { %19694 = vmatpush3.bf16.msra.mxu1 %v21646_v0  ;;  %19671 = vmatprep.subr.bf16.mxu0 %v25529_v61  ;;  %v21684_v0 = vld [vmem:[#allocation10 + $0x14b8] sm:$0xff]  }
 0x9fc   :  { %19695 = vmatprep.subr.bf16.mxu1 %v25529_v61 }
 0x9fe   :  { %19672 = vmatpush3.bf16.msra.mxu0 %v21647_v36  ;;  %v21685_v36 = vld [vmem:[#allocation10 + $0x13b0] sm:$0xff]  }
 0x9ff   :  { %19696 = vmatpush3.bf16.msra.mxu1 %v21648_v33  ;;  %19673 = vmatprep.subr.bf16.mxu0 %v25529_v61 }
 0xa00   :  { %19697 = vmatprep.subr.bf16.mxu1 %v25529_v61 }
 0xa01   :  { %v18738_v15 = vpop.f32.mrb[208].mxu1 }
 0xa02   :  { %v18739_v8 = vpop.f32.mrb[209].mxu1  ;;  %19674 = vmatpush3.bf16.msra.mxu0 %v21649_v23  ;;  %v21687_v23 = vld [vmem:[#allocation10 + $0x1580] sm:$0xff]  }
 0xa03   :  { %v25037_v63 = vadd.f32 %v18739_v8, %v18738_v15  ;;  %v18741_v37 = vpop.f32.mrb[210].mxu1  ;;  %19698 = vmatpush3.bf16.msra.mxu1 %v21650_v13  ;;  %19675 = vmatprep.subr.bf16.mxu0 %v25529_v61 }
 0xa04   :  { %v18742_v34 = vpop.f32.mrb[211].mxu1  ;;  %19699 = vmatprep.subr.bf16.mxu1 %v25529_v61 }
 0xa05   :  { %v25041_v52 = vadd.f32 %v18742_v34, %v18741_v37 }
 0xa06   :  { %19676 = vmatpush3.bf16.msra.mxu0 %v21651_v57  ;;  %v21686_v57 = vld [vmem:[#allocation10 + $0x1370] sm:$0xff]  }
 0xa07   :  { %19700 = vmatpush3.bf16.msra.mxu1 %v21652_v3  ;;  %19677 = vmatprep.subr.bf16.mxu0 %v25529_v61 }
 0xa08   :  { %v18685_v7 = vpop.f32.mrb[204].mxu0  ;;  %19701 = vmatprep.subr.bf16.mxu1 %v25529_v61 }
 0xa09   :  { %v18686_v41 = vpop.f32.mrb[205].mxu0 }
 0xa0a   :  { %v18687_v43 = vadd.f32 %v18686_v41, %v18685_v7  ;;  %v18688_v10 = vpop.f32.mrb[206].mxu0  ;;  %19678 = vmatpush3.bf16.msra.mxu0 %v21653_v31  ;;  %v21688_v31 = vld [vmem:[#allocation10 + $0x1540] sm:$0xff]   ;;  %v21691_v7 = vld [vmem:[#allocation10 + $0x1588] sm:$0xff]  }
 0xa0b   :  { %v18689_v48 = vpop.f32.mrb[207].mxu0  ;;  %19702 = vmatpush3.bf16.msra.mxu1 %v21654_v25  ;;  %19679 = vmatprep.subr.bf16.mxu0 %v25529_v61  ;;  %v21689_v25 = vld [vmem:[#allocation10 + $0x13b8] sm:$0xff]  }
 0xa0c   :  { %v18690_v30 = vadd.f32 %v18689_v48, %v18688_v10  ;;  %19009 = vmatprep.subr.bf16.mxu1 %v21656_v1  ;;  %v25047_v54 = vadd.f32 %v25007_v51, %v18687_v43  ;;  %v21664_v51 = vld [vmem:[#allocation10 + $0x1490] sm:$0xff]   ;;  %v25657_v41 = vld [vmem:[#allocation53_spill] sm:$0xff] }
 0xa0d   :  { %v21690_v43 = vld [vmem:[#allocation10 + $0x1378] sm:$0xff]   ;;  %v21695_v48 = vld [vmem:[#allocation10 + $0x1590] sm:$0xff]  }
 0xa0e   :  { %19680 = vmatpush3.bf16.msra.mxu0 %v21655_v47  ;;  %19704 = vmatmul.mubr.bf16.vlgmr.msra.gmra.mrb[236].mxu1 %v24656_v55  ;;  %v25051_v16 = vadd.f32 %v25009_v20, %v18690_v30  ;;  %v21667_v55 = vld [vmem:[#allocation10 + $0x14d8] sm:$0xff]   ;;  %v25656_v20 = vld [vmem:[#allocation51_spill] sm:$0xff]  ;;  %v21693_v47 = vld [vmem:[#allocation10 + $0x1440] sm:$0xff]  }
 0xa0f   :  { %19010 = vmatpush3.bf16.msra.mxu1 %v21657_v2  ;;  %15287 = vmatprep.mubr.bf16.mxu1 %v24371_v22  ;;  %v21666_v22 = vld [vmem:[#allocation10 + $0x1348] sm:$0xff]   ;;  %v25658_v10 = vld [vmem:[#allocation57_spill] sm:$0xff]  ;;  %v21696_v30 = vld [vmem:[#allocation10 + $0x1550] sm:$0xff]  }
 0xa10   :  { %19681 = vmatprep.subr.bf16.mxu0 %v25529_v61  ;;  %19011 = vmatprep.subr.bf16.mxu1 %v21659_v62  ;;  %v21694_v2 = vld [vmem:[#allocation10 + $0x1400] sm:$0xff]   ;;  %v21697_v62 = vld [vmem:[#allocation10 + $0x1448] sm:$0xff]  }
 0xa12   :  { %19682 = vmatpush3.bf16.msra.mxu0 %v21658_v19  ;;  %v25660_v19 = vld [vmem:[#allocation52_spill] sm:$0xff] }
 0xa13   :  { %19012 = vmatpush3.bf16.msra.mxu1 %v21660_v29  ;;  %18956 = vmatprep.subr.bf16.mxu0 %v21661_v11  ;;  %v21700_v29 = vld [vmem:[#allocation10 + $0x1558] sm:$0xff]   ;;  %v21701_v11 = vld [vmem:[#allocation10 + $0x1450] sm:$0xff]  }
 0xa14   :  { %19013 = vmatprep.subr.bf16.mxu1 %v21663_v6  ;;  %v21703_v6 = vld [vmem:[#allocation10 + $0x15a0] sm:$0xff]  }
 0xa15   :  { %19684 = vmatmul.mubr.bf16.vlgmr.msra.gmra.mrb[232].mxu0 %v24648_v46  ;;  %v21674_v46 = vld [vmem:[#allocation10 + $0x1358] sm:$0xff]  }
 0xa16   :  { %18957 = vmatpush3.bf16.msra.mxu0 %v21662_v42  ;;  %14841 = vmatprep.mubr.bf16.mxu0 %v25656_v20  ;;  %v21702_v42 = vld [vmem:[#allocation10 + $0x1410] sm:$0xff]   ;;  %v21706_v20 = vld [vmem:[#allocation10 + $0x1418] sm:$0xff]  }
 0xa17   :  { %19014 = vmatpush3.bf16.msra.mxu1 %v21664_v51  ;;  %18958 = vmatprep.subr.bf16.mxu0 %v21665_v26  ;;  %v21704_v51 = vld [vmem:[#allocation10 + $0x1560] sm:$0xff]   ;;  %v21705_v26 = vld [vmem:[#allocation10 + $0x1458] sm:$0xff]  }
 0xa18   :  { %19015 = vmatprep.subr.bf16.mxu1 %v21667_v55  ;;  %v21707_v55 = vld [vmem:[#allocation10 + $0x15a8] sm:$0xff]  }
 0xa1a   :  { %18959 = vmatpush3.bf16.msra.mxu0 %v21666_v22  ;;  %v21708_v22 = vld [vmem:[#allocation10 + $0x1568] sm:$0xff]  }
 0xa1b   :  { %19016 = vmatpush3.bf16.msra.mxu1 %v21668_v28  ;;  %18960 = vmatprep.subr.bf16.mxu0 %v21669_v9  ;;  %v21709_v28 = vld [vmem:[#allocation10 + $0x1460] sm:$0xff]   ;;  %v21711_v9 = vld [vmem:[#allocation10 + $0x15b0] sm:$0xff]  }
 0xa1c   :  { %19017 = vmatprep.subr.bf16.mxu1 %v21671_v35 }
 0xa1e   :  { %18961 = vmatpush3.bf16.msra.mxu0 %v21670_v59 }
 0xa1f   :  { %19018 = vmatpush3.bf16.msra.mxu1 %v21672_v5  ;;  %18962 = vmatprep.subr.bf16.mxu0 %v21673_v21  ;;  %v21710_v5 = vld [vmem:[#allocation10 + $0x1420] sm:$0xff]  }
 0xa20   :  { %19019 = vmatprep.subr.bf16.mxu1 %v21675_v58 }
 0xa21   :  { %v25057_v39 = vpop.f32.mrb[212].mxu1 }
 0xa22   :  { %v19625_v4 = vpop.f32.mrb[213].mxu1  ;;  %18963 = vmatpush3.bf16.msra.mxu0 %v21674_v46  ;;  %v21712_v46 = vld [vmem:[#allocation10 + $0x1570] sm:$0xff]  }
 0xa23   :  { %v25059_v38 = vpop.f32.mrb[214].mxu1  ;;  %19020 = vmatpush3.bf16.msra.mxu1 %v21676_v12  ;;  %18964 = vmatprep.subr.bf16.mxu0 %v21677_v24  ;;  %v21713_v12 = vld [vmem:[#allocation10 + $0x1468] sm:$0xff]  }
 0xa24   :  { %v19626_v44 = vpop.f32.mrb[215].mxu1  ;;  %19021 = vmatprep.subr.bf16.mxu1 %v21679_v17  ;;  %v21715_v17 = vld [vmem:[#allocation10 + $0x15b8] sm:$0xff]  }
 0xa26   :  { %18965 = vmatpush3.bf16.msra.mxu0 %v21678_v40  ;;  %v21714_v40 = vld [vmem:[#allocation10 + $0x1428] sm:$0xff]  }
 0xa27   :  { %19022 = vmatpush3.bf16.msra.mxu1 %v21680_v49  ;;  %18966 = vmatprep.subr.bf16.mxu0 %v21681_v60  ;;  %v21716_v49 = vld [vmem:[#allocation10 + $0x1578] sm:$0xff]   ;;  %v21717_v60 = vld [vmem:[#allocation10 + $0x1470] sm:$0xff]  }
 0xa28   :  { %v12654_v33 = vpop.f32.mrb[208].mxu0  ;;  %19023 = vmatprep.subr.bf16.mxu1 %v21683_v56 }
 0xa29   :  { %v12655_v13 = vadd.f32 %v12654_v33, %v25047_v54  ;;  %v19605_v15 = vpop.f32.mrb[209].mxu0  ;;  %v25659_v54 = vld [vmem:[#allocation48_spill] sm:$0xff] }
 0xa2a   :  { %v12657_v8 = vpop.f32.mrb[210].mxu0  ;;  %18967 = vmatpush3.bf16.msra.mxu0 %v21682_v18 }
 0xa2b   :  { %v25063_v37 = vadd.f32 %v12655_v13, %v25021_v53  ;;  %v12658_v3 = vadd.f32 %v12657_v8, %v25051_v16  ;;  %v19606_v34 = vpop.f32.mrb[211].mxu0  ;;  %19024 = vmatpush3.bf16.msra.mxu1 %v21684_v0  ;;  %18968 = vmatprep.subr.bf16.mxu0 %v21685_v36  ;;  %v21692_v53 = vld [vmem:[#allocation10 + $0x1548] sm:$0xff]   ;;  %v21718_v36 = vld [vmem:[#allocation10 + $0x1430] sm:$0xff]   ;;  %v21720_v13 = vld [vmem:[#allocation10 + $0x1478] sm:$0xff]  }
 0xa2c   :  { %19040 = vmatprep.subr.bf16.mxu1 %v21687_v23  ;;  %v21698_v16 = vld [vmem:[#allocation10 + $0x1408] sm:$0xff]   ;;  %v21719_v23 = vld [vmem:[#allocation10 + $0x1640] sm:$0xff]  }
 0xa2d   :  { %v25067_v1 = vadd.f32 %v12658_v3, %v25024_v14  ;;  %v21699_v14 = vld [vmem:[#allocation10 + $0x1598] sm:$0xff]   ;;  %v25661_v34 = vld [vmem:[#allocation55_spill] sm:$0xff] }
 0xa2e   :  { %18969 = vmatpush3.bf16.msra.mxu0 %v21686_v57  ;;  %15288 = vmatmul.mubr.bf16.vlgmr.msra.gmra.mrb[40].mxu1 %v25657_v41  ;;  %v21724_v41 = vld [vmem:[#allocation10 + $0x1650] sm:$0xff]  }
 0xa2f   :  { %19041 = vmatpush3.bf16.msra.mxu1 %v21688_v31  ;;  %15692 = vmatprep.mubr.bf16.mxu1 %v25658_v10  ;;  %v21721_v31 = vld [vmem:[#allocation10 + $0x1438] sm:$0xff]   ;;  %v21728_v10 = vld [vmem:[#allocation10 + $0x1660] sm:$0xff]  }
 0xa30   :  { %18970 = vmatprep.subr.bf16.mxu0 %v21689_v25  ;;  %19042 = vmatprep.subr.bf16.mxu1 %v21691_v7  ;;  %v21722_v25 = vld [vmem:[#allocation10 + $0x1648] sm:$0xff]  }
 0xa32   :  { %18971 = vmatpush3.bf16.msra.mxu0 %v21690_v43  ;;  %v21725_v43 = vld [vmem:[#allocation10 + $0x1508] sm:$0xff]  }
 0xa33   :  { %19043 = vmatpush3.bf16.msra.mxu1 %v21692_v53  ;;  %18987 = vmatprep.subr.bf16.mxu0 %v21693_v47  ;;  %v21729_v53 = vld [vmem:[#allocation10 + $0x1518] sm:$0xff]   ;;  %v21730_v47 = vld [vmem:[#allocation10 + $0x1668] sm:$0xff]  }
 0xa34   :  { %19044 = vmatprep.subr.bf16.mxu1 %v21695_v48 }
 0xa35   :  { %14842 = vmatmul.mubr.bf16.vlgmr.msra.gmra.mrb[236].mxu0 %v25659_v54  ;;  %v21732_v54 = vld [vmem:[#allocation10 + $0x1670] sm:$0xff]  }
 0xa36   :  { %18988 = vmatpush3.bf16.msra.mxu0 %v21694_v2  ;;  %15246 = vmatprep.mubr.bf16.mxu0 %v25660_v19 }
 0xa37   :  { %19045 = vmatpush3.bf16.msra.mxu1 %v21696_v30  ;;  %18989 = vmatprep.subr.bf16.mxu0 %v21697_v62  ;;  %v21731_v30 = vld [vmem:[#allocation10 + $0x1520] sm:$0xff]  }
 0xa38   :  { %19046 = vmatprep.subr.bf16.mxu1 %v21699_v14 }
 0xa3a   :  { %18990 = vmatpush3.bf16.msra.mxu0 %v21698_v16 }
 0xa3b   :  { %19047 = vmatpush3.bf16.msra.mxu1 %v21700_v29  ;;  %18991 = vmatprep.subr.bf16.mxu0 %v21701_v11  ;;  %v21733_v29 = vld [vmem:[#allocation10 + $0x1528] sm:$0xff]   ;;  %v21734_v11 = vld [vmem:[#allocation10 + $0x1678] sm:$0xff]  }
 0xa3c   :  { %19048 = vmatprep.subr.bf16.mxu1 %v21703_v6 }
 0xa3e   :  { %18992 = vmatpush3.bf16.msra.mxu0 %v21702_v42  ;;  %v21736_v42 = vld [vmem:[#allocation10 + $0x1740] sm:$0xff]  }
 0xa3f   :  { %19049 = vmatpush3.bf16.msra.mxu1 %v21704_v51  ;;  %18993 = vmatprep.subr.bf16.mxu0 %v21705_v26 }
 0xa40   :  { %19050 = vmatprep.subr.bf16.mxu1 %v21707_v55 }
 0xa41   :  { %v18813_v35 = vpop.f32.mrb[216].mxu1 }
 0xa42   :  { %v18814_v59 = vpop.f32.mrb[217].mxu1  ;;  %18994 = vmatpush3.bf16.msra.mxu0 %v21706_v20  ;;  %v21735_v20 = vld [vmem:[#allocation10 + $0x1530] sm:$0xff]  }
 0xa43   :  { %v25073_v21 = vadd.f32 %v18814_v59, %v18813_v35  ;;  %v18816_v58 = vpop.f32.mrb[218].mxu1  ;;  %19051 = vmatpush3.bf16.msra.mxu1 %v21708_v22  ;;  %18995 = vmatprep.subr.bf16.mxu0 %v21709_v28  ;;  %v21737_v28 = vld [vmem:[#allocation10 + $0x1700] sm:$0xff]   ;;  %v21739_v35 = vld [vmem:[#allocation10 + $0x1748] sm:$0xff]  }
 0xa44   :  { %v18817_v24 = vpop.f32.mrb[219].mxu1  ;;  %19052 = vmatprep.subr.bf16.mxu1 %v21711_v9 }
 0xa45   :  { %v25075_v4 = vadd.f32 %v18817_v24, %v18816_v58  ;;  %v21741_v24 = vld [vmem:[#allocation10 + $0x1600] sm:$0xff]  }
 0xa46   :  { %18996 = vmatpush3.bf16.msra.mxu0 %v21710_v5  ;;  %v21738_v5 = vld [vmem:[#allocation10 + $0x1538] sm:$0xff]  }
 0xa47   :  { %19053 = vmatpush3.bf16.msra.mxu1 %v21712_v46  ;;  %18997 = vmatprep.subr.bf16.mxu0 %v21713_v12  ;;  %v25663_v46 = vld [vmem:[#allocation60_spill] sm:$0xff]  ;;  %v21740_v12 = vld [vmem:[#allocation10 + $0x1708] sm:$0xff]  }
 0xa48   :  { %v18760_v44 = vpop.f32.mrb[212].mxu0  ;;  %19054 = vmatprep.subr.bf16.mxu1 %v21715_v17  ;;  %v21743_v17 = vld [vmem:[#allocation10 + $0x1750] sm:$0xff]  }
 0xa49   :  { %v18761_v56 = vpop.f32.mrb[213].mxu0 }
 0xa4a   :  { %v18762_v18 = vadd.f32 %v18761_v56, %v18760_v44  ;;  %v18763_v0 = vpop.f32.mrb[214].mxu0  ;;  %18998 = vmatpush3.bf16.msra.mxu0 %v21714_v40  ;;  %v21742_v40 = vld [vmem:[#allocation10 + $0x15c0] sm:$0xff]   ;;  %v21748_v44 = vld [vmem:[#allocation10 + $0x1718] sm:$0xff]   ;;  %v21749_v56 = vld [vmem:[#allocation10 + $0x1610] sm:$0xff]  }
 0xa4b   :  { %v18764_v33 = vpop.f32.mrb[215].mxu0  ;;  %19055 = vmatpush3.bf16.msra.mxu1 %v21716_v49  ;;  %18999 = vmatprep.subr.bf16.mxu0 %v21717_v60  ;;  %v21745_v49 = vld [vmem:[#allocation10 + $0x1608] sm:$0xff]  }
 0xa4c   :  { %v13060_v15 = vadd.f32 %v18762_v18, %v25037_v63  ;;  %v18765_v8 = vadd.f32 %v18764_v33, %v18763_v0  ;;  %19727 = vmatprep.subr.bf16.mxu1 %v25529_v61  ;;  %v21746_v60 = vld [vmem:[#allocation10 + $0x15c8] sm:$0xff]   ;;  %v21751_v18 = vld [vmem:[#allocation10 + $0x1760] sm:$0xff]   ;;  %v21750_v0 = vld [vmem:[#allocation10 + $0x15d0] sm:$0xff]  }
 0xa4d   :  { %v21753_v33 = vld [vmem:[#allocation10 + $0x1618] sm:$0xff]  }
 0xa4e   :  { %v13101_v57 = vadd.f32 %v25057_v39, %v13060_v15  ;;  %v13063_v3 = vadd.f32 %v18765_v8, %v25041_v52  ;;  %19000 = vmatpush3.bf16.msra.mxu0 %v21718_v36  ;;  %15693 = vmatmul.mubr.bf16.vlgmr.msra.gmra.mrb[44].mxu1 %v25661_v34  ;;  %v21723_v39 = vld [vmem:[#allocation10 + $0x1500] sm:$0xff]   ;;  %v21759_v8 = vld [vmem:[#allocation10 + $0x1770] sm:$0xff]  }
 0xa4f   :  { %19728 = vmatpush3.bf16.msra.mxu1 %v21719_v23  ;;  %19001 = vmatprep.subr.bf16.mxu0 %v21720_v13  ;;  %v21752_v36 = vld [vmem:[#allocation10 + $0x1720] sm:$0xff]   ;;  %v21755_v23 = vld [vmem:[#allocation10 + $0x1768] sm:$0xff]  }
 0xa50   :  { %v13104_v7 = vadd.f32 %v25059_v38, %v13063_v3  ;;  %19729 = vmatprep.subr.bf16.mxu1 %v25529_v61  ;;  %19743 = vmatprep.mubr.msk.bf16.mxu1 %vm22013_vm5, %v25529_v61  ;;  %v25087_v63 = vadd.f32 %v13101_v57, %v25063_v37  ;;  %v25662_v38 = vld [vmem:[#allocation50_spill] sm:$0xff]  ;;  %v21726_v37 = vld [vmem:[#allocation10 + $0x1658] sm:$0xff]  }
 0xa51   :  { %v21756_v13 = vld [vmem:[#allocation10 + $0x1728] sm:$0xff]   ;;  %v21757_v15 = vld [vmem:[#allocation10 + $0x1620] sm:$0xff]  }
 0xa52   :  { %19002 = vmatpush3.bf16.msra.mxu0 %v21721_v31  ;;  %v25090_v52 = vadd.f32 %v13104_v7, %v25067_v1  ;;  %v21727_v1 = vld [vmem:[#allocation10 + $0x1510] sm:$0xff]   ;;  %v21758_v34 = vld [vmem:[#allocation10 + $0x15e0] sm:$0xff]   ;;  %v21761_v7 = vld [vmem:[#allocation10 + $0x1628] sm:$0xff]  }
 0xa53   :  { %19730 = vmatpush3.bf16.msra.mxu1 %v21722_v25  ;;  %19707 = vmatprep.subr.bf16.mxu0 %v25529_v61  ;;  %v21760_v25 = vld [vmem:[#allocation10 + $0x1730] sm:$0xff]  }
 0xa54   :  { %19731 = vmatprep.subr.bf16.mxu1 %v25529_v61 }
 0xa55   :  { %15247 = vmatmul.mubr.bf16.vlgmr.msra.gmra.mrb[240].mxu0 %v25662_v38  ;;  %v21762_v38 = vld [vmem:[#allocation10 + $0x15e8] sm:$0xff]  }
 0xa56   :  { %19708 = vmatpush3.bf16.msra.mxu0 %v21723_v39  ;;  %19723 = vmatprep.mubr.msk.bf16.mxu0 %vm22013_vm5, %v25529_v61 }
 0xa57   :  { %19732 = vmatpush3.bf16.msra.mxu1 %v21724_v41  ;;  %19709 = vmatprep.subr.bf16.mxu0 %v25529_v61  ;;  %v21763_v41 = vld [vmem:[#allocation10 + $0x1778] sm:$0xff]  }
 0xa58   :  { %19733 = vmatprep.subr.bf16.mxu1 %v25529_v61 }
 0xa5a   :  { %19710 = vmatpush3.bf16.msra.mxu0 %v21725_v43  ;;  %v21764_v43 = vld [vmem:[#allocation10 + $0x1738] sm:$0xff]  }
 0xa5b   :  { %19734 = vmatpush3.bf16.msra.mxu1 %v21726_v37  ;;  %19711 = vmatprep.subr.bf16.mxu0 %v25529_v61  ;;  %v21765_v37 = vld [vmem:[#allocation10 + $0x1630] sm:$0xff]  }
 0xa5c   :  { %19735 = vmatprep.subr.bf16.mxu1 %v25529_v61 }
 0xa5e   :  { %19712 = vmatpush3.bf16.msra.mxu0 %v21727_v1 }
 0xa5f   :  { %19736 = vmatpush3.bf16.msra.mxu1 %v21728_v10  ;;  %19713 = vmatprep.subr.bf16.mxu0 %v25529_v61  ;;  %v21767_v10 = vld [vmem:[#allocation10 + $0x1800] sm:$0xff]  }
 0xa60   :  { %19737 = vmatprep.subr.bf16.mxu1 %v25529_v61 }
 0xa61   :  { %v18844_v48 = vpop.f32.mrb[220].mxu1 }
 0xa62   :  { %v18845_v2 = vpop.f32.mrb[221].mxu1  ;;  %19714 = vmatpush3.bf16.msra.mxu0 %v21729_v53 }
 0xa63   :  { %v25103_v62 = vadd.f32 %v18845_v2, %v18844_v48  ;;  %v18847_v14 = vpop.f32.mrb[222].mxu1  ;;  %19738 = vmatpush3.bf16.msra.mxu1 %v21730_v47  ;;  %19715 = vmatprep.subr.bf16.mxu0 %v25529_v61  ;;  %v21766_v2 = vld [vmem:[#allocation10 + $0x15f0] sm:$0xff]  }
 0xa64   :  { %v18848_v19 = vpop.f32.mrb[223].mxu1  ;;  %19739 = vmatprep.subr.bf16.mxu1 %v25529_v61 }
 0xa65   :  { %v25107_v16 = vadd.f32 %v18848_v19, %v18847_v14  ;;  %v21768_v19 = vld [vmem:[#allocation10 + $0x17c0] sm:$0xff]  }
 0xa66   :  { %19716 = vmatpush3.bf16.msra.mxu0 %v21731_v30 }
 0xa67   :  { %19740 = vmatpush3.bf16.msra.mxu1 %v21732_v54  ;;  %19717 = vmatprep.subr.bf16.mxu0 %v25529_v61 }
 0xa68   :  { %v18791_v6 = vpop.f32.mrb[216].mxu0  ;;  %19741 = vmatprep.subr.bf16.mxu1 %v25529_v61 }
 0xa69   :  { %v18792_v51 = vpop.f32.mrb[217].mxu0 }
 0xa6a   :  { %v18793_v26 = vadd.f32 %v18792_v51, %v18791_v6  ;;  %v18794_v55 = vpop.f32.mrb[218].mxu0  ;;  %19718 = vmatpush3.bf16.msra.mxu0 %v21733_v29  ;;  %v21769_v29 = vld [vmem:[#allocation10 + $0x1638] sm:$0xff]  }
 0xa6b   :  { %v18795_v22 = vpop.f32.mrb[219].mxu0  ;;  %19742 = vmatpush3.bf16.msra.mxu1 %v21734_v11  ;;  %19719 = vmatprep.subr.bf16.mxu0 %v25529_v61  ;;  %v21771_v11 = vld [vmem:[#allocation10 + $0x1808] sm:$0xff]   ;;  %v21770_v51 = vld [vmem:[#allocation10 + $0x15f8] sm:$0xff]  }
 0xa6c   :  { %v18796_v9 = vadd.f32 %v18795_v22, %v18794_v55  ;;  %19115 = vmatprep.subr.bf16.mxu1 %v21736_v42  ;;  %v25113_v59 = vadd.f32 %v25073_v21, %v18793_v26  ;;  %v21744_v21 = vld [vmem:[#allocation10 + $0x1710] sm:$0xff]   ;;  %v25665_v42 = vld [vmem:[#allocation58_spill] sm:$0xff] }
 0xa6d   :  { %v25666_v26 = vld [vmem:[#allocation96_spill] sm:$0xff]  ;;  %v21773_v55 = vld [vmem:[#allocation10 + $0x16c0] sm:$0xff]  }
 0xa6e   :  { %19720 = vmatpush3.bf16.msra.mxu0 %v21735_v20  ;;  %19744 = vmatmul.mubr.bf16.vlgmr.msra.gmra.mrb[48].mxu1 %v24674_v50  ;;  %v25117_v58 = vadd.f32 %v25075_v4, %v18796_v9  ;;  %v21747_v50 = vld [vmem:[#allocation10 + $0x1758] sm:$0xff]   ;;  %v21775_v20 = vld [vmem:[#allocation10 + $0x1810] sm:$0xff]   ;;  %v21774_v22 = vld [vmem:[#allocation10 + $0x1680] sm:$0xff]  }
 0xa6f   :  { %19116 = vmatpush3.bf16.msra.mxu1 %v21737_v28  ;;  %16179 = vmatprep.mubr.bf16.mxu1 %v25663_v46  ;;  %v25664_v4 = vld [vmem:[#allocation56_spill] sm:$0xff]  ;;  %v21777_v9 = vld [vmem:[#allocation10 + $0x16c8] sm:$0xff]  }
 0xa70   :  { %19721 = vmatprep.subr.bf16.mxu0 %v25529_v61  ;;  %19117 = vmatprep.subr.bf16.mxu1 %v21739_v35  ;;  %v21776_v28 = vld [vmem:[#allocation10 + $0x17d0] sm:$0xff]   ;;  %v25667_v35 = vld [vmem:[#allocation54_spill] sm:$0xff] }
 0xa71   :  { %v21781_v46 = vld [vmem:[#allocation10 + $0x16d0] sm:$0xff]  }
 0xa72   :  { %19722 = vmatpush3.bf16.msra.mxu0 %v21738_v5  ;;  %v21778_v5 = vld [vmem:[#allocation10 + $0x1688] sm:$0xff]  }
 0xa73   :  { %19118 = vmatpush3.bf16.msra.mxu1 %v21740_v12  ;;  %19062 = vmatprep.subr.bf16.mxu0 %v21741_v24  ;;  %v21783_v12 = vld [vmem:[#allocation10 + $0x1820] sm:$0xff]   ;;  %v21782_v24 = vld [vmem:[#allocation10 + $0x1690] sm:$0xff]  }
 0xa74   :  { %19119 = vmatprep.subr.bf16.mxu1 %v21743_v17  ;;  %v21784_v17 = vld [vmem:[#allocation10 + $0x17e0] sm:$0xff]  }
 0xa75   :  { %19724 = vmatmul.mubr.bf16.vlgmr.msra.gmra.mrb[244].mxu0 %v24664_v27  ;;  %v21754_v27 = vld [vmem:[#allocation10 + $0x15d8] sm:$0xff]  }
 0xa76   :  { %19063 = vmatpush3.bf16.msra.mxu0 %v21742_v40  ;;  %15733 = vmatprep.mubr.bf16.mxu0 %v25664_v4  ;;  %v21785_v40 = vld [vmem:[#allocation10 + $0x16d8] sm:$0xff]   ;;  %v21789_v4 = vld [vmem:[#allocation10 + $0x16e0] sm:$0xff]  }
 0xa77   :  { %19120 = vmatpush3.bf16.msra.mxu1 %v21744_v21  ;;  %19064 = vmatprep.subr.bf16.mxu0 %v21745_v49  ;;  %v21787_v21 = vld [vmem:[#allocation10 + $0x1828] sm:$0xff]   ;;  %v21786_v49 = vld [vmem:[#allocation10 + $0x1698] sm:$0xff]  }
 0xa78   :  { %19121 = vmatprep.subr.bf16.mxu1 %v21747_v50  ;;  %v21788_v50 = vld [vmem:[#allocation10 + $0x17e8] sm:$0xff]  }
 0xa7a   :  { %19065 = vmatpush3.bf16.msra.mxu0 %v21746_v60  ;;  %v21791_v60 = vld [vmem:[#allocation10 + $0x1830] sm:$0xff]  }
 0xa7b   :  { %19122 = vmatpush3.bf16.msra.mxu1 %v21748_v44  ;;  %19066 = vmatprep.subr.bf16.mxu0 %v21749_v56 }
 0xa7c   :  { %19123 = vmatprep.subr.bf16.mxu1 %v21751_v18  ;;  %v21790_v18 = vld [vmem:[#allocation10 + $0x16a0] sm:$0xff]  }
 0xa7e   :  { %19067 = vmatpush3.bf16.msra.mxu0 %v21750_v0 }
 0xa7f   :  { %19124 = vmatpush3.bf16.msra.mxu1 %v21752_v36  ;;  %19068 = vmatprep.subr.bf16.mxu0 %v21753_v33  ;;  %v21792_v33 = vld [vmem:[#allocation10 + $0x17f0] sm:$0xff]  }
 0xa80   :  { %19125 = vmatprep.subr.bf16.mxu1 %v21755_v23  ;;  %v21793_v23 = vld [vmem:[#allocation10 + $0x16e8] sm:$0xff]  }
 0xa81   :  { %v25123_v57 = vpop.f32.mrb[224].mxu1 }
 0xa82   :  { %v19665_v3 = vpop.f32.mrb[225].mxu1  ;;  %19069 = vmatpush3.bf16.msra.mxu0 %v21754_v27 }
 0xa83   :  { %v25125_v31 = vpop.f32.mrb[226].mxu1  ;;  %19126 = vmatpush3.bf16.msra.mxu1 %v21756_v13  ;;  %19070 = vmatprep.subr.bf16.mxu0 %v21757_v15  ;;  %v21795_v13 = vld [vmem:[#allocation10 + $0x1838] sm:$0xff]  }
 0xa84   :  { %v19666_v39 = vpop.f32.mrb[227].mxu1  ;;  %19127 = vmatprep.subr.bf16.mxu1 %v21759_v8  ;;  %v21794_v8 = vld [vmem:[#allocation10 + $0x16a8] sm:$0xff]   ;;  %v21796_v3 = vld [vmem:[#allocation10 + $0x17f8] sm:$0xff]  }
 0xa86   :  { %19071 = vmatpush3.bf16.msra.mxu0 %v21758_v34  ;;  %v21797_v34 = vld [vmem:[#allocation10 + $0x16f0] sm:$0xff]  }
 0xa87   :  { %19128 = vmatpush3.bf16.msra.mxu1 %v21760_v25  ;;  %19072 = vmatprep.subr.bf16.mxu0 %v21761_v7 }
 0xa88   :  { %v13546_v1 = vpop.f32.mrb[220].mxu0  ;;  %19129 = vmatprep.subr.bf16.mxu1 %v21763_v41 }
 0xa89   :  { %v13547_v53 = vadd.f32 %v13546_v1, %v25113_v59  ;;  %v19645_v47 = vpop.f32.mrb[221].mxu0  ;;  %v25668_v59 = vld [vmem:[#allocation61_spill] sm:$0xff] }
 0xa8a   :  { %v13549_v48 = vpop.f32.mrb[222].mxu0  ;;  %19073 = vmatpush3.bf16.msra.mxu0 %v21762_v38  ;;  %v21798_v38 = vld [vmem:[#allocation10 + $0x16b0] sm:$0xff]   ;;  %v21800_v1 = vld [vmem:[#allocation10 + $0x16f8] sm:$0xff]  }
 0xa8b   :  { %v25129_v30 = vadd.f32 %v13547_v53, %v25087_v63  ;;  %v13550_v14 = vadd.f32 %v13549_v48, %v25117_v58  ;;  %v19646_v54 = vpop.f32.mrb[223].mxu0  ;;  %19130 = vmatpush3.bf16.msra.mxu1 %v21764_v43  ;;  %19074 = vmatprep.subr.bf16.mxu0 %v21765_v37  ;;  %v21772_v63 = vld [vmem:[#allocation10 + $0x17c8] sm:$0xff]   ;;  %v21780_v58 = vld [vmem:[#allocation10 + $0x17d8] sm:$0xff]   ;;  %v21799_v37 = vld [vmem:[#allocation10 + $0x18c0] sm:$0xff]  }
 0xa8c   :  { %19146 = vmatprep.subr.bf16.mxu1 %v21767_v10  ;;  %v21802_v54 = vld [vmem:[#allocation10 + $0x18c8] sm:$0xff]  }
 0xa8d   :  { %v25133_v6 = vadd.f32 %v13550_v14, %v25090_v52  ;;  %v21779_v52 = vld [vmem:[#allocation10 + $0x1818] sm:$0xff]  }
 0xa8e   :  { %19075 = vmatpush3.bf16.msra.mxu0 %v21766_v2  ;;  %16180 = vmatmul.mubr.bf16.vlgmr.msra.gmra.mrb[52].mxu1 %v25665_v42  ;;  %v25669_v2 = vld [vmem:[#allocation62_spill] sm:$0xff]  ;;  %v21801_v14 = vld [vmem:[#allocation10 + $0x16b8] sm:$0xff]  }
 0xa8f   :  { %19147 = vmatpush3.bf16.msra.mxu1 %v21768_v19  ;;  %16584 = vmatprep.mubr.bf16.mxu1 %v25666_v26  ;;  %v21808_v42 = vld [vmem:[#allocation10 + $0x18e0] sm:$0xff]   ;;  %v21810_v26 = vld [vmem:[#allocation10 + $0x18e8] sm:$0xff]  }
 0xa90   :  { %19076 = vmatprep.subr.bf16.mxu0 %v21769_v29  ;;  %19148 = vmatprep.subr.bf16.mxu1 %v21771_v11  ;;  %v21804_v29 = vld [vmem:[#allocation10 + $0x18d0] sm:$0xff]   ;;  %v21805_v11 = vld [vmem:[#allocation10 + $0x1788] sm:$0xff]  }
 0xa92   :  { %19077 = vmatpush3.bf16.msra.mxu0 %v21770_v51  ;;  %v21809_v51 = vld [vmem:[#allocation10 + $0x1798] sm:$0xff]  }
 0xa93   :  { %19149 = vmatpush3.bf16.msra.mxu1 %v21772_v63  ;;  %19093 = vmatprep.subr.bf16.mxu0 %v21773_v55 }
 0xa94   :  { %19150 = vmatprep.subr.bf16.mxu1 %v21775_v20  ;;  %v21811_v20 = vld [vmem:[#allocation10 + $0x17a0] sm:$0xff]  }
 0xa95   :  { %15734 = vmatmul.mubr.bf16.vlgmr.msra.gmra.mrb[248].mxu0 %v25667_v35 }
 0xa96   :  { %19094 = vmatpush3.bf16.msra.mxu0 %v21774_v22  ;;  %16138 = vmatprep.mubr.bf16.mxu0 %v25668_v59  ;;  %v21813_v59 = vld [vmem:[#allocation10 + $0x17a8] sm:$0xff]  }
 0xa97   :  { %19151 = vmatpush3.bf16.msra.mxu1 %v21776_v28  ;;  %19095 = vmatprep.subr.bf16.mxu0 %v21777_v9  ;;  %v21812_v9 = vld [vmem:[#allocation10 + $0x18f0] sm:$0xff]  }
 0xa98   :  { %19152 = vmatprep.subr.bf16.mxu1 %v21779_v52 }
 0xa9a   :  { %19096 = vmatpush3.bf16.msra.mxu0 %v21778_v5  ;;  %v21814_v5 = vld [vmem:[#allocation10 + $0x18f8] sm:$0xff]  }
 0xa9b   :  { %19153 = vmatpush3.bf16.msra.mxu1 %v21780_v58  ;;  %19097 = vmatprep.subr.bf16.mxu0 %v21781_v46 }
 0xa9c   :  { %19154 = vmatprep.subr.bf16.mxu1 %v21783_v12 }
 0xa9e   :  { %19098 = vmatpush3.bf16.msra.mxu0 %v21782_v24 }
 0xa9f   :  { %19155 = vmatpush3.bf16.msra.mxu1 %v21784_v17  ;;  %19099 = vmatprep.subr.bf16.mxu0 %v21785_v40  ;;  %v21815_v17 = vld [vmem:[#allocation10 + $0x17b0] sm:$0xff]  }
 0xaa0   :  { %19156 = vmatprep.subr.bf16.mxu1 %v21787_v21 }
 0xaa1   :  { %v18919_v44 = vpop.f32.mrb[228].mxu1 }
 0xaa2   :  { %v18920_v56 = vpop.f32.mrb[229].mxu1  ;;  %19100 = vmatpush3.bf16.msra.mxu0 %v21786_v49 }
 0xaa3   :  { %v25139_v0 = vadd.f32 %v18920_v56, %v18919_v44  ;;  %v18922_v36 = vpop.f32.mrb[230].mxu1  ;;  %19157 = vmatpush3.bf16.msra.mxu1 %v21788_v50  ;;  %19101 = vmatprep.subr.bf16.mxu0 %v21789_v4  ;;  %v21816_v50 = vld [vmem:[#allocation10 + $0x17b8] sm:$0xff]   ;;  %v21818_v44 = vld [vmem:[#allocation10 + $0x1840] sm:$0xff]   ;;  %v21819_v56 = vld [vmem:[#allocation10 + $0x1888] sm:$0xff]  }
 0xaa4   :  { %v18923_v27 = vpop.f32.mrb[231].mxu1  ;;  %19158 = vmatprep.subr.bf16.mxu1 %v21791_v60  ;;  %v21817_v60 = vld [vmem:[#allocation10 + $0x1880] sm:$0xff]  }
 0xaa5   :  { %v25141_v15 = vadd.f32 %v18923_v27, %v18922_v36  ;;  %v21820_v36 = vld [vmem:[#allocation10 + $0x1848] sm:$0xff]  }
 0xaa6   :  { %19102 = vmatpush3.bf16.msra.mxu0 %v21790_v18  ;;  %v25671_v18 = vld [vmem:[#allocation97_spill] sm:$0xff] }
 0xaa7   :  { %19159 = vmatpush3.bf16.msra.mxu1 %v21792_v33  ;;  %19103 = vmatprep.subr.bf16.mxu0 %v21793_v23  ;;  %v21823_v33 = vld [vmem:[#allocation10 + $0x1898] sm:$0xff]  }
 0xaa8   :  { %v18866_v25 = vpop.f32.mrb[224].mxu0  ;;  %19160 = vmatprep.subr.bf16.mxu1 %v21795_v13  ;;  %v21824_v23 = vld [vmem:[#allocation10 + $0x1858] sm:$0xff]  }
 0xaa9   :  { %v18867_v7 = vpop.f32.mrb[225].mxu0 }
 0xaaa   :  { %v18868_v39 = vadd.f32 %v18867_v7, %v18866_v25  ;;  %v18869_v41 = vpop.f32.mrb[226].mxu0  ;;  %19104 = vmatpush3.bf16.msra.mxu0 %v21794_v8  ;;  %v21829_v25 = vld [vmem:[#allocation10 + $0x18b0] sm:$0xff]  }
 0xaab   :  { %v18870_v43 = vpop.f32.mrb[227].mxu0  ;;  %19161 = vmatpush3.bf16.msra.mxu1 %v21796_v3  ;;  %19105 = vmatprep.subr.bf16.mxu0 %v21797_v34  ;;  %v21828_v34 = vld [vmem:[#allocation10 + $0x1868] sm:$0xff]  }
 0xaac   :  { %v13952_v10 = vadd.f32 %v18868_v39, %v25103_v62  ;;  %v18871_v53 = vadd.f32 %v18870_v43, %v18869_v41  ;;  %19767 = vmatprep.subr.bf16.mxu1 %v25529_v61  ;;  %v21830_v43 = vld [vmem:[#allocation10 + $0x1870] sm:$0xff]  }
 0xaae   :  { %v13993_v47 = vadd.f32 %v25123_v57, %v13952_v10  ;;  %v13955_v48 = vadd.f32 %v18871_v53, %v25107_v16  ;;  %19106 = vmatpush3.bf16.msra.mxu0 %v21798_v38  ;;  %16585 = vmatmul.mubr.bf16.vlgmr.msra.gmra.mrb[56].mxu1 %v25669_v2  ;;  %v21803_v57 = vld [vmem:[#allocation10 + $0x1780] sm:$0xff]   ;;  %v21831_v53 = vld [vmem:[#allocation10 + $0x18b8] sm:$0xff]   ;;  %v25672_v2 = vld [vmem:[#allocation95_spill] sm:$0xff] }
 0xaaf   :  { %19768 = vmatpush3.bf16.msra.mxu1 %v21799_v37  ;;  %19107 = vmatprep.subr.bf16.mxu0 %v21800_v1 }
 0xab0   :  { %v13996_v19 = vadd.f32 %v25125_v31, %v13955_v48  ;;  %19769 = vmatprep.subr.bf16.mxu1 %v25529_v61  ;;  %19783 = vmatprep.mubr.msk.bf16.mxu1 %vm22013_vm5, %v25529_v61  ;;  %v25153_v62 = vadd.f32 %v13993_v47, %v25129_v30  ;;  %v25670_v31 = vld [vmem:[#allocation59_spill] sm:$0xff]  ;;  %v21806_v30 = vld [vmem:[#allocation10 + $0x18d8] sm:$0xff]  }
 0xab1   :  { %v21832_v48 = vld [vmem:[#allocation10 + $0x1878] sm:$0xff]  }
 0xab2   :  { %19108 = vmatpush3.bf16.msra.mxu0 %v21801_v14  ;;  %v25156_v16 = vadd.f32 %v13996_v19, %v25133_v6  ;;  %v21807_v6 = vld [vmem:[#allocation10 + $0x1790] sm:$0xff]  }
 0xab3   :  { %19770 = vmatpush3.bf16.msra.mxu1 %v21802_v54  ;;  %19747 = vmatprep.subr.bf16.mxu0 %v25529_v61 }
 0xab4   :  { %19771 = vmatprep.subr.bf16.mxu1 %v25529_v61 }
 0xab5   :  { %16139 = vmatmul.mubr.bf16.vlgmr.msra.gmra.mrb[252].mxu0 %v25670_v31 }
 0xab6   :  { %19748 = vmatpush3.bf16.msra.mxu0 %v21803_v57  ;;  %19763 = vmatprep.mubr.msk.bf16.mxu0 %vm22013_vm5, %v25529_v61 }
 0xab7   :  { %19772 = vmatpush3.bf16.msra.mxu1 %v21804_v29  ;;  %19749 = vmatprep.subr.bf16.mxu0 %v25529_v61 }
 0xab8   :  { %19773 = vmatprep.subr.bf16.mxu1 %v25529_v61 }
 0xaba   :  { %19750 = vmatpush3.bf16.msra.mxu0 %v21805_v11 }
 0xabb   :  { %19774 = vmatpush3.bf16.msra.mxu1 %v21806_v30  ;;  %19751 = vmatprep.subr.bf16.mxu0 %v25529_v61 }
 0xabc   :  { %19775 = vmatprep.subr.bf16.mxu1 %v25529_v61 }
 0xabe   :  { %19752 = vmatpush3.bf16.msra.mxu0 %v21807_v6 }
 0xabf   :  { %19776 = vmatpush3.bf16.msra.mxu1 %v21808_v42  ;;  %19753 = vmatprep.subr.bf16.mxu0 %v25529_v61 }
 0xac0   :  { %19777 = vmatprep.subr.bf16.mxu1 %v25529_v61 }
 0xac1   :  { %v18950_v63 = vpop.f32.mrb[232].mxu1 }
 0xac2   :  { %v18951_v55 = vpop.f32.mrb[233].mxu1  ;;  %19754 = vmatpush3.bf16.msra.mxu0 %v21809_v51 }
 0xac3   :  { %v25169_v22 = vadd.f32 %v18951_v55, %v18950_v63  ;;  %v18953_v28 = vpop.f32.mrb[234].mxu1  ;;  %19778 = vmatpush3.bf16.msra.mxu1 %v21810_v26  ;;  %19755 = vmatprep.subr.bf16.mxu0 %v25529_v61 }
 0xac4   :  { %v18954_v52 = vpop.f32.mrb[235].mxu1  ;;  %19779 = vmatprep.subr.bf16.mxu1 %v25529_v61 }
 0xac5   :  { %v25173_v35 = vadd.f32 %v18954_v52, %v18953_v28 }
 0xac6   :  { %19756 = vmatpush3.bf16.msra.mxu0 %v21811_v20 }
 0xac7   :  { %19780 = vmatpush3.bf16.msra.mxu1 %v21812_v9  ;;  %19757 = vmatprep.subr.bf16.mxu0 %v25529_v61 }
 0xac8   :  { %v18897_v58 = vpop.f32.mrb[228].mxu0  ;;  %19781 = vmatprep.subr.bf16.mxu1 %v25529_v61 }
 0xac9   :  { %v18898_v46 = vpop.f32.mrb[229].mxu0 }
 0xaca   :  { %v18899_v12 = vadd.f32 %v18898_v46, %v18897_v58  ;;  %v18900_v24 = vpop.f32.mrb[230].mxu0  ;;  %19758 = vmatpush3.bf16.msra.mxu0 %v21813_v59 }
 0xacb   :  { %v18901_v40 = vpop.f32.mrb[231].mxu0  ;;  %19782 = vmatpush3.bf16.msra.mxu1 %v21814_v5  ;;  %19759 = vmatprep.subr.bf16.mxu0 %v25529_v61 }
 0xacc   :  { %v18902_v21 = vadd.f32 %v18901_v40, %v18900_v24  ;;  %v14398_v49 = vadd.f32 %v25139_v0, %v18899_v12  ;;  %v21821_v0 = vld [vmem:[#allocation10 + $0x1890] sm:$0xff]  }
 0xace   :  { %19760 = vmatpush3.bf16.msra.mxu0 %v21815_v17  ;;  %19784 = vmatmul.mubr.bf16.vlgmr.msra.gmra.mrb[60].mxu1 %v24691_v45  ;;  %v14401_v4 = vadd.f32 %v25141_v15, %v18902_v21  ;;  %v21822_v45 = vld [vmem:[#allocation10 + $0x1850] sm:$0xff]   ;;  %v21826_v15 = vld [vmem:[#allocation10 + $0x1860] sm:$0xff]  }
 0xacf   :  { %19761 = vmatprep.subr.bf16.mxu0 %v25529_v61  ;;  %v21825_v61 = vld [vmem:[#allocation10 + $0x18a0] sm:$0xff]  }
 0xad2   :  { %19762 = vmatpush3.bf16.msra.mxu0 %v21816_v50 }
 0xad3   :  { %19168 = vmatprep.subr.bf16.mxu0 %v21817_v60 }
 0xad5   :  { %19764 = vmatmul.mubr.bf16.vlgmr.msra.gmra.mrb[0].mxu0 %v24684_v32  ;;  %v21827_v32 = vld [vmem:[#allocation10 + $0x18a8] sm:$0xff]  }
 0xad6   :  { %19169 = vmatpush3.bf16.msra.mxu0 %v21818_v44  ;;  %16625 = vmatprep.mubr.bf16.mxu0 %v25671_v18 }
 0xad7   :  { %19170 = vmatprep.subr.bf16.mxu0 %v21819_v56 }
 0xada   :  { %19171 = vmatpush3.bf16.msra.mxu0 %v21820_v36 }
 0xadb   :  { %19172 = vmatprep.subr.bf16.mxu0 %v21821_v0 }
 0xade   :  { %19173 = vmatpush3.bf16.msra.mxu0 %v21822_v45 }
 0xadf   :  { %19174 = vmatprep.subr.bf16.mxu0 %v21823_v33 }
 0xae1   :  { %v14884_v27 = vpop.f32.mrb[236].mxu1 }
 0xae2   :  { %v19705_v13 = vpop.f32.mrb[237].mxu1  ;;  %19175 = vmatpush3.bf16.msra.mxu0 %v21824_v23 }
 0xae3   :  { %v14887_v8 = vpop.f32.mrb[238].mxu1  ;;  %19176 = vmatprep.subr.bf16.mxu0 %v21825_v61 }
 0xae4   :  { %v19706_v3 = vpop.f32.mrb[239].mxu1 }
 0xae6   :  { %19177 = vmatpush3.bf16.msra.mxu0 %v21826_v15 }
 0xae7   :  { %19178 = vmatprep.subr.bf16.mxu0 %v21827_v32 }
 0xae8   :  { %v14438_v7 = vpop.f32.mrb[232].mxu0 }
 0xae9   :  { %v14439_v39 = vadd.f32 %v14438_v7, %v14398_v49  ;;  %v19685_v41 = vpop.f32.mrb[233].mxu0 }
 0xaea   :  { %v14441_v38 = vpop.f32.mrb[234].mxu0  ;;  %19179 = vmatpush3.bf16.msra.mxu0 %v21828_v34 }
 0xaeb   :  { %v14445_v37 = vadd.f32 %v14439_v39, %v25153_v62  ;;  %v14442_v1 = vadd.f32 %v14441_v38, %v14401_v4  ;;  %v19686_v10 = vpop.f32.mrb[235].mxu0  ;;  %19180 = vmatprep.subr.bf16.mxu0 %v21829_v25 }
 0xaed   :  { %v14446_v47 = vadd.f32 %v14442_v1, %v25156_v16 }
 0xaee   :  { %19181 = vmatpush3.bf16.msra.mxu0 %v21830_v43 }
 0xaef   :  { %19182 = vmatprep.subr.bf16.mxu0 %v21831_v53 }
 0xaf2   :  { %19183 = vmatpush3.bf16.msra.mxu0 %v21832_v48 }
 0xaf5   :  { %16626 = vmatmul.mubr.bf16.vlgmr.msra.gmra.mrb[4].mxu0 %v25672_v2 }
 0xb01   :  { %v19025_v14 = vpop.f32.mrb[40].mxu1 }
 0xb02   :  { %v19026_v54 = vpop.f32.mrb[41].mxu1 }
 0xb03   :  { %v19027_v19 = vadd.f32 %v19026_v54, %v19025_v14  ;;  %v19028_v57 = vpop.f32.mrb[42].mxu1 }
 0xb04   :  { %v19029_v29 = vpop.f32.mrb[43].mxu1 }
 0xb05   :  { %v19030_v31 = vadd.f32 %v19029_v29, %v19028_v57 }
 0xb08   :  { %v18972_v11 = vpop.f32.mrb[236].mxu0 }
 0xb09   :  { %v18973_v62 = vpop.f32.mrb[237].mxu0 }
 0xb0a   :  { %v18974_v30 = vadd.f32 %v18973_v62, %v18972_v11  ;;  %v18975_v6 = vpop.f32.mrb[238].mxu0 }
 0xb0b   :  { %v18976_v42 = vpop.f32.mrb[239].mxu0 }
 0xb0c   :  { %v14844_v51 = vadd.f32 %v18974_v30, %v25169_v22  ;;  %v18977_v16 = vadd.f32 %v18976_v42, %v18975_v6 }
 0xb0e   :  { %v14885_v26 = vadd.f32 %v14884_v27, %v14844_v51  ;;  %v14847_v63 = vadd.f32 %v18977_v16, %v25173_v35 }
 0xb10   :  { %v14888_v55 = vadd.f32 %v14887_v8, %v14847_v63  ;;  %v14891_v20 = vadd.f32 %v14885_v26, %v14445_v37 }
 0xb12   :  { %v14892_v28 = vadd.f32 %v14888_v55, %v14446_v47 }
 0xb21   :  { %v19056_v9 = vpop.f32.mrb[44].mxu1 }
 0xb22   :  { %v19057_v52 = vpop.f32.mrb[45].mxu1 }
 0xb23   :  { %v19058_v59 = vadd.f32 %v19057_v52, %v19056_v9  ;;  %v19059_v5 = vpop.f32.mrb[46].mxu1 }
 0xb24   :  { %v19060_v58 = vpop.f32.mrb[47].mxu1 }
 0xb25   :  { %v19061_v46 = vadd.f32 %v19060_v58, %v19059_v5 }
 0xb28   :  { %v19003_v12 = vpop.f32.mrb[240].mxu0 }
 0xb29   :  { %v19004_v24 = vpop.f32.mrb[241].mxu0 }
 0xb2a   :  { %v19005_v17 = vadd.f32 %v19004_v24, %v19003_v12  ;;  %v19006_v40 = vpop.f32.mrb[242].mxu0 }
 0xb2b   :  { %v19007_v21 = vpop.f32.mrb[243].mxu0 }
 0xb2c   :  { %v19008_v49 = vadd.f32 %v19007_v21, %v19006_v40  ;;  %v15290_v22 = vadd.f32 %v19027_v19, %v19005_v17 }
 0xb2e   :  { %v15293_v50 = vadd.f32 %v19030_v31, %v19008_v49 }
 0xb41   :  { %v15776_v4 = vpop.f32.mrb[48].mxu1 }
 0xb42   :  { %v19745_v60 = vpop.f32.mrb[49].mxu1 }
 0xb43   :  { %v15779_v35 = vpop.f32.mrb[50].mxu1  ;;  %v18042_v60 = vld [vmem:[#allocation11] ss:$0 sm:$0xff] }
 0xb44   :  { %v19746_v44 = vpop.f32.mrb[51].mxu1 }
 0xb48   :  { %v15330_v56 = vpop.f32.mrb[244].mxu0 }
 0xb49   :  { %v15331_v18 = vadd.f32 %v15330_v56, %v15290_v22  ;;  %v19725_v36 = vpop.f32.mrb[245].mxu0 }
 0xb4a   :  { %v15333_v0 = vpop.f32.mrb[246].mxu0  ;;  %v18043_v36 = vld [vmem:[#allocation13] ss:$0 sm:$0xff] }
 0xb4b   :  { %v15337_v45 = vadd.f32 %v15331_v18, %v14891_v20  ;;  %v15334_v33 = vadd.f32 %v15333_v0, %v15293_v50  ;;  %v19726_v23 = vpop.f32.mrb[247].mxu0 }
 0xb4d   :  { %v15338_v61 = vadd.f32 %v15334_v33, %v14892_v28 }
 0xb61   :  { %v19131_v27 = vpop.f32.mrb[52].mxu1 }
 0xb62   :  { %v19132_v13 = vpop.f32.mrb[53].mxu1 }
 0xb63   :  { %v19133_v15 = vadd.f32 %v19132_v13, %v19131_v27  ;;  %v19134_v8 = vpop.f32.mrb[54].mxu1  ;;  %v18044_v27 = vld [vmem:[#allocation2] ss:$0 sm:$0xff] }
 0xb64   :  { %v19135_v32 = vpop.f32.mrb[55].mxu1 }
 0xb65   :  { %v19136_v3 = vadd.f32 %v19135_v32, %v19134_v8 }
 0xb68   :  { %v19078_v34 = vpop.f32.mrb[248].mxu0 }
 0xb69   :  { %v19079_v25 = vpop.f32.mrb[249].mxu0 }
 0xb6a   :  { %v19080_v7 = vadd.f32 %v19079_v25, %v19078_v34  ;;  %v19081_v39 = vpop.f32.mrb[250].mxu0 }
 0xb6b   :  { %v19082_v41 = vpop.f32.mrb[251].mxu0 }
 0xb6c   :  { %v15736_v38 = vadd.f32 %v19080_v7, %v19058_v59  ;;  %v19083_v43 = vadd.f32 %v19082_v41, %v19081_v39 }
 0xb6e   :  { %v15777_v37 = vadd.f32 %v15776_v4, %v15736_v38  ;;  %v15739_v1 = vadd.f32 %v19083_v43, %v19061_v46 }
 0xb70   :  { %v15780_v10 = vadd.f32 %v15779_v35, %v15739_v1  ;;  %v15783_v53 = vadd.f32 %v15777_v37, %v15337_v45 }
 0xb72   :  { %v15784_v47 = vadd.f32 %v15780_v10, %v15338_v61 }
 0xb81   :  { %v19162_v48 = vpop.f32.mrb[56].mxu1 }
 0xb82   :  { %v19163_v2 = vpop.f32.mrb[57].mxu1 }
 0xb83   :  { %v19164_v14 = vadd.f32 %v19163_v2, %v19162_v48  ;;  %v19165_v54 = vpop.f32.mrb[58].mxu1 }
 0xb84   :  { %v19166_v19 = vpop.f32.mrb[59].mxu1 }
 0xb85   :  { %v19167_v57 = vadd.f32 %v19166_v19, %v19165_v54 }
 0xb88   :  { %v19109_v29 = vpop.f32.mrb[252].mxu0 }
 0xb89   :  { %v19110_v31 = vpop.f32.mrb[253].mxu0 }
 0xb8a   :  { %v19111_v11 = vadd.f32 %v19110_v31, %v19109_v29  ;;  %v19112_v62 = vpop.f32.mrb[254].mxu0 }
 0xb8b   :  { %v19113_v30 = vpop.f32.mrb[255].mxu0 }
 0xb8c   :  { %v19114_v6 = vadd.f32 %v19113_v30, %v19112_v62  ;;  %v16182_v42 = vadd.f32 %v19133_v15, %v19111_v11 }
 0xb8e   :  { %v16185_v51 = vadd.f32 %v19136_v3, %v19114_v6 }
 0xba1   :  { %v16668_v16 = vpop.f32.mrb[60].mxu1 }
 0xba2   :  { %v19785_v26 = vpop.f32.mrb[61].mxu1 }
 0xba3   :  { %v16671_v63 = vpop.f32.mrb[62].mxu1 }
 0xba4   :  { %v19786_v55 = vpop.f32.mrb[63].mxu1 }
 0xba8   :  { %v16222_v20 = vpop.f32.mrb[0].mxu0 }
 0xba9   :  { %v16223_v28 = vadd.f32 %v16222_v20, %v16182_v42  ;;  %v19765_v9 = vpop.f32.mrb[1].mxu0 }
 0xbaa   :  { %v16225_v52 = vpop.f32.mrb[2].mxu0 }
 0xbab   :  { %v16229_v59 = vadd.f32 %v16223_v28, %v15783_v53  ;;  %v16226_v5 = vadd.f32 %v16225_v52, %v16185_v51  ;;  %v19766_v58 = vpop.f32.mrb[3].mxu0 }
 0xbad   :  { %v16230_v46 = vadd.f32 %v16226_v5, %v15784_v47 }
 0xbc8   :  { %v19184_v12 = vpop.f32.mrb[4].mxu0 }
 0xbc9   :  { %v19185_v24 = vpop.f32.mrb[5].mxu0 }
 0xbca   :  { %v19186_v17 = vadd.f32 %v19185_v24, %v19184_v12  ;;  %v19187_v40 = vpop.f32.mrb[6].mxu0 }
 0xbcb   :  { %v19188_v21 = vpop.f32.mrb[7].mxu0 }
 0xbcc   :  { %v16628_v49 = vadd.f32 %v19186_v17, %v19164_v14  ;;  %v19189_v22 = vadd.f32 %v19188_v21, %v19187_v40 }
 0xbce   :  { %v16669_v50 = vadd.f32 %v16668_v16, %v16628_v49  ;;  %v16631_v4 = vadd.f32 %v19189_v22, %v19167_v57 }
 0xbd0   :  { %v16672_v35 = vadd.f32 %v16671_v63, %v16631_v4  ;;  %v16675_v44 = vadd.f32 %v16669_v50, %v16229_v59 }
 0xbd2   :  { %v16684_v56 = vadd.f32 %v18042_v60, %v16675_v44  ;;  %v16676_v18 = vadd.f32 %v16672_v35, %v16230_v46 }
 0xbd4   :  { %v16686_v0 = vmax.f32 %v16684_v56, 0.0  ;;  %v16685_v45 = vadd.f32 %v18042_v60, %v16676_v18 }
 0xbd6   :  { %v16695_v33 = vmul.f32 %v18043_v36, %v16686_v0  ;;  %v16687_v23 = vmax.f32 %v16685_v45, 0.0 }
 0xbd8   :  { %16697 = vadd.xlane.f32.xlu0 %v16695_v33  ;;  %v16696_v61 = vmul.f32 %v18043_v36, %v16687_v23 }
 0xbda   :  { %16699 = vadd.xlane.f32.xlu1 %v16696_v61 }
 0xc65   :  { %v16698_v13 = vpop.xlane.xlu0 %16697 }
 0xc66   :  { %v16708_v15 = vadd.f32 %v18044_v27, %v16698_v13 }
 0xc67   :  { %v16700_v8 = vpop.xlane.xlu1 %16699 }
 0xc68   :  { %16711 = vst.msk [vmem:[%s25204_s9] sm:$0xff] %vm16710_vm6, %v16708_v15  ;;  %v16709_v32 = vadd.f32 %v18044_v27, %v16700_v8 }
 0xc6a   :  { %16712 = vst.msk [vmem:[%s25204_s9 + $0x8] sm:$0xff] %vm16710_vm6, %v16709_v32 }
 0xc6b   :  { %16717 = vsyncpa [#allocation4], 1 }
 0xc6c   :  { %16718 = vsyncpa [#allocation6], 1 }
 0xc6d   :  { %16719 = vsyncpa [#allocation9], 1 }
 0xc6e   :  { %16720 = vsyncpa [#allocation12], 1 }

</bundles_post_ra>
